<compile_context>
chip_gen: v6e
topology: v6e:2x2x1
jax: 0.10.0
libtpu: 0.0.40
codegen_flags: <defaults>
</compile_context>

<pallas_src>
import functools

import jax
import jax.numpy as jnp
from jax.experimental import pallas as pl
from jax.experimental.pallas import tpu as pltpu


CFG = dict(
    embedding_size=32,           # E
    GA_hidden=16,                # GA hidden
    nheads=4,                    # attention heads
    training_max_code_length=8,  # L
    n_vocab=50,                  # no.vocabs
    pad=0,                       # <PAD>
    dim_feedforward=248,         # transformer FFN width (as in the module)
    n_layers=3,
)


# --------------------------------------------------------------------------
# in-kernel helpers (pure jnp, traced inside the Pallas kernel)
# --------------------------------------------------------------------------
def _layernorm(x, w, b, eps=1e-5):
    mu = jnp.mean(x, axis=-1, keepdims=True)
    var = jnp.mean((x - mu) ** 2, axis=-1, keepdims=True)
    return (x - mu) * jax.lax.rsqrt(var + eps) * w + b


def _erf(x):
    # Abramowitz & Stegun 7.1.26, |error| < 1.5e-7.
    ax = jnp.abs(x)
    t = 1.0 / (1.0 + 0.3275911 * ax)
    y = 1.0 - ((((1.061405429 * t - 1.453152027) * t + 1.421413741) * t
                - 0.284496736) * t + 0.254829592) * t * jnp.exp(-ax * ax)
    return jnp.where(x >= 0.0, y, -y)


def _gelu(x):  # exact (erf) GELU, matching activation='gelu'
    return 0.5 * x * (1.0 + _erf(x * 0.7071067811865476))


# --------------------------------------------------------------------------
# The fused encode kernel: one grid step = one triplet member ([N, 1] ids)
# --------------------------------------------------------------------------
def encode_kernel(tok_ref, emb_ref, pos_ref,
                  wqkv_ref, bqkv_ref, wo_ref, bo_ref,
                  ln1w_ref, ln1b_ref, w1_ref, b1_ref,
                  w2_ref, b2_ref, ln2w_ref, ln2b_ref,
                  gqw_ref, gqb_ref, gvw_ref, gvb_ref, gaw_ref, gab_ref,
                  gnw_ref, gnb_ref,
                  f0w_ref, f0b_ref, n0w_ref, n0b_ref,
                  f1w_ref, f1b_ref, n1w_ref, n1b_ref,
                  o_ref, *, batch, seq_half, nheads, n_layers, pad_id, n_vocab):
    B = batch
    L = seq_half
    S = 2 * L                       # transformer sequence = both streams
    V = n_vocab
    E = emb_ref.shape[1]
    N = B * S                       # total token rows for this grid step
    dh = E // nheads
    scale = 1.0 / float(dh) ** 0.5

    ids = tok_ref[0]                # [N, 1] int32, rows ordered (b, stream, pos)

    # ---- embedding gather (one-hot matmul; tiny vocab) + position embedding
    onehot = jnp.where(
        ids == jax.lax.broadcasted_iota(jnp.int32, (N, V), 1), 1.0, 0.0)
    x = jnp.dot(onehot, emb_ref[...], preferred_element_type=jnp.float32)  # [N,E]
    # positions repeat per stream (split of leading dim only: lane dim kept)
    x = (x.reshape(B * 2, L, E) + pos_ref[...][None]).reshape(N, E)

    # ---- 3 x post-norm TransformerEncoderLayer (MHA + GELU FFN), no key mask
    #      (matches the reference: srcencoder is called without a padding mask)
    for l in range(n_layers):
        qkv = jnp.dot(x, wqkv_ref[l],
                      preferred_element_type=jnp.float32) + bqkv_ref[l]   # [N,3E]
        woT = wo_ref[l]                                                   # [E,E]
        attn = None
        for h in range(nheads):                  # static loop over heads
            qh = qkv[:, h * dh:(h + 1) * dh].reshape(B, S, dh)
            kh = qkv[:, E + h * dh:E + (h + 1) * dh].reshape(B, S, dh)
            vh = qkv[:, 2 * E + h * dh:2 * E + (h + 1) * dh].reshape(B, S, dh)
            sc = jnp.einsum('bqd,bkd->bqk', qh, kh,
                            preferred_element_type=jnp.float32) * scale
            sc = sc - jnp.max(sc, axis=-1, keepdims=True)
            p = jnp.exp(sc)
            p = p / jnp.sum(p, axis=-1, keepdims=True)
            ctx = jnp.einsum('bqk,bkd->bqd', p, vh,
                             preferred_element_type=jnp.float32).reshape(N, dh)
            # fold the output projection into the head loop (no concat)
            part = jnp.dot(ctx, woT[h * dh:(h + 1) * dh, :],
                           preferred_element_type=jnp.float32)
            attn = part if attn is None else attn + part
        attn = attn + bo_ref[l]
        x1 = _layernorm(x + attn, ln1w_ref[l], ln1b_ref[l])

        hf = _gelu(jnp.dot(x1, w1_ref[l],
                           preferred_element_type=jnp.float32) + b1_ref[l])
        ff = jnp.dot(hf, w2_ref[l],
                     preferred_element_type=jnp.float32) + b2_ref[l]
        x = _layernorm(x1 + ff, ln2w_ref[l], ln2b_ref[l])

    # ---- GlobalAttention pooling (per stream), normGA
    hga = jnp.dot(x, gqw_ref[...],
                  preferred_element_type=jnp.float32) + gqb_ref[...]      # [N,GH]
    vga = jnp.dot(x, gvw_ref[...],
                  preferred_element_type=jnp.float32) + gvb_ref[...]      # [N,E]
    s = jnp.sum(hga * gaw_ref[...], axis=-1, keepdims=True) + gab_ref[...]  # [N,1]

    # pad mask from token ids; (term stream, position 0) is never masked
    n_iota = jax.lax.broadcasted_iota(jnp.int32, (N, 1), 0)
    is_pad = ids == pad_id
    keep = (n_iota % S) == L                    # row n is (stream=1, pos=0)
    s = jnp.where(jnp.logical_and(is_pad, jnp.logical_not(keep)), -jnp.inf, s)

    s4 = s.reshape(B, 2, L, 1)                  # leading-dim split only
    v4 = vga.reshape(B, 2, L, E)
    zs = []
    for stream in range(2):                     # 0 = nonterm, 1 = term
        ss = s4[:, stream]                      # [B,L,1]  (leading-dim index)
        ss = ss - jnp.max(ss, axis=1, keepdims=True)
        ee = jnp.exp(ss)
        aa = ee / jnp.sum(ee, axis=1, keepdims=True)
        zz = jnp.sum(v4[:, stream] * aa, axis=1)            # [B,E]
        zs.append(_layernorm(zz, gnw_ref[...], gnb_ref[...]))
    enc = jnp.concatenate(zs, axis=-1)                       # [B, 2E] = [nt|t]

    # ---- head: ln1(enc + fc1(ln0(relu(fc0(enc)))))  (dp0 identity at eval)
    h0 = jnp.maximum(
        jnp.dot(enc, f0w_ref[...],
                preferred_element_type=jnp.float32) + f0b_ref[...], 0.0)
    h0 = _layernorm(h0, n0w_ref[...], n0b_ref[...])
    f1 = jnp.dot(h0, f1w_ref[...],
                 preferred_element_type=jnp.float32) + f1b_ref[...]
    o_ref[0] = _layernorm(enc + f1, n1w_ref[...], n1b_ref[...])


# --------------------------------------------------------------------------
# pallas_call wrapper: tokens [G, N, 1] int32 -> encodings [G, B, 2E]
# --------------------------------------------------------------------------
def fused_encode(packed, tokens_gn1, cfg, batch):
    G, N, _ = tokens_gn1.shape
    E = cfg['embedding_size']
    L = cfg['training_max_code_length']

    args = (
        tokens_gn1,
        packed['embedding'], packed['positions'],
        packed['wqkv_t'], packed['bqkv'], packed['wo_t'], packed['bo'],
        packed['ln1w'], packed['ln1b'], packed['w1_t'], packed['b1'],
        packed['w2_t'], packed['b2'], packed['ln2w'], packed['ln2b'],
        packed['ga_qw_t'], packed['ga_qb'], packed['ga_vw_t'], packed['ga_vb'],
        packed['ga_aw'], packed['ga_ab'], packed['normGA_w'], packed['normGA_b'],
        packed['fc0_w_t'], packed['fc0_b'], packed['ln0_w'], packed['ln0_b'],
        packed['fc1_w_t'], packed['fc1_b'], packed['hln1_w'], packed['hln1_b'],
    )

    def const_spec(a):
        nd = a.ndim
        return pl.BlockSpec(a.shape, lambda g, _nd=nd: (0,) * _nd)

    in_specs = [pl.BlockSpec((1, N, 1), lambda g: (g, 0, 0))]
    in_specs += [const_spec(a) for a in args[1:]]
    out_spec = pl.BlockSpec((1, batch, 2 * E), lambda g: (g, 0, 0))

    kern = functools.partial(
        encode_kernel,
        batch=batch, seq_half=L, nheads=cfg['nheads'],
        n_layers=cfg['n_layers'], pad_id=cfg['pad'], n_vocab=cfg['n_vocab'])

    return pl.pallas_call(
        kern,
        out_shape=jax.ShapeDtypeStruct((G, batch, 2 * E), jnp.float32),
        grid_spec=pltpu.PrefetchScalarGridSpec(
            num_scalar_prefetch=0, grid=(G,),
            in_specs=in_specs, out_specs=out_spec),
        compiler_params=pltpu.CompilerParams(
            dimension_semantics=("parallel",)),   # v7x: 2 TCs share the triplet
    )(*args)


# --------------------------------------------------------------------------
# parameter packing: stack the 3 layers, pre-transpose every weight matrix so
# all in-kernel matmuls are plain (lhs last dim x rhs first dim), zero-pad the
# FFN width 248 -> 256.
# --------------------------------------------------------------------------
def pack_params(params, cfg):
    F = cfg['dim_feedforward']
    FP = ((F + 127) // 128) * 128            # 256

    layers = params['layers']
    stk = lambda k: jnp.stack([lp[k] for lp in layers], 0)

    def w1t(w):   # linear1.weight [F,E] -> [E,FP]
        return jnp.pad(w.T, ((0, 0), (0, FP - F)))

    def b1p(b):   # [1,F] -> [1,FP]
        return jnp.pad(b, ((0, 0), (0, FP - F)))

    def w2t(w):   # linear2.weight [E,F] -> [FP,E]
        return jnp.pad(w.T, ((0, FP - F), (0, 0)))

    packed = dict(
        embedding=params['embedding'], positions=params['positions'],
        wqkv_t=jnp.stack([lp['wqkv'].T for lp in layers], 0),   # [3,E,3E]
        bqkv=stk('bqkv'),
        wo_t=jnp.stack([lp['wo'].T for lp in layers], 0),       # [3,E,E]
        bo=stk('bo'),
        ln1w=stk('ln1w'), ln1b=stk('ln1b'),
        w1_t=jnp.stack([w1t(lp['w1']) for lp in layers], 0),    # [3,E,FP]
        b1=jnp.stack([b1p(lp['b1']) for lp in layers], 0),
        w2_t=jnp.stack([w2t(lp['w2']) for lp in layers], 0),    # [3,FP,E]
        b2=stk('b2'), ln2w=stk('ln2w'), ln2b=stk('ln2b'),
        ga_qw_t=params['ga']['qw'].T, ga_qb=params['ga']['qb'],
        ga_vw_t=params['ga']['vw'].T, ga_vb=params['ga']['vb'],
        ga_aw=params['ga']['aw'], ga_ab=params['ga']['ab'],
        normGA_w=params['normGA_w'], normGA_b=params['normGA_b'],
        fc0_w_t=params['fc0_w'].T, fc0_b=params['fc0_b'],
        ln0_w=params['ln0_w'], ln0_b=params['ln0_b'],
        fc1_w_t=params['fc1_w'].T, fc1_b=params['fc1_b'],
        hln1_w=params['ln1_w'], hln1_b=params['ln1_b'],
    )
    return packed


# --------------------------------------------------------------------------
# Model glue
# --------------------------------------------------------------------------
def encode(params, sequences, cfg):
    """sequences: [B, 2, >=L] int ids -> [B, 2E] encodings (single launch)."""
    L = cfg['training_max_code_length']
    packed = pack_params(params, cfg)
    seq = sequences[:, :, :L].astype(jnp.int32)
    B = seq.shape[0]
    toks = seq.reshape(1, B * 2 * L, 1)
    return fused_encode(packed, toks, cfg, B)[0]


def forward(params, anchors, positives, negatives, cfg):
    """Triplet forward: all three encodes batched into ONE kernel launch."""
    L = cfg['training_max_code_length']
    packed = pack_params(params, cfg)
    toks = jnp.stack([anchors, positives, negatives], axis=0)[:, :, :, :L]
    G, B = toks.shape[0], toks.shape[1]
    toks = toks.reshape(G, B * 2 * L, 1).astype(jnp.int32)
    out = fused_encode(packed, toks, cfg, B)          # [3, B, 2E]
    return out[0], out[1], out[2]


# --------------------------------------------------------------------------
# deterministic parameter construction (synthetic; shapes follow __init__,
# PyTorch [out, in] layout — pack_params transposes for the kernel)
# --------------------------------------------------------------------------
def init_params(key, cfg):
    E = cfg['embedding_size']
    L = cfg['training_max_code_length']
    GH = cfg['GA_hidden']
    F = cfg['dim_feedforward']
    V = cfg['n_vocab']
    keys = iter(jax.random.split(key, 128))

    def w(shape, scale=0.05):
        return (scale * jax.random.normal(next(keys), shape)).astype(jnp.float32)

    params = {}
    emb = w((V, E), 0.1)
    emb = emb.at[cfg['pad']].set(0.0)        # padding_idx row is zero
    params['embedding'] = emb
    params['positions'] = w((L, E), 0.1)

    layers = []
    for _ in range(cfg['n_layers']):
        layers.append(dict(
            wqkv=w((3 * E, E)), bqkv=w((1, 3 * E)),
            wo=w((E, E)), bo=w((1, E)),
            ln1w=jnp.ones((1, E), jnp.float32), ln1b=jnp.zeros((1, E), jnp.float32),
            w1=w((F, E)), b1=w((1, F)),
            w2=w((E, F)), b2=w((1, E)),
            ln2w=jnp.ones((1, E), jnp.float32), ln2b=jnp.zeros((1, E), jnp.float32),
        ))
    params['layers'] = layers

    params['ga'] = dict(qw=w((GH, E)), qb=w((1, GH)),
                        vw=w((E, E)), vb=w((1, E)),
                        aw=w((1, GH)), ab=w((1, 1)))
    params['normGA_w'] = jnp.ones((1, E), jnp.float32)
    params['normGA_b'] = jnp.zeros((1, E), jnp.float32)

    params['fc0_w'] = w((256, 2 * E)); params['fc0_b'] = w((1, 256))
    params['ln0_w'] = jnp.ones((1, 256), jnp.float32)
    params['ln0_b'] = jnp.zeros((1, 256), jnp.float32)
    params['fc1_w'] = w((2 * E, 256)); params['fc1_b'] = w((1, 2 * E))
    params['ln1_w'] = jnp.ones((1, 2 * E), jnp.float32)
    params['ln1_b'] = jnp.zeros((1, 2 * E), jnp.float32)
    return params


if __name__ == "__main__":
    cfg = CFG
    key = jax.random.PRNGKey(0)
    pkey, akey, bkey, ckey = jax.random.split(key, 4)
    params = init_params(pkey, cfg)

    B, L = 2, cfg['training_max_code_length']

    def make_ids(k):
        ids = jax.random.randint(k, (B, 2, L), 1, cfg['n_vocab'], dtype=jnp.int32)
        # pad the tail so masking is exercised (never a fully-masked stream)
        return ids.at[:, :, L - 2:].set(cfg['pad'])

    anchors = make_ids(akey)
    positives = make_ids(bkey)
    negatives = make_ids(ckey)

    fwd = jax.jit(functools.partial(forward, cfg=cfg))
    out = fwd(params, anchors, positives, negatives)
    jax.block_until_ready(out)

    assert all(o.shape == (B, 2 * cfg['embedding_size']) for o in out)
    assert all(bool(jnp.all(jnp.isfinite(o))) for o in out)
    print("KERNEL_OK")
</pallas_src>

<mosaic_0001>
module attributes {stable_mosaic.version = 11 : i64} {
  func.func @encode_kernel(%arg0: i32, %arg1: memref<1x32x1xi32, #tpu.memory_space<vmem>>, %arg2: memref<50x32xf32, #tpu.memory_space<vmem>>, %arg3: memref<8x32xf32, #tpu.memory_space<vmem>>, %arg4: memref<3x32x96xf32, #tpu.memory_space<vmem>>, %arg5: memref<3x1x96xf32, #tpu.memory_space<vmem>>, %arg6: memref<3x32x32xf32, #tpu.memory_space<vmem>>, %arg7: memref<3x1x32xf32, #tpu.memory_space<vmem>>, %arg8: memref<3x1x32xf32, #tpu.memory_space<vmem>>, %arg9: memref<3x1x32xf32, #tpu.memory_space<vmem>>, %arg10: memref<3x32x256xf32, #tpu.memory_space<vmem>>, %arg11: memref<3x1x256xf32, #tpu.memory_space<vmem>>, %arg12: memref<3x256x32xf32, #tpu.memory_space<vmem>>, %arg13: memref<3x1x32xf32, #tpu.memory_space<vmem>>, %arg14: memref<3x1x32xf32, #tpu.memory_space<vmem>>, %arg15: memref<3x1x32xf32, #tpu.memory_space<vmem>>, %arg16: memref<32x16xf32, #tpu.memory_space<vmem>>, %arg17: memref<1x16xf32, #tpu.memory_space<vmem>>, %arg18: memref<32x32xf32, #tpu.memory_space<vmem>>, %arg19: memref<1x32xf32, #tpu.memory_space<vmem>>, %arg20: memref<1x16xf32, #tpu.memory_space<vmem>>, %arg21: memref<1x1xf32, #tpu.memory_space<vmem>>, %arg22: memref<1x32xf32, #tpu.memory_space<vmem>>, %arg23: memref<1x32xf32, #tpu.memory_space<vmem>>, %arg24: memref<64x256xf32, #tpu.memory_space<vmem>>, %arg25: memref<1x256xf32, #tpu.memory_space<vmem>>, %arg26: memref<1x256xf32, #tpu.memory_space<vmem>>, %arg27: memref<1x256xf32, #tpu.memory_space<vmem>>, %arg28: memref<256x64xf32, #tpu.memory_space<vmem>>, %arg29: memref<1x64xf32, #tpu.memory_space<vmem>>, %arg30: memref<1x64xf32, #tpu.memory_space<vmem>>, %arg31: memref<1x64xf32, #tpu.memory_space<vmem>>, %arg32: memref<1x2x64xf32, #tpu.memory_space<vmem>>) attributes {dimension_semantics = [#tpu.dimension_semantics<parallel>], iteration_bounds = array<i64: 3>, scalar_prefetch = 0 : i64, scratch_operands = 0 : i64, tpu.core_type = #tpu.core_type<tc>, window_params = [{transform_indices = @transform_0, window_bounds = array<i64: 1, 32, 1>}, {pipeline_mode = #tpu.pipeline_mode<synchronous>, transform_indices = @transform_1, window_bounds = array<i64: 50, 32>}, {pipeline_mode = #tpu.pipeline_mode<synchronous>, transform_indices = @transform_2, window_bounds = array<i64: 8, 32>}, {pipeline_mode = #tpu.pipeline_mode<synchronous>, transform_indices = @transform_3, window_bounds = array<i64: 3, 32, 96>}, {pipeline_mode = #tpu.pipeline_mode<synchronous>, transform_indices = @transform_4, window_bounds = array<i64: 3, 1, 96>}, {pipeline_mode = #tpu.pipeline_mode<synchronous>, transform_indices = @transform_5, window_bounds = array<i64: 3, 32, 32>}, {pipeline_mode = #tpu.pipeline_mode<synchronous>, transform_indices = @transform_6, window_bounds = array<i64: 3, 1, 32>}, {pipeline_mode = #tpu.pipeline_mode<synchronous>, transform_indices = @transform_7, window_bounds = array<i64: 3, 1, 32>}, {pipeline_mode = #tpu.pipeline_mode<synchronous>, transform_indices = @transform_8, window_bounds = array<i64: 3, 1, 32>}, {pipeline_mode = #tpu.pipeline_mode<synchronous>, transform_indices = @transform_9, window_bounds = array<i64: 3, 32, 256>}, {pipeline_mode = #tpu.pipeline_mode<synchronous>, transform_indices = @transform_10, window_bounds = array<i64: 3, 1, 256>}, {pipeline_mode = #tpu.pipeline_mode<synchronous>, transform_indices = @transform_11, window_bounds = array<i64: 3, 256, 32>}, {pipeline_mode = #tpu.pipeline_mode<synchronous>, transform_indices = @transform_12, window_bounds = array<i64: 3, 1, 32>}, {pipeline_mode = #tpu.pipeline_mode<synchronous>, transform_indices = @transform_13, window_bounds = array<i64: 3, 1, 32>}, {pipeline_mode = #tpu.pipeline_mode<synchronous>, transform_indices = @transform_14, window_bounds = array<i64: 3, 1, 32>}, {pipeline_mode = #tpu.pipeline_mode<synchronous>, transform_indices = @transform_15, window_bounds = array<i64: 32, 16>}, {pipeline_mode = #tpu.pipeline_mode<synchronous>, transform_indices = @transform_16, window_bounds = array<i64: 1, 16>}, {pipeline_mode = #tpu.pipeline_mode<synchronous>, transform_indices = @transform_17, window_bounds = array<i64: 32, 32>}, {pipeline_mode = #tpu.pipeline_mode<synchronous>, transform_indices = @transform_18, window_bounds = array<i64: 1, 32>}, {pipeline_mode = #tpu.pipeline_mode<synchronous>, transform_indices = @transform_19, window_bounds = array<i64: 1, 16>}, {pipeline_mode = #tpu.pipeline_mode<synchronous>, transform_indices = @transform_20, window_bounds = array<i64: 1, 1>}, {pipeline_mode = #tpu.pipeline_mode<synchronous>, transform_indices = @transform_21, window_bounds = array<i64: 1, 32>}, {pipeline_mode = #tpu.pipeline_mode<synchronous>, transform_indices = @transform_22, window_bounds = array<i64: 1, 32>}, {pipeline_mode = #tpu.pipeline_mode<synchronous>, transform_indices = @transform_23, window_bounds = array<i64: 64, 256>}, {pipeline_mode = #tpu.pipeline_mode<synchronous>, transform_indices = @transform_24, window_bounds = array<i64: 1, 256>}, {pipeline_mode = #tpu.pipeline_mode<synchronous>, transform_indices = @transform_25, window_bounds = array<i64: 1, 256>}, {pipeline_mode = #tpu.pipeline_mode<synchronous>, transform_indices = @transform_26, window_bounds = array<i64: 1, 256>}, {pipeline_mode = #tpu.pipeline_mode<synchronous>, transform_indices = @transform_27, window_bounds = array<i64: 256, 64>}, {pipeline_mode = #tpu.pipeline_mode<synchronous>, transform_indices = @transform_28, window_bounds = array<i64: 1, 64>}, {pipeline_mode = #tpu.pipeline_mode<synchronous>, transform_indices = @transform_29, window_bounds = array<i64: 1, 64>}, {pipeline_mode = #tpu.pipeline_mode<synchronous>, transform_indices = @transform_30, window_bounds = array<i64: 1, 64>}, {transform_indices = @transform_31, window_bounds = array<i64: 1, 2, 64>}]} {
    %c0 = arith.constant 0 : index
    %c0_0 = arith.constant 0 : index
    %c0_1 = arith.constant 0 : index
    %0 = vector.load %arg1[%c0, %c0_0, %c0_1] : memref<1x32x1xi32, #tpu.memory_space<vmem>>, vector<1x32x1xi32>
    %1 = vector.shape_cast %0 : vector<1x32x1xi32> to vector<32x1xi32>
    %2 = tpu.iota {dimensions = array<i32: 1>} : vector<32x50xi32>
    %3 = vector.broadcast %1 : vector<32x1xi32> to vector<32x50xi32>
    %4 = arith.cmpi eq, %3, %2 : vector<32x50xi32>
    %cst = arith.constant 1.000000e+00 : f32
    %cst_2 = arith.constant 0.000000e+00 : f32
    %5 = vector.broadcast %cst : f32 to vector<32x50xf32>
    %6 = vector.broadcast %cst_2 : f32 to vector<32x50xf32>
    %7 = arith.select %4, %5, %6 : vector<32x50xi1>, vector<32x50xf32>
    %c0_3 = arith.constant 0 : index
    %c0_4 = arith.constant 0 : index
    %8 = vector.load %arg2[%c0_3, %c0_4] : memref<50x32xf32, #tpu.memory_space<vmem>>, vector<50x32xf32>
    %cst_5 = arith.constant dense<0.000000e+00> : vector<32x32xf32>
    %9 = tpu.matmul %7, %8, %cst_5 {dimension_numbers = #tpu.dot_dimension_numbers<[1], [0], [0], [1], [0, 0, 1, 1], [], []>} : vector<32x50xf32>, vector<50x32xf32>, vector<32x32xf32> -> vector<32x32xf32>
    %10 = vector.shape_cast %9 : vector<32x32xf32> to vector<4x8x32xf32>
    %c0_6 = arith.constant 0 : index
    %c0_7 = arith.constant 0 : index
    %11 = vector.load %arg3[%c0_6, %c0_7] : memref<8x32xf32, #tpu.memory_space<vmem>>, vector<8x32xf32>
    %12 = vector.shape_cast %11 : vector<8x32xf32> to vector<1x8x32xf32>
    %13 = vector.broadcast %12 : vector<1x8x32xf32> to vector<4x8x32xf32>
    %14 = arith.addf %10, %13 : vector<4x8x32xf32>
    %15 = vector.shape_cast %14 : vector<4x8x32xf32> to vector<32x32xf32>
    %c0_8 = arith.constant 0 : index
    %c0_9 = arith.constant 0 : index
    %c0_10 = arith.constant 0 : index
    %16 = vector.load %arg4[%c0_8, %c0_9, %c0_10] : memref<3x32x96xf32, #tpu.memory_space<vmem>>, vector<1x32x96xf32>
    %17 = vector.shape_cast %16 : vector<1x32x96xf32> to vector<32x96xf32>
    %cst_11 = arith.constant dense<0.000000e+00> : vector<32x96xf32>
    %18 = tpu.matmul %15, %17, %cst_11 {dimension_numbers = #tpu.dot_dimension_numbers<[1], [0], [0], [1], [0, 0, 1, 1], [], []>} : vector<32x32xf32>, vector<32x96xf32>, vector<32x96xf32> -> vector<32x96xf32>
    %c0_12 = arith.constant 0 : index
    %c0_13 = arith.constant 0 : index
    %c0_14 = arith.constant 0 : index
    %19 = vector.load %arg5[%c0_12, %c0_13, %c0_14] : memref<3x1x96xf32, #tpu.memory_space<vmem>>, vector<1x1x96xf32>
    %20 = vector.shape_cast %19 : vector<1x1x96xf32> to vector<1x96xf32>
    %21 = vector.broadcast %20 : vector<1x96xf32> to vector<32x96xf32>
    %22 = arith.addf %18, %21 : vector<32x96xf32>
    %c0_15 = arith.constant 0 : index
    %c0_16 = arith.constant 0 : index
    %c0_17 = arith.constant 0 : index
    %23 = vector.load %arg6[%c0_15, %c0_16, %c0_17] : memref<3x32x32xf32, #tpu.memory_space<vmem>>, vector<1x32x32xf32>
    %24 = vector.shape_cast %23 : vector<1x32x32xf32> to vector<32x32xf32>
    %25 = vector.extract_strided_slice %22 {offsets = [0, 0], sizes = [32, 8], strides = [1, 1]} : vector<32x96xf32> to vector<32x8xf32>
    %26 = vector.shape_cast %25 : vector<32x8xf32> to vector<2x16x8xf32>
    %27 = vector.extract_strided_slice %22 {offsets = [0, 32], sizes = [32, 8], strides = [1, 1]} : vector<32x96xf32> to vector<32x8xf32>
    %28 = vector.shape_cast %27 : vector<32x8xf32> to vector<2x16x8xf32>
    %29 = vector.extract_strided_slice %22 {offsets = [0, 64], sizes = [32, 8], strides = [1, 1]} : vector<32x96xf32> to vector<32x8xf32>
    %30 = vector.shape_cast %29 : vector<32x8xf32> to vector<2x16x8xf32>
    "tpu.trace_start"() <{level = 10 : i32, message = "bqd,bkd->bqk"}> : () -> ()
    %cst_18 = arith.constant dense<0.000000e+00> : vector<2x16x16xf32>
    %31 = tpu.matmul %26, %28, %cst_18 {dimension_numbers = #tpu.dot_dimension_numbers<[2], [2], [1], [1], [0, 0, 0, 1, 1, 1], [0], [0]>} : vector<2x16x8xf32>, vector<2x16x8xf32>, vector<2x16x16xf32> -> vector<2x16x16xf32>
    "tpu.trace_stop"() : () -> ()
    %cst_19 = arith.constant 0.353553385 : f32
    %32 = vector.broadcast %cst_19 : f32 to vector<2x16x16xf32>
    %33 = arith.mulf %31, %32 : vector<2x16x16xf32>
    %cst_20 = arith.constant dense<0xFF800000> : vector<2x16xf32>
    %34 = vector.multi_reduction <maximumf>, %33, %cst_20 [2] : vector<2x16x16xf32> to vector<2x16xf32>
    %35 = vector.shape_cast %34 : vector<2x16xf32> to vector<2x16x1xf32>
    %36 = vector.broadcast %35 : vector<2x16x1xf32> to vector<2x16x16xf32>
    %37 = arith.subf %33, %36 : vector<2x16x16xf32>
    %38 = math.exp %37 : vector<2x16x16xf32>
    %cst_21 = arith.constant dense<0.000000e+00> : vector<2x16xf32>
    %39 = vector.multi_reduction <add>, %38, %cst_21 [2] : vector<2x16x16xf32> to vector<2x16xf32>
    %40 = vector.shape_cast %39 : vector<2x16xf32> to vector<2x16x1xf32>
    %41 = vector.broadcast %40 : vector<2x16x1xf32> to vector<2x16x16xf32>
    %42 = arith.divf %38, %41 : vector<2x16x16xf32>
    "tpu.trace_start"() <{level = 10 : i32, message = "bqk,bkd->bqd"}> : () -> ()
    %cst_22 = arith.constant dense<0.000000e+00> : vector<2x16x8xf32>
    %43 = tpu.matmul %42, %30, %cst_22 {dimension_numbers = #tpu.dot_dimension_numbers<[2], [1], [1], [2], [0, 0, 0, 1, 1, 2], [0], [0]>} : vector<2x16x16xf32>, vector<2x16x8xf32>, vector<2x16x8xf32> -> vector<2x16x8xf32>
    "tpu.trace_stop"() : () -> ()
    %44 = vector.shape_cast %43 : vector<2x16x8xf32> to vector<32x8xf32>
    %45 = vector.extract_strided_slice %24 {offsets = [0, 0], sizes = [8, 32], strides = [1, 1]} : vector<32x32xf32> to vector<8x32xf32>
    %cst_23 = arith.constant dense<0.000000e+00> : vector<32x32xf32>
    %46 = tpu.matmul %44, %45, %cst_23 {dimension_numbers = #tpu.dot_dimension_numbers<[1], [0], [0], [1], [0, 0, 1, 1], [], []>} : vector<32x8xf32>, vector<8x32xf32>, vector<32x32xf32> -> vector<32x32xf32>
    %47 = vector.extract_strided_slice %22 {offsets = [0, 8], sizes = [32, 8], strides = [1, 1]} : vector<32x96xf32> to vector<32x8xf32>
    %48 = vector.shape_cast %47 : vector<32x8xf32> to vector<2x16x8xf32>
    %49 = vector.extract_strided_slice %22 {offsets = [0, 40], sizes = [32, 8], strides = [1, 1]} : vector<32x96xf32> to vector<32x8xf32>
    %50 = vector.shape_cast %49 : vector<32x8xf32> to vector<2x16x8xf32>
    %51 = vector.extract_strided_slice %22 {offsets = [0, 72], sizes = [32, 8], strides = [1, 1]} : vector<32x96xf32> to vector<32x8xf32>
    %52 = vector.shape_cast %51 : vector<32x8xf32> to vector<2x16x8xf32>
    "tpu.trace_start"() <{level = 10 : i32, message = "bqd,bkd->bqk"}> : () -> ()
    %cst_24 = arith.constant dense<0.000000e+00> : vector<2x16x16xf32>
    %53 = tpu.matmul %48, %50, %cst_24 {dimension_numbers = #tpu.dot_dimension_numbers<[2], [2], [1], [1], [0, 0, 0, 1, 1, 1], [0], [0]>} : vector<2x16x8xf32>, vector<2x16x8xf32>, vector<2x16x16xf32> -> vector<2x16x16xf32>
    "tpu.trace_stop"() : () -> ()
    %cst_25 = arith.constant 0.353553385 : f32
    %54 = vector.broadcast %cst_25 : f32 to vector<2x16x16xf32>
    %55 = arith.mulf %53, %54 : vector<2x16x16xf32>
    %cst_26 = arith.constant dense<0xFF800000> : vector<2x16xf32>
    %56 = vector.multi_reduction <maximumf>, %55, %cst_26 [2] : vector<2x16x16xf32> to vector<2x16xf32>
    %57 = vector.shape_cast %56 : vector<2x16xf32> to vector<2x16x1xf32>
    %58 = vector.broadcast %57 : vector<2x16x1xf32> to vector<2x16x16xf32>
    %59 = arith.subf %55, %58 : vector<2x16x16xf32>
    %60 = math.exp %59 : vector<2x16x16xf32>
    %cst_27 = arith.constant dense<0.000000e+00> : vector<2x16xf32>
    %61 = vector.multi_reduction <add>, %60, %cst_27 [2] : vector<2x16x16xf32> to vector<2x16xf32>
    %62 = vector.shape_cast %61 : vector<2x16xf32> to vector<2x16x1xf32>
    %63 = vector.broadcast %62 : vector<2x16x1xf32> to vector<2x16x16xf32>
    %64 = arith.divf %60, %63 : vector<2x16x16xf32>
    "tpu.trace_start"() <{level = 10 : i32, message = "bqk,bkd->bqd"}> : () -> ()
    %cst_28 = arith.constant dense<0.000000e+00> : vector<2x16x8xf32>
    %65 = tpu.matmul %64, %52, %cst_28 {dimension_numbers = #tpu.dot_dimension_numbers<[2], [1], [1], [2], [0, 0, 0, 1, 1, 2], [0], [0]>} : vector<2x16x16xf32>, vector<2x16x8xf32>, vector<2x16x8xf32> -> vector<2x16x8xf32>
    "tpu.trace_stop"() : () -> ()
    %66 = vector.shape_cast %65 : vector<2x16x8xf32> to vector<32x8xf32>
    %67 = vector.extract_strided_slice %24 {offsets = [8, 0], sizes = [8, 32], strides = [1, 1]} : vector<32x32xf32> to vector<8x32xf32>
    %cst_29 = arith.constant dense<0.000000e+00> : vector<32x32xf32>
    %68 = tpu.matmul %66, %67, %cst_29 {dimension_numbers = #tpu.dot_dimension_numbers<[1], [0], [0], [1], [0, 0, 1, 1], [], []>} : vector<32x8xf32>, vector<8x32xf32>, vector<32x32xf32> -> vector<32x32xf32>
    %69 = arith.addf %46, %68 : vector<32x32xf32>
    %70 = vector.extract_strided_slice %22 {offsets = [0, 16], sizes = [32, 8], strides = [1, 1]} : vector<32x96xf32> to vector<32x8xf32>
    %71 = vector.shape_cast %70 : vector<32x8xf32> to vector<2x16x8xf32>
    %72 = vector.extract_strided_slice %22 {offsets = [0, 48], sizes = [32, 8], strides = [1, 1]} : vector<32x96xf32> to vector<32x8xf32>
    %73 = vector.shape_cast %72 : vector<32x8xf32> to vector<2x16x8xf32>
    %74 = vector.extract_strided_slice %22 {offsets = [0, 80], sizes = [32, 8], strides = [1, 1]} : vector<32x96xf32> to vector<32x8xf32>
    %75 = vector.shape_cast %74 : vector<32x8xf32> to vector<2x16x8xf32>
    "tpu.trace_start"() <{level = 10 : i32, message = "bqd,bkd->bqk"}> : () -> ()
    %cst_30 = arith.constant dense<0.000000e+00> : vector<2x16x16xf32>
    %76 = tpu.matmul %71, %73, %cst_30 {dimension_numbers = #tpu.dot_dimension_numbers<[2], [2], [1], [1], [0, 0, 0, 1, 1, 1], [0], [0]>} : vector<2x16x8xf32>, vector<2x16x8xf32>, vector<2x16x16xf32> -> vector<2x16x16xf32>
    "tpu.trace_stop"() : () -> ()
    %cst_31 = arith.constant 0.353553385 : f32
    %77 = vector.broadcast %cst_31 : f32 to vector<2x16x16xf32>
    %78 = arith.mulf %76, %77 : vector<2x16x16xf32>
    %cst_32 = arith.constant dense<0xFF800000> : vector<2x16xf32>
    %79 = vector.multi_reduction <maximumf>, %78, %cst_32 [2] : vector<2x16x16xf32> to vector<2x16xf32>
    %80 = vector.shape_cast %79 : vector<2x16xf32> to vector<2x16x1xf32>
    %81 = vector.broadcast %80 : vector<2x16x1xf32> to vector<2x16x16xf32>
    %82 = arith.subf %78, %81 : vector<2x16x16xf32>
    %83 = math.exp %82 : vector<2x16x16xf32>
    %cst_33 = arith.constant dense<0.000000e+00> : vector<2x16xf32>
    %84 = vector.multi_reduction <add>, %83, %cst_33 [2] : vector<2x16x16xf32> to vector<2x16xf32>
    %85 = vector.shape_cast %84 : vector<2x16xf32> to vector<2x16x1xf32>
    %86 = vector.broadcast %85 : vector<2x16x1xf32> to vector<2x16x16xf32>
    %87 = arith.divf %83, %86 : vector<2x16x16xf32>
    "tpu.trace_start"() <{level = 10 : i32, message = "bqk,bkd->bqd"}> : () -> ()
    %cst_34 = arith.constant dense<0.000000e+00> : vector<2x16x8xf32>
    %88 = tpu.matmul %87, %75, %cst_34 {dimension_numbers = #tpu.dot_dimension_numbers<[2], [1], [1], [2], [0, 0, 0, 1, 1, 2], [0], [0]>} : vector<2x16x16xf32>, vector<2x16x8xf32>, vector<2x16x8xf32> -> vector<2x16x8xf32>
    "tpu.trace_stop"() : () -> ()
    %89 = vector.shape_cast %88 : vector<2x16x8xf32> to vector<32x8xf32>
    %90 = vector.extract_strided_slice %24 {offsets = [16, 0], sizes = [8, 32], strides = [1, 1]} : vector<32x32xf32> to vector<8x32xf32>
    %cst_35 = arith.constant dense<0.000000e+00> : vector<32x32xf32>
    %91 = tpu.matmul %89, %90, %cst_35 {dimension_numbers = #tpu.dot_dimension_numbers<[1], [0], [0], [1], [0, 0, 1, 1], [], []>} : vector<32x8xf32>, vector<8x32xf32>, vector<32x32xf32> -> vector<32x32xf32>
    %92 = arith.addf %69, %91 : vector<32x32xf32>
    %93 = vector.extract_strided_slice %22 {offsets = [0, 24], sizes = [32, 8], strides = [1, 1]} : vector<32x96xf32> to vector<32x8xf32>
    %94 = vector.shape_cast %93 : vector<32x8xf32> to vector<2x16x8xf32>
    %95 = vector.extract_strided_slice %22 {offsets = [0, 56], sizes = [32, 8], strides = [1, 1]} : vector<32x96xf32> to vector<32x8xf32>
    %96 = vector.shape_cast %95 : vector<32x8xf32> to vector<2x16x8xf32>
    %97 = vector.extract_strided_slice %22 {offsets = [0, 88], sizes = [32, 8], strides = [1, 1]} : vector<32x96xf32> to vector<32x8xf32>
    %98 = vector.shape_cast %97 : vector<32x8xf32> to vector<2x16x8xf32>
    "tpu.trace_start"() <{level = 10 : i32, message = "bqd,bkd->bqk"}> : () -> ()
    %cst_36 = arith.constant dense<0.000000e+00> : vector<2x16x16xf32>
    %99 = tpu.matmul %94, %96, %cst_36 {dimension_numbers = #tpu.dot_dimension_numbers<[2], [2], [1], [1], [0, 0, 0, 1, 1, 1], [0], [0]>} : vector<2x16x8xf32>, vector<2x16x8xf32>, vector<2x16x16xf32> -> vector<2x16x16xf32>
    "tpu.trace_stop"() : () -> ()
    %cst_37 = arith.constant 0.353553385 : f32
    %100 = vector.broadcast %cst_37 : f32 to vector<2x16x16xf32>
    %101 = arith.mulf %99, %100 : vector<2x16x16xf32>
    %cst_38 = arith.constant dense<0xFF800000> : vector<2x16xf32>
    %102 = vector.multi_reduction <maximumf>, %101, %cst_38 [2] : vector<2x16x16xf32> to vector<2x16xf32>
    %103 = vector.shape_cast %102 : vector<2x16xf32> to vector<2x16x1xf32>
    %104 = vector.broadcast %103 : vector<2x16x1xf32> to vector<2x16x16xf32>
    %105 = arith.subf %101, %104 : vector<2x16x16xf32>
    %106 = math.exp %105 : vector<2x16x16xf32>
    %cst_39 = arith.constant dense<0.000000e+00> : vector<2x16xf32>
    %107 = vector.multi_reduction <add>, %106, %cst_39 [2] : vector<2x16x16xf32> to vector<2x16xf32>
    %108 = vector.shape_cast %107 : vector<2x16xf32> to vector<2x16x1xf32>
    %109 = vector.broadcast %108 : vector<2x16x1xf32> to vector<2x16x16xf32>
    %110 = arith.divf %106, %109 : vector<2x16x16xf32>
    "tpu.trace_start"() <{level = 10 : i32, message = "bqk,bkd->bqd"}> : () -> ()
    %cst_40 = arith.constant dense<0.000000e+00> : vector<2x16x8xf32>
    %111 = tpu.matmul %110, %98, %cst_40 {dimension_numbers = #tpu.dot_dimension_numbers<[2], [1], [1], [2], [0, 0, 0, 1, 1, 2], [0], [0]>} : vector<2x16x16xf32>, vector<2x16x8xf32>, vector<2x16x8xf32> -> vector<2x16x8xf32>
    "tpu.trace_stop"() : () -> ()
    %112 = vector.shape_cast %111 : vector<2x16x8xf32> to vector<32x8xf32>
    %113 = vector.extract_strided_slice %24 {offsets = [24, 0], sizes = [8, 32], strides = [1, 1]} : vector<32x32xf32> to vector<8x32xf32>
    %cst_41 = arith.constant dense<0.000000e+00> : vector<32x32xf32>
    %114 = tpu.matmul %112, %113, %cst_41 {dimension_numbers = #tpu.dot_dimension_numbers<[1], [0], [0], [1], [0, 0, 1, 1], [], []>} : vector<32x8xf32>, vector<8x32xf32>, vector<32x32xf32> -> vector<32x32xf32>
    %115 = arith.addf %92, %114 : vector<32x32xf32>
    %c0_42 = arith.constant 0 : index
    %c0_43 = arith.constant 0 : index
    %c0_44 = arith.constant 0 : index
    %116 = vector.load %arg7[%c0_42, %c0_43, %c0_44] : memref<3x1x32xf32, #tpu.memory_space<vmem>>, vector<1x1x32xf32>
    %117 = vector.shape_cast %116 : vector<1x1x32xf32> to vector<1x32xf32>
    %118 = vector.broadcast %117 : vector<1x32xf32> to vector<32x32xf32>
    %119 = arith.addf %115, %118 : vector<32x32xf32>
    %120 = arith.addf %15, %119 : vector<32x32xf32>
    %c0_45 = arith.constant 0 : index
    %c0_46 = arith.constant 0 : index
    %c0_47 = arith.constant 0 : index
    %121 = vector.load %arg8[%c0_45, %c0_46, %c0_47] : memref<3x1x32xf32, #tpu.memory_space<vmem>>, vector<1x1x32xf32>
    %122 = vector.shape_cast %121 : vector<1x1x32xf32> to vector<1x32xf32>
    %c0_48 = arith.constant 0 : index
    %c0_49 = arith.constant 0 : index
    %c0_50 = arith.constant 0 : index
    %123 = vector.load %arg9[%c0_48, %c0_49, %c0_50] : memref<3x1x32xf32, #tpu.memory_space<vmem>>, vector<1x1x32xf32>
    %124 = vector.shape_cast %123 : vector<1x1x32xf32> to vector<1x32xf32>
    %cst_51 = arith.constant dense<0.000000e+00> : vector<32xf32>
    %125 = vector.multi_reduction <add>, %120, %cst_51 [1] : vector<32x32xf32> to vector<32xf32>
    %126 = vector.shape_cast %125 : vector<32xf32> to vector<32x1xf32>
    %cst_52 = arith.constant 3.200000e+01 : f32
    %127 = vector.broadcast %cst_52 : f32 to vector<32x1xf32>
    %128 = arith.divf %126, %127 : vector<32x1xf32>
    %129 = vector.broadcast %128 : vector<32x1xf32> to vector<32x32xf32>
    %130 = arith.subf %120, %129 : vector<32x32xf32>
    %131 = arith.mulf %130, %130 : vector<32x32xf32>
    %cst_53 = arith.constant dense<0.000000e+00> : vector<32xf32>
    %132 = vector.multi_reduction <add>, %131, %cst_53 [1] : vector<32x32xf32> to vector<32xf32>
    %133 = vector.shape_cast %132 : vector<32xf32> to vector<32x1xf32>
    %cst_54 = arith.constant 3.200000e+01 : f32
    %134 = vector.broadcast %cst_54 : f32 to vector<32x1xf32>
    %135 = arith.divf %133, %134 : vector<32x1xf32>
    %136 = vector.broadcast %128 : vector<32x1xf32> to vector<32x32xf32>
    %137 = arith.subf %120, %136 : vector<32x32xf32>
    %cst_55 = arith.constant 9.99999974E-6 : f32
    %138 = vector.broadcast %cst_55 : f32 to vector<32x1xf32>
    %139 = arith.addf %135, %138 : vector<32x1xf32>
    %140 = math.rsqrt %139 : vector<32x1xf32>
    %141 = vector.broadcast %140 : vector<32x1xf32> to vector<32x32xf32>
    %142 = arith.mulf %137, %141 : vector<32x32xf32>
    %143 = vector.broadcast %122 : vector<1x32xf32> to vector<32x32xf32>
    %144 = arith.mulf %142, %143 : vector<32x32xf32>
    %145 = vector.broadcast %124 : vector<1x32xf32> to vector<32x32xf32>
    %146 = arith.addf %144, %145 : vector<32x32xf32>
    %c0_56 = arith.constant 0 : index
    %c0_57 = arith.constant 0 : index
    %c0_58 = arith.constant 0 : index
    %147 = vector.load %arg10[%c0_56, %c0_57, %c0_58] : memref<3x32x256xf32, #tpu.memory_space<vmem>>, vector<1x32x256xf32>
    %148 = vector.shape_cast %147 : vector<1x32x256xf32> to vector<32x256xf32>
    %cst_59 = arith.constant dense<0.000000e+00> : vector<32x256xf32>
    %149 = tpu.matmul %146, %148, %cst_59 {dimension_numbers = #tpu.dot_dimension_numbers<[1], [0], [0], [1], [0, 0, 1, 1], [], []>} : vector<32x32xf32>, vector<32x256xf32>, vector<32x256xf32> -> vector<32x256xf32>
    %c0_60 = arith.constant 0 : index
    %c0_61 = arith.constant 0 : index
    %c0_62 = arith.constant 0 : index
    %150 = vector.load %arg11[%c0_60, %c0_61, %c0_62] : memref<3x1x256xf32, #tpu.memory_space<vmem>>, vector<1x1x256xf32>
    %151 = vector.shape_cast %150 : vector<1x1x256xf32> to vector<1x256xf32>
    %152 = vector.broadcast %151 : vector<1x256xf32> to vector<32x256xf32>
    %153 = arith.addf %149, %152 : vector<32x256xf32>
    %cst_63 = arith.constant 5.000000e-01 : f32
    %154 = vector.broadcast %cst_63 : f32 to vector<32x256xf32>
    %155 = arith.mulf %154, %153 : vector<32x256xf32>
    %cst_64 = arith.constant 0.707106769 : f32
    %156 = vector.broadcast %cst_64 : f32 to vector<32x256xf32>
    %157 = arith.mulf %153, %156 : vector<32x256xf32>
    %158 = math.absf %157 : vector<32x256xf32>
    %cst_65 = arith.constant 0.327591091 : f32
    %159 = vector.broadcast %cst_65 : f32 to vector<32x256xf32>
    %160 = arith.mulf %159, %158 : vector<32x256xf32>
    %cst_66 = arith.constant 1.000000e+00 : f32
    %161 = vector.broadcast %cst_66 : f32 to vector<32x256xf32>
    %162 = arith.addf %161, %160 : vector<32x256xf32>
    %cst_67 = arith.constant 1.000000e+00 : f32
    %163 = vector.broadcast %cst_67 : f32 to vector<32x256xf32>
    %164 = arith.divf %163, %162 : vector<32x256xf32>
    %cst_68 = arith.constant 1.06140542 : f32
    %165 = vector.broadcast %cst_68 : f32 to vector<32x256xf32>
    %166 = arith.mulf %165, %164 : vector<32x256xf32>
    %cst_69 = arith.constant 1.45315206 : f32
    %167 = vector.broadcast %cst_69 : f32 to vector<32x256xf32>
    %168 = arith.subf %166, %167 : vector<32x256xf32>
    %169 = arith.mulf %168, %164 : vector<32x256xf32>
    %cst_70 = arith.constant 1.42141378 : f32
    %170 = vector.broadcast %cst_70 : f32 to vector<32x256xf32>
    %171 = arith.addf %169, %170 : vector<32x256xf32>
    %172 = arith.mulf %171, %164 : vector<32x256xf32>
    %cst_71 = arith.constant 0.284496725 : f32
    %173 = vector.broadcast %cst_71 : f32 to vector<32x256xf32>
    %174 = arith.subf %172, %173 : vector<32x256xf32>
    %175 = arith.mulf %174, %164 : vector<32x256xf32>
    %cst_72 = arith.constant 0.254829586 : f32
    %176 = vector.broadcast %cst_72 : f32 to vector<32x256xf32>
    %177 = arith.addf %175, %176 : vector<32x256xf32>
    %178 = arith.mulf %177, %164 : vector<32x256xf32>
    %cst_73 = arith.constant 0.000000e+00 : f32
    %179 = vector.broadcast %cst_73 : f32 to vector<32x256xf32>
    %180 = arith.subf %179, %158 : vector<32x256xf32>
    %181 = arith.mulf %180, %158 : vector<32x256xf32>
    %182 = math.exp %181 : vector<32x256xf32>
    %183 = arith.mulf %178, %182 : vector<32x256xf32>
    %cst_74 = arith.constant 1.000000e+00 : f32
    %184 = vector.broadcast %cst_74 : f32 to vector<32x256xf32>
    %185 = arith.subf %184, %183 : vector<32x256xf32>
    %cst_75 = arith.constant 0.000000e+00 : f32
    %186 = vector.broadcast %cst_75 : f32 to vector<32x256xf32>
    %187 = arith.cmpf oge, %157, %186 : vector<32x256xf32>
    %cst_76 = arith.constant 0.000000e+00 : f32
    %188 = vector.broadcast %cst_76 : f32 to vector<32x256xf32>
    %189 = arith.subf %188, %185 : vector<32x256xf32>
    %190 = arith.select %187, %185, %189 : vector<32x256xi1>, vector<32x256xf32>
    %cst_77 = arith.constant 1.000000e+00 : f32
    %191 = vector.broadcast %cst_77 : f32 to vector<32x256xf32>
    %192 = arith.addf %191, %190 : vector<32x256xf32>
    %193 = arith.mulf %155, %192 : vector<32x256xf32>
    %c0_78 = arith.constant 0 : index
    %c0_79 = arith.constant 0 : index
    %c0_80 = arith.constant 0 : index
    %194 = vector.load %arg12[%c0_78, %c0_79, %c0_80] : memref<3x256x32xf32, #tpu.memory_space<vmem>>, vector<1x256x32xf32>
    %195 = vector.shape_cast %194 : vector<1x256x32xf32> to vector<256x32xf32>
    %cst_81 = arith.constant dense<0.000000e+00> : vector<32x32xf32>
    %196 = tpu.matmul %193, %195, %cst_81 {dimension_numbers = #tpu.dot_dimension_numbers<[1], [0], [0], [1], [0, 0, 1, 1], [], []>} : vector<32x256xf32>, vector<256x32xf32>, vector<32x32xf32> -> vector<32x32xf32>
    %c0_82 = arith.constant 0 : index
    %c0_83 = arith.constant 0 : index
    %c0_84 = arith.constant 0 : index
    %197 = vector.load %arg13[%c0_82, %c0_83, %c0_84] : memref<3x1x32xf32, #tpu.memory_space<vmem>>, vector<1x1x32xf32>
    %198 = vector.shape_cast %197 : vector<1x1x32xf32> to vector<1x32xf32>
    %199 = vector.broadcast %198 : vector<1x32xf32> to vector<32x32xf32>
    %200 = arith.addf %196, %199 : vector<32x32xf32>
    %201 = arith.addf %146, %200 : vector<32x32xf32>
    %c0_85 = arith.constant 0 : index
    %c0_86 = arith.constant 0 : index
    %c0_87 = arith.constant 0 : index
    %202 = vector.load %arg14[%c0_85, %c0_86, %c0_87] : memref<3x1x32xf32, #tpu.memory_space<vmem>>, vector<1x1x32xf32>
    %203 = vector.shape_cast %202 : vector<1x1x32xf32> to vector<1x32xf32>
    %c0_88 = arith.constant 0 : index
    %c0_89 = arith.constant 0 : index
    %c0_90 = arith.constant 0 : index
    %204 = vector.load %arg15[%c0_88, %c0_89, %c0_90] : memref<3x1x32xf32, #tpu.memory_space<vmem>>, vector<1x1x32xf32>
    %205 = vector.shape_cast %204 : vector<1x1x32xf32> to vector<1x32xf32>
    %cst_91 = arith.constant dense<0.000000e+00> : vector<32xf32>
    %206 = vector.multi_reduction <add>, %201, %cst_91 [1] : vector<32x32xf32> to vector<32xf32>
    %207 = vector.shape_cast %206 : vector<32xf32> to vector<32x1xf32>
    %cst_92 = arith.constant 3.200000e+01 : f32
    %208 = vector.broadcast %cst_92 : f32 to vector<32x1xf32>
    %209 = arith.divf %207, %208 : vector<32x1xf32>
    %210 = vector.broadcast %209 : vector<32x1xf32> to vector<32x32xf32>
    %211 = arith.subf %201, %210 : vector<32x32xf32>
    %212 = arith.mulf %211, %211 : vector<32x32xf32>
    %cst_93 = arith.constant dense<0.000000e+00> : vector<32xf32>
    %213 = vector.multi_reduction <add>, %212, %cst_93 [1] : vector<32x32xf32> to vector<32xf32>
    %214 = vector.shape_cast %213 : vector<32xf32> to vector<32x1xf32>
    %cst_94 = arith.constant 3.200000e+01 : f32
    %215 = vector.broadcast %cst_94 : f32 to vector<32x1xf32>
    %216 = arith.divf %214, %215 : vector<32x1xf32>
    %217 = vector.broadcast %209 : vector<32x1xf32> to vector<32x32xf32>
    %218 = arith.subf %201, %217 : vector<32x32xf32>
    %cst_95 = arith.constant 9.99999974E-6 : f32
    %219 = vector.broadcast %cst_95 : f32 to vector<32x1xf32>
    %220 = arith.addf %216, %219 : vector<32x1xf32>
    %221 = math.rsqrt %220 : vector<32x1xf32>
    %222 = vector.broadcast %221 : vector<32x1xf32> to vector<32x32xf32>
    %223 = arith.mulf %218, %222 : vector<32x32xf32>
    %224 = vector.broadcast %203 : vector<1x32xf32> to vector<32x32xf32>
    %225 = arith.mulf %223, %224 : vector<32x32xf32>
    %226 = vector.broadcast %205 : vector<1x32xf32> to vector<32x32xf32>
    %227 = arith.addf %225, %226 : vector<32x32xf32>
    %c1 = arith.constant 1 : index
    %c0_96 = arith.constant 0 : index
    %c0_97 = arith.constant 0 : index
    %228 = vector.load %arg4[%c1, %c0_96, %c0_97] : memref<3x32x96xf32, #tpu.memory_space<vmem>>, vector<1x32x96xf32>
    %229 = vector.shape_cast %228 : vector<1x32x96xf32> to vector<32x96xf32>
    %cst_98 = arith.constant dense<0.000000e+00> : vector<32x96xf32>
    %230 = tpu.matmul %227, %229, %cst_98 {dimension_numbers = #tpu.dot_dimension_numbers<[1], [0], [0], [1], [0, 0, 1, 1], [], []>} : vector<32x32xf32>, vector<32x96xf32>, vector<32x96xf32> -> vector<32x96xf32>
    %c1_99 = arith.constant 1 : index
    %c0_100 = arith.constant 0 : index
    %c0_101 = arith.constant 0 : index
    %231 = vector.load %arg5[%c1_99, %c0_100, %c0_101] : memref<3x1x96xf32, #tpu.memory_space<vmem>>, vector<1x1x96xf32>
    %232 = vector.shape_cast %231 : vector<1x1x96xf32> to vector<1x96xf32>
    %233 = vector.broadcast %232 : vector<1x96xf32> to vector<32x96xf32>
    %234 = arith.addf %230, %233 : vector<32x96xf32>
    %c1_102 = arith.constant 1 : index
    %c0_103 = arith.constant 0 : index
    %c0_104 = arith.constant 0 : index
    %235 = vector.load %arg6[%c1_102, %c0_103, %c0_104] : memref<3x32x32xf32, #tpu.memory_space<vmem>>, vector<1x32x32xf32>
    %236 = vector.shape_cast %235 : vector<1x32x32xf32> to vector<32x32xf32>
    %237 = vector.extract_strided_slice %234 {offsets = [0, 0], sizes = [32, 8], strides = [1, 1]} : vector<32x96xf32> to vector<32x8xf32>
    %238 = vector.shape_cast %237 : vector<32x8xf32> to vector<2x16x8xf32>
    %239 = vector.extract_strided_slice %234 {offsets = [0, 32], sizes = [32, 8], strides = [1, 1]} : vector<32x96xf32> to vector<32x8xf32>
    %240 = vector.shape_cast %239 : vector<32x8xf32> to vector<2x16x8xf32>
    %241 = vector.extract_strided_slice %234 {offsets = [0, 64], sizes = [32, 8], strides = [1, 1]} : vector<32x96xf32> to vector<32x8xf32>
    %242 = vector.shape_cast %241 : vector<32x8xf32> to vector<2x16x8xf32>
    "tpu.trace_start"() <{level = 10 : i32, message = "bqd,bkd->bqk"}> : () -> ()
    %cst_105 = arith.constant dense<0.000000e+00> : vector<2x16x16xf32>
    %243 = tpu.matmul %238, %240, %cst_105 {dimension_numbers = #tpu.dot_dimension_numbers<[2], [2], [1], [1], [0, 0, 0, 1, 1, 1], [0], [0]>} : vector<2x16x8xf32>, vector<2x16x8xf32>, vector<2x16x16xf32> -> vector<2x16x16xf32>
    "tpu.trace_stop"() : () -> ()
    %cst_106 = arith.constant 0.353553385 : f32
    %244 = vector.broadcast %cst_106 : f32 to vector<2x16x16xf32>
    %245 = arith.mulf %243, %244 : vector<2x16x16xf32>
    %cst_107 = arith.constant dense<0xFF800000> : vector<2x16xf32>
    %246 = vector.multi_reduction <maximumf>, %245, %cst_107 [2] : vector<2x16x16xf32> to vector<2x16xf32>
    %247 = vector.shape_cast %246 : vector<2x16xf32> to vector<2x16x1xf32>
    %248 = vector.broadcast %247 : vector<2x16x1xf32> to vector<2x16x16xf32>
    %249 = arith.subf %245, %248 : vector<2x16x16xf32>
    %250 = math.exp %249 : vector<2x16x16xf32>
    %cst_108 = arith.constant dense<0.000000e+00> : vector<2x16xf32>
    %251 = vector.multi_reduction <add>, %250, %cst_108 [2] : vector<2x16x16xf32> to vector<2x16xf32>
    %252 = vector.shape_cast %251 : vector<2x16xf32> to vector<2x16x1xf32>
    %253 = vector.broadcast %252 : vector<2x16x1xf32> to vector<2x16x16xf32>
    %254 = arith.divf %250, %253 : vector<2x16x16xf32>
    "tpu.trace_start"() <{level = 10 : i32, message = "bqk,bkd->bqd"}> : () -> ()
    %cst_109 = arith.constant dense<0.000000e+00> : vector<2x16x8xf32>
    %255 = tpu.matmul %254, %242, %cst_109 {dimension_numbers = #tpu.dot_dimension_numbers<[2], [1], [1], [2], [0, 0, 0, 1, 1, 2], [0], [0]>} : vector<2x16x16xf32>, vector<2x16x8xf32>, vector<2x16x8xf32> -> vector<2x16x8xf32>
    "tpu.trace_stop"() : () -> ()
    %256 = vector.shape_cast %255 : vector<2x16x8xf32> to vector<32x8xf32>
    %257 = vector.extract_strided_slice %236 {offsets = [0, 0], sizes = [8, 32], strides = [1, 1]} : vector<32x32xf32> to vector<8x32xf32>
    %cst_110 = arith.constant dense<0.000000e+00> : vector<32x32xf32>
    %258 = tpu.matmul %256, %257, %cst_110 {dimension_numbers = #tpu.dot_dimension_numbers<[1], [0], [0], [1], [0, 0, 1, 1], [], []>} : vector<32x8xf32>, vector<8x32xf32>, vector<32x32xf32> -> vector<32x32xf32>
    %259 = vector.extract_strided_slice %234 {offsets = [0, 8], sizes = [32, 8], strides = [1, 1]} : vector<32x96xf32> to vector<32x8xf32>
    %260 = vector.shape_cast %259 : vector<32x8xf32> to vector<2x16x8xf32>
    %261 = vector.extract_strided_slice %234 {offsets = [0, 40], sizes = [32, 8], strides = [1, 1]} : vector<32x96xf32> to vector<32x8xf32>
    %262 = vector.shape_cast %261 : vector<32x8xf32> to vector<2x16x8xf32>
    %263 = vector.extract_strided_slice %234 {offsets = [0, 72], sizes = [32, 8], strides = [1, 1]} : vector<32x96xf32> to vector<32x8xf32>
    %264 = vector.shape_cast %263 : vector<32x8xf32> to vector<2x16x8xf32>
    "tpu.trace_start"() <{level = 10 : i32, message = "bqd,bkd->bqk"}> : () -> ()
    %cst_111 = arith.constant dense<0.000000e+00> : vector<2x16x16xf32>
    %265 = tpu.matmul %260, %262, %cst_111 {dimension_numbers = #tpu.dot_dimension_numbers<[2], [2], [1], [1], [0, 0, 0, 1, 1, 1], [0], [0]>} : vector<2x16x8xf32>, vector<2x16x8xf32>, vector<2x16x16xf32> -> vector<2x16x16xf32>
    "tpu.trace_stop"() : () -> ()
    %cst_112 = arith.constant 0.353553385 : f32
    %266 = vector.broadcast %cst_112 : f32 to vector<2x16x16xf32>
    %267 = arith.mulf %265, %266 : vector<2x16x16xf32>
    %cst_113 = arith.constant dense<0xFF800000> : vector<2x16xf32>
    %268 = vector.multi_reduction <maximumf>, %267, %cst_113 [2] : vector<2x16x16xf32> to vector<2x16xf32>
    %269 = vector.shape_cast %268 : vector<2x16xf32> to vector<2x16x1xf32>
    %270 = vector.broadcast %269 : vector<2x16x1xf32> to vector<2x16x16xf32>
    %271 = arith.subf %267, %270 : vector<2x16x16xf32>
    %272 = math.exp %271 : vector<2x16x16xf32>
    %cst_114 = arith.constant dense<0.000000e+00> : vector<2x16xf32>
    %273 = vector.multi_reduction <add>, %272, %cst_114 [2] : vector<2x16x16xf32> to vector<2x16xf32>
    %274 = vector.shape_cast %273 : vector<2x16xf32> to vector<2x16x1xf32>
    %275 = vector.broadcast %274 : vector<2x16x1xf32> to vector<2x16x16xf32>
    %276 = arith.divf %272, %275 : vector<2x16x16xf32>
    "tpu.trace_start"() <{level = 10 : i32, message = "bqk,bkd->bqd"}> : () -> ()
    %cst_115 = arith.constant dense<0.000000e+00> : vector<2x16x8xf32>
    %277 = tpu.matmul %276, %264, %cst_115 {dimension_numbers = #tpu.dot_dimension_numbers<[2], [1], [1], [2], [0, 0, 0, 1, 1, 2], [0], [0]>} : vector<2x16x16xf32>, vector<2x16x8xf32>, vector<2x16x8xf32> -> vector<2x16x8xf32>
    "tpu.trace_stop"() : () -> ()
    %278 = vector.shape_cast %277 : vector<2x16x8xf32> to vector<32x8xf32>
    %279 = vector.extract_strided_slice %236 {offsets = [8, 0], sizes = [8, 32], strides = [1, 1]} : vector<32x32xf32> to vector<8x32xf32>
    %cst_116 = arith.constant dense<0.000000e+00> : vector<32x32xf32>
    %280 = tpu.matmul %278, %279, %cst_116 {dimension_numbers = #tpu.dot_dimension_numbers<[1], [0], [0], [1], [0, 0, 1, 1], [], []>} : vector<32x8xf32>, vector<8x32xf32>, vector<32x32xf32> -> vector<32x32xf32>
    %281 = arith.addf %258, %280 : vector<32x32xf32>
    %282 = vector.extract_strided_slice %234 {offsets = [0, 16], sizes = [32, 8], strides = [1, 1]} : vector<32x96xf32> to vector<32x8xf32>
    %283 = vector.shape_cast %282 : vector<32x8xf32> to vector<2x16x8xf32>
    %284 = vector.extract_strided_slice %234 {offsets = [0, 48], sizes = [32, 8], strides = [1, 1]} : vector<32x96xf32> to vector<32x8xf32>
    %285 = vector.shape_cast %284 : vector<32x8xf32> to vector<2x16x8xf32>
    %286 = vector.extract_strided_slice %234 {offsets = [0, 80], sizes = [32, 8], strides = [1, 1]} : vector<32x96xf32> to vector<32x8xf32>
    %287 = vector.shape_cast %286 : vector<32x8xf32> to vector<2x16x8xf32>
    "tpu.trace_start"() <{level = 10 : i32, message = "bqd,bkd->bqk"}> : () -> ()
    %cst_117 = arith.constant dense<0.000000e+00> : vector<2x16x16xf32>
    %288 = tpu.matmul %283, %285, %cst_117 {dimension_numbers = #tpu.dot_dimension_numbers<[2], [2], [1], [1], [0, 0, 0, 1, 1, 1], [0], [0]>} : vector<2x16x8xf32>, vector<2x16x8xf32>, vector<2x16x16xf32> -> vector<2x16x16xf32>
    "tpu.trace_stop"() : () -> ()
    %cst_118 = arith.constant 0.353553385 : f32
    %289 = vector.broadcast %cst_118 : f32 to vector<2x16x16xf32>
    %290 = arith.mulf %288, %289 : vector<2x16x16xf32>
    %cst_119 = arith.constant dense<0xFF800000> : vector<2x16xf32>
    %291 = vector.multi_reduction <maximumf>, %290, %cst_119 [2] : vector<2x16x16xf32> to vector<2x16xf32>
    %292 = vector.shape_cast %291 : vector<2x16xf32> to vector<2x16x1xf32>
    %293 = vector.broadcast %292 : vector<2x16x1xf32> to vector<2x16x16xf32>
    %294 = arith.subf %290, %293 : vector<2x16x16xf32>
    %295 = math.exp %294 : vector<2x16x16xf32>
    %cst_120 = arith.constant dense<0.000000e+00> : vector<2x16xf32>
    %296 = vector.multi_reduction <add>, %295, %cst_120 [2] : vector<2x16x16xf32> to vector<2x16xf32>
    %297 = vector.shape_cast %296 : vector<2x16xf32> to vector<2x16x1xf32>
    %298 = vector.broadcast %297 : vector<2x16x1xf32> to vector<2x16x16xf32>
    %299 = arith.divf %295, %298 : vector<2x16x16xf32>
    "tpu.trace_start"() <{level = 10 : i32, message = "bqk,bkd->bqd"}> : () -> ()
    %cst_121 = arith.constant dense<0.000000e+00> : vector<2x16x8xf32>
    %300 = tpu.matmul %299, %287, %cst_121 {dimension_numbers = #tpu.dot_dimension_numbers<[2], [1], [1], [2], [0, 0, 0, 1, 1, 2], [0], [0]>} : vector<2x16x16xf32>, vector<2x16x8xf32>, vector<2x16x8xf32> -> vector<2x16x8xf32>
    "tpu.trace_stop"() : () -> ()
    %301 = vector.shape_cast %300 : vector<2x16x8xf32> to vector<32x8xf32>
    %302 = vector.extract_strided_slice %236 {offsets = [16, 0], sizes = [8, 32], strides = [1, 1]} : vector<32x32xf32> to vector<8x32xf32>
    %cst_122 = arith.constant dense<0.000000e+00> : vector<32x32xf32>
    %303 = tpu.matmul %301, %302, %cst_122 {dimension_numbers = #tpu.dot_dimension_numbers<[1], [0], [0], [1], [0, 0, 1, 1], [], []>} : vector<32x8xf32>, vector<8x32xf32>, vector<32x32xf32> -> vector<32x32xf32>
    %304 = arith.addf %281, %303 : vector<32x32xf32>
    %305 = vector.extract_strided_slice %234 {offsets = [0, 24], sizes = [32, 8], strides = [1, 1]} : vector<32x96xf32> to vector<32x8xf32>
    %306 = vector.shape_cast %305 : vector<32x8xf32> to vector<2x16x8xf32>
    %307 = vector.extract_strided_slice %234 {offsets = [0, 56], sizes = [32, 8], strides = [1, 1]} : vector<32x96xf32> to vector<32x8xf32>
    %308 = vector.shape_cast %307 : vector<32x8xf32> to vector<2x16x8xf32>
    %309 = vector.extract_strided_slice %234 {offsets = [0, 88], sizes = [32, 8], strides = [1, 1]} : vector<32x96xf32> to vector<32x8xf32>
    %310 = vector.shape_cast %309 : vector<32x8xf32> to vector<2x16x8xf32>
    "tpu.trace_start"() <{level = 10 : i32, message = "bqd,bkd->bqk"}> : () -> ()
    %cst_123 = arith.constant dense<0.000000e+00> : vector<2x16x16xf32>
    %311 = tpu.matmul %306, %308, %cst_123 {dimension_numbers = #tpu.dot_dimension_numbers<[2], [2], [1], [1], [0, 0, 0, 1, 1, 1], [0], [0]>} : vector<2x16x8xf32>, vector<2x16x8xf32>, vector<2x16x16xf32> -> vector<2x16x16xf32>
    "tpu.trace_stop"() : () -> ()
    %cst_124 = arith.constant 0.353553385 : f32
    %312 = vector.broadcast %cst_124 : f32 to vector<2x16x16xf32>
    %313 = arith.mulf %311, %312 : vector<2x16x16xf32>
    %cst_125 = arith.constant dense<0xFF800000> : vector<2x16xf32>
    %314 = vector.multi_reduction <maximumf>, %313, %cst_125 [2] : vector<2x16x16xf32> to vector<2x16xf32>
    %315 = vector.shape_cast %314 : vector<2x16xf32> to vector<2x16x1xf32>
    %316 = vector.broadcast %315 : vector<2x16x1xf32> to vector<2x16x16xf32>
    %317 = arith.subf %313, %316 : vector<2x16x16xf32>
    %318 = math.exp %317 : vector<2x16x16xf32>
    %cst_126 = arith.constant dense<0.000000e+00> : vector<2x16xf32>
    %319 = vector.multi_reduction <add>, %318, %cst_126 [2] : vector<2x16x16xf32> to vector<2x16xf32>
    %320 = vector.shape_cast %319 : vector<2x16xf32> to vector<2x16x1xf32>
    %321 = vector.broadcast %320 : vector<2x16x1xf32> to vector<2x16x16xf32>
    %322 = arith.divf %318, %321 : vector<2x16x16xf32>
    "tpu.trace_start"() <{level = 10 : i32, message = "bqk,bkd->bqd"}> : () -> ()
    %cst_127 = arith.constant dense<0.000000e+00> : vector<2x16x8xf32>
    %323 = tpu.matmul %322, %310, %cst_127 {dimension_numbers = #tpu.dot_dimension_numbers<[2], [1], [1], [2], [0, 0, 0, 1, 1, 2], [0], [0]>} : vector<2x16x16xf32>, vector<2x16x8xf32>, vector<2x16x8xf32> -> vector<2x16x8xf32>
    "tpu.trace_stop"() : () -> ()
    %324 = vector.shape_cast %323 : vector<2x16x8xf32> to vector<32x8xf32>
    %325 = vector.extract_strided_slice %236 {offsets = [24, 0], sizes = [8, 32], strides = [1, 1]} : vector<32x32xf32> to vector<8x32xf32>
    %cst_128 = arith.constant dense<0.000000e+00> : vector<32x32xf32>
    %326 = tpu.matmul %324, %325, %cst_128 {dimension_numbers = #tpu.dot_dimension_numbers<[1], [0], [0], [1], [0, 0, 1, 1], [], []>} : vector<32x8xf32>, vector<8x32xf32>, vector<32x32xf32> -> vector<32x32xf32>
    %327 = arith.addf %304, %326 : vector<32x32xf32>
    %c1_129 = arith.constant 1 : index
    %c0_130 = arith.constant 0 : index
    %c0_131 = arith.constant 0 : index
    %328 = vector.load %arg7[%c1_129, %c0_130, %c0_131] : memref<3x1x32xf32, #tpu.memory_space<vmem>>, vector<1x1x32xf32>
    %329 = vector.shape_cast %328 : vector<1x1x32xf32> to vector<1x32xf32>
    %330 = vector.broadcast %329 : vector<1x32xf32> to vector<32x32xf32>
    %331 = arith.addf %327, %330 : vector<32x32xf32>
    %332 = arith.addf %227, %331 : vector<32x32xf32>
    %c1_132 = arith.constant 1 : index
    %c0_133 = arith.constant 0 : index
    %c0_134 = arith.constant 0 : index
    %333 = vector.load %arg8[%c1_132, %c0_133, %c0_134] : memref<3x1x32xf32, #tpu.memory_space<vmem>>, vector<1x1x32xf32>
    %334 = vector.shape_cast %333 : vector<1x1x32xf32> to vector<1x32xf32>
    %c1_135 = arith.constant 1 : index
    %c0_136 = arith.constant 0 : index
    %c0_137 = arith.constant 0 : index
    %335 = vector.load %arg9[%c1_135, %c0_136, %c0_137] : memref<3x1x32xf32, #tpu.memory_space<vmem>>, vector<1x1x32xf32>
    %336 = vector.shape_cast %335 : vector<1x1x32xf32> to vector<1x32xf32>
    %cst_138 = arith.constant dense<0.000000e+00> : vector<32xf32>
    %337 = vector.multi_reduction <add>, %332, %cst_138 [1] : vector<32x32xf32> to vector<32xf32>
    %338 = vector.shape_cast %337 : vector<32xf32> to vector<32x1xf32>
    %cst_139 = arith.constant 3.200000e+01 : f32
    %339 = vector.broadcast %cst_139 : f32 to vector<32x1xf32>
    %340 = arith.divf %338, %339 : vector<32x1xf32>
    %341 = vector.broadcast %340 : vector<32x1xf32> to vector<32x32xf32>
    %342 = arith.subf %332, %341 : vector<32x32xf32>
    %343 = arith.mulf %342, %342 : vector<32x32xf32>
    %cst_140 = arith.constant dense<0.000000e+00> : vector<32xf32>
    %344 = vector.multi_reduction <add>, %343, %cst_140 [1] : vector<32x32xf32> to vector<32xf32>
    %345 = vector.shape_cast %344 : vector<32xf32> to vector<32x1xf32>
    %cst_141 = arith.constant 3.200000e+01 : f32
    %346 = vector.broadcast %cst_141 : f32 to vector<32x1xf32>
    %347 = arith.divf %345, %346 : vector<32x1xf32>
    %348 = vector.broadcast %340 : vector<32x1xf32> to vector<32x32xf32>
    %349 = arith.subf %332, %348 : vector<32x32xf32>
    %cst_142 = arith.constant 9.99999974E-6 : f32
    %350 = vector.broadcast %cst_142 : f32 to vector<32x1xf32>
    %351 = arith.addf %347, %350 : vector<32x1xf32>
    %352 = math.rsqrt %351 : vector<32x1xf32>
    %353 = vector.broadcast %352 : vector<32x1xf32> to vector<32x32xf32>
    %354 = arith.mulf %349, %353 : vector<32x32xf32>
    %355 = vector.broadcast %334 : vector<1x32xf32> to vector<32x32xf32>
    %356 = arith.mulf %354, %355 : vector<32x32xf32>
    %357 = vector.broadcast %336 : vector<1x32xf32> to vector<32x32xf32>
    %358 = arith.addf %356, %357 : vector<32x32xf32>
    %c1_143 = arith.constant 1 : index
    %c0_144 = arith.constant 0 : index
    %c0_145 = arith.constant 0 : index
    %359 = vector.load %arg10[%c1_143, %c0_144, %c0_145] : memref<3x32x256xf32, #tpu.memory_space<vmem>>, vector<1x32x256xf32>
    %360 = vector.shape_cast %359 : vector<1x32x256xf32> to vector<32x256xf32>
    %cst_146 = arith.constant dense<0.000000e+00> : vector<32x256xf32>
    %361 = tpu.matmul %358, %360, %cst_146 {dimension_numbers = #tpu.dot_dimension_numbers<[1], [0], [0], [1], [0, 0, 1, 1], [], []>} : vector<32x32xf32>, vector<32x256xf32>, vector<32x256xf32> -> vector<32x256xf32>
    %c1_147 = arith.constant 1 : index
    %c0_148 = arith.constant 0 : index
    %c0_149 = arith.constant 0 : index
    %362 = vector.load %arg11[%c1_147, %c0_148, %c0_149] : memref<3x1x256xf32, #tpu.memory_space<vmem>>, vector<1x1x256xf32>
    %363 = vector.shape_cast %362 : vector<1x1x256xf32> to vector<1x256xf32>
    %364 = vector.broadcast %363 : vector<1x256xf32> to vector<32x256xf32>
    %365 = arith.addf %361, %364 : vector<32x256xf32>
    %cst_150 = arith.constant 5.000000e-01 : f32
    %366 = vector.broadcast %cst_150 : f32 to vector<32x256xf32>
    %367 = arith.mulf %366, %365 : vector<32x256xf32>
    %cst_151 = arith.constant 0.707106769 : f32
    %368 = vector.broadcast %cst_151 : f32 to vector<32x256xf32>
    %369 = arith.mulf %365, %368 : vector<32x256xf32>
    %370 = math.absf %369 : vector<32x256xf32>
    %cst_152 = arith.constant 0.327591091 : f32
    %371 = vector.broadcast %cst_152 : f32 to vector<32x256xf32>
    %372 = arith.mulf %371, %370 : vector<32x256xf32>
    %cst_153 = arith.constant 1.000000e+00 : f32
    %373 = vector.broadcast %cst_153 : f32 to vector<32x256xf32>
    %374 = arith.addf %373, %372 : vector<32x256xf32>
    %cst_154 = arith.constant 1.000000e+00 : f32
    %375 = vector.broadcast %cst_154 : f32 to vector<32x256xf32>
    %376 = arith.divf %375, %374 : vector<32x256xf32>
    %cst_155 = arith.constant 1.06140542 : f32
    %377 = vector.broadcast %cst_155 : f32 to vector<32x256xf32>
    %378 = arith.mulf %377, %376 : vector<32x256xf32>
    %cst_156 = arith.constant 1.45315206 : f32
    %379 = vector.broadcast %cst_156 : f32 to vector<32x256xf32>
    %380 = arith.subf %378, %379 : vector<32x256xf32>
    %381 = arith.mulf %380, %376 : vector<32x256xf32>
    %cst_157 = arith.constant 1.42141378 : f32
    %382 = vector.broadcast %cst_157 : f32 to vector<32x256xf32>
    %383 = arith.addf %381, %382 : vector<32x256xf32>
    %384 = arith.mulf %383, %376 : vector<32x256xf32>
    %cst_158 = arith.constant 0.284496725 : f32
    %385 = vector.broadcast %cst_158 : f32 to vector<32x256xf32>
    %386 = arith.subf %384, %385 : vector<32x256xf32>
    %387 = arith.mulf %386, %376 : vector<32x256xf32>
    %cst_159 = arith.constant 0.254829586 : f32
    %388 = vector.broadcast %cst_159 : f32 to vector<32x256xf32>
    %389 = arith.addf %387, %388 : vector<32x256xf32>
    %390 = arith.mulf %389, %376 : vector<32x256xf32>
    %cst_160 = arith.constant 0.000000e+00 : f32
    %391 = vector.broadcast %cst_160 : f32 to vector<32x256xf32>
    %392 = arith.subf %391, %370 : vector<32x256xf32>
    %393 = arith.mulf %392, %370 : vector<32x256xf32>
    %394 = math.exp %393 : vector<32x256xf32>
    %395 = arith.mulf %390, %394 : vector<32x256xf32>
    %cst_161 = arith.constant 1.000000e+00 : f32
    %396 = vector.broadcast %cst_161 : f32 to vector<32x256xf32>
    %397 = arith.subf %396, %395 : vector<32x256xf32>
    %cst_162 = arith.constant 0.000000e+00 : f32
    %398 = vector.broadcast %cst_162 : f32 to vector<32x256xf32>
    %399 = arith.cmpf oge, %369, %398 : vector<32x256xf32>
    %cst_163 = arith.constant 0.000000e+00 : f32
    %400 = vector.broadcast %cst_163 : f32 to vector<32x256xf32>
    %401 = arith.subf %400, %397 : vector<32x256xf32>
    %402 = arith.select %399, %397, %401 : vector<32x256xi1>, vector<32x256xf32>
    %cst_164 = arith.constant 1.000000e+00 : f32
    %403 = vector.broadcast %cst_164 : f32 to vector<32x256xf32>
    %404 = arith.addf %403, %402 : vector<32x256xf32>
    %405 = arith.mulf %367, %404 : vector<32x256xf32>
    %c1_165 = arith.constant 1 : index
    %c0_166 = arith.constant 0 : index
    %c0_167 = arith.constant 0 : index
    %406 = vector.load %arg12[%c1_165, %c0_166, %c0_167] : memref<3x256x32xf32, #tpu.memory_space<vmem>>, vector<1x256x32xf32>
    %407 = vector.shape_cast %406 : vector<1x256x32xf32> to vector<256x32xf32>
    %cst_168 = arith.constant dense<0.000000e+00> : vector<32x32xf32>
    %408 = tpu.matmul %405, %407, %cst_168 {dimension_numbers = #tpu.dot_dimension_numbers<[1], [0], [0], [1], [0, 0, 1, 1], [], []>} : vector<32x256xf32>, vector<256x32xf32>, vector<32x32xf32> -> vector<32x32xf32>
    %c1_169 = arith.constant 1 : index
    %c0_170 = arith.constant 0 : index
    %c0_171 = arith.constant 0 : index
    %409 = vector.load %arg13[%c1_169, %c0_170, %c0_171] : memref<3x1x32xf32, #tpu.memory_space<vmem>>, vector<1x1x32xf32>
    %410 = vector.shape_cast %409 : vector<1x1x32xf32> to vector<1x32xf32>
    %411 = vector.broadcast %410 : vector<1x32xf32> to vector<32x32xf32>
    %412 = arith.addf %408, %411 : vector<32x32xf32>
    %413 = arith.addf %358, %412 : vector<32x32xf32>
    %c1_172 = arith.constant 1 : index
    %c0_173 = arith.constant 0 : index
    %c0_174 = arith.constant 0 : index
    %414 = vector.load %arg14[%c1_172, %c0_173, %c0_174] : memref<3x1x32xf32, #tpu.memory_space<vmem>>, vector<1x1x32xf32>
    %415 = vector.shape_cast %414 : vector<1x1x32xf32> to vector<1x32xf32>
    %c1_175 = arith.constant 1 : index
    %c0_176 = arith.constant 0 : index
    %c0_177 = arith.constant 0 : index
    %416 = vector.load %arg15[%c1_175, %c0_176, %c0_177] : memref<3x1x32xf32, #tpu.memory_space<vmem>>, vector<1x1x32xf32>
    %417 = vector.shape_cast %416 : vector<1x1x32xf32> to vector<1x32xf32>
    %cst_178 = arith.constant dense<0.000000e+00> : vector<32xf32>
    %418 = vector.multi_reduction <add>, %413, %cst_178 [1] : vector<32x32xf32> to vector<32xf32>
    %419 = vector.shape_cast %418 : vector<32xf32> to vector<32x1xf32>
    %cst_179 = arith.constant 3.200000e+01 : f32
    %420 = vector.broadcast %cst_179 : f32 to vector<32x1xf32>
    %421 = arith.divf %419, %420 : vector<32x1xf32>
    %422 = vector.broadcast %421 : vector<32x1xf32> to vector<32x32xf32>
    %423 = arith.subf %413, %422 : vector<32x32xf32>
    %424 = arith.mulf %423, %423 : vector<32x32xf32>
    %cst_180 = arith.constant dense<0.000000e+00> : vector<32xf32>
    %425 = vector.multi_reduction <add>, %424, %cst_180 [1] : vector<32x32xf32> to vector<32xf32>
    %426 = vector.shape_cast %425 : vector<32xf32> to vector<32x1xf32>
    %cst_181 = arith.constant 3.200000e+01 : f32
    %427 = vector.broadcast %cst_181 : f32 to vector<32x1xf32>
    %428 = arith.divf %426, %427 : vector<32x1xf32>
    %429 = vector.broadcast %421 : vector<32x1xf32> to vector<32x32xf32>
    %430 = arith.subf %413, %429 : vector<32x32xf32>
    %cst_182 = arith.constant 9.99999974E-6 : f32
    %431 = vector.broadcast %cst_182 : f32 to vector<32x1xf32>
    %432 = arith.addf %428, %431 : vector<32x1xf32>
    %433 = math.rsqrt %432 : vector<32x1xf32>
    %434 = vector.broadcast %433 : vector<32x1xf32> to vector<32x32xf32>
    %435 = arith.mulf %430, %434 : vector<32x32xf32>
    %436 = vector.broadcast %415 : vector<1x32xf32> to vector<32x32xf32>
    %437 = arith.mulf %435, %436 : vector<32x32xf32>
    %438 = vector.broadcast %417 : vector<1x32xf32> to vector<32x32xf32>
    %439 = arith.addf %437, %438 : vector<32x32xf32>
    %c2 = arith.constant 2 : index
    %c0_183 = arith.constant 0 : index
    %c0_184 = arith.constant 0 : index
    %440 = vector.load %arg4[%c2, %c0_183, %c0_184] : memref<3x32x96xf32, #tpu.memory_space<vmem>>, vector<1x32x96xf32>
    %441 = vector.shape_cast %440 : vector<1x32x96xf32> to vector<32x96xf32>
    %cst_185 = arith.constant dense<0.000000e+00> : vector<32x96xf32>
    %442 = tpu.matmul %439, %441, %cst_185 {dimension_numbers = #tpu.dot_dimension_numbers<[1], [0], [0], [1], [0, 0, 1, 1], [], []>} : vector<32x32xf32>, vector<32x96xf32>, vector<32x96xf32> -> vector<32x96xf32>
    %c2_186 = arith.constant 2 : index
    %c0_187 = arith.constant 0 : index
    %c0_188 = arith.constant 0 : index
    %443 = vector.load %arg5[%c2_186, %c0_187, %c0_188] : memref<3x1x96xf32, #tpu.memory_space<vmem>>, vector<1x1x96xf32>
    %444 = vector.shape_cast %443 : vector<1x1x96xf32> to vector<1x96xf32>
    %445 = vector.broadcast %444 : vector<1x96xf32> to vector<32x96xf32>
    %446 = arith.addf %442, %445 : vector<32x96xf32>
    %c2_189 = arith.constant 2 : index
    %c0_190 = arith.constant 0 : index
    %c0_191 = arith.constant 0 : index
    %447 = vector.load %arg6[%c2_189, %c0_190, %c0_191] : memref<3x32x32xf32, #tpu.memory_space<vmem>>, vector<1x32x32xf32>
    %448 = vector.shape_cast %447 : vector<1x32x32xf32> to vector<32x32xf32>
    %449 = vector.extract_strided_slice %446 {offsets = [0, 0], sizes = [32, 8], strides = [1, 1]} : vector<32x96xf32> to vector<32x8xf32>
    %450 = vector.shape_cast %449 : vector<32x8xf32> to vector<2x16x8xf32>
    %451 = vector.extract_strided_slice %446 {offsets = [0, 32], sizes = [32, 8], strides = [1, 1]} : vector<32x96xf32> to vector<32x8xf32>
    %452 = vector.shape_cast %451 : vector<32x8xf32> to vector<2x16x8xf32>
    %453 = vector.extract_strided_slice %446 {offsets = [0, 64], sizes = [32, 8], strides = [1, 1]} : vector<32x96xf32> to vector<32x8xf32>
    %454 = vector.shape_cast %453 : vector<32x8xf32> to vector<2x16x8xf32>
    "tpu.trace_start"() <{level = 10 : i32, message = "bqd,bkd->bqk"}> : () -> ()
    %cst_192 = arith.constant dense<0.000000e+00> : vector<2x16x16xf32>
    %455 = tpu.matmul %450, %452, %cst_192 {dimension_numbers = #tpu.dot_dimension_numbers<[2], [2], [1], [1], [0, 0, 0, 1, 1, 1], [0], [0]>} : vector<2x16x8xf32>, vector<2x16x8xf32>, vector<2x16x16xf32> -> vector<2x16x16xf32>
    "tpu.trace_stop"() : () -> ()
    %cst_193 = arith.constant 0.353553385 : f32
    %456 = vector.broadcast %cst_193 : f32 to vector<2x16x16xf32>
    %457 = arith.mulf %455, %456 : vector<2x16x16xf32>
    %cst_194 = arith.constant dense<0xFF800000> : vector<2x16xf32>
    %458 = vector.multi_reduction <maximumf>, %457, %cst_194 [2] : vector<2x16x16xf32> to vector<2x16xf32>
    %459 = vector.shape_cast %458 : vector<2x16xf32> to vector<2x16x1xf32>
    %460 = vector.broadcast %459 : vector<2x16x1xf32> to vector<2x16x16xf32>
    %461 = arith.subf %457, %460 : vector<2x16x16xf32>
    %462 = math.exp %461 : vector<2x16x16xf32>
    %cst_195 = arith.constant dense<0.000000e+00> : vector<2x16xf32>
    %463 = vector.multi_reduction <add>, %462, %cst_195 [2] : vector<2x16x16xf32> to vector<2x16xf32>
    %464 = vector.shape_cast %463 : vector<2x16xf32> to vector<2x16x1xf32>
    %465 = vector.broadcast %464 : vector<2x16x1xf32> to vector<2x16x16xf32>
    %466 = arith.divf %462, %465 : vector<2x16x16xf32>
    "tpu.trace_start"() <{level = 10 : i32, message = "bqk,bkd->bqd"}> : () -> ()
    %cst_196 = arith.constant dense<0.000000e+00> : vector<2x16x8xf32>
    %467 = tpu.matmul %466, %454, %cst_196 {dimension_numbers = #tpu.dot_dimension_numbers<[2], [1], [1], [2], [0, 0, 0, 1, 1, 2], [0], [0]>} : vector<2x16x16xf32>, vector<2x16x8xf32>, vector<2x16x8xf32> -> vector<2x16x8xf32>
    "tpu.trace_stop"() : () -> ()
    %468 = vector.shape_cast %467 : vector<2x16x8xf32> to vector<32x8xf32>
    %469 = vector.extract_strided_slice %448 {offsets = [0, 0], sizes = [8, 32], strides = [1, 1]} : vector<32x32xf32> to vector<8x32xf32>
    %cst_197 = arith.constant dense<0.000000e+00> : vector<32x32xf32>
    %470 = tpu.matmul %468, %469, %cst_197 {dimension_numbers = #tpu.dot_dimension_numbers<[1], [0], [0], [1], [0, 0, 1, 1], [], []>} : vector<32x8xf32>, vector<8x32xf32>, vector<32x32xf32> -> vector<32x32xf32>
    %471 = vector.extract_strided_slice %446 {offsets = [0, 8], sizes = [32, 8], strides = [1, 1]} : vector<32x96xf32> to vector<32x8xf32>
    %472 = vector.shape_cast %471 : vector<32x8xf32> to vector<2x16x8xf32>
    %473 = vector.extract_strided_slice %446 {offsets = [0, 40], sizes = [32, 8], strides = [1, 1]} : vector<32x96xf32> to vector<32x8xf32>
    %474 = vector.shape_cast %473 : vector<32x8xf32> to vector<2x16x8xf32>
    %475 = vector.extract_strided_slice %446 {offsets = [0, 72], sizes = [32, 8], strides = [1, 1]} : vector<32x96xf32> to vector<32x8xf32>
    %476 = vector.shape_cast %475 : vector<32x8xf32> to vector<2x16x8xf32>
    "tpu.trace_start"() <{level = 10 : i32, message = "bqd,bkd->bqk"}> : () -> ()
    %cst_198 = arith.constant dense<0.000000e+00> : vector<2x16x16xf32>
    %477 = tpu.matmul %472, %474, %cst_198 {dimension_numbers = #tpu.dot_dimension_numbers<[2], [2], [1], [1], [0, 0, 0, 1, 1, 1], [0], [0]>} : vector<2x16x8xf32>, vector<2x16x8xf32>, vector<2x16x16xf32> -> vector<2x16x16xf32>
    "tpu.trace_stop"() : () -> ()
    %cst_199 = arith.constant 0.353553385 : f32
    %478 = vector.broadcast %cst_199 : f32 to vector<2x16x16xf32>
    %479 = arith.mulf %477, %478 : vector<2x16x16xf32>
    %cst_200 = arith.constant dense<0xFF800000> : vector<2x16xf32>
    %480 = vector.multi_reduction <maximumf>, %479, %cst_200 [2] : vector<2x16x16xf32> to vector<2x16xf32>
    %481 = vector.shape_cast %480 : vector<2x16xf32> to vector<2x16x1xf32>
    %482 = vector.broadcast %481 : vector<2x16x1xf32> to vector<2x16x16xf32>
    %483 = arith.subf %479, %482 : vector<2x16x16xf32>
    %484 = math.exp %483 : vector<2x16x16xf32>
    %cst_201 = arith.constant dense<0.000000e+00> : vector<2x16xf32>
    %485 = vector.multi_reduction <add>, %484, %cst_201 [2] : vector<2x16x16xf32> to vector<2x16xf32>
    %486 = vector.shape_cast %485 : vector<2x16xf32> to vector<2x16x1xf32>
    %487 = vector.broadcast %486 : vector<2x16x1xf32> to vector<2x16x16xf32>
    %488 = arith.divf %484, %487 : vector<2x16x16xf32>
    "tpu.trace_start"() <{level = 10 : i32, message = "bqk,bkd->bqd"}> : () -> ()
    %cst_202 = arith.constant dense<0.000000e+00> : vector<2x16x8xf32>
    %489 = tpu.matmul %488, %476, %cst_202 {dimension_numbers = #tpu.dot_dimension_numbers<[2], [1], [1], [2], [0, 0, 0, 1, 1, 2], [0], [0]>} : vector<2x16x16xf32>, vector<2x16x8xf32>, vector<2x16x8xf32> -> vector<2x16x8xf32>
    "tpu.trace_stop"() : () -> ()
    %490 = vector.shape_cast %489 : vector<2x16x8xf32> to vector<32x8xf32>
    %491 = vector.extract_strided_slice %448 {offsets = [8, 0], sizes = [8, 32], strides = [1, 1]} : vector<32x32xf32> to vector<8x32xf32>
    %cst_203 = arith.constant dense<0.000000e+00> : vector<32x32xf32>
    %492 = tpu.matmul %490, %491, %cst_203 {dimension_numbers = #tpu.dot_dimension_numbers<[1], [0], [0], [1], [0, 0, 1, 1], [], []>} : vector<32x8xf32>, vector<8x32xf32>, vector<32x32xf32> -> vector<32x32xf32>
    %493 = arith.addf %470, %492 : vector<32x32xf32>
    %494 = vector.extract_strided_slice %446 {offsets = [0, 16], sizes = [32, 8], strides = [1, 1]} : vector<32x96xf32> to vector<32x8xf32>
    %495 = vector.shape_cast %494 : vector<32x8xf32> to vector<2x16x8xf32>
    %496 = vector.extract_strided_slice %446 {offsets = [0, 48], sizes = [32, 8], strides = [1, 1]} : vector<32x96xf32> to vector<32x8xf32>
    %497 = vector.shape_cast %496 : vector<32x8xf32> to vector<2x16x8xf32>
    %498 = vector.extract_strided_slice %446 {offsets = [0, 80], sizes = [32, 8], strides = [1, 1]} : vector<32x96xf32> to vector<32x8xf32>
    %499 = vector.shape_cast %498 : vector<32x8xf32> to vector<2x16x8xf32>
    "tpu.trace_start"() <{level = 10 : i32, message = "bqd,bkd->bqk"}> : () -> ()
    %cst_204 = arith.constant dense<0.000000e+00> : vector<2x16x16xf32>
    %500 = tpu.matmul %495, %497, %cst_204 {dimension_numbers = #tpu.dot_dimension_numbers<[2], [2], [1], [1], [0, 0, 0, 1, 1, 1], [0], [0]>} : vector<2x16x8xf32>, vector<2x16x8xf32>, vector<2x16x16xf32> -> vector<2x16x16xf32>
    "tpu.trace_stop"() : () -> ()
    %cst_205 = arith.constant 0.353553385 : f32
    %501 = vector.broadcast %cst_205 : f32 to vector<2x16x16xf32>
    %502 = arith.mulf %500, %501 : vector<2x16x16xf32>
    %cst_206 = arith.constant dense<0xFF800000> : vector<2x16xf32>
    %503 = vector.multi_reduction <maximumf>, %502, %cst_206 [2] : vector<2x16x16xf32> to vector<2x16xf32>
    %504 = vector.shape_cast %503 : vector<2x16xf32> to vector<2x16x1xf32>
    %505 = vector.broadcast %504 : vector<2x16x1xf32> to vector<2x16x16xf32>
    %506 = arith.subf %502, %505 : vector<2x16x16xf32>
    %507 = math.exp %506 : vector<2x16x16xf32>
    %cst_207 = arith.constant dense<0.000000e+00> : vector<2x16xf32>
    %508 = vector.multi_reduction <add>, %507, %cst_207 [2] : vector<2x16x16xf32> to vector<2x16xf32>
    %509 = vector.shape_cast %508 : vector<2x16xf32> to vector<2x16x1xf32>
    %510 = vector.broadcast %509 : vector<2x16x1xf32> to vector<2x16x16xf32>
    %511 = arith.divf %507, %510 : vector<2x16x16xf32>
    "tpu.trace_start"() <{level = 10 : i32, message = "bqk,bkd->bqd"}> : () -> ()
    %cst_208 = arith.constant dense<0.000000e+00> : vector<2x16x8xf32>
    %512 = tpu.matmul %511, %499, %cst_208 {dimension_numbers = #tpu.dot_dimension_numbers<[2], [1], [1], [2], [0, 0, 0, 1, 1, 2], [0], [0]>} : vector<2x16x16xf32>, vector<2x16x8xf32>, vector<2x16x8xf32> -> vector<2x16x8xf32>
    "tpu.trace_stop"() : () -> ()
    %513 = vector.shape_cast %512 : vector<2x16x8xf32> to vector<32x8xf32>
    %514 = vector.extract_strided_slice %448 {offsets = [16, 0], sizes = [8, 32], strides = [1, 1]} : vector<32x32xf32> to vector<8x32xf32>
    %cst_209 = arith.constant dense<0.000000e+00> : vector<32x32xf32>
    %515 = tpu.matmul %513, %514, %cst_209 {dimension_numbers = #tpu.dot_dimension_numbers<[1], [0], [0], [1], [0, 0, 1, 1], [], []>} : vector<32x8xf32>, vector<8x32xf32>, vector<32x32xf32> -> vector<32x32xf32>
    %516 = arith.addf %493, %515 : vector<32x32xf32>
    %517 = vector.extract_strided_slice %446 {offsets = [0, 24], sizes = [32, 8], strides = [1, 1]} : vector<32x96xf32> to vector<32x8xf32>
    %518 = vector.shape_cast %517 : vector<32x8xf32> to vector<2x16x8xf32>
    %519 = vector.extract_strided_slice %446 {offsets = [0, 56], sizes = [32, 8], strides = [1, 1]} : vector<32x96xf32> to vector<32x8xf32>
    %520 = vector.shape_cast %519 : vector<32x8xf32> to vector<2x16x8xf32>
    %521 = vector.extract_strided_slice %446 {offsets = [0, 88], sizes = [32, 8], strides = [1, 1]} : vector<32x96xf32> to vector<32x8xf32>
    %522 = vector.shape_cast %521 : vector<32x8xf32> to vector<2x16x8xf32>
    "tpu.trace_start"() <{level = 10 : i32, message = "bqd,bkd->bqk"}> : () -> ()
    %cst_210 = arith.constant dense<0.000000e+00> : vector<2x16x16xf32>
    %523 = tpu.matmul %518, %520, %cst_210 {dimension_numbers = #tpu.dot_dimension_numbers<[2], [2], [1], [1], [0, 0, 0, 1, 1, 1], [0], [0]>} : vector<2x16x8xf32>, vector<2x16x8xf32>, vector<2x16x16xf32> -> vector<2x16x16xf32>
    "tpu.trace_stop"() : () -> ()
    %cst_211 = arith.constant 0.353553385 : f32
    %524 = vector.broadcast %cst_211 : f32 to vector<2x16x16xf32>
    %525 = arith.mulf %523, %524 : vector<2x16x16xf32>
    %cst_212 = arith.constant dense<0xFF800000> : vector<2x16xf32>
    %526 = vector.multi_reduction <maximumf>, %525, %cst_212 [2] : vector<2x16x16xf32> to vector<2x16xf32>
    %527 = vector.shape_cast %526 : vector<2x16xf32> to vector<2x16x1xf32>
    %528 = vector.broadcast %527 : vector<2x16x1xf32> to vector<2x16x16xf32>
    %529 = arith.subf %525, %528 : vector<2x16x16xf32>
    %530 = math.exp %529 : vector<2x16x16xf32>
    %cst_213 = arith.constant dense<0.000000e+00> : vector<2x16xf32>
    %531 = vector.multi_reduction <add>, %530, %cst_213 [2] : vector<2x16x16xf32> to vector<2x16xf32>
    %532 = vector.shape_cast %531 : vector<2x16xf32> to vector<2x16x1xf32>
    %533 = vector.broadcast %532 : vector<2x16x1xf32> to vector<2x16x16xf32>
    %534 = arith.divf %530, %533 : vector<2x16x16xf32>
    "tpu.trace_start"() <{level = 10 : i32, message = "bqk,bkd->bqd"}> : () -> ()
    %cst_214 = arith.constant dense<0.000000e+00> : vector<2x16x8xf32>
    %535 = tpu.matmul %534, %522, %cst_214 {dimension_numbers = #tpu.dot_dimension_numbers<[2], [1], [1], [2], [0, 0, 0, 1, 1, 2], [0], [0]>} : vector<2x16x16xf32>, vector<2x16x8xf32>, vector<2x16x8xf32> -> vector<2x16x8xf32>
    "tpu.trace_stop"() : () -> ()
    %536 = vector.shape_cast %535 : vector<2x16x8xf32> to vector<32x8xf32>
    %537 = vector.extract_strided_slice %448 {offsets = [24, 0], sizes = [8, 32], strides = [1, 1]} : vector<32x32xf32> to vector<8x32xf32>
    %cst_215 = arith.constant dense<0.000000e+00> : vector<32x32xf32>
    %538 = tpu.matmul %536, %537, %cst_215 {dimension_numbers = #tpu.dot_dimension_numbers<[1], [0], [0], [1], [0, 0, 1, 1], [], []>} : vector<32x8xf32>, vector<8x32xf32>, vector<32x32xf32> -> vector<32x32xf32>
    %539 = arith.addf %516, %538 : vector<32x32xf32>
    %c2_216 = arith.constant 2 : index
    %c0_217 = arith.constant 0 : index
    %c0_218 = arith.constant 0 : index
    %540 = vector.load %arg7[%c2_216, %c0_217, %c0_218] : memref<3x1x32xf32, #tpu.memory_space<vmem>>, vector<1x1x32xf32>
    %541 = vector.shape_cast %540 : vector<1x1x32xf32> to vector<1x32xf32>
    %542 = vector.broadcast %541 : vector<1x32xf32> to vector<32x32xf32>
    %543 = arith.addf %539, %542 : vector<32x32xf32>
    %544 = arith.addf %439, %543 : vector<32x32xf32>
    %c2_219 = arith.constant 2 : index
    %c0_220 = arith.constant 0 : index
    %c0_221 = arith.constant 0 : index
    %545 = vector.load %arg8[%c2_219, %c0_220, %c0_221] : memref<3x1x32xf32, #tpu.memory_space<vmem>>, vector<1x1x32xf32>
    %546 = vector.shape_cast %545 : vector<1x1x32xf32> to vector<1x32xf32>
    %c2_222 = arith.constant 2 : index
    %c0_223 = arith.constant 0 : index
    %c0_224 = arith.constant 0 : index
    %547 = vector.load %arg9[%c2_222, %c0_223, %c0_224] : memref<3x1x32xf32, #tpu.memory_space<vmem>>, vector<1x1x32xf32>
    %548 = vector.shape_cast %547 : vector<1x1x32xf32> to vector<1x32xf32>
    %cst_225 = arith.constant dense<0.000000e+00> : vector<32xf32>
    %549 = vector.multi_reduction <add>, %544, %cst_225 [1] : vector<32x32xf32> to vector<32xf32>
    %550 = vector.shape_cast %549 : vector<32xf32> to vector<32x1xf32>
    %cst_226 = arith.constant 3.200000e+01 : f32
    %551 = vector.broadcast %cst_226 : f32 to vector<32x1xf32>
    %552 = arith.divf %550, %551 : vector<32x1xf32>
    %553 = vector.broadcast %552 : vector<32x1xf32> to vector<32x32xf32>
    %554 = arith.subf %544, %553 : vector<32x32xf32>
    %555 = arith.mulf %554, %554 : vector<32x32xf32>
    %cst_227 = arith.constant dense<0.000000e+00> : vector<32xf32>
    %556 = vector.multi_reduction <add>, %555, %cst_227 [1] : vector<32x32xf32> to vector<32xf32>
    %557 = vector.shape_cast %556 : vector<32xf32> to vector<32x1xf32>
    %cst_228 = arith.constant 3.200000e+01 : f32
    %558 = vector.broadcast %cst_228 : f32 to vector<32x1xf32>
    %559 = arith.divf %557, %558 : vector<32x1xf32>
    %560 = vector.broadcast %552 : vector<32x1xf32> to vector<32x32xf32>
    %561 = arith.subf %544, %560 : vector<32x32xf32>
    %cst_229 = arith.constant 9.99999974E-6 : f32
    %562 = vector.broadcast %cst_229 : f32 to vector<32x1xf32>
    %563 = arith.addf %559, %562 : vector<32x1xf32>
    %564 = math.rsqrt %563 : vector<32x1xf32>
    %565 = vector.broadcast %564 : vector<32x1xf32> to vector<32x32xf32>
    %566 = arith.mulf %561, %565 : vector<32x32xf32>
    %567 = vector.broadcast %546 : vector<1x32xf32> to vector<32x32xf32>
    %568 = arith.mulf %566, %567 : vector<32x32xf32>
    %569 = vector.broadcast %548 : vector<1x32xf32> to vector<32x32xf32>
    %570 = arith.addf %568, %569 : vector<32x32xf32>
    %c2_230 = arith.constant 2 : index
    %c0_231 = arith.constant 0 : index
    %c0_232 = arith.constant 0 : index
    %571 = vector.load %arg10[%c2_230, %c0_231, %c0_232] : memref<3x32x256xf32, #tpu.memory_space<vmem>>, vector<1x32x256xf32>
    %572 = vector.shape_cast %571 : vector<1x32x256xf32> to vector<32x256xf32>
    %cst_233 = arith.constant dense<0.000000e+00> : vector<32x256xf32>
    %573 = tpu.matmul %570, %572, %cst_233 {dimension_numbers = #tpu.dot_dimension_numbers<[1], [0], [0], [1], [0, 0, 1, 1], [], []>} : vector<32x32xf32>, vector<32x256xf32>, vector<32x256xf32> -> vector<32x256xf32>
    %c2_234 = arith.constant 2 : index
    %c0_235 = arith.constant 0 : index
    %c0_236 = arith.constant 0 : index
    %574 = vector.load %arg11[%c2_234, %c0_235, %c0_236] : memref<3x1x256xf32, #tpu.memory_space<vmem>>, vector<1x1x256xf32>
    %575 = vector.shape_cast %574 : vector<1x1x256xf32> to vector<1x256xf32>
    %576 = vector.broadcast %575 : vector<1x256xf32> to vector<32x256xf32>
    %577 = arith.addf %573, %576 : vector<32x256xf32>
    %cst_237 = arith.constant 5.000000e-01 : f32
    %578 = vector.broadcast %cst_237 : f32 to vector<32x256xf32>
    %579 = arith.mulf %578, %577 : vector<32x256xf32>
    %cst_238 = arith.constant 0.707106769 : f32
    %580 = vector.broadcast %cst_238 : f32 to vector<32x256xf32>
    %581 = arith.mulf %577, %580 : vector<32x256xf32>
    %582 = math.absf %581 : vector<32x256xf32>
    %cst_239 = arith.constant 0.327591091 : f32
    %583 = vector.broadcast %cst_239 : f32 to vector<32x256xf32>
    %584 = arith.mulf %583, %582 : vector<32x256xf32>
    %cst_240 = arith.constant 1.000000e+00 : f32
    %585 = vector.broadcast %cst_240 : f32 to vector<32x256xf32>
    %586 = arith.addf %585, %584 : vector<32x256xf32>
    %cst_241 = arith.constant 1.000000e+00 : f32
    %587 = vector.broadcast %cst_241 : f32 to vector<32x256xf32>
    %588 = arith.divf %587, %586 : vector<32x256xf32>
    %cst_242 = arith.constant 1.06140542 : f32
    %589 = vector.broadcast %cst_242 : f32 to vector<32x256xf32>
    %590 = arith.mulf %589, %588 : vector<32x256xf32>
    %cst_243 = arith.constant 1.45315206 : f32
    %591 = vector.broadcast %cst_243 : f32 to vector<32x256xf32>
    %592 = arith.subf %590, %591 : vector<32x256xf32>
    %593 = arith.mulf %592, %588 : vector<32x256xf32>
    %cst_244 = arith.constant 1.42141378 : f32
    %594 = vector.broadcast %cst_244 : f32 to vector<32x256xf32>
    %595 = arith.addf %593, %594 : vector<32x256xf32>
    %596 = arith.mulf %595, %588 : vector<32x256xf32>
    %cst_245 = arith.constant 0.284496725 : f32
    %597 = vector.broadcast %cst_245 : f32 to vector<32x256xf32>
    %598 = arith.subf %596, %597 : vector<32x256xf32>
    %599 = arith.mulf %598, %588 : vector<32x256xf32>
    %cst_246 = arith.constant 0.254829586 : f32
    %600 = vector.broadcast %cst_246 : f32 to vector<32x256xf32>
    %601 = arith.addf %599, %600 : vector<32x256xf32>
    %602 = arith.mulf %601, %588 : vector<32x256xf32>
    %cst_247 = arith.constant 0.000000e+00 : f32
    %603 = vector.broadcast %cst_247 : f32 to vector<32x256xf32>
    %604 = arith.subf %603, %582 : vector<32x256xf32>
    %605 = arith.mulf %604, %582 : vector<32x256xf32>
    %606 = math.exp %605 : vector<32x256xf32>
    %607 = arith.mulf %602, %606 : vector<32x256xf32>
    %cst_248 = arith.constant 1.000000e+00 : f32
    %608 = vector.broadcast %cst_248 : f32 to vector<32x256xf32>
    %609 = arith.subf %608, %607 : vector<32x256xf32>
    %cst_249 = arith.constant 0.000000e+00 : f32
    %610 = vector.broadcast %cst_249 : f32 to vector<32x256xf32>
    %611 = arith.cmpf oge, %581, %610 : vector<32x256xf32>
    %cst_250 = arith.constant 0.000000e+00 : f32
    %612 = vector.broadcast %cst_250 : f32 to vector<32x256xf32>
    %613 = arith.subf %612, %609 : vector<32x256xf32>
    %614 = arith.select %611, %609, %613 : vector<32x256xi1>, vector<32x256xf32>
    %cst_251 = arith.constant 1.000000e+00 : f32
    %615 = vector.broadcast %cst_251 : f32 to vector<32x256xf32>
    %616 = arith.addf %615, %614 : vector<32x256xf32>
    %617 = arith.mulf %579, %616 : vector<32x256xf32>
    %c2_252 = arith.constant 2 : index
    %c0_253 = arith.constant 0 : index
    %c0_254 = arith.constant 0 : index
    %618 = vector.load %arg12[%c2_252, %c0_253, %c0_254] : memref<3x256x32xf32, #tpu.memory_space<vmem>>, vector<1x256x32xf32>
    %619 = vector.shape_cast %618 : vector<1x256x32xf32> to vector<256x32xf32>
    %cst_255 = arith.constant dense<0.000000e+00> : vector<32x32xf32>
    %620 = tpu.matmul %617, %619, %cst_255 {dimension_numbers = #tpu.dot_dimension_numbers<[1], [0], [0], [1], [0, 0, 1, 1], [], []>} : vector<32x256xf32>, vector<256x32xf32>, vector<32x32xf32> -> vector<32x32xf32>
    %c2_256 = arith.constant 2 : index
    %c0_257 = arith.constant 0 : index
    %c0_258 = arith.constant 0 : index
    %621 = vector.load %arg13[%c2_256, %c0_257, %c0_258] : memref<3x1x32xf32, #tpu.memory_space<vmem>>, vector<1x1x32xf32>
    %622 = vector.shape_cast %621 : vector<1x1x32xf32> to vector<1x32xf32>
    %623 = vector.broadcast %622 : vector<1x32xf32> to vector<32x32xf32>
    %624 = arith.addf %620, %623 : vector<32x32xf32>
    %625 = arith.addf %570, %624 : vector<32x32xf32>
    %c2_259 = arith.constant 2 : index
    %c0_260 = arith.constant 0 : index
    %c0_261 = arith.constant 0 : index
    %626 = vector.load %arg14[%c2_259, %c0_260, %c0_261] : memref<3x1x32xf32, #tpu.memory_space<vmem>>, vector<1x1x32xf32>
    %627 = vector.shape_cast %626 : vector<1x1x32xf32> to vector<1x32xf32>
    %c2_262 = arith.constant 2 : index
    %c0_263 = arith.constant 0 : index
    %c0_264 = arith.constant 0 : index
    %628 = vector.load %arg15[%c2_262, %c0_263, %c0_264] : memref<3x1x32xf32, #tpu.memory_space<vmem>>, vector<1x1x32xf32>
    %629 = vector.shape_cast %628 : vector<1x1x32xf32> to vector<1x32xf32>
    %cst_265 = arith.constant dense<0.000000e+00> : vector<32xf32>
    %630 = vector.multi_reduction <add>, %625, %cst_265 [1] : vector<32x32xf32> to vector<32xf32>
    %631 = vector.shape_cast %630 : vector<32xf32> to vector<32x1xf32>
    %cst_266 = arith.constant 3.200000e+01 : f32
    %632 = vector.broadcast %cst_266 : f32 to vector<32x1xf32>
    %633 = arith.divf %631, %632 : vector<32x1xf32>
    %634 = vector.broadcast %633 : vector<32x1xf32> to vector<32x32xf32>
    %635 = arith.subf %625, %634 : vector<32x32xf32>
    %636 = arith.mulf %635, %635 : vector<32x32xf32>
    %cst_267 = arith.constant dense<0.000000e+00> : vector<32xf32>
    %637 = vector.multi_reduction <add>, %636, %cst_267 [1] : vector<32x32xf32> to vector<32xf32>
    %638 = vector.shape_cast %637 : vector<32xf32> to vector<32x1xf32>
    %cst_268 = arith.constant 3.200000e+01 : f32
    %639 = vector.broadcast %cst_268 : f32 to vector<32x1xf32>
    %640 = arith.divf %638, %639 : vector<32x1xf32>
    %641 = vector.broadcast %633 : vector<32x1xf32> to vector<32x32xf32>
    %642 = arith.subf %625, %641 : vector<32x32xf32>
    %cst_269 = arith.constant 9.99999974E-6 : f32
    %643 = vector.broadcast %cst_269 : f32 to vector<32x1xf32>
    %644 = arith.addf %640, %643 : vector<32x1xf32>
    %645 = math.rsqrt %644 : vector<32x1xf32>
    %646 = vector.broadcast %645 : vector<32x1xf32> to vector<32x32xf32>
    %647 = arith.mulf %642, %646 : vector<32x32xf32>
    %648 = vector.broadcast %627 : vector<1x32xf32> to vector<32x32xf32>
    %649 = arith.mulf %647, %648 : vector<32x32xf32>
    %650 = vector.broadcast %629 : vector<1x32xf32> to vector<32x32xf32>
    %651 = arith.addf %649, %650 : vector<32x32xf32>
    %c0_270 = arith.constant 0 : index
    %c0_271 = arith.constant 0 : index
    %652 = vector.load %arg16[%c0_270, %c0_271] : memref<32x16xf32, #tpu.memory_space<vmem>>, vector<32x16xf32>
    %cst_272 = arith.constant dense<0.000000e+00> : vector<32x16xf32>
    %653 = tpu.matmul %651, %652, %cst_272 {dimension_numbers = #tpu.dot_dimension_numbers<[1], [0], [0], [1], [0, 0, 1, 1], [], []>} : vector<32x32xf32>, vector<32x16xf32>, vector<32x16xf32> -> vector<32x16xf32>
    %c0_273 = arith.constant 0 : index
    %c0_274 = arith.constant 0 : index
    %654 = vector.load %arg17[%c0_273, %c0_274] : memref<1x16xf32, #tpu.memory_space<vmem>>, vector<1x16xf32>
    %655 = vector.broadcast %654 : vector<1x16xf32> to vector<32x16xf32>
    %656 = arith.addf %653, %655 : vector<32x16xf32>
    %c0_275 = arith.constant 0 : index
    %c0_276 = arith.constant 0 : index
    %657 = vector.load %arg18[%c0_275, %c0_276] : memref<32x32xf32, #tpu.memory_space<vmem>>, vector<32x32xf32>
    %cst_277 = arith.constant dense<0.000000e+00> : vector<32x32xf32>
    %658 = tpu.matmul %651, %657, %cst_277 {dimension_numbers = #tpu.dot_dimension_numbers<[1], [0], [0], [1], [0, 0, 1, 1], [], []>} : vector<32x32xf32>, vector<32x32xf32>, vector<32x32xf32> -> vector<32x32xf32>
    %c0_278 = arith.constant 0 : index
    %c0_279 = arith.constant 0 : index
    %659 = vector.load %arg19[%c0_278, %c0_279] : memref<1x32xf32, #tpu.memory_space<vmem>>, vector<1x32xf32>
    %660 = vector.broadcast %659 : vector<1x32xf32> to vector<32x32xf32>
    %661 = arith.addf %658, %660 : vector<32x32xf32>
    %c0_280 = arith.constant 0 : index
    %c0_281 = arith.constant 0 : index
    %662 = vector.load %arg20[%c0_280, %c0_281] : memref<1x16xf32, #tpu.memory_space<vmem>>, vector<1x16xf32>
    %663 = vector.broadcast %662 : vector<1x16xf32> to vector<32x16xf32>
    %664 = arith.mulf %656, %663 : vector<32x16xf32>
    %cst_282 = arith.constant dense<0.000000e+00> : vector<32xf32>
    %665 = vector.multi_reduction <add>, %664, %cst_282 [1] : vector<32x16xf32> to vector<32xf32>
    %666 = vector.shape_cast %665 : vector<32xf32> to vector<32x1xf32>
    %c0_283 = arith.constant 0 : index
    %c0_284 = arith.constant 0 : index
    %667 = vector.load %arg21[%c0_283, %c0_284] : memref<1x1xf32, #tpu.memory_space<vmem>>, vector<1x1xf32>
    %668 = vector.broadcast %667 : vector<1x1xf32> to vector<32x1xf32>
    %669 = arith.addf %666, %668 : vector<32x1xf32>
    %670 = tpu.iota {dimensions = array<i32: 0>} : vector<32x1xi32>
    %c0_i32 = arith.constant 0 : i32
    %671 = vector.broadcast %c0_i32 : i32 to vector<32x1xi32>
    %672 = arith.cmpi eq, %1, %671 : vector<32x1xi32>
    %c16_i32 = arith.constant 16 : i32
    %c0_i32_285 = arith.constant 0 : i32
    %673 = arith.cmpi eq, %c16_i32, %c0_i32_285 : i32
    %c1_i32 = arith.constant 1 : i32
    %674 = arith.select %673, %c1_i32, %c16_i32 : i32
    %675 = vector.broadcast %674 : i32 to vector<32x1xi32>
    %676 = arith.remsi %670, %675 : vector<32x1xi32>
    %c0_i32_286 = arith.constant 0 : i32
    %677 = vector.broadcast %c0_i32_286 : i32 to vector<32x1xi32>
    %678 = arith.cmpi ne, %676, %677 : vector<32x1xi32>
    %c0_i32_287 = arith.constant 0 : i32
    %679 = vector.broadcast %c0_i32_287 : i32 to vector<32x1xi32>
    %680 = arith.cmpi slt, %676, %679 : vector<32x1xi32>
    %c0_i32_288 = arith.constant 0 : i32
    %681 = arith.cmpi slt, %674, %c0_i32_288 : i32
    %682 = vector.broadcast %681 : i1 to vector<32x1xi1>
    %683 = vector.broadcast %682 : vector<32x1xi1> to vector<32x1xi1>
    %684 = arith.xori %680, %683 : vector<32x1xi1>
    %685 = arith.andi %684, %678 : vector<32x1xi1>
    %686 = vector.broadcast %674 : i32 to vector<32x1xi32>
    %687 = arith.addi %676, %686 : vector<32x1xi32>
    %688 = arith.select %685, %687, %676 : vector<32x1xi1>, vector<32x1xi32>
    %c8_i32 = arith.constant 8 : i32
    %689 = vector.broadcast %c8_i32 : i32 to vector<32x1xi32>
    %690 = arith.cmpi eq, %688, %689 : vector<32x1xi32>
    %cst_289 = arith.constant dense<true> : vector<32x1xi1>
    %691 = arith.xori %690, %cst_289 : vector<32x1xi1>
    %692 = arith.andi %672, %691 : vector<32x1xi1>
    %cst_290 = arith.constant 0xFF800000 : f32
    %693 = vector.broadcast %cst_290 : f32 to vector<32x1xf32>
    %694 = arith.select %692, %693, %669 : vector<32x1xi1>, vector<32x1xf32>
    %695 = vector.shape_cast %694 : vector<32x1xf32> to vector<2x2x8x1xf32>
    %696 = vector.shape_cast %661 : vector<32x32xf32> to vector<2x2x8x32xf32>
    %697 = vector.extract_strided_slice %695 {offsets = [0, 0, 0, 0], sizes = [2, 1, 8, 1], strides = [1, 1, 1, 1]} : vector<2x2x8x1xf32> to vector<2x1x8x1xf32>
    %698 = vector.shape_cast %697 : vector<2x1x8x1xf32> to vector<2x8x1xf32>
    %cst_291 = arith.constant dense<0xFF800000> : vector<2x1xf32>
    %699 = vector.multi_reduction <maximumf>, %698, %cst_291 [1] : vector<2x8x1xf32> to vector<2x1xf32>
    %700 = vector.shape_cast %699 : vector<2x1xf32> to vector<2x1x1xf32>
    %701 = vector.broadcast %700 : vector<2x1x1xf32> to vector<2x8x1xf32>
    %702 = arith.subf %698, %701 : vector<2x8x1xf32>
    %703 = math.exp %702 : vector<2x8x1xf32>
    %cst_292 = arith.constant dense<0.000000e+00> : vector<2x1xf32>
    %704 = vector.multi_reduction <add>, %703, %cst_292 [1] : vector<2x8x1xf32> to vector<2x1xf32>
    %705 = vector.shape_cast %704 : vector<2x1xf32> to vector<2x1x1xf32>
    %706 = vector.broadcast %705 : vector<2x1x1xf32> to vector<2x8x1xf32>
    %707 = arith.divf %703, %706 : vector<2x8x1xf32>
    %708 = vector.extract_strided_slice %696 {offsets = [0, 0, 0, 0], sizes = [2, 1, 8, 32], strides = [1, 1, 1, 1]} : vector<2x2x8x32xf32> to vector<2x1x8x32xf32>
    %709 = vector.shape_cast %708 : vector<2x1x8x32xf32> to vector<2x8x32xf32>
    %710 = vector.broadcast %707 : vector<2x8x1xf32> to vector<2x8x32xf32>
    %711 = arith.mulf %709, %710 : vector<2x8x32xf32>
    %cst_293 = arith.constant dense<0.000000e+00> : vector<2x32xf32>
    %712 = vector.multi_reduction <add>, %711, %cst_293 [1] : vector<2x8x32xf32> to vector<2x32xf32>
    %c0_294 = arith.constant 0 : index
    %c0_295 = arith.constant 0 : index
    %713 = vector.load %arg22[%c0_294, %c0_295] : memref<1x32xf32, #tpu.memory_space<vmem>>, vector<1x32xf32>
    %c0_296 = arith.constant 0 : index
    %c0_297 = arith.constant 0 : index
    %714 = vector.load %arg23[%c0_296, %c0_297] : memref<1x32xf32, #tpu.memory_space<vmem>>, vector<1x32xf32>
    %cst_298 = arith.constant dense<0.000000e+00> : vector<2xf32>
    %715 = vector.multi_reduction <add>, %712, %cst_298 [1] : vector<2x32xf32> to vector<2xf32>
    %716 = vector.shape_cast %715 : vector<2xf32> to vector<2x1xf32>
    %cst_299 = arith.constant 3.200000e+01 : f32
    %717 = vector.broadcast %cst_299 : f32 to vector<2x1xf32>
    %718 = arith.divf %716, %717 : vector<2x1xf32>
    %719 = vector.broadcast %718 : vector<2x1xf32> to vector<2x32xf32>
    %720 = arith.subf %712, %719 : vector<2x32xf32>
    %721 = arith.mulf %720, %720 : vector<2x32xf32>
    %cst_300 = arith.constant dense<0.000000e+00> : vector<2xf32>
    %722 = vector.multi_reduction <add>, %721, %cst_300 [1] : vector<2x32xf32> to vector<2xf32>
    %723 = vector.shape_cast %722 : vector<2xf32> to vector<2x1xf32>
    %cst_301 = arith.constant 3.200000e+01 : f32
    %724 = vector.broadcast %cst_301 : f32 to vector<2x1xf32>
    %725 = arith.divf %723, %724 : vector<2x1xf32>
    %726 = vector.broadcast %718 : vector<2x1xf32> to vector<2x32xf32>
    %727 = arith.subf %712, %726 : vector<2x32xf32>
    %cst_302 = arith.constant 9.99999974E-6 : f32
    %728 = vector.broadcast %cst_302 : f32 to vector<2x1xf32>
    %729 = arith.addf %725, %728 : vector<2x1xf32>
    %730 = math.rsqrt %729 : vector<2x1xf32>
    %731 = vector.broadcast %730 : vector<2x1xf32> to vector<2x32xf32>
    %732 = arith.mulf %727, %731 : vector<2x32xf32>
    %733 = vector.broadcast %713 : vector<1x32xf32> to vector<2x32xf32>
    %734 = arith.mulf %732, %733 : vector<2x32xf32>
    %735 = vector.broadcast %714 : vector<1x32xf32> to vector<2x32xf32>
    %736 = arith.addf %734, %735 : vector<2x32xf32>
    %737 = vector.extract_strided_slice %695 {offsets = [0, 1, 0, 0], sizes = [2, 1, 8, 1], strides = [1, 1, 1, 1]} : vector<2x2x8x1xf32> to vector<2x1x8x1xf32>
    %738 = vector.shape_cast %737 : vector<2x1x8x1xf32> to vector<2x8x1xf32>
    %cst_303 = arith.constant dense<0xFF800000> : vector<2x1xf32>
    %739 = vector.multi_reduction <maximumf>, %738, %cst_303 [1] : vector<2x8x1xf32> to vector<2x1xf32>
    %740 = vector.shape_cast %739 : vector<2x1xf32> to vector<2x1x1xf32>
    %741 = vector.broadcast %740 : vector<2x1x1xf32> to vector<2x8x1xf32>
    %742 = arith.subf %738, %741 : vector<2x8x1xf32>
    %743 = math.exp %742 : vector<2x8x1xf32>
    %cst_304 = arith.constant dense<0.000000e+00> : vector<2x1xf32>
    %744 = vector.multi_reduction <add>, %743, %cst_304 [1] : vector<2x8x1xf32> to vector<2x1xf32>
    %745 = vector.shape_cast %744 : vector<2x1xf32> to vector<2x1x1xf32>
    %746 = vector.broadcast %745 : vector<2x1x1xf32> to vector<2x8x1xf32>
    %747 = arith.divf %743, %746 : vector<2x8x1xf32>
    %748 = vector.extract_strided_slice %696 {offsets = [0, 1, 0, 0], sizes = [2, 1, 8, 32], strides = [1, 1, 1, 1]} : vector<2x2x8x32xf32> to vector<2x1x8x32xf32>
    %749 = vector.shape_cast %748 : vector<2x1x8x32xf32> to vector<2x8x32xf32>
    %750 = vector.broadcast %747 : vector<2x8x1xf32> to vector<2x8x32xf32>
    %751 = arith.mulf %749, %750 : vector<2x8x32xf32>
    %cst_305 = arith.constant dense<0.000000e+00> : vector<2x32xf32>
    %752 = vector.multi_reduction <add>, %751, %cst_305 [1] : vector<2x8x32xf32> to vector<2x32xf32>
    %c0_306 = arith.constant 0 : index
    %c0_307 = arith.constant 0 : index
    %753 = vector.load %arg22[%c0_306, %c0_307] : memref<1x32xf32, #tpu.memory_space<vmem>>, vector<1x32xf32>
    %c0_308 = arith.constant 0 : index
    %c0_309 = arith.constant 0 : index
    %754 = vector.load %arg23[%c0_308, %c0_309] : memref<1x32xf32, #tpu.memory_space<vmem>>, vector<1x32xf32>
    %cst_310 = arith.constant dense<0.000000e+00> : vector<2xf32>
    %755 = vector.multi_reduction <add>, %752, %cst_310 [1] : vector<2x32xf32> to vector<2xf32>
    %756 = vector.shape_cast %755 : vector<2xf32> to vector<2x1xf32>
    %cst_311 = arith.constant 3.200000e+01 : f32
    %757 = vector.broadcast %cst_311 : f32 to vector<2x1xf32>
    %758 = arith.divf %756, %757 : vector<2x1xf32>
    %759 = vector.broadcast %758 : vector<2x1xf32> to vector<2x32xf32>
    %760 = arith.subf %752, %759 : vector<2x32xf32>
    %761 = arith.mulf %760, %760 : vector<2x32xf32>
    %cst_312 = arith.constant dense<0.000000e+00> : vector<2xf32>
    %762 = vector.multi_reduction <add>, %761, %cst_312 [1] : vector<2x32xf32> to vector<2xf32>
    %763 = vector.shape_cast %762 : vector<2xf32> to vector<2x1xf32>
    %cst_313 = arith.constant 3.200000e+01 : f32
    %764 = vector.broadcast %cst_313 : f32 to vector<2x1xf32>
    %765 = arith.divf %763, %764 : vector<2x1xf32>
    %766 = vector.broadcast %758 : vector<2x1xf32> to vector<2x32xf32>
    %767 = arith.subf %752, %766 : vector<2x32xf32>
    %cst_314 = arith.constant 9.99999974E-6 : f32
    %768 = vector.broadcast %cst_314 : f32 to vector<2x1xf32>
    %769 = arith.addf %765, %768 : vector<2x1xf32>
    %770 = math.rsqrt %769 : vector<2x1xf32>
    %771 = vector.broadcast %770 : vector<2x1xf32> to vector<2x32xf32>
    %772 = arith.mulf %767, %771 : vector<2x32xf32>
    %773 = vector.broadcast %753 : vector<1x32xf32> to vector<2x32xf32>
    %774 = arith.mulf %772, %773 : vector<2x32xf32>
    %775 = vector.broadcast %754 : vector<1x32xf32> to vector<2x32xf32>
    %776 = arith.addf %774, %775 : vector<2x32xf32>
    %777 = tpu.concatenate %736, %776 in 1 : vector<2x32xf32>, vector<2x32xf32> -> vector<2x64xf32>
    %c0_315 = arith.constant 0 : index
    %c0_316 = arith.constant 0 : index
    %778 = vector.load %arg24[%c0_315, %c0_316] : memref<64x256xf32, #tpu.memory_space<vmem>>, vector<64x256xf32>
    %cst_317 = arith.constant dense<0.000000e+00> : vector<2x256xf32>
    %779 = tpu.matmul %777, %778, %cst_317 {dimension_numbers = #tpu.dot_dimension_numbers<[1], [0], [0], [1], [0, 0, 1, 1], [], []>} : vector<2x64xf32>, vector<64x256xf32>, vector<2x256xf32> -> vector<2x256xf32>
    %c0_318 = arith.constant 0 : index
    %c0_319 = arith.constant 0 : index
    %780 = vector.load %arg25[%c0_318, %c0_319] : memref<1x256xf32, #tpu.memory_space<vmem>>, vector<1x256xf32>
    %781 = vector.broadcast %780 : vector<1x256xf32> to vector<2x256xf32>
    %782 = arith.addf %779, %781 : vector<2x256xf32>
    %cst_320 = arith.constant 0.000000e+00 : f32
    %783 = vector.broadcast %cst_320 : f32 to vector<2x256xf32>
    %784 = arith.maximumf %782, %783 : vector<2x256xf32>
    %c0_321 = arith.constant 0 : index
    %c0_322 = arith.constant 0 : index
    %785 = vector.load %arg26[%c0_321, %c0_322] : memref<1x256xf32, #tpu.memory_space<vmem>>, vector<1x256xf32>
    %c0_323 = arith.constant 0 : index
    %c0_324 = arith.constant 0 : index
    %786 = vector.load %arg27[%c0_323, %c0_324] : memref<1x256xf32, #tpu.memory_space<vmem>>, vector<1x256xf32>
    %cst_325 = arith.constant dense<0.000000e+00> : vector<2xf32>
    %787 = vector.multi_reduction <add>, %784, %cst_325 [1] : vector<2x256xf32> to vector<2xf32>
    %788 = vector.shape_cast %787 : vector<2xf32> to vector<2x1xf32>
    %cst_326 = arith.constant 2.560000e+02 : f32
    %789 = vector.broadcast %cst_326 : f32 to vector<2x1xf32>
    %790 = arith.divf %788, %789 : vector<2x1xf32>
    %791 = vector.broadcast %790 : vector<2x1xf32> to vector<2x256xf32>
    %792 = arith.subf %784, %791 : vector<2x256xf32>
    %793 = arith.mulf %792, %792 : vector<2x256xf32>
    %cst_327 = arith.constant dense<0.000000e+00> : vector<2xf32>
    %794 = vector.multi_reduction <add>, %793, %cst_327 [1] : vector<2x256xf32> to vector<2xf32>
    %795 = vector.shape_cast %794 : vector<2xf32> to vector<2x1xf32>
    %cst_328 = arith.constant 2.560000e+02 : f32
    %796 = vector.broadcast %cst_328 : f32 to vector<2x1xf32>
    %797 = arith.divf %795, %796 : vector<2x1xf32>
    %798 = vector.broadcast %790 : vector<2x1xf32> to vector<2x256xf32>
    %799 = arith.subf %784, %798 : vector<2x256xf32>
    %cst_329 = arith.constant 9.99999974E-6 : f32
    %800 = vector.broadcast %cst_329 : f32 to vector<2x1xf32>
    %801 = arith.addf %797, %800 : vector<2x1xf32>
    %802 = math.rsqrt %801 : vector<2x1xf32>
    %803 = vector.broadcast %802 : vector<2x1xf32> to vector<2x256xf32>
    %804 = arith.mulf %799, %803 : vector<2x256xf32>
    %805 = vector.broadcast %785 : vector<1x256xf32> to vector<2x256xf32>
    %806 = arith.mulf %804, %805 : vector<2x256xf32>
    %807 = vector.broadcast %786 : vector<1x256xf32> to vector<2x256xf32>
    %808 = arith.addf %806, %807 : vector<2x256xf32>
    %c0_330 = arith.constant 0 : index
    %c0_331 = arith.constant 0 : index
    %809 = vector.load %arg28[%c0_330, %c0_331] : memref<256x64xf32, #tpu.memory_space<vmem>>, vector<256x64xf32>
    %cst_332 = arith.constant dense<0.000000e+00> : vector<2x64xf32>
    %810 = tpu.matmul %808, %809, %cst_332 {dimension_numbers = #tpu.dot_dimension_numbers<[1], [0], [0], [1], [0, 0, 1, 1], [], []>} : vector<2x256xf32>, vector<256x64xf32>, vector<2x64xf32> -> vector<2x64xf32>
    %c0_333 = arith.constant 0 : index
    %c0_334 = arith.constant 0 : index
    %811 = vector.load %arg29[%c0_333, %c0_334] : memref<1x64xf32, #tpu.memory_space<vmem>>, vector<1x64xf32>
    %812 = vector.broadcast %811 : vector<1x64xf32> to vector<2x64xf32>
    %813 = arith.addf %810, %812 : vector<2x64xf32>
    %814 = arith.addf %777, %813 : vector<2x64xf32>
    %c0_335 = arith.constant 0 : index
    %c0_336 = arith.constant 0 : index
    %815 = vector.load %arg30[%c0_335, %c0_336] : memref<1x64xf32, #tpu.memory_space<vmem>>, vector<1x64xf32>
    %c0_337 = arith.constant 0 : index
    %c0_338 = arith.constant 0 : index
    %816 = vector.load %arg31[%c0_337, %c0_338] : memref<1x64xf32, #tpu.memory_space<vmem>>, vector<1x64xf32>
    %cst_339 = arith.constant dense<0.000000e+00> : vector<2xf32>
    %817 = vector.multi_reduction <add>, %814, %cst_339 [1] : vector<2x64xf32> to vector<2xf32>
    %818 = vector.shape_cast %817 : vector<2xf32> to vector<2x1xf32>
    %cst_340 = arith.constant 6.400000e+01 : f32
    %819 = vector.broadcast %cst_340 : f32 to vector<2x1xf32>
    %820 = arith.divf %818, %819 : vector<2x1xf32>
    %821 = vector.broadcast %820 : vector<2x1xf32> to vector<2x64xf32>
    %822 = arith.subf %814, %821 : vector<2x64xf32>
    %823 = arith.mulf %822, %822 : vector<2x64xf32>
    %cst_341 = arith.constant dense<0.000000e+00> : vector<2xf32>
    %824 = vector.multi_reduction <add>, %823, %cst_341 [1] : vector<2x64xf32> to vector<2xf32>
    %825 = vector.shape_cast %824 : vector<2xf32> to vector<2x1xf32>
    %cst_342 = arith.constant 6.400000e+01 : f32
    %826 = vector.broadcast %cst_342 : f32 to vector<2x1xf32>
    %827 = arith.divf %825, %826 : vector<2x1xf32>
    %828 = vector.broadcast %820 : vector<2x1xf32> to vector<2x64xf32>
    %829 = arith.subf %814, %828 : vector<2x64xf32>
    %cst_343 = arith.constant 9.99999974E-6 : f32
    %830 = vector.broadcast %cst_343 : f32 to vector<2x1xf32>
    %831 = arith.addf %827, %830 : vector<2x1xf32>
    %832 = math.rsqrt %831 : vector<2x1xf32>
    %833 = vector.broadcast %832 : vector<2x1xf32> to vector<2x64xf32>
    %834 = arith.mulf %829, %833 : vector<2x64xf32>
    %835 = vector.broadcast %815 : vector<1x64xf32> to vector<2x64xf32>
    %836 = arith.mulf %834, %835 : vector<2x64xf32>
    %837 = vector.broadcast %816 : vector<1x64xf32> to vector<2x64xf32>
    %838 = arith.addf %836, %837 : vector<2x64xf32>
    %c0_344 = arith.constant 0 : index
    %c0_345 = arith.constant 0 : index
    %c0_346 = arith.constant 0 : index
    %839 = vector.load %arg32[%c0_344, %c0_345, %c0_346] : memref<1x2x64xf32, #tpu.memory_space<vmem>>, vector<1x2x64xf32>
    %840 = vector.shape_cast %839 : vector<1x2x64xf32> to vector<2x64xf32>
    %841 = vector.shape_cast %838 : vector<2x64xf32> to vector<1x2x64xf32>
    tpu.vector_store %arg32[%c0_344, %c0_345, %c0_346], %841 {strides = array<i32>} : memref<1x2x64xf32, #tpu.memory_space<vmem>>, vector<1x2x64xf32>,
    return
  }
  func.func @transform_0(%arg0: i32) -> (i32, i32, i32) {
    %c0_i32 = arith.constant 0 : i32
    %c0_i32_0 = arith.constant 0 : i32
    %c0_i32_1 = arith.constant 0 : i32
    return %arg0, %c0_i32, %c0_i32_0 : i32, i32, i32
  }
  func.func @transform_1(%arg0: i32) -> (i32, i32) {
    %c0_i32 = arith.constant 0 : i32
    %c0_i32_0 = arith.constant 0 : i32
    %c0_i32_1 = arith.constant 0 : i32
    return %c0_i32, %c0_i32_0 : i32, i32
  }
  func.func @transform_2(%arg0: i32) -> (i32, i32) {
    %c0_i32 = arith.constant 0 : i32
    %c0_i32_0 = arith.constant 0 : i32
    %c0_i32_1 = arith.constant 0 : i32
    return %c0_i32, %c0_i32_0 : i32, i32
  }
  func.func @transform_3(%arg0: i32) -> (i32, i32, i32) {
    %c0_i32 = arith.constant 0 : i32
    %c0_i32_0 = arith.constant 0 : i32
    %c0_i32_1 = arith.constant 0 : i32
    %c0_i32_2 = arith.constant 0 : i32
    return %c0_i32, %c0_i32_0, %c0_i32_1 : i32, i32, i32
  }
  func.func @transform_4(%arg0: i32) -> (i32, i32, i32) {
    %c0_i32 = arith.constant 0 : i32
    %c0_i32_0 = arith.constant 0 : i32
    %c0_i32_1 = arith.constant 0 : i32
    %c0_i32_2 = arith.constant 0 : i32
    return %c0_i32, %c0_i32_0, %c0_i32_1 : i32, i32, i32
  }
  func.func @transform_5(%arg0: i32) -> (i32, i32, i32) {
    %c0_i32 = arith.constant 0 : i32
    %c0_i32_0 = arith.constant 0 : i32
    %c0_i32_1 = arith.constant 0 : i32
    %c0_i32_2 = arith.constant 0 : i32
    return %c0_i32, %c0_i32_0, %c0_i32_1 : i32, i32, i32
  }
  func.func @transform_6(%arg0: i32) -> (i32, i32, i32) {
    %c0_i32 = arith.constant 0 : i32
    %c0_i32_0 = arith.constant 0 : i32
    %c0_i32_1 = arith.constant 0 : i32
    %c0_i32_2 = arith.constant 0 : i32
    return %c0_i32, %c0_i32_0, %c0_i32_1 : i32, i32, i32
  }
  func.func @transform_7(%arg0: i32) -> (i32, i32, i32) {
    %c0_i32 = arith.constant 0 : i32
    %c0_i32_0 = arith.constant 0 : i32
    %c0_i32_1 = arith.constant 0 : i32
    %c0_i32_2 = arith.constant 0 : i32
    return %c0_i32, %c0_i32_0, %c0_i32_1 : i32, i32, i32
  }
  func.func @transform_8(%arg0: i32) -> (i32, i32, i32) {
    %c0_i32 = arith.constant 0 : i32
    %c0_i32_0 = arith.constant 0 : i32
    %c0_i32_1 = arith.constant 0 : i32
    %c0_i32_2 = arith.constant 0 : i32
    return %c0_i32, %c0_i32_0, %c0_i32_1 : i32, i32, i32
  }
  func.func @transform_9(%arg0: i32) -> (i32, i32, i32) {
    %c0_i32 = arith.constant 0 : i32
    %c0_i32_0 = arith.constant 0 : i32
    %c0_i32_1 = arith.constant 0 : i32
    %c0_i32_2 = arith.constant 0 : i32
    return %c0_i32, %c0_i32_0, %c0_i32_1 : i32, i32, i32
  }
  func.func @transform_10(%arg0: i32) -> (i32, i32, i32) {
    %c0_i32 = arith.constant 0 : i32
    %c0_i32_0 = arith.constant 0 : i32
    %c0_i32_1 = arith.constant 0 : i32
    %c0_i32_2 = arith.constant 0 : i32
    return %c0_i32, %c0_i32_0, %c0_i32_1 : i32, i32, i32
  }
  func.func @transform_11(%arg0: i32) -> (i32, i32, i32) {
    %c0_i32 = arith.constant 0 : i32
    %c0_i32_0 = arith.constant 0 : i32
    %c0_i32_1 = arith.constant 0 : i32
    %c0_i32_2 = arith.constant 0 : i32
    return %c0_i32, %c0_i32_0, %c0_i32_1 : i32, i32, i32
  }
  func.func @transform_12(%arg0: i32) -> (i32, i32, i32) {
    %c0_i32 = arith.constant 0 : i32
    %c0_i32_0 = arith.constant 0 : i32
    %c0_i32_1 = arith.constant 0 : i32
    %c0_i32_2 = arith.constant 0 : i32
    return %c0_i32, %c0_i32_0, %c0_i32_1 : i32, i32, i32
  }
  func.func @transform_13(%arg0: i32) -> (i32, i32, i32) {
    %c0_i32 = arith.constant 0 : i32
    %c0_i32_0 = arith.constant 0 : i32
    %c0_i32_1 = arith.constant 0 : i32
    %c0_i32_2 = arith.constant 0 : i32
    return %c0_i32, %c0_i32_0, %c0_i32_1 : i32, i32, i32
  }
  func.func @transform_14(%arg0: i32) -> (i32, i32, i32) {
    %c0_i32 = arith.constant 0 : i32
    %c0_i32_0 = arith.constant 0 : i32
    %c0_i32_1 = arith.constant 0 : i32
    %c0_i32_2 = arith.constant 0 : i32
    return %c0_i32, %c0_i32_0, %c0_i32_1 : i32, i32, i32
  }
  func.func @transform_15(%arg0: i32) -> (i32, i32) {
    %c0_i32 = arith.constant 0 : i32
    %c0_i32_0 = arith.constant 0 : i32
    %c0_i32_1 = arith.constant 0 : i32
    return %c0_i32, %c0_i32_0 : i32, i32
  }
  func.func @transform_16(%arg0: i32) -> (i32, i32) {
    %c0_i32 = arith.constant 0 : i32
    %c0_i32_0 = arith.constant 0 : i32
    %c0_i32_1 = arith.constant 0 : i32
    return %c0_i32, %c0_i32_0 : i32, i32
  }
  func.func @transform_17(%arg0: i32) -> (i32, i32) {
    %c0_i32 = arith.constant 0 : i32
    %c0_i32_0 = arith.constant 0 : i32
    %c0_i32_1 = arith.constant 0 : i32
    return %c0_i32, %c0_i32_0 : i32, i32
  }
  func.func @transform_18(%arg0: i32) -> (i32, i32) {
    %c0_i32 = arith.constant 0 : i32
    %c0_i32_0 = arith.constant 0 : i32
    %c0_i32_1 = arith.constant 0 : i32
    return %c0_i32, %c0_i32_0 : i32, i32
  }
  func.func @transform_19(%arg0: i32) -> (i32, i32) {
    %c0_i32 = arith.constant 0 : i32
    %c0_i32_0 = arith.constant 0 : i32
    %c0_i32_1 = arith.constant 0 : i32
    return %c0_i32, %c0_i32_0 : i32, i32
  }
  func.func @transform_20(%arg0: i32) -> (i32, i32) {
    %c0_i32 = arith.constant 0 : i32
    %c0_i32_0 = arith.constant 0 : i32
    %c0_i32_1 = arith.constant 0 : i32
    return %c0_i32, %c0_i32_0 : i32, i32
  }
  func.func @transform_21(%arg0: i32) -> (i32, i32) {
    %c0_i32 = arith.constant 0 : i32
    %c0_i32_0 = arith.constant 0 : i32
    %c0_i32_1 = arith.constant 0 : i32
    return %c0_i32, %c0_i32_0 : i32, i32
  }
  func.func @transform_22(%arg0: i32) -> (i32, i32) {
    %c0_i32 = arith.constant 0 : i32
    %c0_i32_0 = arith.constant 0 : i32
    %c0_i32_1 = arith.constant 0 : i32
    return %c0_i32, %c0_i32_0 : i32, i32
  }
  func.func @transform_23(%arg0: i32) -> (i32, i32) {
    %c0_i32 = arith.constant 0 : i32
    %c0_i32_0 = arith.constant 0 : i32
    %c0_i32_1 = arith.constant 0 : i32
    return %c0_i32, %c0_i32_0 : i32, i32
  }
  func.func @transform_24(%arg0: i32) -> (i32, i32) {
    %c0_i32 = arith.constant 0 : i32
    %c0_i32_0 = arith.constant 0 : i32
    %c0_i32_1 = arith.constant 0 : i32
    return %c0_i32, %c0_i32_0 : i32, i32
  }
  func.func @transform_25(%arg0: i32) -> (i32, i32) {
    %c0_i32 = arith.constant 0 : i32
    %c0_i32_0 = arith.constant 0 : i32
    %c0_i32_1 = arith.constant 0 : i32
    return %c0_i32, %c0_i32_0 : i32, i32
  }
  func.func @transform_26(%arg0: i32) -> (i32, i32) {
    %c0_i32 = arith.constant 0 : i32
    %c0_i32_0 = arith.constant 0 : i32
    %c0_i32_1 = arith.constant 0 : i32
    return %c0_i32, %c0_i32_0 : i32, i32
  }
  func.func @transform_27(%arg0: i32) -> (i32, i32) {
    %c0_i32 = arith.constant 0 : i32
    %c0_i32_0 = arith.constant 0 : i32
    %c0_i32_1 = arith.constant 0 : i32
    return %c0_i32, %c0_i32_0 : i32, i32
  }
  func.func @transform_28(%arg0: i32) -> (i32, i32) {
    %c0_i32 = arith.constant 0 : i32
    %c0_i32_0 = arith.constant 0 : i32
    %c0_i32_1 = arith.constant 0 : i32
    return %c0_i32, %c0_i32_0 : i32, i32
  }
  func.func @transform_29(%arg0: i32) -> (i32, i32) {
    %c0_i32 = arith.constant 0 : i32
    %c0_i32_0 = arith.constant 0 : i32
    %c0_i32_1 = arith.constant 0 : i32
    return %c0_i32, %c0_i32_0 : i32, i32
  }
  func.func @transform_30(%arg0: i32) -> (i32, i32) {
    %c0_i32 = arith.constant 0 : i32
    %c0_i32_0 = arith.constant 0 : i32
    %c0_i32_1 = arith.constant 0 : i32
    return %c0_i32, %c0_i32_0 : i32, i32
  }
  func.func @transform_31(%arg0: i32) -> (i32, i32, i32) {
    %c0_i32 = arith.constant 0 : i32
    %c0_i32_0 = arith.constant 0 : i32
    %c0_i32_1 = arith.constant 0 : i32
    return %arg0, %c0_i32, %c0_i32_0 : i32, i32, i32
  }
}

</mosaic_0001>

<bundles_post_ra>
// kernel: forward.1
= control target key start
LH: loop header
LB: loop body
LE: loop exit
PB: predicated region body
PF: predicated region fallthrough
CT: control target
= control target key end

     0   :  { %s12145_s6 = smov 1   ;;  %s12146_s10 = smov 2   ;;  %s14076_s0 = inlined_call_operand.smem [shape: u32[32], index: -1, kind: input, shape index: {}] }
   0x1   :  { %s12199_s5 = sld [smem:[%s14076_s0]]   ;;  %s12147_s14 = smov 3  }
   0x2   :  { %s12204_s9 = sld [smem:[%s14076_s0 + %s12145_s6]]   ;;  %s12148_s18 = smov 4  }
   0x3   :  { %s12209_s13 = sld [smem:[%s14076_s0 + %s12146_s10]]   ;;  %s12149_s22 = smov 5  }
   0x4   :  { %s12214_s17 = sld [smem:[%s14076_s0 + %s12147_s14]]   ;;  %s12150_s26 = smov 6  }
   0x5   :  { %s12219_s21 = sld [smem:[%s14076_s0 + %s12148_s18]]   ;;  %s12151_s30 = smov 7  }
   0x6   :  { %s12224_s25 = sld [smem:[%s14076_s0 + %s12149_s22]]   ;;  %s12152_s4 = smov 8  }
   0x7   :  { %s12229_s29 = sld [smem:[%s14076_s0 + %s12150_s26]]   ;;  %s12153_s10 = smov 9  }
   0x8   :  { %s12234_s3 = sld [smem:[%s14076_s0 + %s12151_s30]]   ;;  %s12154_s15 = smov 10  }
   0x9   :  { %s12239_s8 = sld [smem:[%s14076_s0 + %s12152_s4]]   ;;  %s12155_s20 = smov 11  }
   0xa   :  { %s12244_s14 = sld [smem:[%s14076_s0 + %s12153_s10]]   ;;  %s12156_s26 = smov 12  }
   0xb   :  { %s12249_s19 = sld [smem:[%s14076_s0 + %s12154_s15]]   ;;  %s12157_s1 = smov 13  }
   0xc   :  { %s12254_s24 = sld [smem:[%s14076_s0 + %s12155_s20]]   ;;  %s12158_s7 = smov 14  }
   0xd   :  { %s12259_s30 = sld [smem:[%s14076_s0 + %s12156_s26]]   ;;  %s12159_s15 = smov 15  }
   0xe   :  { %s12264_s6 = sld [smem:[%s14076_s0 + %s12157_s1]]   ;;  %s12160_s22 = smov 16  }
   0xf   :  { %s12269_s12 = sld [smem:[%s14076_s0 + %s12158_s7]]   ;;  %s12161_s28 = smov 17  }
  0x10   :  { %s12274_s20 = sld [smem:[%s14076_s0 + %s12159_s15]]   ;;  %s12162_s7 = smov 18  }
  0x11   :  { %s12279_s27 = sld [smem:[%s14076_s0 + %s12160_s22]]   ;;  %s12163_s15 = smov 19  }
  0x12   :  { %s12284_s4 = sld [smem:[%s14076_s0 + %s12161_s28]]   ;;  %s12164_s22 = smov 20  }
  0x13   :  { %s12165_s1 = smov 21   ;;  %s12166_s10 = smov 22  }
  0x14   :  { %14094 = sst [smem:[#allocation3_spill]] %s12264_s6  ;;  %s12167_s16 = smov 23  }
  0x15   :  { %14095 = sst [smem:[#allocation4_spill]] %s12269_s12  ;;  %s12168_s23 = smov 24  }
  0x16   :  { %14096 = sst [smem:[#allocation5_spill]] %s12274_s20  ;;  %s12173_s28 = smov 29  }
  0x17   :  { %14097 = sst [smem:[#allocation6_spill]] %s12279_s27 }
  0x18   :  { %14098 = sst [smem:[#allocation7_spill]] %s12284_s4 }
  0x19   :  { %s12289_s12 = sld [smem:[%s14076_s0 + %s12162_s7]]  }
  0x1a   :  { %s12294_s20 = sld [smem:[%s14076_s0 + %s12163_s15]]  }
  0x1b   :  { %s10282_s27 = sld [smem:[%s14076_s0 + %s12164_s22]]  }
  0x1c   :  { %s12302_s4 = sld [smem:[%s14076_s0 + %s12165_s1]]   ;;  %s12169_s1 = smov 25  }
  0x1d   :  { %s12317_s6 = sld [smem:[%s14076_s0 + %s12168_s23]]   ;;  %s12172_s23 = smov 28  }
  0x1f   :  { %14099 = sst [smem:[#allocation8_spill]] %s12289_s12 }
  0x20   :  { %14100 = sst [smem:[#allocation9_spill]] %s12294_s20 }
  0x21   :  { %s12307_s12 = sld [smem:[%s14076_s0 + %s12166_s10]]   ;;  %s12170_s10 = smov 26   ;;  %v68_v0 = vstv %s10282_s27 }
  0x22   :  { %14101 = sst [smem:[#allocation10_spill]] %s12302_s4  ;;  %69 = vst [vmem:[#allocation2] sm:$0x1] %v68_v0  ;;  %s12174_s27 = smov 30  }
  0x23   :  { %s12312_s20 = sld [smem:[%s14076_s0 + %s12167_s16]]   ;;  %s12171_s16 = smov 27  }
  0x24   :  { %14103 = sst [smem:[#allocation12_spill]] %s12317_s6  ;;  %s12354_s6 = smov 0  }
  0x25   :  { %s12322_s4 = sld [smem:[%s14076_s0 + %s12169_s1]]  }
  0x26   :  { %s12332_s22 = sld [smem:[%s14076_s0 + %s12171_s16]]   ;;  %s12175_s16 = smov 31  }
  0x27   :  { %14102 = sst [smem:[#allocation11_spill]] %s12307_s12 }
  0x28   :  { %s12327_s12 = sld [smem:[%s14076_s0 + %s12170_s10]]  }
  0x29   :  { %s12337_s1 = sld [smem:[%s14076_s0 + %s12172_s23]]  }
  0x2a   :  { %s12342_s10 = sld [smem:[%s14076_s0 + %s12173_s28]]  }
  0x2b   :  { %14104 = sst [smem:[#allocation13_spill]] %s12322_s4 }
  0x2c   :  { %14106 = sst [smem:[#allocation15_spill]] %s12332_s22 }
  0x2d   :  { %s12347_s15 = sld [smem:[%s14076_s0 + %s12174_s27]]  }
  0x2e   :  { %14105 = sst [smem:[#allocation14_spill]] %s12327_s12 }
  0x2f   :  { %s12352_s22 = sld [smem:[%s14076_s0 + %s12175_s16]]  }
  0x30 LB: > { %s10294_s4 = sadd.s32 4294967295, %s12143_s6   ;;  %p10298_p0 = scmp.ge.s32.totalorder %s12143_s6, 1  ;;  %s12143_s6 = sphi %s12354_s6, %s75_s6  }
  0x31   : > { %p871_p1 = scmp.lt.s32.totalorder %s12143_s6, 4 }
  0x33   : > { %p872_p2 = pnand %p10298_p0, %p871_p1 }
  0x34   : > { %p950_p3 = scmp.lt.s32.totalorder (!%p872_p2), %s10294_s4, 2  ;;  %s12178_s23 = smov (!%p872_p2), 96  }
  0x35   : > { %875 = sbr.rel (%p872_p2) target bundleno = 15520 (0x3ca0), region = 144  ;;  %s12179_s26 = smov (!%p872_p2), 64  }
  0x36   : > { %s12180_s28 = smov (!%p872_p2), 88   ;;  %s12181_s2 = smov (!%p872_p2), 120  }
  0x37   : > { %s12182_s27 = smov (!%p872_p2), 56   ;;  %s14090_s7 = smov (!%p872_p2), 80  }
  0x38   : > { %s14088_s11 = smov (!%p872_p2), 112   ;;  %s14092_s16 = smov (!%p872_p2), 48  }
  0x39   : > { %s14086_s18 = smov (!%p872_p2), 72  }
  0x3a   : > { %v991_v1 = vld [vmem:[%s12204_s9 + $0x30] sm:$0x3]  ;;  %vm1005_vm0 = vcmask 1041408   ;;  %v12176_v2 = vmov 0   ;;  %v990_v3 = vld [vmem:[%s12204_s9 + $0x28] sm:$0xff]  ;;  %s14127_s4 = smov (!%p950_p3, %s10294_s4), 2  ;;  %v963_v14 = vlaneseq }
  0x3b   : > { %11771 = vset.pattern.permute.xlu0 %v12176_v2  ;;  %11772 = vset.pattern.permute.xlu1 %v12176_v2  ;;  %v989_v4 = vld [vmem:[%s12204_s9 + $0x20] sm:$0xff]  ;;  %s10724_s0 = sshll.u32 %s14127_s4, 5  ;;  %v988_v7 = vld [vmem:[%s12204_s9 + $0x18] sm:$0xff]  ;;  %v987_v10 = vld [vmem:[%s12204_s9 + $0x10] sm:$0xff]  ;;  %vm992_vm1 = vcmask 408576   ;;  %v12177_v18 = vmov 0.0  }
  0x3c   : > { %11195 = vmatprep.subr.msk.mxu0 %vm1005_vm0, %v991_v1  ;;  %s12371_s12 = scalar_lea.vmem %s12199_s5, %s10724_s0  ;;  %v986_v11 = vld [vmem:[%s12204_s9 + $0x8] sm:$0xff]  ;;  %v985_v12 = vld [vmem:[%s12204_s9] sm:$0xff]  ;;  %v1102_v13 = vld [vmem:[%s12214_s17 + $0x18] sm:$0xff]  ;;  %v964_v15 = vand.u32 127, %v963_v14  ;;  %vm1110_vm6 = vcmask 261120   ;;  %vm1218_vm7 = vcmask 64512  }
  0x3d   : > { %11196 = vmatpush3.msk.msra.mxu0 %vm1005_vm0, %v991_v1  ;;  %v959_v5 = vld [vmem:[%s12371_s12] sm:$0xff]  ;;  %v961_v6 = vld [vmem:[%s12371_s12 + $0x10] sm:$0xff]  ;;  %v960_v8 = vld [vmem:[%s12371_s12 + $0x8] sm:$0xff]  ;;  %vm1395_vm8 = vcmask 130048   ;;  %s14082_s0 = smov 104  }
  0x3e   : > { %11197 = vmatprep.subr.mxu0 %v990_v3  ;;  %966 = vperm.xlu0 %11771, %v959_v5   ;;  %v962_v9 = vld [vmem:[%s12371_s12 + $0x18] sm:$0xff]  ;;  %v1101_v25 = vld [vmem:[%s12214_s17 + $0x10] sm:$0xff]  ;;  %v1100_v26 = vld [vmem:[%s12214_s17 + $0x8] sm:$0xff] }
  0x3f   : > { %11198 = vmatpush3.msra.mxu0 %v990_v3  ;;  %972 = vperm.xlu1 %11772, %v961_v6   ;;  %v1099_v27 = vld [vmem:[%s12214_s17] sm:$0xff] }
  0x40   : > { %11199 = vmatprep.subr.mxu0 %v989_v4  ;;  %v1094_v29 = vld [vmem:[%s12209_s13] sm:$0xff] }
  0x41   : > { %11200 = vmatpush3.msra.mxu0 %v989_v4  ;;  %v10307_v37 = vld [vmem:[%s12219_s21] ss:$0 sm:$0xff] }
  0x42   : > { %11201 = vmatprep.subr.mxu0 %v988_v7  ;;  %969 = vperm.xlu0 %11771, %v960_v8  }
  0x43   : > { %11202 = vmatpush3.msra.mxu0 %v988_v7  ;;  %975 = vperm.xlu1 %11772, %v962_v9  }
  0x44   : > { %11203 = vmatprep.subr.mxu0 %v987_v10 }
  0x45   : > { %11204 = vmatpush3.msra.mxu0 %v987_v10 }
  0x46   : > { %11205 = vmatprep.subr.mxu0 %v986_v11 }
  0x47   : > { %11206 = vmatpush3.msra.mxu0 %v986_v11 }
  0x48   : > { %11207 = vmatprep.subr.mxu0 %v985_v12 }
  0x49   : > { %11208 = vmatpush3.msra.mxu0 %v985_v12 }
  0x4a   : > { %11215 = vmatprep.subr.mxu0 %v1102_v13 }
  0xb9   : > { %v967_v16 = vpop.permute.xlu0 %966 }
  0xba   : > { %v973_v17 = vpop.permute.xlu1 %972  ;;  %vm977_vm2 = vcmp.eq.s32.totalorder %v967_v16, %v964_v15 }
  0xbb   : > { %v981_v19 = vsel %vm977_vm2, 1.0, %v12177_v18  ;;  %vm979_vm3 = vcmp.eq.s32.totalorder %v973_v17, %v964_v15 }
  0xbc   : > { %11209 = vmatprep.mubr.msk.f32.mxu0 %vm992_vm1, %v981_v19  ;;  %v983_v22 = vsel %vm979_vm3, 1.0, %v12177_v18 }
  0xbd   : > { %v970_v20 = vpop.permute.xlu0 %969 }
  0xbe   : > { %v976_v21 = vpop.permute.xlu1 %975  ;;  %vm978_vm4 = vcmp.eq.s32.totalorder %v970_v20, %v964_v15 }
  0xbf   : > { %vm980_vm5 = vcmp.eq.s32.totalorder %v976_v21, %v964_v15  ;;  %v982_v23 = vsel %vm978_vm4, 1.0, %v12177_v18 }
  0xc0   : > { %11210 = vmatmul.mubr.msk.f32.vlgmr.msra.gmra.mxu0 %vm992_vm1, %v982_v23  ;;  %v984_v24 = vsel %vm980_vm5, 1.0, %v12177_v18 }
  0xc1   : > { %11212 = vmatprep.mubr.msk.f32.mxu0 %vm992_vm1, %v983_v22  ;;  %11216 = vmatpush3.msra.mxu0 %v1102_v13 }
  0xc2   : > { %11217 = vmatprep.subr.mxu0 %v1101_v25 }
  0xc3   : > { %11218 = vmatpush3.msra.mxu0 %v1101_v25 }
  0xc4   : > { %11213 = vmatmul.mubr.msk.f32.gmra.mxu0 %vm992_vm1, %v984_v24  ;;  %11219 = vmatprep.subr.mxu0 %v1100_v26 }
  0xc5   : > { %11220 = vmatpush3.msra.mxu0 %v1100_v26 }
  0xc6   : > { %11221 = vmatprep.subr.mxu0 %v1099_v27 }
  0xc7   : > { %11222 = vmatpush3.msra.mxu0 %v1099_v27 }
 0x180   : > { %v11211_v28 = vpop.f32.mrf.mxu0 }
 0x181   : > { %v12397_v32 = vadd.f32 %v11211_v28, %v1094_v29 }
 0x182   : > { %v1075_v30 = vpop.f32.mrf.mxu0 }
 0x183   : > { %v12395_v31 = vadd.f32 %v1094_v29, %v1075_v30 }
 0x184   : > { %v11214_v33 = vpop.f32.mrf.mxu0 }
 0x185   : > { %11223 = vmatprep.mubr.msk.f32.mxu0 %vm1110_vm6, %v12395_v31  ;;  %v12401_v34 = vadd.f32 %v11214_v33, %v1094_v29 }
 0x186   : > { %v1085_v35 = vpop.f32.mrf.mxu0  ;;  %11224 = vmatmul.mubr.msk.f32.vlgmr.msra.gmra.mxu0 %vm1110_vm6, %v12397_v32 }
 0x187   : > { %v12405_v36 = vadd.f32 %v1094_v29, %v1085_v35 }
 0x189   : > { %11226 = vmatprep.mubr.msk.f32.mxu0 %vm1110_vm6, %v12405_v36 }
 0x18a   : > { %11227 = vmatmul.mubr.msk.f32.gmra.mxu0 %vm1110_vm6, %v12401_v34 }
 0x246   : > { %v11225_v38 = vpop.f32.mrf.mxu0 }
 0x247   : > { %v12412_v39 = vadd.f32 %v11225_v38, %v10307_v37 }
 0x248   : > { %v1189_v40 = vpop.f32.mrf.mxu0 }
 0x249   : > { %v12414_v41 = vadd.f32 %v10307_v37, %v1189_v40  ;;  %1216 = vrot.lane.b32.xlu0 %v12412_v39, %s12178_s23 }
 0x24a   : > { %v11228_v42 = vpop.f32.mrf.mxu0 }
 0x24b   : > { %v12418_v43 = vadd.f32 %v11228_v42, %v10307_v37  ;;  %1214 = vrot.lane.b32.xlu1 %v12414_v41, %s12178_s23  ;;  %11233 = vmatprep.mubr.msk.f32.mxu1 %vm1218_vm7, %v12414_v41 }
 0x24c   : > { %v1199_v44 = vpop.f32.mrf.mxu0 }
 0x24d   : > { %1306 = vrot.lane.b32.xlu0 %v12418_v43, %s12178_s23  ;;  %v12426_v45 = vadd.f32 %v10307_v37, %v1199_v44 }
 0x24f   : > { %1304 = vrot.lane.b32.xlu1 %v12426_v45, %s12178_s23  ;;  %11240 = vmatprep.mubr.msk.f32.mxu0 %vm1218_vm7, %v12426_v45 }
 0x2bb   : > { %v1217_v46 = vpop.permute.xlu0 %1216 }
 0x2bc   : > { %11229 = vmatprep.subr.msk.mxu1 %vm1218_vm7, %v1217_v46 }
 0x2bd   : > { %11230 = vmatpush3.xpose.msk.msra.mxu1 %vm1218_vm7, %v1217_v46  ;;  %v1215_v47 = vpop.permute.xlu1 %1214 }
 0x2be   : > { %11231 = vmatprep.subr.msk.mxu1 %vm1218_vm7, %v1215_v47 }
 0x2bf   : > { %v1307_v48 = vpop.permute.xlu0 %1306 }
 0x2c0   : > { %11236 = vmatprep.subr.msk.mxu0 %vm1218_vm7, %v1307_v48 }
 0x2c1   : > { %11232 = vmatpush3.xpose.msk.msra.mxu1 %vm1218_vm7, %v1215_v47  ;;  %11237 = vmatpush3.xpose.msk.msra.mxu0 %vm1218_vm7, %v1307_v48  ;;  %v1305_v49 = vpop.permute.xlu1 %1304 }
 0x2c2   : > { %11238 = vmatprep.subr.msk.mxu0 %vm1218_vm7, %v1305_v49 }
 0x2c4   : > { %11234 = vmatmul.mubr.msk.f32.vlgmr.msra.gmra.mxu1 %vm1218_vm7, %v12412_v39 }
 0x2c5   : > { %11239 = vmatpush3.xpose.msk.msra.mxu0 %vm1218_vm7, %v1305_v49 }
 0x2c8   : > { %11241 = vmatmul.mubr.msk.f32.vlgmr.msra.gmra.mxu0 %vm1218_vm7, %v12418_v43 }
 0x384   : > { %v11235_v50 = vpop.f32.mrf.mxu1 }
 0x385   : > { %v1392_v51 = vmul.f32 0.35355338, %v11235_v50 }
 0x386   : > { %v1293_v52 = vpop.f32.mrf.mxu1 }
 0x387   : > { %v1391_v53 = vmul.f32 0.35355338, %v1293_v52  ;;  %v1399_v54 = vsel %vm1395_vm8, %v1392_v51, -inf }
 0x388   : > { %1400 = vmax.xlane.f32.xlu1 %v1399_v54  ;;  %v11242_v55 = vpop.f32.mrf.mxu0 }
 0x389   : > { %v1396_v56 = vsel %vm1395_vm8, %v1391_v53, -inf  ;;  %v1394_v59 = vmul.f32 0.35355338, %v11242_v55 }
 0x38a   : > { %1397 = vmax.xlane.f32.xlu0 %v1396_v56  ;;  %v1382_v57 = vpop.f32.mrf.mxu0 }
 0x38b   : > { %v1393_v58 = vmul.f32 0.35355338, %v1382_v57  ;;  %v1405_v61 = vsel %vm1395_vm8, %v1394_v59, -inf }
 0x38d   : > { %v1402_v60 = vsel %vm1395_vm8, %v1393_v58, -inf }
 0x38e   : > { %1403 = vmax.xlane.f32.xlu0 %v1402_v60 }
 0x392   : > { %1406 = vmax.xlane.f32.xlu0 %v1405_v61 }
 0x399   : > { %1442 = vrot.lane.b32.xlu1 %v12412_v39, %s12179_s26 }
 0x39d   : > { %1529 = vrot.lane.b32.xlu1 %v12418_v43, %s12179_s26 }
 0x3a1   : > { %1620 = vrot.lane.b32.xlu1 %v12412_v39, %s12180_s28 }
 0x3a5   : > { %1618 = vrot.lane.b32.xlu1 %v12414_v41, %s12180_s28 }
 0x3a8   : > { %1440 = vrot.lane.b32.xlu0 %v12414_v41, %s12179_s26 }
 0x3a9   : > { %1614 = vrot.lane.b32.xlu1 %v12414_v41, %s12181_s2 }
 0x3ac   : > { %1527 = vrot.lane.b32.xlu0 %v12426_v45, %s12179_s26 }
 0x3b0   : > { %1711 = vrot.lane.b32.xlu0 %v12418_v43, %s12180_s28 }
 0x411   : > { %v1401_v62 = vpop.xlane.xlu1 %1400 }
 0x412   : > { %v1409_v63 = vsub.f32 %v1392_v51, %v1401_v62 }
 0x413   : > { %v1398_v0 = vpop.xlane.xlu0 %1397 }
 0x414   : > { %v1414_v1 = vmul.f32 1.442695, %v1409_v63  ;;  %v1408_v2 = vsub.f32 %v1391_v53, %v1398_v0 }
 0x415   : > { %v1443_v3 = vpop.permute.xlu1 %1442 }
 0x416   : > { %11773 = vpow2.f32 %v1414_v1  ;;  %v1412_v4 = vmul.f32 1.442695, %v1408_v2  ;;  %11243 = vmatprep.subr.mxu1 %v1443_v3 }
 0x417   : > { %11244 = vmatpush3.msra.mxu1 %v1443_v3  ;;  %v1404_v5 = vpop.xlane.xlu0 %1403 }
 0x418   : > { %11775 = vpow2.f32 %v1412_v4  ;;  %v1410_v22 = vsub.f32 %v1393_v58, %v1404_v5 }
 0x419   : > { %v1530_v6 = vpop.permute.xlu1 %1529 }
 0x41a   : > { %v1416_v23 = vmul.f32 1.442695, %v1410_v22 }
 0x41b   : > { %v1407_v7 = vpop.xlane.xlu0 %1406 }
 0x41c   : > { %v1411_v8 = vsub.f32 %v1394_v59, %v1407_v7 }
 0x41d   : > { %v1621_v9 = vpop.permute.xlu1 %1620 }
 0x41e   : > { %v1418_v10 = vmul.f32 1.442695, %v1411_v8  ;;  %11257 = vmatprep.subr.msk.mxu0 %vm1218_vm7, %v1621_v9 }
 0x41f   : > { %11258 = vmatpush3.xpose.msk.msra.mxu0 %vm1218_vm7, %v1621_v9  ;;  %v1441_v11 = vpop.permute.xlu0 %1440 }
 0x420   : > { %11777 = vpow2.f32 %v1418_v10  ;;  %11245 = vmatprep.subr.mxu1 %v1441_v11 }
 0x421   : > { %v1619_v12 = vpop.permute.xlu1 %1618  ;;  %11246 = vmatpush3.msra.mxu1 %v1441_v11  ;;  %11779 = vpow2.f32 %v1416_v23 }
 0x422   : > { %11250 = vmatprep.subr.mxu1 %v1530_v6  ;;  %11259 = vmatprep.subr.msk.mxu0 %vm1218_vm7, %v1619_v12 }
 0x423   : > { %v11774_v13 = vpop.eup %11773  ;;  %11260 = vmatpush3.xpose.msk.msra.mxu0 %vm1218_vm7, %v1619_v12  ;;  %v1528_v26 = vpop.permute.xlu0 %1527 }
 0x424   : > { %v1423_v15 = vsel %vm1395_vm8, %v11774_v13, 0.0 }
 0x425   : > { %v11776_v16 = vpop.eup %11775  ;;  %v1615_v17 = vpop.permute.xlu1 %1614  ;;  %1424 = vadd.xlane.f32.xlu0 %v1423_v15 }
 0x426   : > { %11261 = vmatprep.mubr.msk.f32.mxu0 %vm1218_vm7, %v1615_v17  ;;  %v1420_v19 = vsel %vm1395_vm8, %v11776_v16, 0.0 }
 0x427   : > { %1421 = vadd.xlane.f32.xlu1 %v1420_v19  ;;  %v1712_v27 = vpop.permute.xlu0 %1711 }
 0x42d   : > { %v11778_v20 = vpop.eup %11777 }
 0x42e   : > { %v1429_v21 = vsel %vm1395_vm8, %v11778_v20, 0.0  ;;  %v11780_v24 = vpop.eup %11779 }
 0x42f   : > { %1430 = vadd.xlane.f32.xlu0 %v1429_v21  ;;  %v1426_v25 = vsel %vm1395_vm8, %v11780_v24, 0.0 }
 0x438   : > { %1709 = vrot.lane.b32.xlu1 %v12426_v45, %s12180_s28 }
 0x445   : > { %1616 = vrot.lane.b32.xlu0 %v12412_v39, %s12181_s2 }
 0x449   : > { %1705 = vrot.lane.b32.xlu0 %v12426_v45, %s12181_s2 }
 0x45c   : > { %1427 = vadd.xlane.f32.xlu1 %v1426_v25 }
 0x46d   : > { %1707 = vrot.lane.b32.xlu1 %v12418_v43, %s12181_s2 }
 0x4ae   : > { %v1425_v28 = vpop.xlane.xlu0 %1424 }
 0x4af   : > { %11781 = vrcp.f32 %v1425_v28 }
 0x4b0   : > { %v1422_v29 = vpop.xlane.xlu1 %1421 }
 0x4b1   : > { %11783 = vrcp.f32 %v1422_v29 }
 0x4b4   : > { %v1710_v42 = vpop.permute.xlu1 %1709 }
 0x4b8   : > { %v1431_v30 = vpop.xlane.xlu0 %1430 }
 0x4b9   : > { %11785 = vrcp.f32 %v1431_v30 }
 0x4bc   : > { %v1617_v33 = vpop.permute.xlu0 %1616  ;;  %v11782_v35 = vpop.eup %11781 }
 0x4bd   : > { %11262 = vmatmul.mubr.msk.f32.vlgmr.msra.gmra.mxu0 %vm1218_vm7, %v1617_v33  ;;  %v1435_v40 = vmul.f32 %v11782_v35, %v11774_v13 }
 0x4be   : > { %v11784_v37 = vpop.eup %11783 }
 0x4bf   : > { %v1433_v38 = vmul.f32 %v11784_v37, %v11776_v16 }
 0x4c0   : > { %v1706_v50 = vpop.permute.xlu0 %1705 }
 0x4c1   : > { %11247 = vmatprep.mubr.msk.f32.mxu1 %vm1395_vm8, %v1433_v38 }
 0x4c2   : > { %11248 = vmatmul.mubr.msk.f32.vlgmr.msra.gmra.mxu1 %vm1395_vm8, %v1435_v40  ;;  %v1208_v40 = vld [vmem:[%s12224_s25] sm:$0xff] }
 0x4c3   : > { %11251 = vmatpush3.msra.mxu1 %v1530_v6 }
 0x4c4   : > { %11252 = vmatprep.subr.mxu1 %v1528_v26 }
 0x4c5   : > { %11253 = vmatpush3.msra.mxu1 %v1528_v26 }
 0x4c6   : > { %11264 = vmatprep.subr.msk.mxu1 %vm1218_vm7, %v1712_v27  ;;  %v11786_v46 = vpop.eup %11785 }
 0x4c7   : > { %v1439_v49 = vmul.f32 %v11786_v46, %v11778_v20  ;;  %v1209_v46 = vld [vmem:[%s12224_s25 + $0x8] sm:$0xff] }
 0x4e5   : > { %v1428_v44 = vpop.xlane.xlu1 %1427 }
 0x4e6   : > { %11787 = vrcp.f32 %v1428_v44 }
 0x4e9   : > { %v1708_v51 = vpop.permute.xlu1 %1707 }
 0x4f3   : > { %v11788_v47 = vpop.eup %11787 }
 0x4f4   : > { %v1437_v48 = vmul.f32 %v11788_v47, %v11780_v24 }
 0x4f6   : > { %11254 = vmatprep.mubr.msk.f32.mxu1 %vm1395_vm8, %v1437_v48 }
 0x4f7   : > { %11255 = vmatmul.mubr.msk.f32.vlgmr.msra.gmra.mxu1 %vm1395_vm8, %v1439_v49 }
 0x4f8   : > { %11265 = vmatpush3.xpose.msk.msra.mxu1 %vm1218_vm7, %v1712_v27  ;;  %11268 = vmatprep.mubr.msk.f32.mxu1 %vm1218_vm7, %v1706_v50 }
 0x4f9   : > { %11266 = vmatprep.subr.msk.mxu1 %vm1218_vm7, %v1710_v42 }
 0x4fc   : > { %11267 = vmatpush3.xpose.msk.msra.mxu1 %vm1218_vm7, %v1710_v42 }
 0x4ff   : > { %11269 = vmatmul.mubr.msk.f32.vlgmr.msra.gmra.mxu1 %vm1218_vm7, %v1708_v51 }
 0x57d   : > { %v11263_v52 = vpop.f32.mrf.mxu0 }
 0x57e   : > { %v1797_v53 = vmul.f32 0.35355338, %v11263_v52 }
 0x57f   : > { %v1696_v54 = vpop.f32.mrf.mxu0 }
 0x580   : > { %v1796_v55 = vmul.f32 0.35355338, %v1696_v54  ;;  %v1803_v56 = vsel %vm1395_vm8, %v1797_v53, -inf }
 0x581   : > { %1804 = vmax.xlane.f32.xlu1 %v1803_v56 }
 0x582   : > { %v1800_v57 = vsel %vm1395_vm8, %v1796_v55, -inf  ;;  %v12494_v58 = vpop.f32.mrf.mxu1 }
 0x583   : > { %1801 = vmax.xlane.f32.xlu0 %v1800_v57 }
 0x584   : > { %v12496_v59 = vpop.f32.mrf.mxu1 }
 0x5b7   : > { %v12498_v60 = vpop.f32.mrf.mxu1 }
 0x5b9   : > { %v12500_v61 = vpop.f32.mrf.mxu1 }
 0x5bf   : > { %v11270_v62 = vpop.f32.mrf.mxu1 }
 0x5c0   : > { %v1799_v1 = vmul.f32 0.35355338, %v11270_v62 }
 0x5c1   : > { %v1787_v63 = vpop.f32.mrf.mxu1 }
 0x5c2   : > { %v1798_v0 = vmul.f32 0.35355338, %v1787_v63  ;;  %v1809_v3 = vsel %vm1395_vm8, %v1799_v1, -inf }
 0x5c4   : > { %v1806_v2 = vsel %vm1395_vm8, %v1798_v0, -inf }
 0x5c5   : > { %1807 = vmax.xlane.f32.xlu0 %v1806_v2 }
 0x5c9   : > { %1810 = vmax.xlane.f32.xlu0 %v1809_v3 }
 0x60a   : > { %v1805_v4 = vpop.xlane.xlu1 %1804 }
 0x60b   : > { %v1813_v5 = vsub.f32 %v1797_v53, %v1805_v4 }
 0x60c   : > { %v1802_v6 = vpop.xlane.xlu0 %1801 }
 0x60d   : > { %v1818_v7 = vmul.f32 1.442695, %v1813_v5  ;;  %v1812_v8 = vsub.f32 %v1796_v55, %v1802_v6 }
 0x60f   : > { %11789 = vpow2.f32 %v1818_v7  ;;  %v1816_v9 = vmul.f32 1.442695, %v1812_v8 }
 0x611   : > { %11791 = vpow2.f32 %v1816_v9 }
 0x61c   : > { %v11790_v10 = vpop.eup %11789 }
 0x61d   : > { %v1827_v11 = vsel %vm1395_vm8, %v11790_v10, 0.0 }
 0x61e   : > { %v11792_v12 = vpop.eup %11791  ;;  %1828 = vadd.xlane.f32.xlu0 %v1827_v11 }
 0x61f   : > { %v1824_v13 = vsel %vm1395_vm8, %v11792_v12, 0.0 }
 0x620   : > { %1825 = vadd.xlane.f32.xlu1 %v1824_v13 }
 0x631   : > { %1846 = vrot.lane.b32.xlu1 %v12412_v39, %s12182_s27 }
 0x635   : > { %1933 = vrot.lane.b32.xlu1 %v12418_v43, %s12182_s27 }
 0x64e   : > { %v1808_v15 = vpop.xlane.xlu0 %1807 }
 0x64f   : > { %v1814_v16 = vsub.f32 %v1798_v0, %v1808_v15 }
 0x651   : > { %v1820_v17 = vmul.f32 1.442695, %v1814_v16 }
 0x652   : > { %v1811_v19 = vpop.xlane.xlu0 %1810 }
 0x653   : > { %11793 = vpow2.f32 %v1820_v17  ;;  %v1815_v20 = vsub.f32 %v1799_v1, %v1811_v19 }
 0x655   : > { %v1822_v21 = vmul.f32 1.442695, %v1815_v20 }
 0x657   : > { %11795 = vpow2.f32 %v1822_v21 }
 0x660   : > { %v11794_v22 = vpop.eup %11793 }
 0x661   : > { %v1830_v23 = vsel %vm1395_vm8, %v11794_v22, 0.0 }
 0x662   : > { %1831 = vadd.xlane.f32.xlu1 %v1830_v23 }
 0x664   : > { %v11796_v24 = vpop.eup %11795 }
 0x665   : > { %v1833_v25 = vsel %vm1395_vm8, %v11796_v24, 0.0 }
 0x666   : > { %1834 = vadd.xlane.f32.xlu0 %v1833_v25 }
 0x673   : > { %1931 = vrot.lane.b32.xlu1 %v12426_v45, %s12182_s27 }
 0x677   : > { %2216 = vrot.lane.b32.xlu1 %v12414_v41, %s14090_s7 }
 0x67b   : > { %2212 = vrot.lane.b32.xlu1 %v12414_v41, %s14088_s11 }
 0x67c   : > { %1844 = vrot.lane.b32.xlu0 %v12414_v41, %s12182_s27 }
 0x67f   : > { %2307 = vrot.lane.b32.xlu1 %v12426_v45, %s14090_s7 }
 0x680   : > { %2218 = vrot.lane.b32.xlu0 %v12412_v39, %s14090_s7 }
 0x683   : > { %2305 = vrot.lane.b32.xlu1 %v12418_v43, %s14088_s11 }
 0x684   : > { %2309 = vrot.lane.b32.xlu0 %v12418_v43, %s14090_s7 }
 0x688   : > { %2214 = vrot.lane.b32.xlu0 %v12412_v39, %s14088_s11 }
 0x68c   : > { %2303 = vrot.lane.b32.xlu0 %v12426_v45, %s14088_s11 }
 0x6a7   : > { %v1829_v33 = vpop.xlane.xlu0 %1828 }
 0x6a9   : > { %v1826_v26 = vpop.xlane.xlu1 %1825 }
 0x6aa   : > { %11797 = vrcp.f32 %v1826_v26 }
 0x6ab   : > { %11799 = vrcp.f32 %v1829_v33 }
 0x6ad   : > { %v1847_v27 = vpop.permute.xlu1 %1846 }
 0x6ae   : > { %11271 = vmatprep.subr.mxu0 %v1847_v27 }
 0x6af   : > { %11272 = vmatpush3.msra.mxu0 %v1847_v27 }
 0x6b1   : > { %v1934_v28 = vpop.permute.xlu1 %1933 }
 0x6b2   : > { %11278 = vmatprep.subr.mxu1 %v1934_v28 }
 0x6b3   : > { %11279 = vmatpush3.msra.mxu1 %v1934_v28 }
 0x6b7   : > { %v11798_v29 = vpop.eup %11797 }
 0x6b8   : > { %v1837_v30 = vmul.f32 %v11798_v29, %v11792_v12  ;;  %v11800_v42 = vpop.eup %11799 }
 0x6b9   : > { %v1839_v47 = vmul.f32 %v11800_v42, %v11790_v10 }
 0x6ba   : > { %11275 = vmatprep.mubr.msk.f32.mxu0 %vm1395_vm8, %v1837_v30 }
 0x6eb   : > { %v1832_v35 = vpop.xlane.xlu1 %1831 }
 0x6ec   : > { %11801 = vrcp.f32 %v1832_v35 }
 0x6ef   : > { %v1932_v37 = vpop.permute.xlu1 %1931  ;;  %v1835_v38 = vpop.xlane.xlu0 %1834 }
 0x6f0   : > { %11803 = vrcp.f32 %v1835_v38  ;;  %11280 = vmatprep.subr.mxu1 %v1932_v37 }
 0x6f1   : > { %11281 = vmatpush3.msra.mxu1 %v1932_v37 }
 0x6f2   : > { %11293 = vmatprep.subr.mxu1 %v1208_v40 }
 0x6f3   : > { %v1845_v44 = vpop.permute.xlu0 %1844  ;;  %v2217_v50 = vpop.permute.xlu1 %2216 }
 0x6f4   : > { %11273 = vmatprep.subr.mxu0 %v1845_v44 }
 0x6f5   : > { %11274 = vmatpush3.msra.mxu0 %v1845_v44 }
 0x6f6   : > { %11276 = vmatmul.mubr.msk.f32.vlgmr.msra.gmra.mxu0 %vm1395_vm8, %v1839_v47  ;;  %11285 = vmatprep.subr.mxu0 %v1209_v46 }
 0x6f7   : > { %11286 = vmatpush3.msra.mxu0 %v1209_v46  ;;  %v2219_v48 = vpop.permute.xlu0 %2218  ;;  %v2213_v55 = vpop.permute.xlu1 %2212 }
 0x6f8   : > { %11301 = vmatprep.subr.msk.mxu0 %vm1218_vm7, %v2219_v48 }
 0x6f9   : > { %v11802_v49 = vpop.eup %11801 }
 0x6fa   : > { %v1841_v51 = vmul.f32 %v11802_v49, %v11794_v22 }
 0x6fb   : > { %v2310_v52 = vpop.permute.xlu0 %2309  ;;  %v2308_v57 = vpop.permute.xlu1 %2307 }
 0x6fc   : > { %11282 = vmatprep.mubr.msk.f32.mxu1 %vm1395_vm8, %v1841_v51 }
 0x6fd   : > { %v11804_v53 = vpop.eup %11803 }
 0x6fe   : > { %v1843_v54 = vmul.f32 %v11804_v53, %v11796_v24 }
 0x6ff   : > { %v2215_v56 = vpop.permute.xlu0 %2214 }
 0x700   : > { %11283 = vmatmul.mubr.msk.f32.vlgmr.msra.gmra.mxu1 %vm1395_vm8, %v1843_v54 }
 0x701   : > { %11294 = vmatpush3.msra.mxu1 %v1208_v40  ;;  %11295 = vmatprep.mubr.msk.f32.mxu1 %vm1218_vm7, %v12496_v59  ;;  %v2306_v59 = vpop.permute.xlu1 %2305 }
 0x702   : > { %11308 = vmatprep.subr.msk.mxu1 %vm1218_vm7, %v2310_v52 }
 0x703   : > { %v2304_v62 = vpop.permute.xlu0 %2303 }
 0x704   : > { %11296 = vmatmul.mubr.msk.f32.vlgmr.msra.gmra.mxu1 %vm1218_vm7, %v12494_v58 }
 0x705   : > { %11309 = vmatpush3.xpose.msk.msra.mxu1 %vm1218_vm7, %v2310_v52  ;;  %11298 = vmatprep.mubr.msk.f32.mxu1 %vm1218_vm7, %v12500_v61 }
 0x706   : > { %11310 = vmatprep.subr.msk.mxu1 %vm1218_vm7, %v2308_v57 }
 0x708   : > { %11299 = vmatmul.mubr.msk.f32.gmra.mxu1 %vm1218_vm7, %v12498_v60 }
 0x709   : > { %11311 = vmatpush3.xpose.msk.msra.mxu1 %vm1218_vm7, %v2308_v57  ;;  %11312 = vmatprep.mubr.msk.f32.mxu1 %vm1218_vm7, %v2304_v62 }
 0x70c   : > { %11313 = vmatmul.mubr.msk.f32.vlgmr.msra.gmra.mxu1 %vm1218_vm7, %v2306_v59 }
 0x7b6   : > { %v11277_v58 = vpop.f32.mrf.mxu0 }
 0x7b8   : > { %v1922_v63 = vpop.f32.mrf.mxu0 }
 0x7b9   : > { %11287 = vmatprep.mubr.msk.f32.mxu0 %vm1218_vm7, %v1922_v63 }
 0x7ba   : > { %11288 = vmatmul.mubr.msk.f32.vlgmr.msra.gmra.mxu0 %vm1218_vm7, %v11277_v58 }
 0x7bb   : > { %11302 = vmatpush3.xpose.msk.msra.mxu0 %vm1218_vm7, %v2219_v48 }
 0x7bc   : > { %11303 = vmatprep.subr.msk.mxu0 %vm1218_vm7, %v2217_v50 }
 0x7bf   : > { %11304 = vmatpush3.xpose.msk.msra.mxu0 %vm1218_vm7, %v2217_v50 }
 0x7c0   : > { %v11284_v60 = vpop.f32.mrf.mxu1 }
 0x7c2   : > { %v2009_v61 = vpop.f32.mrf.mxu1 }
 0x7c3   : > { %11290 = vmatprep.mubr.msk.f32.mxu0 %vm1218_vm7, %v2009_v61 }
 0x7c4   : > { %11291 = vmatmul.mubr.msk.f32.gmra.mxu0 %vm1218_vm7, %v11284_v60  ;;  %v12562_v0 = vpop.f32.mrf.mxu1 }
 0x7c5   : > { %11305 = vmatprep.mubr.msk.f32.mxu0 %vm1218_vm7, %v2213_v55 }
 0x7c6   : > { %v12564_v1 = vpop.f32.mrf.mxu1 }
 0x7c8   : > { %11306 = vmatmul.mubr.msk.f32.vlgmr.msra.gmra.mxu0 %vm1218_vm7, %v2215_v56  ;;  %v12566_v2 = vpop.f32.mrf.mxu1  ;;  %v1210_v56 = vld [vmem:[%s12224_s25 + $0x10] sm:$0xff] }
 0x7ca   : > { %v12570_v4 = vpop.f32.mrf.mxu1 }
 0x7cc   : > { %v11314_v7 = vpop.f32.mrf.mxu1 }
 0x7cd   : > { %v2397_v19 = vmul.f32 0.35355338, %v11314_v7 }
 0x7ce   : > { %v2385_v11 = vpop.f32.mrf.mxu1 }
 0x7cf   : > { %v2396_v16 = vmul.f32 0.35355338, %v2385_v11  ;;  %v2407_v21 = vsel %vm1395_vm8, %v2397_v19, -inf }
 0x7d1   : > { %v2404_v20 = vsel %vm1395_vm8, %v2396_v16, -inf }
 0x87a   : > { %v12568_v3 = vpop.f32.mrf.mxu0 }
 0x87c   : > { %v12572_v5 = vpop.f32.mrf.mxu0 }
 0x884   : > { %v12574_v6 = vpop.f32.mrf.mxu0 }
 0x886   : > { %v12576_v8 = vpop.f32.mrf.mxu0 }
 0x888   : > { %v11307_v9 = vpop.f32.mrf.mxu0 }
 0x889   : > { %v2395_v10 = vmul.f32 0.35355338, %v11307_v9 }
 0x88a   : > { %v2294_v12 = vpop.f32.mrf.mxu0 }
 0x88b   : > { %v2394_v13 = vmul.f32 0.35355338, %v2294_v12  ;;  %v2401_v15 = vsel %vm1395_vm8, %v2395_v10, -inf }
 0x88c   : > { %2402 = vmax.xlane.f32.xlu1 %v2401_v15 }
 0x88d   : > { %v2398_v17 = vsel %vm1395_vm8, %v2394_v13, -inf }
 0x88e   : > { %2399 = vmax.xlane.f32.xlu0 %v2398_v17 }
 0x892   : > { %2405 = vmax.xlane.f32.xlu0 %v2404_v20 }
 0x896   : > { %2408 = vmax.xlane.f32.xlu0 %v2407_v21 }
 0x915   : > { %v2403_v23 = vpop.xlane.xlu1 %2402 }
 0x916   : > { %v2411_v26 = vsub.f32 %v2395_v10, %v2403_v23 }
 0x917   : > { %v2400_v22 = vpop.xlane.xlu0 %2399 }
 0x918   : > { %v2416_v30 = vmul.f32 1.442695, %v2411_v26  ;;  %v2410_v46 = vsub.f32 %v2394_v13, %v2400_v22 }
 0x91a   : > { %v2414_v47 = vmul.f32 1.442695, %v2410_v46  ;;  %v2199_v46 = vadd.f32 %v12562_v0, %v12568_v3 }
 0x91b   : > { %v2406_v24 = vpop.xlane.xlu0 %2405 }
 0x91c   : > { %v2412_v25 = vsub.f32 %v2396_v16, %v2406_v24 }
 0x91e   : > { %v2418_v27 = vmul.f32 1.442695, %v2412_v25 }
 0x91f   : > { %v2409_v28 = vpop.xlane.xlu0 %2408 }
 0x920   : > { %11805 = vpow2.f32 %v2418_v27  ;;  %v2413_v29 = vsub.f32 %v2397_v19, %v2409_v28 }
 0x922   : > { %v2420_v33 = vmul.f32 1.442695, %v2413_v29 }
 0x924   : > { %11807 = vpow2.f32 %v2420_v33 }
 0x925   : > { %11809 = vpow2.f32 %v2416_v30 }
 0x926   : > { %11811 = vpow2.f32 %v2414_v47 }
 0x92d   : > { %v11806_v35 = vpop.eup %11805 }
 0x92e   : > { %v2428_v37 = vsel %vm1395_vm8, %v11806_v35, 0.0 }
 0x92f   : > { %2429 = vadd.xlane.f32.xlu1 %v2428_v37 }
 0x931   : > { %v11808_v38 = vpop.eup %11807 }
 0x932   : > { %v2431_v40 = vsel %vm1395_vm8, %v11808_v38, 0.0  ;;  %v12584_v42 = vpop.eup %11809 }
 0x933   : > { %2432 = vadd.xlane.f32.xlu0 %v2431_v40  ;;  %v2425_v44 = vsel %vm1395_vm8, %v12584_v42, 0.0  ;;  %v11812_v48 = vpop.eup %11811 }
 0x934   : > { %v2422_v49 = vsel %vm1395_vm8, %v11812_v48, 0.0 }
 0x937   : > { %2426 = vadd.xlane.f32.xlu0 %v2425_v44 }
 0x940   : > { %2444 = vrot.lane.b32.xlu1 %v12412_v39, %s14092_s16 }
 0x944   : > { %2531 = vrot.lane.b32.xlu1 %v12418_v43, %s14092_s16 }
 0x94d   : > { %2442 = vrot.lane.b32.xlu0 %v12414_v41, %s14092_s16 }
 0x951   : > { %2723 = vrot.lane.b32.xlu0 %v12412_v39, %s14086_s18 }
 0x955   : > { %2717 = vrot.lane.b32.xlu0 %v12414_v41, %s14082_s0 }
 0x959   : > { %2814 = vrot.lane.b32.xlu0 %v12418_v43, %s14086_s18 }
 0x95d   : > { %2808 = vrot.lane.b32.xlu0 %v12426_v45, %s14082_s0 }
 0x968   : > { %2423 = vadd.xlane.f32.xlu1 %v2422_v49 }
 0x979   : > { %2529 = vrot.lane.b32.xlu1 %v12426_v45, %s14092_s16 }
 0x97d   : > { %2721 = vrot.lane.b32.xlu1 %v12414_v41, %s14086_s18 }
 0x981   : > { %2719 = vrot.lane.b32.xlu1 %v12412_v39, %s14082_s0 }
 0x985   : > { %2812 = vrot.lane.b32.xlu1 %v12426_v45, %s14086_s18  ;;  %s14108_s18 = sld [smem:[#allocation4_spill]] }
 0x989   : > { %2810 = vrot.lane.b32.xlu1 %v12418_v43, %s14082_s0  ;;  %s14084_s0 = smov 40  }
 0x9b8   : > { %v2430_v50 = vpop.xlane.xlu1 %2429 }
 0x9b9   : > { %11813 = vrcp.f32 %v2430_v50 }
 0x9bc   : > { %v2445_v51 = vpop.permute.xlu1 %2444  ;;  %v2433_v52 = vpop.xlane.xlu0 %2432 }
 0x9bd   : > { %11315 = vmatprep.subr.mxu0 %v2445_v51  ;;  %11815 = vrcp.f32 %v2433_v52  ;;  %v2209_v52 = vadd.f32 %v12566_v2, %v12574_v6 }
 0x9be   : > { %11316 = vmatpush3.msra.mxu0 %v2445_v51 }
 0x9c0   : > { %v2532_v53 = vpop.permute.xlu1 %2531  ;;  %v2427_v54 = vpop.xlane.xlu0 %2426 }
 0x9c1   : > { %11322 = vmatprep.subr.mxu1 %v2532_v53  ;;  %11817 = vrcp.f32 %v2427_v54 }
 0x9c2   : > { %11323 = vmatpush3.msra.mxu1 %v2532_v53 }
 0x9c4   : > { %v2443_v55 = vpop.permute.xlu0 %2442 }
 0x9c5   : > { %11317 = vmatprep.subr.mxu0 %v2443_v55 }
 0x9c6   : > { %v11814_v57 = vpop.eup %11813  ;;  %11318 = vmatpush3.msra.mxu0 %v2443_v55 }
 0x9c7   : > { %v2439_v62 = vmul.f32 %v11814_v57, %v11806_v35  ;;  %11329 = vmatprep.subr.mxu0 %v1210_v56 }
 0x9c8   : > { %v2724_v58 = vpop.permute.xlu0 %2723 }
 0x9c9   : > { %11326 = vmatprep.mubr.msk.f32.mxu1 %vm1395_vm8, %v2439_v62 }
 0x9ca   : > { %v11816_v63 = vpop.eup %11815 }
 0x9cb   : > { %v2441_v61 = vmul.f32 %v11816_v63, %v11808_v38 }
 0x9cc   : > { %v2718_v7 = vpop.permute.xlu0 %2717 }
 0x9ce   : > { %v11818_v10 = vpop.eup %11817 }
 0x9cf   : > { %v2437_v15 = vmul.f32 %v11818_v10, %v12584_v42 }
 0x9d0   : > { %v2815_v16 = vpop.permute.xlu0 %2814 }
 0x9d4   : > { %v2809_v29 = vpop.permute.xlu0 %2808 }
 0x9f1   : > { %v2424_v59 = vpop.xlane.xlu1 %2423 }
 0x9f2   : > { %11819 = vrcp.f32 %v2424_v59 }
 0x9f5   : > { %v2530_v60 = vpop.permute.xlu1 %2529 }
 0x9f6   : > { %11324 = vmatprep.subr.mxu1 %v2530_v60 }
 0x9f7   : > { %11325 = vmatpush3.msra.mxu1 %v2530_v60 }
 0x9f8   : > { %11327 = vmatmul.mubr.msk.f32.vlgmr.msra.gmra.mxu1 %vm1395_vm8, %v2441_v61  ;;  %11337 = vmatprep.subr.msk.mxu1 %vm1218_vm7, %v2724_v58 }
 0x9f9   : > { %v2722_v9 = vpop.permute.xlu1 %2721  ;;  %11338 = vmatpush3.xpose.msk.msra.mxu1 %vm1218_vm7, %v2724_v58  ;;  %11341 = vmatprep.mubr.msk.f32.mxu1 %vm1218_vm7, %v2718_v7 }
 0x9fa   : > { %11339 = vmatprep.subr.msk.mxu1 %vm1218_vm7, %v2722_v9 }
 0x9fd   : > { %11340 = vmatpush3.xpose.msk.msra.mxu1 %vm1218_vm7, %v2722_v9  ;;  %v2720_v12 = vpop.permute.xlu1 %2719 }
 0x9ff   : > { %v11820_v11 = vpop.eup %11819 }
 0xa00   : > { %11342 = vmatmul.mubr.msk.f32.vlgmr.msra.gmra.mxu1 %vm1218_vm7, %v2720_v12  ;;  %v2435_v13 = vmul.f32 %v11820_v11, %v11812_v48  ;;  %v2194_v48 = vadd.f32 %v12564_v1, %v12572_v5 }
 0xa01   : > { %v2813_v28 = vpop.permute.xlu1 %2812 }
 0xa02   : > { %11319 = vmatprep.mubr.msk.f32.mxu0 %vm1395_vm8, %v2435_v13 }
 0xa03   : > { %11320 = vmatmul.mubr.msk.f32.vlgmr.msra.gmra.mxu0 %vm1395_vm8, %v2437_v15 }
 0xa04   : > { %11330 = vmatpush3.msra.mxu0 %v1210_v56 }
 0xa05   : > { %11344 = vmatprep.subr.msk.mxu0 %vm1218_vm7, %v2815_v16  ;;  %v2811_v30 = vpop.permute.xlu1 %2810 }
 0xab8   : > { %v11328_v17 = vpop.f32.mrf.mxu1 }
 0xaba   : > { %v2607_v19 = vpop.f32.mrf.mxu1 }
 0xac0   : > { %v11343_v20 = vpop.f32.mrf.mxu1 }
 0xac1   : > { %v2900_v21 = vmul.f32 0.35355338, %v11343_v20 }
 0xac2   : > { %v2799_v22 = vpop.f32.mrf.mxu1 }
 0xac3   : > { %v2899_v23 = vmul.f32 0.35355338, %v2799_v22  ;;  %v11321_v24 = vpop.f32.mrf.mxu0  ;;  %v2906_v25 = vsel %vm1395_vm8, %v2900_v21, -inf }
 0xac4   : > { %2907 = vmax.xlane.f32.xlu1 %v2906_v25 }
 0xac5   : > { %v2520_v26 = vpop.f32.mrf.mxu0  ;;  %v2903_v27 = vsel %vm1395_vm8, %v2899_v23, -inf }
 0xac6   : > { %11331 = vmatprep.mubr.msk.f32.mxu0 %vm1218_vm7, %v2520_v26  ;;  %2904 = vmax.xlane.f32.xlu0 %v2903_v27  ;;  %v1211_v27 = vld [vmem:[%s12224_s25 + $0x18] sm:$0xff] }
 0xac7   : > { %11332 = vmatmul.mubr.msk.f32.vlgmr.msra.gmra.mxu0 %vm1218_vm7, %v11321_v24 }
 0xac8   : > { %11345 = vmatpush3.xpose.msk.msra.mxu0 %vm1218_vm7, %v2815_v16  ;;  %11334 = vmatprep.mubr.msk.f32.mxu0 %vm1218_vm7, %v2607_v19 }
 0xac9   : > { %11346 = vmatprep.subr.msk.mxu0 %vm1218_vm7, %v2813_v28 }
 0xacb   : > { %11335 = vmatmul.mubr.msk.f32.gmra.mxu0 %vm1218_vm7, %v11328_v17 }
 0xacc   : > { %11347 = vmatpush3.xpose.msk.msra.mxu0 %vm1218_vm7, %v2813_v28  ;;  %11348 = vmatprep.mubr.msk.f32.mxu0 %vm1218_vm7, %v2809_v29 }
 0xacf   : > { %11349 = vmatmul.mubr.msk.f32.vlgmr.msra.gmra.mxu0 %vm1218_vm7, %v2811_v30 }
 0xb4d   : > { %v2908_v42 = vpop.xlane.xlu1 %2907 }
 0xb4e   : > { %v2916_v44 = vsub.f32 %v2900_v21, %v2908_v42 }
 0xb4f   : > { %v2905_v33 = vpop.xlane.xlu0 %2904 }
 0xb50   : > { %v2915_v35 = vsub.f32 %v2899_v23, %v2905_v33  ;;  %v2921_v49 = vmul.f32 1.442695, %v2916_v44 }
 0xb52   : > { %v2919_v37 = vmul.f32 1.442695, %v2915_v35 }
 0xb54   : > { %11821 = vpow2.f32 %v2919_v37  ;;  %v10376_v37 = vld [vmem:[%s12229_s29] ss:$0 sm:$0xff] }
 0xb55   : > { %11823 = vpow2.f32 %v2921_v49 }
 0xb61   : > { %v11822_v38 = vpop.eup %11821 }
 0xb62   : > { %v2927_v40 = vsel %vm1395_vm8, %v11822_v38, 0.0  ;;  %v11824_v6 = vpop.eup %11823 }
 0xb63   : > { %2928 = vadd.xlane.f32.xlu1 %v2927_v40  ;;  %v2930_v62 = vsel %vm1395_vm8, %v11824_v6, 0.0 }
 0xb74   : > { %2949 = vrot.lane.b32.xlu1 %v12412_v39, %s14084_s0 }
 0xb78   : > { %3036 = vrot.lane.b32.xlu1 %v12418_v43, %s14084_s0  ;;  %v2204_v43 = vadd.f32 %v12570_v4, %v12576_v8 }
 0xb87   : > { %v11333_v47 = vpop.f32.mrf.mxu0 }
 0xb88   : > { %v12646_v50 = vadd.f32 %v11333_v47, %v2199_v46 }
 0xb89   : > { %v2694_v51 = vpop.f32.mrf.mxu0 }
 0xb8a   : > { %v12650_v39 = vadd.f32 %v2694_v51, %v2194_v48 }
 0xb8b   : > { %v11336_v53 = vpop.f32.mrf.mxu0 }
 0xb8c   : > { %v12654_v54 = vadd.f32 %v11336_v53, %v2209_v52 }
 0xb8d   : > { %v2704_v0 = vpop.f32.mrf.mxu0 }
 0xb8e   : > { %v12656_v3 = vadd.f32 %v2704_v0, %v2204_v43 }
 0xb8f   : > { %v11350_v1 = vpop.f32.mrf.mxu0 }
 0xb90   : > { %v2902_v56 = vmul.f32 0.35355338, %v11350_v1 }
 0xb91   : > { %v2890_v5 = vpop.f32.mrf.mxu0 }
 0xb92   : > { %v2901_v55 = vmul.f32 0.35355338, %v2890_v5  ;;  %v2912_v2 = vsel %vm1395_vm8, %v2902_v56, -inf }
 0xb94   : > { %v2909_v57 = vsel %vm1395_vm8, %v2901_v55, -inf }
 0xb95   : > { %2910 = vmax.xlane.f32.xlu0 %v2909_v57 }
 0xb99   : > { %2913 = vmax.xlane.f32.xlu0 %v2912_v2 }
 0xb9d   : > { %2931 = vadd.xlane.f32.xlu0 %v2930_v62 }
 0xbec   : > { %v2929_v4 = vpop.xlane.xlu1 %2928 }
 0xbed   : > { %11825 = vrcp.f32 %v2929_v4 }
 0xbf0   : > { %v2950_v8 = vpop.permute.xlu1 %2949 }
 0xbf1   : > { %11351 = vmatprep.subr.mxu1 %v2950_v8 }
 0xbf2   : > { %11352 = vmatpush3.msra.mxu1 %v2950_v8 }
 0xbf4   : > { %v3037_v59 = vpop.permute.xlu1 %3036 }
 0xbf5   : > { %11358 = vmatprep.subr.mxu0 %v3037_v59 }
 0xbf6   : > { %11359 = vmatpush3.msra.mxu0 %v3037_v59 }
 0xbfa   : > { %v11826_v58 = vpop.eup %11825 }
 0xbfb   : > { %v2940_v63 = vmul.f32 %v11826_v58, %v11822_v38 }
 0xbfd   : > { %11355 = vmatprep.mubr.msk.f32.mxu1 %vm1395_vm8, %v2940_v63 }
 0xc1e   : > { %v2911_v60 = vpop.xlane.xlu0 %2910 }
 0xc1f   : > { %v2917_v61 = vsub.f32 %v2901_v55, %v2911_v60 }
 0xc21   : > { %v2923_v7 = vmul.f32 1.442695, %v2917_v61 }
 0xc22   : > { %v2914_v9 = vpop.xlane.xlu0 %2913 }
 0xc23   : > { %11827 = vpow2.f32 %v2923_v7  ;;  %v2918_v10 = vsub.f32 %v2902_v56, %v2914_v9 }
 0xc25   : > { %v2925_v11 = vmul.f32 1.442695, %v2918_v10 }
 0xc26   : > { %v2932_v17 = vpop.xlane.xlu0 %2931 }
 0xc27   : > { %11829 = vpow2.f32 %v2925_v11  ;;  %v3319_v11 = vld [vmem:[%s12244_s14 + $0x38] sm:$0xff] }
 0xc28   : > { %11831 = vrcp.f32 %v2932_v17  ;;  %v3314_v17 = vld [vmem:[%s12244_s14 + $0x10] sm:$0xff] }
 0xc30   : > { %v11828_v12 = vpop.eup %11827 }
 0xc31   : > { %v2933_v13 = vsel %vm1395_vm8, %v11828_v12, 0.0 }
 0xc32   : > { %2934 = vadd.xlane.f32.xlu1 %v2933_v13  ;;  %v3317_v13 = vld [vmem:[%s12244_s14 + $0x28] sm:$0xff] }
 0xc34   : > { %v11830_v15 = vpop.eup %11829 }
 0xc35   : > { %v2936_v16 = vsel %vm1395_vm8, %v11830_v15, 0.0  ;;  %v11832_v22 = vpop.eup %11831 }
 0xc36   : > { %2937 = vadd.xlane.f32.xlu0 %v2936_v16  ;;  %v2942_v24 = vmul.f32 %v11832_v22, %v11824_v6  ;;  %v3315_v16 = vld [vmem:[%s12244_s14 + $0x18] sm:$0xff] }
 0xc43   : > { %3034 = vrot.lane.b32.xlu1 %v12426_v45, %s14084_s0 }
 0xc4c   : > { %2947 = vrot.lane.b32.xlu0 %v12414_v41, %s14084_s0  ;;  %s14107_s0 = sld [smem:[#allocation3_spill]] }
 0xcbb   : > { %v2935_v19 = vpop.xlane.xlu1 %2934 }
 0xcbc   : > { %11833 = vrcp.f32 %v2935_v19  ;;  %v3313_v19 = vld [vmem:[%s12244_s14 + $0x8] sm:$0xff] }
 0xcbf   : > { %v3035_v20 = vpop.permute.xlu1 %3034  ;;  %v2938_v21 = vpop.xlane.xlu0 %2937 }
 0xcc0   : > { %11835 = vrcp.f32 %v2938_v21  ;;  %11360 = vmatprep.subr.mxu0 %v3035_v20 }
 0xcc1   : > { %11361 = vmatpush3.msra.mxu0 %v3035_v20  ;;  %v3312_v20 = vld [vmem:[%s12244_s14] sm:$0xff] }
 0xcc2   : > { %3368 = vmatprep.subr.mxu0 %v3319_v11  ;;  %v3668_v11 = vld [vmem:[%s12254_s24 + $0x98] sm:$0xff] }
 0xcc3   : > { %v2948_v23 = vpop.permute.xlu0 %2947 }
 0xcc4   : > { %11353 = vmatprep.subr.mxu1 %v2948_v23 }
 0xcc5   : > { %11354 = vmatpush3.msra.mxu1 %v2948_v23 }
 0xcc6   : > { %11356 = vmatmul.mubr.msk.f32.vlgmr.msra.gmra.mxu1 %vm1395_vm8, %v2942_v24  ;;  %11365 = vmatprep.subr.mxu1 %v1211_v27 }
 0xcc7   : > { %11366 = vmatpush3.msra.mxu1 %v1211_v27 }
 0xcc9   : > { %v11834_v45 = vpop.eup %11833 }
 0xcca   : > { %v2944_v25 = vmul.f32 %v11834_v45, %v11828_v12  ;;  %v3318_v12 = vld [vmem:[%s12244_s14 + $0x30] sm:$0xff] }
 0xccc   : > { %11362 = vmatprep.mubr.msk.f32.mxu0 %vm1395_vm8, %v2944_v25 }
 0xccd   : > { %v11836_v41 = vpop.eup %11835 }
 0xcce   : > { %v2946_v26 = vmul.f32 %v11836_v41, %v11830_v15  ;;  %v3316_v15 = vld [vmem:[%s12244_s14 + $0x20] sm:$0xff] }
 0xcd0   : > { %11363 = vmatmul.mubr.msk.f32.vlgmr.msra.gmra.mxu0 %vm1395_vm8, %v2946_v26 }
 0xcd1   : > { %3408 = vmatprep.mubr.f32.mxu0 %v12177_v18  ;;  %3369 = vmatpush1.msra.mxu0 %v3318_v12  ;;  %v3652_v12 = vld [vmem:[%s12254_s24 + $0x18] sm:$0xff] }
 0xcd2   : > { %3370 = vmatprep.subr.mxu0 %v3317_v13  ;;  %v3667_v13 = vld [vmem:[%s12254_s24 + $0x90] sm:$0xff] }
 0xcd3   : > { %3371 = vmatpush1.msra.mxu0 %v3316_v15  ;;  %v3651_v15 = vld [vmem:[%s12254_s24 + $0x10] sm:$0xff] }
 0xcd4   : > { %3372 = vmatprep.subr.mxu0 %v3315_v16  ;;  %v3666_v16 = vld [vmem:[%s12254_s24 + $0x88] sm:$0xff] }
 0xcd5   : > { %3373 = vmatpush1.msra.mxu0 %v3314_v17  ;;  %v3650_v17 = vld [vmem:[%s12254_s24 + $0x8] sm:$0xff] }
 0xcd6   : > { %3374 = vmatprep.subr.mxu0 %v3313_v19  ;;  %v3665_v19 = vld [vmem:[%s12254_s24 + $0x80] sm:$0xff] }
 0xcd7   : > { %3375 = vmatpush1.msra.mxu0 %v3312_v20  ;;  %v3649_v20 = vld [vmem:[%s12254_s24] sm:$0xff] }
 0xd86   : > { %v11357_v28 = vpop.f32.mrf.mxu1 }
 0xd88   : > { %v3025_v29 = vpop.f32.mrf.mxu1 }
 0xd89   : > { %11367 = vmatprep.mubr.msk.f32.mxu1 %vm1218_vm7, %v3025_v29 }
 0xd8a   : > { %11368 = vmatmul.mubr.msk.f32.vlgmr.msra.gmra.mxu1 %vm1218_vm7, %v11357_v28 }
 0xd90   : > { %v11364_v30 = vpop.f32.mrf.mxu0 }
 0xd92   : > { %v3112_v33 = vpop.f32.mrf.mxu0 }
 0xd93   : > { %11370 = vmatprep.mubr.msk.f32.mxu1 %vm1218_vm7, %v3112_v33 }
 0xd94   : > { %11371 = vmatmul.mubr.msk.f32.gmra.mxu1 %vm1218_vm7, %v11364_v30 }
 0xe4a   : > { %v11369_v35 = vpop.f32.mrf.mxu1 }
 0xe4b   : > { %v3219_v38 = vadd.f32 %v11369_v35, %v12646_v50 }
 0xe4c   : > { %v3199_v40 = vpop.f32.mrf.mxu1 }
 0xe4d   : > { %v3230_v42 = vadd.f32 %v10376_v37, %v3219_v38  ;;  %v3218_v44 = vadd.f32 %v3199_v40, %v12650_v39  ;;  %v10377_v40 = vld [vmem:[%s12234_s3] ss:$0 sm:$0xff] }
 0xe4f   : > { %v3229_v46 = vadd.f32 %v10376_v37, %v3218_v44  ;;  %v3234_v47 = vadd.f32 %v3230_v42, %v12397_v32  ;;  %v10378_v44 = vld [vmem:[%s12239_s8] ss:$0 sm:$0xff] }
 0xe51   : > { %v3242_v48 = vsel %vm1110_vm6, %v3234_v47, 0.0  ;;  %v3233_v49 = vadd.f32 %v3229_v46, %v12395_v31 }
 0xe52   : > { %3243 = vadd.xlane.f32.xlu1 %v3242_v48 }
 0xe53   : > { %v3239_v51 = vsel %vm1110_vm6, %v3233_v49, 0.0 }
 0xe54   : > { %3240 = vadd.xlane.f32.xlu0 %v3239_v51  ;;  %v11372_v52 = vpop.f32.mrf.mxu1 }
 0xe55   : > { %v3221_v53 = vadd.f32 %v11372_v52, %v12654_v54 }
 0xe56   : > { %v3209_v43 = vpop.f32.mrf.mxu1 }
 0xe57   : > { %v3220_v50 = vadd.f32 %v3209_v43, %v12656_v3  ;;  %v3232_v0 = vadd.f32 %v10376_v37, %v3221_v53 }
 0xe59   : > { %v3231_v1 = vadd.f32 %v10376_v37, %v3220_v50  ;;  %v3236_v5 = vadd.f32 %v3232_v0, %v12401_v34 }
 0xe5b   : > { %v3235_v39 = vadd.f32 %v3231_v1, %v12405_v36  ;;  %v3248_v31 = vsel %vm1110_vm6, %v3236_v5, 0.0 }
 0xe5d   : > { %v3245_v32 = vsel %vm1110_vm6, %v3235_v39, 0.0 }
 0xe5e   : > { %3246 = vadd.xlane.f32.xlu0 %v3245_v32  ;;  %v3664_v32 = vld [vmem:[%s12254_s24 + $0x78] sm:$0xff] }
 0xe62   : > { %3249 = vadd.xlane.f32.xlu0 %v3248_v31  ;;  %v3663_v31 = vld [vmem:[%s12254_s24 + $0x70] sm:$0xff] }
 0xedb   : > { %v3244_v55 = vpop.xlane.xlu1 %3243 }
 0xedc   : > { %v3253_v56 = vmul.f32 0.03125, %v3244_v55  ;;  %v3678_v55 = vld [vmem:[%s12254_s24 + $0xe8] sm:$0xff] }
 0xedd   : > { %v3241_v57 = vpop.xlane.xlu0 %3240 }
 0xede   : > { %v3257_v2 = vsub.f32 %v3234_v47, %v3253_v56  ;;  %v3252_v54 = vmul.f32 0.03125, %v3241_v57  ;;  %v3662_v56 = vld [vmem:[%s12254_s24 + $0x68] sm:$0xff]  ;;  %v3677_v57 = vld [vmem:[%s12254_s24 + $0xe0] sm:$0xff] }
 0xee0   : > { %v3256_v6 = vsub.f32 %v3233_v49, %v3252_v54  ;;  %v3261_v62 = vmul.f32 %v3257_v2, %v3257_v2  ;;  %v3676_v54 = vld [vmem:[%s12254_s24 + $0xd8] sm:$0xff] }
 0xee2   : > { %v3267_v3 = vsel %vm1110_vm6, %v3261_v62, 0.0  ;;  %v3260_v4 = vmul.f32 %v3256_v6, %v3256_v6  ;;  %v3675_v62 = vld [vmem:[%s12254_s24 + $0xd0] sm:$0xff] }
 0xee3   : > { %3268 = vadd.xlane.f32.xlu0 %v3267_v3  ;;  %v3659_v3 = vld [vmem:[%s12254_s24 + $0x50] sm:$0xff] }
 0xee4   : > { %v3264_v36 = vsel %vm1110_vm6, %v3260_v4, 0.0  ;;  %v3674_v4 = vld [vmem:[%s12254_s24 + $0xc8] sm:$0xff] }
 0xee5   : > { %3265 = vadd.xlane.f32.xlu1 %v3264_v36  ;;  %v3658_v36 = vld [vmem:[%s12254_s24 + $0x48] sm:$0xff] }
 0xee7   : > { %v3247_v34 = vpop.xlane.xlu0 %3246 }
 0xee8   : > { %v3254_v8 = vmul.f32 0.03125, %v3247_v34  ;;  %v3673_v34 = vld [vmem:[%s12254_s24 + $0xc0] sm:$0xff] }
 0xeea   : > { %v3258_v59 = vsub.f32 %v3235_v39, %v3254_v8  ;;  %v3680_v39 = vld [vmem:[%s12254_s24 + $0xf8] sm:$0xff]  ;;  %v3657_v8 = vld [vmem:[%s12254_s24 + $0x40] sm:$0xff] }
 0xeeb   : > { %v3250_v58 = vpop.xlane.xlu0 %3249  ;;  %10828 = vmatprep.subr.mxu1 %v3680_v39 }
 0xeec   : > { %v3255_v63 = vmul.f32 0.03125, %v3250_v58  ;;  %v3262_v60 = vmul.f32 %v3258_v59, %v3258_v59  ;;  %10829 = vmatpush3.msra.mxu1 %v3664_v32  ;;  %v3656_v58 = vld [vmem:[%s12254_s24 + $0x38] sm:$0xff] }
 0xeee   : > { %v3259_v61 = vsub.f32 %v3236_v5, %v3255_v63  ;;  %v3270_v7 = vsel %vm1110_vm6, %v3262_v60, 0.0  ;;  %v3679_v5 = vld [vmem:[%s12254_s24 + $0xf0] sm:$0xff] }
 0xeef   : > { %3271 = vadd.xlane.f32.xlu1 %v3270_v7  ;;  %10830 = vmatprep.subr.mxu1 %v3679_v5  ;;  %v3671_v63 = vld [vmem:[%s12254_s24 + $0xb0] sm:$0xff]  ;;  %v3654_v7 = vld [vmem:[%s12254_s24 + $0x28] sm:$0xff] }
 0xef0   : > { %v3263_v9 = vmul.f32 %v3259_v61, %v3259_v61  ;;  %10831 = vmatpush3.msra.mxu1 %v3663_v31  ;;  %v3655_v60 = vld [vmem:[%s12254_s24 + $0x30] sm:$0xff] }
 0xef1   : > { %10832 = vmatprep.subr.mxu1 %v3678_v55 }
 0xef2   : > { %v3273_v10 = vsel %vm1110_vm6, %v3263_v9, 0.0  ;;  %10833 = vmatpush3.msra.mxu1 %v3662_v56  ;;  %v3669_v9 = vld [vmem:[%s12254_s24 + $0xa0] sm:$0xff] }
 0xef3   : > { %3274 = vadd.xlane.f32.xlu0 %v3273_v10  ;;  %10834 = vmatprep.subr.mxu1 %v3677_v57  ;;  %v3653_v10 = vld [vmem:[%s12254_s24 + $0x20] sm:$0xff] }
 0xf6c   : > { %v3269_v21 = vpop.xlane.xlu0 %3268 }
 0xf6d   : > { %v3277_v22 = vmul.f32 0.03125, %v3269_v21  ;;  %v12756_v21 = vshrl.u32 %v963_v14, 7 }
 0xf6e   : > { %v3266_v23 = vpop.xlane.xlu1 %3265 }
 0xf6f   : > { %v3281_v24 = vadd.f32 1e-05, %v3277_v22  ;;  %v3276_v45 = vmul.f32 0.03125, %v3266_v23  ;;  %v12759_v22 = vsub.s32 0, %v12756_v21  ;;  %v3320_v23 = vld [vmem:[%s12249_s19] sm:$0x3] }
 0xf71   : > { %11837 = vrsqrt.f32 %v3281_v24  ;;  %v3280_v25 = vadd.f32 1e-05, %v3276_v45  ;;  %v12763_v24 = vsub.s32 1, %v12756_v21  ;;  %v3325_v45 = vrot.slane %v3320_v23, %v12759_v22 }
 0xf73   : > { %11839 = vrsqrt.f32 %v3280_v25  ;;  %v3329_v25 = vrot.slane %v3320_v23, %v12763_v24 }
 0xf78   : > { %v3272_v41 = vpop.xlane.xlu1 %3271 }
 0xf79   : > { %v3278_v26 = vmul.f32 0.03125, %v3272_v41 }
 0xf7b   : > { %v3282_v27 = vadd.f32 1e-05, %v3278_v26 }
 0xf7c   : > { %v3275_v28 = vpop.xlane.xlu0 %3274 }
 0xf7d   : > { %11841 = vrsqrt.f32 %v3282_v27  ;;  %v3279_v29 = vmul.f32 0.03125, %v3275_v28 }
 0xf7e   : > { %v11838_v30 = vpop.eup %11837 }
 0xf7f   : > { %v3283_v33 = vadd.f32 1e-05, %v3279_v29  ;;  %v3289_v38 = vmul.f32 %v11838_v30, %v3257_v2  ;;  %v3661_v2 = vld [vmem:[%s12254_s24 + $0x60] sm:$0xff] }
 0xf80   : > { %v11840_v35 = vpop.eup %11839  ;;  %10835 = vmatpush3.msra.mxu1 %v3661_v2 }
 0xf81   : > { %11843 = vrsqrt.f32 %v3283_v33  ;;  %v3288_v37 = vmul.f32 %v11840_v35, %v3256_v6  ;;  %v3299_v47 = vmul.f32 %v10377_v40, %v3289_v38  ;;  %10836 = vmatprep.subr.mxu1 %v3676_v54  ;;  %v3660_v6 = vld [vmem:[%s12254_s24 + $0x58] sm:$0xff] }
 0xf82   : > { %10837 = vmatpush3.msra.mxu1 %v3660_v6 }
 0xf83   : > { %v3298_v42 = vmul.f32 %v10377_v40, %v3288_v37  ;;  %v12709_v48 = vadd.f32 %v10378_v44, %v3299_v47  ;;  %10838 = vmatprep.subr.mxu1 %v3675_v62 }
 0xf84   : > { %10839 = vmatpush3.msra.mxu1 %v3659_v3 }
 0xf85   : > { %v12704_v46 = vadd.f32 %v10378_v44, %v3298_v42  ;;  %10840 = vmatprep.subr.mxu1 %v3674_v4 }
 0xf86   : > { %10841 = vmatpush3.msra.mxu1 %v3658_v36 }
 0xf87   : > { %10379 = vmatmul.mubr.msk.f32.vlgmr.msra.gmra.mxu0 %vm1110_vm6, %v12704_v46  ;;  %10842 = vmatprep.subr.mxu1 %v3673_v34 }
 0xf88   : > { %3414 = vmatprep.mubr.f32.mxu0 %v12177_v18  ;;  %10843 = vmatpush3.msra.mxu1 %v3657_v8 }
 0xf8a   : > { %v11842_v49 = vpop.eup %11841 }
 0xf8b   : > { %10380 = vmatmul.mubr.msk.f32.gmra.mxu0 %vm1110_vm6, %v12709_v48  ;;  %v3290_v51 = vmul.f32 %v11842_v49, %v3258_v59  ;;  %v3672_v59 = vld [vmem:[%s12254_s24 + $0xb8] sm:$0xff] }
 0xf8c   : > { %3420 = vmatprep.mubr.f32.mxu0 %v12177_v18  ;;  %10844 = vmatprep.subr.mxu1 %v3672_v59 }
 0xf8d   : > { %v3300_v52 = vmul.f32 %v10377_v40, %v3290_v51  ;;  %10845 = vmatpush3.msra.mxu1 %v3656_v58 }
 0xf8e   : > { %v11844_v53 = vpop.eup %11843  ;;  %10846 = vmatprep.subr.mxu1 %v3671_v63 }
 0xf8f   : > { %v12714_v43 = vadd.f32 %v10378_v44, %v3300_v52  ;;  %v3291_v50 = vmul.f32 %v11844_v53, %v3259_v61  ;;  %10847 = vmatpush3.msra.mxu1 %v3655_v60  ;;  %v3670_v61 = vld [vmem:[%s12254_s24 + $0xa8] sm:$0xff] }
 0xf90   : > { %10848 = vmatprep.subr.mxu1 %v3670_v61 }
 0xf91   : > { %10381 = vmatmul.mubr.msk.f32.gmra.mxu0 %vm1110_vm6, %v12714_v43  ;;  %v3301_v0 = vmul.f32 %v10377_v40, %v3291_v50  ;;  %10849 = vmatpush3.msra.mxu1 %v3654_v7 }
 0xf92   : > { %3426 = vmatprep.mubr.f32.mxu0 %v12177_v18  ;;  %10850 = vmatprep.subr.mxu1 %v3669_v9 }
 0xf93   : > { %v12719_v1 = vadd.f32 %v10378_v44, %v3301_v0  ;;  %10851 = vmatpush3.msra.mxu1 %v3653_v10 }
 0xf94   : > { %10852 = vmatprep.subr.mxu1 %v3668_v11 }
 0xf95   : > { %10382 = vmatmul.mubr.msk.f32.gmra.mxu0 %vm1110_vm6, %v12719_v1  ;;  %10853 = vmatpush3.msra.mxu1 %v3652_v12 }
 0xf96   : > { %10854 = vmatprep.subr.mxu1 %v3667_v13 }
 0xf97   : > { %10855 = vmatpush3.msra.mxu1 %v3651_v15 }
 0xf98   : > { %10856 = vmatprep.subr.mxu1 %v3666_v16 }
 0xf99   : > { %10857 = vmatpush3.msra.mxu1 %v3650_v17 }
 0xf9a   : > { %10858 = vmatprep.subr.mxu1 %v3665_v19 }
 0xf9b   : > { %10859 = vmatpush3.msra.mxu1 %v3649_v20 }
0x1047   : > { %v3410_v41 = vpop.f32.mrf.mxu0 }
0x1048   : > { %v12767_v26 = vadd.f32 %v3410_v41, %v3325_v45 }
0x1049   : > { %v3412_v27 = vpop.f32.mrf.mxu0 }
0x104a   : > { %v12770_v28 = vmul.f32 0.70710677, %v12767_v26  ;;  %v12772_v14 = vadd.f32 %v3412_v27, %v3329_v25 }
0x104b   : > { %v3416_v29 = vpop.f32.mrf.mxu0 }
0x104c   : > { %v3449_v30 = vand.u32 2147483647, %v12770_v28  ;;  %v12776_v33 = vmul.f32 0.70710677, %v12772_v14  ;;  %v12778_v35 = vadd.f32 %v3416_v29, %v3325_v45  ;;  %vm3609_vm9 = vcmp.ge.f32.partialorder %v12770_v28, 0.0 }
0x104d   : > { %v3418_v37 = vpop.f32.mrf.mxu0 }
0x104e   : > { %v3457_v38 = vmul.f32 0.3275911, %v3449_v30  ;;  %v3450_v40 = vand.u32 2147483647, %v12776_v33  ;;  %v12782_v42 = vmul.f32 0.70710677, %v12778_v35  ;;  %v12784_v44 = vadd.f32 %v3418_v37, %v3329_v25 }
0x104f   : > { %v3561_v2 = vsub.f32 0.0, %v3449_v30  ;;  %vm3610_vm10 = vcmp.ge.f32.partialorder %v12776_v33, 0.0 }
0x1050   : > { %v3465_v47 = vadd.f32 1.0, %v3457_v38  ;;  %v3458_v49 = vmul.f32 0.3275911, %v3450_v40  ;;  %v3451_v51 = vand.u32 2147483647, %v12782_v42  ;;  %v3562_v58 = vsub.f32 0.0, %v3450_v40 }
0x1051   : > { %v12788_v52 = vmul.f32 0.70710677, %v12784_v44  ;;  %v3422_v53 = vpop.f32.mrf.mxu0  ;;  %v3569_v34 = vmul.f32 %v3561_v2, %v3449_v30  ;;  %vm3611_vm11 = vcmp.ge.f32.partialorder %v12782_v42, 0.0 }
0x1052   : > { %11845 = vrcp.f32 %v3465_v47  ;;  %v3466_v50 = vadd.f32 1.0, %v3458_v49  ;;  %v3459_v0 = vmul.f32 0.3275911, %v3451_v51  ;;  %v12791_v5 = vadd.f32 %v3422_v53, %v3325_v45 }
0x1053   : > { %v3452_v39 = vand.u32 2147483647, %v12788_v52  ;;  %v3424_v32 = vpop.f32.mrf.mxu0  ;;  %v3563_v7 = vsub.f32 0.0, %v3451_v51  ;;  %v3577_v11 = vmul.f32 1.442695, %v3569_v34  ;;  %v3570_v15 = vmul.f32 %v3562_v58, %v3450_v40 }
0x1054   : > { %v12793_v31 = vadd.f32 %v3424_v32, %v3329_v25  ;;  %11847 = vrcp.f32 %v3466_v50  ;;  %v3467_v55 = vadd.f32 1.0, %v3459_v0  ;;  %v12796_v54 = vmul.f32 0.70710677, %v12791_v5 }
0x1055   : > { %v3460_v56 = vmul.f32 0.3275911, %v3452_v39  ;;  %v3428_v57 = vpop.f32.mrf.mxu0  ;;  %v3564_v16 = vsub.f32 0.0, %v3452_v39  ;;  %v3579_v37 = vmul.f32 1.442695, %v3570_v15  ;;  %vm3612_vm12 = vcmp.ge.f32.partialorder %v12788_v52, 0.0 }
0x1056   : > { %11849 = vrcp.f32 %v3467_v55  ;;  %v3453_v3 = vand.u32 2147483647, %v12796_v54  ;;  %v12800_v4 = vmul.f32 0.70710677, %v12793_v31  ;;  %v12802_v36 = vadd.f32 %v3428_v57, %v3325_v45 }
0x1057   : > { %v3468_v6 = vadd.f32 1.0, %v3460_v56  ;;  %v3430_v62 = vpop.f32.mrf.mxu0  ;;  %v3571_v45 = vmul.f32 %v3563_v7, %v3451_v51  ;;  %v3572_v38 = vmul.f32 %v3564_v16, %v3452_v39  ;;  %vm3613_vm13 = vcmp.ge.f32.partialorder %v12796_v54, 0.0 }
0x1058   : > { %v3461_v8 = vmul.f32 0.3275911, %v3453_v3  ;;  %v12804_v59 = vadd.f32 %v3430_v62, %v3329_v25  ;;  %v3454_v63 = vand.u32 2147483647, %v12800_v4  ;;  %v12808_v60 = vmul.f32 0.70710677, %v12802_v36 }
0x1059   : > { %11851 = vrcp.f32 %v3468_v6  ;;  %v3565_v29 = vsub.f32 0.0, %v3453_v3  ;;  %v3581_v51 = vmul.f32 1.442695, %v3571_v45  ;;  %v3583_v39 = vmul.f32 1.442695, %v3572_v38 }
0x105a   : > { %v3469_v61 = vadd.f32 1.0, %v3461_v8  ;;  %v3462_v9 = vmul.f32 0.3275911, %v3454_v63  ;;  %v3455_v10 = vand.u32 2147483647, %v12808_v60  ;;  %v3566_v53 = vsub.f32 0.0, %v3454_v63 }
0x105b   : > { %v12812_v12 = vmul.f32 0.70710677, %v12804_v59  ;;  %v3573_v56 = vmul.f32 %v3565_v29, %v3453_v3  ;;  %vm3614_vm14 = vcmp.ge.f32.partialorder %v12800_v4, 0.0  ;;  %vm3615_vm15 = vcmp.ge.f32.partialorder %v12808_v60, 0.0  ;;  %v10399_v60 = vld [vmem:[%s12259_s30] ss:$0 sm:$0xff] }
0x105c   : > { %11853 = vrcp.f32 %v3469_v61  ;;  %v3470_v17 = vadd.f32 1.0, %v3462_v9  ;;  %v3463_v19 = vmul.f32 0.3275911, %v3455_v10  ;;  %v3574_v34 = vmul.f32 %v3566_v53, %v3454_v63 }
0x105d   : > { %v3456_v23 = vand.u32 2147483647, %v12812_v12  ;;  %v3567_v58 = vsub.f32 0.0, %v3455_v10  ;;  %v3585_v3 = vmul.f32 1.442695, %v3573_v56  ;;  %vm3616_vm1 = vcmp.ge.f32.partialorder %v12812_v12, 0.0 }
0x105e   : > { %11855 = vrcp.f32 %v3470_v17  ;;  %v3471_v25 = vadd.f32 1.0, %v3463_v19  ;;  %v3587_v63 = vmul.f32 1.442695, %v3574_v34 }
0x105f   : > { %v12814_v13 = vpop.eup %11845  ;;  %v3464_v30 = vmul.f32 0.3275911, %v3456_v23  ;;  %11857 = vpow2.f32 %v3577_v11  ;;  %v3568_v16 = vsub.f32 0.0, %v3456_v23  ;;  %v3575_v29 = vmul.f32 %v3567_v58, %v3455_v10 }
0x1060   : > { %v3489_v20 = vmul.f32 1.0614054, %v12814_v13  ;;  %11859 = vrcp.f32 %v3471_v25 }
0x1061   : > { %v12818_v41 = vpop.eup %11847  ;;  %v3472_v50 = vadd.f32 1.0, %v3464_v30 }
0x1062   : > { %v10383_v27 = vadd.f32 -1.4531521, %v3489_v20  ;;  %v3490_v40 = vmul.f32 1.0614054, %v12818_v41 }
0x1063   : > { %v12821_v47 = vpop.eup %11849  ;;  %11861 = vrcp.f32 %v3472_v50  ;;  %v3576_v50 = vmul.f32 %v3568_v16, %v3456_v23 }
0x1064   : > { %v3505_v49 = vmul.f32 %v12814_v13, %v10383_v27  ;;  %v10384_v0 = vadd.f32 -1.4531521, %v3490_v40  ;;  %v3491_v32 = vmul.f32 1.0614054, %v12821_v47  ;;  %11863 = vpow2.f32 %v3579_v37 }
0x1065   : > { %11865 = vpow2.f32 %v3581_v51  ;;  %v12838_v27 = vmul.f32 0.5, %v12772_v14 }
0x1066   : > { %v3513_v55 = vadd.f32 1.4214138, %v3505_v49  ;;  %v12825_v57 = vpop.eup %11851  ;;  %v3506_v2 = vmul.f32 %v12818_v41, %v10384_v0  ;;  %v10385_v6 = vadd.f32 -1.4531521, %v3491_v32  ;;  %11867 = vpow2.f32 %v3583_v39 }
0x1067   : > { %v3492_v8 = vmul.f32 1.0614054, %v12825_v57  ;;  %11869 = vpow2.f32 %v3585_v3 }
0x1068   : > { %v3521_v62 = vmul.f32 %v12814_v13, %v3513_v55  ;;  %v3514_v61 = vadd.f32 1.4214138, %v3506_v2  ;;  %v3507_v7 = vmul.f32 %v12821_v47, %v10385_v6  ;;  %11871 = vpow2.f32 %v3587_v63 }
0x1069   : > { %v10386_v11 = vadd.f32 -1.4531521, %v3492_v8  ;;  %v12831_v15 = vpop.eup %11853  ;;  %v3589_v2 = vmul.f32 1.442695, %v3575_v29 }
0x106a   : > { %v10391_v9 = vadd.f32 -0.28449672, %v3521_v62  ;;  %v3522_v17 = vmul.f32 %v12818_v41, %v3514_v61  ;;  %v3515_v19 = vadd.f32 1.4214138, %v3507_v7  ;;  %v3493_v25 = vmul.f32 1.0614054, %v12831_v15 }
0x106b   : > { %v3508_v45 = vmul.f32 %v12825_v57, %v10386_v11  ;;  %v12841_v38 = vpop.eup %11855  ;;  %v3591_v7 = vmul.f32 1.442695, %v3576_v50  ;;  %11873 = vpow2.f32 %v3589_v2 }
0x106c   : > { %v3537_v20 = vmul.f32 %v12814_v13, %v10391_v9  ;;  %v10392_v30 = vadd.f32 -0.28449672, %v3522_v17  ;;  %v3523_v37 = vmul.f32 %v12821_v47, %v3515_v19  ;;  %v10387_v53 = vadd.f32 -1.4531521, %v3493_v25  ;;  %v11858_v14 = vpop.eup %11857 }
0x106d   : > { %v3516_v49 = vadd.f32 1.4214138, %v3508_v45  ;;  %v3494_v32 = vmul.f32 1.0614054, %v12841_v38  ;;  %v12849_v39 = vpop.eup %11859  ;;  %11875 = vpow2.f32 %v3591_v7 }
0x106e   : > { %v3545_v40 = vadd.f32 0.2548296, %v3537_v20  ;;  %v3538_v51 = vmul.f32 %v12818_v41, %v10392_v30  ;;  %v10393_v0 = vadd.f32 -0.28449672, %v3523_v37  ;;  %v3509_v56 = vmul.f32 %v12831_v15, %v10387_v53 }
0x106f   : > { %v3524_v55 = vmul.f32 %v12825_v57, %v3516_v49  ;;  %v10388_v23 = vadd.f32 -1.4531521, %v3494_v32  ;;  %v3495_v61 = vmul.f32 1.0614054, %v12849_v39 }
0x1070   : > { %v3553_v10 = vmul.f32 %v12814_v13, %v3545_v40  ;;  %v3546_v6 = vadd.f32 0.2548296, %v3538_v51  ;;  %v3539_v62 = vmul.f32 %v12821_v47, %v10393_v0  ;;  %v3517_v58 = vadd.f32 1.4214138, %v3509_v56  ;;  %v12854_v13 = vpop.eup %11861 }
0x1071   : > { %v10394_v8 = vadd.f32 -0.28449672, %v3524_v55  ;;  %v3510_v11 = vmul.f32 %v12841_v38, %v10388_v23  ;;  %v11864_v16 = vpop.eup %11863  ;;  %v3496_v63 = vmul.f32 1.0614054, %v12854_v13  ;;  %v10389_v30 = vadd.f32 -1.4531521, %v3495_v61 }
0x1072   : > { %v3593_v34 = vmul.f32 %v11858_v14, %v3553_v10  ;;  %v3554_v9 = vmul.f32 %v12818_v41, %v3546_v6  ;;  %v3547_v3 = vadd.f32 0.2548296, %v3539_v62  ;;  %v3525_v20 = vmul.f32 %v12831_v15, %v3517_v58  ;;  %v11866_v37 = vpop.eup %11865 }
0x1073   : > { %v3540_v19 = vmul.f32 %v12825_v57, %v10394_v8  ;;  %v3518_v29 = vadd.f32 1.4214138, %v3510_v11  ;;  %v10390_v0 = vadd.f32 -1.4531521, %v3496_v63  ;;  %v11868_v32 = vpop.eup %11867  ;;  %v3511_v55 = vmul.f32 %v12849_v39, %v10389_v30 }
0x1074   : > { %v3601_v17 = vsub.f32 1.0, %v3593_v34  ;;  %v3594_v45 = vmul.f32 %v11864_v16, %v3554_v9  ;;  %v3555_v25 = vmul.f32 %v12821_v47, %v3547_v3  ;;  %v10395_v49 = vadd.f32 -0.28449672, %v3525_v20  ;;  %v11870_v58 = vpop.eup %11869 }
0x1075   : > { %v3548_v40 = vadd.f32 0.2548296, %v3540_v19  ;;  %v3526_v51 = vmul.f32 %v12841_v38, %v3518_v29  ;;  %v3512_v34 = vmul.f32 %v12854_v13, %v10390_v0  ;;  %v3519_v8 = vadd.f32 1.4214138, %v3511_v55 }
0x1076   : > { %v3617_v41 = vsub.f32 0.0, %v3601_v17  ;;  %v3602_v53 = vsub.f32 1.0, %v3594_v45  ;;  %v3595_v50 = vmul.f32 %v11866_v37, %v3555_v25  ;;  %v3541_v47 = vmul.f32 %v12831_v15, %v10395_v49 }
0x1077   : > { %v3556_v10 = vmul.f32 %v12825_v57, %v3548_v40  ;;  %v10396_v6 = vadd.f32 -0.28449672, %v3526_v51  ;;  %v3520_v16 = vadd.f32 1.4214138, %v3512_v34  ;;  %v3433_v19 = vmul.f32 0.5, %v12767_v26 }
0x1078   : > { %v3625_v14 = vsel %vm3609_vm9, %v3601_v17, %v3617_v41  ;;  %v3618_v56 = vsub.f32 0.0, %v3602_v53  ;;  %v3603_v2 = vsub.f32 1.0, %v3595_v50  ;;  %v3549_v23 = vadd.f32 0.2548296, %v3541_v47  ;;  %v11872_v17 = vpop.eup %11871 }
0x1079   : > { %v3596_v62 = vmul.f32 %v11868_v32, %v3556_v10  ;;  %v3633_v61 = vadd.f32 1.0, %v3625_v14  ;;  %v3542_v57 = vmul.f32 %v12841_v38, %v10396_v6  ;;  %v3527_v45 = vmul.f32 %v12849_v39, %v3519_v8  ;;  %v11874_v0 = vpop.eup %11873 }
0x107a   : > { %v3626_v28 = vsel %vm3610_vm10, %v3602_v53, %v3618_v56  ;;  %v3619_v9 = vsub.f32 0.0, %v3603_v2  ;;  %v3557_v7 = vmul.f32 %v12831_v15, %v3549_v23  ;;  %v3528_v15 = vmul.f32 %v12854_v13, %v3520_v16 }
0x107b   : > { %v3634_v3 = vadd.f32 1.0, %v3626_v28  ;;  %v3604_v11 = vsub.f32 1.0, %v3596_v62  ;;  %v3550_v63 = vadd.f32 0.2548296, %v3542_v57  ;;  %v3641_v30 = vmul.f32 %v3633_v61, %v3433_v19  ;;  %v11876_v62 = vpop.eup %11875 }
0x107c   : > { %v3627_v20 = vsel %vm3611_vm11, %v3603_v2, %v3619_v9  ;;  %v3597_v29 = vmul.f32 %v11870_v58, %v3557_v7  ;;  %v10397_v41 = vadd.f32 -0.28449672, %v3527_v45  ;;  %v3436_v26 = vmul.f32 0.5, %v12784_v44 }
0x107d   : > { %v3642_v33 = vmul.f32 %v3634_v3, %v12838_v27  ;;  %v3620_v25 = vsub.f32 0.0, %v3604_v11  ;;  %v3558_v37 = vmul.f32 %v12841_v38, %v3550_v63  ;;  %v3635_v40 = vadd.f32 1.0, %v3627_v20 }
0x107e   : > { %v3605_v49 = vsub.f32 1.0, %v3597_v29  ;;  %v10398_v52 = vadd.f32 -0.28449672, %v3528_v15  ;;  %v3543_v27 = vmul.f32 %v12849_v39, %v10397_v41  ;;  %v3435_v51 = vmul.f32 0.5, %v12778_v35 }
0x107f   : > { %3752 = vmatprep.mubr.f32.mxu1 %v3642_v33  ;;  %v3628_v42 = vsel %vm3612_vm12, %v3604_v11, %v3620_v25  ;;  %v3598_v50 = vmul.f32 %v11872_v17, %v3558_v37  ;;  %v3438_v8 = vmul.f32 0.5, %v12793_v31  ;;  %v3437_v61 = vmul.f32 0.5, %v12791_v5 }
0x1080   : > { %3753 = vmatmul.mubr.f32.vlgmr.msra.gmra.mxu1 %v3641_v30  ;;  %v3636_v53 = vadd.f32 1.0, %v3628_v42  ;;  %v3621_v38 = vsub.f32 0.0, %v3605_v49  ;;  %v3544_v44 = vmul.f32 %v12854_v13, %v10398_v52  ;;  %v3551_v10 = vadd.f32 0.2548296, %v3543_v27 }
0x1081   : > { %v3606_v14 = vsub.f32 1.0, %v3598_v50  ;;  %v3643_v47 = vmul.f32 %v3635_v40, %v3435_v51  ;;  %v3440_v16 = vmul.f32 0.5, %v12804_v59  ;;  %v3439_v17 = vmul.f32 0.5, %v12802_v36 }
0x1082   : > { %v3644_v32 = vmul.f32 %v3636_v53, %v3436_v26  ;;  %v3629_v55 = vsel %vm3613_vm13, %v3605_v49, %v3621_v38  ;;  %v3552_v2 = vadd.f32 0.2548296, %v3544_v44  ;;  %v3559_v6 = vmul.f32 %v12849_v39, %v3551_v10 }
0x1083   : > { %v3622_v56 = vsub.f32 0.0, %v3606_v14  ;;  %v3637_v54 = vadd.f32 1.0, %v3629_v55 }
0x1084   : > { %3757 = vmatprep.mubr.f32.mxu1 %v3644_v32  ;;  %v3560_v23 = vmul.f32 %v12854_v13, %v3552_v2  ;;  %v3599_v34 = vmul.f32 %v11874_v0, %v3559_v6 }
0x1085   : > { %3758 = vmatmul.mubr.f32.gmra.mxu1 %v3643_v47  ;;  %v3630_v35 = vsel %vm3614_vm14, %v3606_v14, %v3622_v56  ;;  %v3645_v3 = vmul.f32 %v3637_v54, %v3437_v61 }
0x1086   : > { %v3638_v58 = vadd.f32 1.0, %v3630_v35  ;;  %v3600_v28 = vmul.f32 %v11876_v62, %v3560_v23  ;;  %v3607_v9 = vsub.f32 1.0, %v3599_v34 }
0x1088   : > { %v3646_v57 = vmul.f32 %v3638_v58, %v3438_v8  ;;  %v3608_v11 = vsub.f32 1.0, %v3600_v28  ;;  %v3623_v39 = vsub.f32 0.0, %v3607_v9  ;;  %v10405_v28 = vld [vmem:[%s12214_s17 + $0x38] sm:$0xff] }
0x1089   : > { %11373 = vmatprep.subr.mxu0 %v10405_v28 }
0x108a   : > { %3762 = vmatprep.mubr.f32.mxu1 %v3646_v57  ;;  %v3624_v4 = vsub.f32 0.0, %v3608_v11  ;;  %v3631_v7 = vsel %vm3615_vm15, %v3607_v9, %v3623_v39  ;;  %v10404_v9 = vld [vmem:[%s12214_s17 + $0x30] sm:$0xff]  ;;  %11374 = vmatpush3.msra.mxu0 %v10405_v28  ;;  %v10403_v57 = vld [vmem:[%s12214_s17 + $0x28] sm:$0xff] }
0x108b   : > { %3763 = vmatmul.mubr.f32.gmra.mxu1 %v3645_v3  ;;  %v3639_v31 = vadd.f32 1.0, %v3631_v7  ;;  %11375 = vmatprep.subr.mxu0 %v10404_v9  ;;  %v10402_v3 = vld [vmem:[%s12214_s17 + $0x20] sm:$0xff] }
0x108c   : > { %v3632_v13 = vsel %vm3616_vm1, %v3608_v11, %v3624_v4  ;;  %11376 = vmatpush3.msra.mxu0 %v10404_v9 }
0x108d   : > { %v3640_v5 = vadd.f32 1.0, %v3632_v13  ;;  %v3647_v20 = vmul.f32 %v3639_v31, %v3439_v17  ;;  %11377 = vmatprep.subr.mxu0 %v10403_v57 }
0x108e   : > { %11378 = vmatpush3.msra.mxu0 %v10403_v57 }
0x108f   : > { %v3648_v19 = vmul.f32 %v3640_v5, %v3440_v16  ;;  %11379 = vmatprep.subr.mxu0 %v10402_v3 }
0x1090   : > { %11380 = vmatpush3.msra.mxu0 %v10402_v3 }
0x1091   : > { %3767 = vmatprep.mubr.f32.mxu1 %v3648_v19 }
0x1092   : > { %3768 = vmatmul.mubr.f32.gmra.mxu1 %v3647_v20  ;;  %v10400_v20 = vld [vmem:[%s14107_s0] ss:$0 sm:$0xff] }
0x1140   : > { %v10860_v63 = vpop.f32.mrf.mxu1 }
0x1142   : > { %v10861_v45 = vpop.f32.mrf.mxu1 }
0x1143   : > { %v10862_v33 = vadd.f32 %v10861_v45, %v10860_v63  ;;  %v10401_v45 = vld [vmem:[%s14108_s18] ss:$0 sm:$0xff] }
0x1145   : > { %v3755_v25 = vadd.f32 %v10862_v33, %v10399_v60  ;;  %v10863_v29 = vpop.f32.mrf.mxu1 }
0x1147   : > { %v10864_v30 = vpop.f32.mrf.mxu1  ;;  %v3773_v12 = vadd.f32 %v3755_v25, %v12704_v46 }
0x1148   : > { %v10865_v37 = vadd.f32 %v10864_v30, %v10863_v29 }
0x1149   : > { %v3779_v15 = vsel %vm1110_vm6, %v3773_v12, 0.0 }
0x114a   : > { %v3760_v59 = vadd.f32 %v10865_v37, %v10399_v60  ;;  %3780 = vadd.xlane.f32.xlu1 %v3779_v15 }
0x114b   : > { %v10866_v41 = vpop.f32.mrf.mxu1 }
0x114c   : > { %v3774_v36 = vadd.f32 %v3760_v59, %v12709_v48 }
0x114d   : > { %v10867_v26 = vpop.f32.mrf.mxu1 }
0x114e   : > { %v3782_v42 = vsel %vm1110_vm6, %v3774_v36, 0.0  ;;  %v10868_v40 = vadd.f32 %v10867_v26, %v10866_v41 }
0x114f   : > { %3783 = vadd.xlane.f32.xlu0 %v3782_v42 }
0x1150   : > { %v3765_v49 = vadd.f32 %v10868_v40, %v10399_v60 }
0x1152   : > { %v3775_v53 = vadd.f32 %v3765_v49, %v12714_v43  ;;  %v10869_v50 = vpop.f32.mrf.mxu1 }
0x1154   : > { %v3785_v52 = vsel %vm1110_vm6, %v3775_v53, 0.0  ;;  %v10870_v46 = vpop.f32.mrf.mxu1 }
0x1155   : > { %3786 = vadd.xlane.f32.xlu1 %v3785_v52  ;;  %v10871_v27 = vadd.f32 %v10870_v46, %v10869_v50  ;;  %v10407_v52 = vld [vmem:[%s12219_s21 + $0x1] ss:$0 sm:$0xff] }
0x1157   : > { %v3770_v51 = vadd.f32 %v10871_v27, %v10399_v60 }
0x1159   : > { %v3776_v38 = vadd.f32 %v3770_v51, %v12719_v1 }
0x115b   : > { %v3788_v0 = vsel %vm1110_vm6, %v3776_v38, 0.0 }
0x115c   : > { %3789 = vadd.xlane.f32.xlu0 %v3788_v0 }
0x11d3   : > { %v3781_v48 = vpop.xlane.xlu1 %3780 }
0x11d4   : > { %v3791_v32 = vmul.f32 0.03125, %v3781_v48 }
0x11d6   : > { %v3795_v14 = vsub.f32 %v3773_v12, %v3791_v32 }
0x11d8   : > { %v3784_v44 = vpop.xlane.xlu0 %3783  ;;  %v3799_v10 = vmul.f32 %v3795_v14, %v3795_v14 }
0x11d9   : > { %v3792_v47 = vmul.f32 0.03125, %v3784_v44 }
0x11da   : > { %v3803_v43 = vsel %vm1110_vm6, %v3799_v10, 0.0 }
0x11db   : > { %v3796_v55 = vsub.f32 %v3774_v36, %v3792_v47  ;;  %3804 = vadd.xlane.f32.xlu1 %v3803_v43 }
0x11dd   : > { %v3800_v56 = vmul.f32 %v3796_v55, %v3796_v55 }
0x11de   : > { %v3787_v2 = vpop.xlane.xlu1 %3786 }
0x11df   : > { %v3806_v6 = vsel %vm1110_vm6, %v3800_v56, 0.0  ;;  %v3793_v1 = vmul.f32 0.03125, %v3787_v2 }
0x11e0   : > { %3807 = vadd.xlane.f32.xlu0 %v3806_v6 }
0x11e1   : > { %v3797_v62 = vsub.f32 %v3775_v53, %v3793_v1 }
0x11e3   : > { %v3801_v35 = vmul.f32 %v3797_v62, %v3797_v62 }
0x11e5   : > { %v3809_v54 = vsel %vm1110_vm6, %v3801_v35, 0.0  ;;  %v3790_v23 = vpop.xlane.xlu0 %3789 }
0x11e6   : > { %3810 = vadd.xlane.f32.xlu1 %v3809_v54  ;;  %v3794_v34 = vmul.f32 0.03125, %v3790_v23 }
0x11e8   : > { %v3798_v8 = vsub.f32 %v3776_v38, %v3794_v34 }
0x11ea   : > { %v3802_v58 = vmul.f32 %v3798_v8, %v3798_v8 }
0x11ec   : > { %v3812_v61 = vsel %vm1110_vm6, %v3802_v58, 0.0 }
0x11ed   : > { %3813 = vadd.xlane.f32.xlu0 %v3812_v61 }
0x1264   : > { %v3805_v11 = vpop.xlane.xlu1 %3804 }
0x1265   : > { %v3815_v39 = vmul.f32 0.03125, %v3805_v11 }
0x1267   : > { %v3819_v4 = vadd.f32 1e-05, %v3815_v39 }
0x1269   : > { %11877 = vrsqrt.f32 %v3819_v4  ;;  %v3808_v7 = vpop.xlane.xlu0 %3807 }
0x126a   : > { %v3816_v13 = vmul.f32 0.03125, %v3808_v7 }
0x126c   : > { %v3820_v31 = vadd.f32 1e-05, %v3816_v13 }
0x126e   : > { %11879 = vrsqrt.f32 %v3820_v31 }
0x126f   : > { %v3811_v16 = vpop.xlane.xlu1 %3810 }
0x1270   : > { %v3817_v5 = vmul.f32 0.03125, %v3811_v16 }
0x1272   : > { %v3821_v17 = vadd.f32 1e-05, %v3817_v5 }
0x1274   : > { %11881 = vrsqrt.f32 %v3821_v17 }
0x1276   : > { %v11878_v19 = vpop.eup %11877  ;;  %v3814_v60 = vpop.xlane.xlu0 %3813 }
0x1277   : > { %v3827_v63 = vmul.f32 %v11878_v19, %v3795_v14  ;;  %v3818_v33 = vmul.f32 0.03125, %v3814_v60 }
0x1279   : > { %v3837_v25 = vmul.f32 %v10400_v20, %v3827_v63  ;;  %v3822_v30 = vadd.f32 1e-05, %v3818_v33 }
0x127b   : > { %v11880_v29 = vpop.eup %11879  ;;  %v12915_v12 = vadd.f32 %v10401_v45, %v3837_v25  ;;  %11883 = vrsqrt.f32 %v3822_v30 }
0x127c   : > { %v3828_v37 = vmul.f32 %v11880_v29, %v3796_v55 }
0x127d   : > { %11381 = vmatprep.mubr.msk.f32.mxu0 %vm1110_vm6, %v12915_v12 }
0x127e   : > { %v3838_v15 = vmul.f32 %v10400_v20, %v3828_v37 }
0x1280   : > { %v12919_v59 = vadd.f32 %v10401_v45, %v3838_v15 }
0x1281   : > { %v11882_v41 = vpop.eup %11881 }
0x1282   : > { %11382 = vmatmul.mubr.msk.f32.vlgmr.msra.gmra.mxu0 %vm1110_vm6, %v12919_v59  ;;  %v3829_v36 = vmul.f32 %v11882_v41, %v3797_v62 }
0x1284   : > { %v3839_v26 = vmul.f32 %v10400_v20, %v3829_v36 }
0x1286   : > { %v12923_v42 = vadd.f32 %v10401_v45, %v3839_v26 }
0x1288   : > { %11384 = vmatprep.mubr.msk.f32.mxu0 %vm1110_vm6, %v12923_v42  ;;  %v11884_v40 = vpop.eup %11883 }
0x1289   : > { %v3830_v49 = vmul.f32 %v11884_v40, %v3798_v8 }
0x128b   : > { %v3840_v53 = vmul.f32 %v10400_v20, %v3830_v49 }
0x128d   : > { %v12927_v50 = vadd.f32 %v10401_v45, %v3840_v53 }
0x128f   : > { %11385 = vmatmul.mubr.msk.f32.gmra.mxu0 %vm1110_vm6, %v12927_v50 }
0x1342   : > { %v11383_v46 = vpop.f32.mrf.mxu0 }
0x1343   : > { %v12932_v27 = vadd.f32 %v11383_v46, %v10407_v52 }
0x1344   : > { %v3942_v51 = vpop.f32.mrf.mxu0 }
0x1345   : > { %v12934_v38 = vadd.f32 %v10407_v52, %v3942_v51  ;;  %3970 = vrot.lane.b32.xlu1 %v12932_v27, %s12178_s23 }
0x1347   : > { %3968 = vrot.lane.b32.xlu0 %v12934_v38, %s12178_s23  ;;  %11391 = vmatprep.mubr.msk.f32.mxu0 %vm1218_vm7, %v12934_v38 }
0x134f   : > { %v11386_v0 = vpop.f32.mrf.mxu0 }
0x1350   : > { %v12942_v48 = vadd.f32 %v11386_v0, %v10407_v52 }
0x1351   : > { %v3952_v32 = vpop.f32.mrf.mxu0 }
0x1352   : > { %4059 = vrot.lane.b32.xlu1 %v12942_v48, %s12178_s23  ;;  %v12946_v14 = vadd.f32 %v10407_v52, %v3952_v32 }
0x1356   : > { %4057 = vrot.lane.b32.xlu1 %v12946_v14, %s12178_s23 }
0x13b7   : > { %v3971_v44 = vpop.permute.xlu1 %3970 }
0x13b8   : > { %11387 = vmatprep.subr.msk.mxu0 %vm1218_vm7, %v3971_v44 }
0x13b9   : > { %11388 = vmatpush3.xpose.msk.msra.mxu0 %vm1218_vm7, %v3971_v44  ;;  %v3969_v10 = vpop.permute.xlu0 %3968 }
0x13ba   : > { %11389 = vmatprep.subr.msk.mxu0 %vm1218_vm7, %v3969_v10 }
0x13bd   : > { %11390 = vmatpush3.xpose.msk.msra.mxu0 %vm1218_vm7, %v3969_v10 }
0x13c0   : > { %11392 = vmatmul.mubr.msk.f32.vlgmr.msra.gmra.mxu0 %vm1218_vm7, %v12932_v27 }
0x13c1   : > { %11398 = vmatprep.mubr.msk.f32.mxu0 %vm1218_vm7, %v12946_v14 }
0x13c4   : > { %v4060_v47 = vpop.permute.xlu1 %4059 }
0x13c5   : > { %11394 = vmatprep.subr.msk.mxu0 %vm1218_vm7, %v4060_v47 }
0x13c6   : > { %11395 = vmatpush3.xpose.msk.msra.mxu0 %vm1218_vm7, %v4060_v47 }
0x13c8   : > { %v4058_v43 = vpop.permute.xlu1 %4057 }
0x13c9   : > { %11396 = vmatprep.subr.msk.mxu0 %vm1218_vm7, %v4058_v43 }
0x13ca   : > { %11397 = vmatpush3.xpose.msk.msra.mxu0 %vm1218_vm7, %v4058_v43 }
0x13cd   : > { %11399 = vmatmul.mubr.msk.f32.vlgmr.msra.gmra.mxu0 %vm1218_vm7, %v12942_v48 }
0x1480   : > { %v11393_v55 = vpop.f32.mrf.mxu0 }
0x1481   : > { %v4145_v56 = vmul.f32 0.35355338, %v11393_v55 }
0x1482   : > { %v4046_v2 = vpop.f32.mrf.mxu0 }
0x1483   : > { %v4144_v6 = vmul.f32 0.35355338, %v4046_v2  ;;  %v4151_v1 = vsel %vm1395_vm8, %v4145_v56, -inf }
0x1484   : > { %4152 = vmax.xlane.f32.xlu1 %v4151_v1 }
0x1485   : > { %v4148_v62 = vsel %vm1395_vm8, %v4144_v6, -inf }
0x1486   : > { %4149 = vmax.xlane.f32.xlu0 %v4148_v62 }
0x148d   : > { %v11400_v35 = vpop.f32.mrf.mxu0 }
0x148e   : > { %v4147_v34 = vmul.f32 0.35355338, %v11400_v35 }
0x148f   : > { %v4135_v54 = vpop.f32.mrf.mxu0 }
0x1490   : > { %v4146_v23 = vmul.f32 0.35355338, %v4135_v54  ;;  %v4157_v58 = vsel %vm1395_vm8, %v4147_v34, -inf }
0x1492   : > { %v4154_v8 = vsel %vm1395_vm8, %v4146_v23, -inf }
0x1493   : > { %4155 = vmax.xlane.f32.xlu0 %v4154_v8 }
0x1497   : > { %4158 = vmax.xlane.f32.xlu0 %v4157_v58 }
0x150d   : > { %v4153_v61 = vpop.xlane.xlu1 %4152 }
0x150e   : > { %v4161_v28 = vsub.f32 %v4145_v56, %v4153_v61 }
0x150f   : > { %v4150_v9 = vpop.xlane.xlu0 %4149 }
0x1510   : > { %v4166_v57 = vmul.f32 1.442695, %v4161_v28  ;;  %v4160_v3 = vsub.f32 %v4144_v6, %v4150_v9 }
0x1512   : > { %11885 = vpow2.f32 %v4166_v57  ;;  %v4164_v11 = vmul.f32 1.442695, %v4160_v3 }
0x1514   : > { %11887 = vpow2.f32 %v4164_v11 }
0x151c   : > { %v4156_v31 = vpop.xlane.xlu0 %4155 }
0x151d   : > { %v4162_v19 = vsub.f32 %v4146_v23, %v4156_v31 }
0x151f   : > { %v11886_v39 = vpop.eup %11885  ;;  %v4168_v20 = vmul.f32 1.442695, %v4162_v19 }
0x1520   : > { %v4175_v4 = vsel %vm1395_vm8, %v11886_v39, 0.0  ;;  %v4159_v16 = vpop.xlane.xlu0 %4158 }
0x1521   : > { %v11888_v7 = vpop.eup %11887  ;;  %4176 = vadd.xlane.f32.xlu0 %v4175_v4  ;;  %v4163_v5 = vsub.f32 %v4147_v34, %v4159_v16 }
0x1522   : > { %v4172_v13 = vsel %vm1395_vm8, %v11888_v7, 0.0 }
0x1523   : > { %4173 = vadd.xlane.f32.xlu1 %v4172_v13  ;;  %v4170_v17 = vmul.f32 1.442695, %v4163_v5 }
0x1525   : > { %11889 = vpow2.f32 %v4170_v17 }
0x1526   : > { %11891 = vpow2.f32 %v4168_v20 }
0x1532   : > { %v11890_v63 = vpop.eup %11889 }
0x1533   : > { %v4181_v60 = vsel %vm1395_vm8, %v11890_v63, 0.0  ;;  %v11892_v45 = vpop.eup %11891 }
0x1534   : > { %4194 = vrot.lane.b32.xlu1 %v12932_v27, %s12179_s26  ;;  %v4178_v33 = vsel %vm1395_vm8, %v11892_v45, 0.0 }
0x1537   : > { %4192 = vrot.lane.b32.xlu0 %v12934_v38, %s12179_s26 }
0x1538   : > { %4281 = vrot.lane.b32.xlu1 %v12942_v48, %s12179_s26 }
0x153b   : > { %4279 = vrot.lane.b32.xlu0 %v12946_v14, %s12179_s26 }
0x153c   : > { %4372 = vrot.lane.b32.xlu1 %v12932_v27, %s12180_s28 }
0x153f   : > { %4463 = vrot.lane.b32.xlu0 %v12942_v48, %s12180_s28 }
0x1540   : > { %4370 = vrot.lane.b32.xlu1 %v12934_v38, %s12180_s28 }
0x1544   : > { %4366 = vrot.lane.b32.xlu1 %v12934_v38, %s12181_s2 }
0x1548   : > { %4461 = vrot.lane.b32.xlu1 %v12946_v14, %s12180_s28 }
0x155e   : > { %4182 = vadd.xlane.f32.xlu0 %v4181_v60 }
0x156c   : > { %4179 = vadd.xlane.f32.xlu1 %v4178_v33 }
0x1574   : > { %4368 = vrot.lane.b32.xlu0 %v12932_v27, %s12181_s2 }
0x1578   : > { %4457 = vrot.lane.b32.xlu0 %v12946_v14, %s12181_s2 }
0x157d   : > { %4459 = vrot.lane.b32.xlu1 %v12942_v48, %s12181_s2 }
0x15aa   : > { %v4177_v25 = vpop.xlane.xlu0 %4176 }
0x15ab   : > { %11893 = vrcp.f32 %v4177_v25 }
0x15ac   : > { %v4174_v29 = vpop.xlane.xlu1 %4173 }
0x15ad   : > { %11895 = vrcp.f32 %v4174_v29 }
0x15ae   : > { %v4193_v37 = vpop.permute.xlu0 %4192 }
0x15b0   : > { %v4195_v30 = vpop.permute.xlu1 %4194 }
0x15b1   : > { %11401 = vmatprep.subr.mxu0 %v4195_v30 }
0x15b2   : > { %11402 = vmatpush3.msra.mxu0 %v4195_v30  ;;  %v4280_v40 = vpop.permute.xlu0 %4279 }
0x15b3   : > { %11403 = vmatprep.subr.mxu0 %v4193_v37 }
0x15b4   : > { %v4282_v15 = vpop.permute.xlu1 %4281  ;;  %11404 = vmatpush3.msra.mxu0 %v4193_v37 }
0x15b5   : > { %11408 = vmatprep.subr.mxu0 %v4282_v15 }
0x15b6   : > { %v4464_v51 = vpop.permute.xlu0 %4463 }
0x15b8   : > { %v4373_v41 = vpop.permute.xlu1 %4372  ;;  %v11894_v36 = vpop.eup %11893 }
0x15b9   : > { %11415 = vmatprep.subr.msk.mxu1 %vm1218_vm7, %v4373_v41  ;;  %v4187_v52 = vmul.f32 %v11894_v36, %v11886_v39 }
0x15ba   : > { %v11896_v26 = vpop.eup %11895  ;;  %11416 = vmatpush3.xpose.msk.msra.mxu1 %vm1218_vm7, %v4373_v41 }
0x15bb   : > { %v4185_v49 = vmul.f32 %v11896_v26, %v11888_v7  ;;  %v10413_v26 = vld [vmem:[%s12224_s25 + $0x28] sm:$0xff] }
0x15bc   : > { %v4371_v53 = vpop.permute.xlu1 %4370 }
0x15bd   : > { %11405 = vmatprep.mubr.msk.f32.mxu0 %vm1395_vm8, %v4185_v49  ;;  %11417 = vmatprep.subr.msk.mxu1 %vm1218_vm7, %v4371_v53 }
0x15be   : > { %11406 = vmatmul.mubr.msk.f32.vlgmr.msra.gmra.mxu0 %vm1395_vm8, %v4187_v52  ;;  %11418 = vmatpush3.xpose.msk.msra.mxu1 %vm1218_vm7, %v4371_v53 }
0x15bf   : > { %11409 = vmatpush3.msra.mxu0 %v4282_v15 }
0x15c0   : > { %11410 = vmatprep.subr.mxu0 %v4280_v40  ;;  %v4367_v46 = vpop.permute.xlu1 %4366 }
0x15c1   : > { %11411 = vmatpush3.msra.mxu0 %v4280_v40  ;;  %11419 = vmatprep.mubr.msk.f32.mxu1 %vm1218_vm7, %v4367_v46 }
0x15c2   : > { %11422 = vmatprep.subr.msk.mxu0 %vm1218_vm7, %v4464_v51 }
0x15c4   : > { %v4462_v44 = vpop.permute.xlu1 %4461 }
0x15e7   : > { %v4183_v0 = vpop.xlane.xlu0 %4182 }
0x15e8   : > { %11897 = vrcp.f32 %v4183_v0 }
0x15eb   : > { %v4369_v32 = vpop.permute.xlu0 %4368 }
0x15ec   : > { %11420 = vmatmul.mubr.msk.f32.vlgmr.msra.gmra.mxu1 %vm1218_vm7, %v4369_v32 }
0x15ef   : > { %v4458_v2 = vpop.permute.xlu0 %4457 }
0x15f5   : > { %v4180_v10 = vpop.xlane.xlu1 %4179  ;;  %v11898_v47 = vpop.eup %11897 }
0x15f6   : > { %11899 = vrcp.f32 %v4180_v10  ;;  %v4191_v56 = vmul.f32 %v11898_v47, %v11890_v63 }
0x15f9   : > { %v4460_v6 = vpop.permute.xlu1 %4459 }
0x1603   : > { %v11900_v43 = vpop.eup %11899 }
0x1604   : > { %v4189_v55 = vmul.f32 %v11900_v43, %v11892_v45 }
0x1606   : > { %11412 = vmatprep.mubr.msk.f32.mxu0 %vm1395_vm8, %v4189_v55 }
0x1607   : > { %11413 = vmatmul.mubr.msk.f32.vlgmr.msra.gmra.mxu0 %vm1395_vm8, %v4191_v56 }
0x1608   : > { %11423 = vmatpush3.xpose.msk.msra.mxu0 %vm1218_vm7, %v4464_v51  ;;  %11426 = vmatprep.mubr.msk.f32.mxu0 %vm1218_vm7, %v4458_v2  ;;  %v10412_v2 = vld [vmem:[%s12224_s25 + $0x20] sm:$0xff] }
0x1609   : > { %11424 = vmatprep.subr.msk.mxu0 %vm1218_vm7, %v4462_v44 }
0x160c   : > { %11425 = vmatpush3.xpose.msk.msra.mxu0 %vm1218_vm7, %v4462_v44 }
0x160d   : > { %11443 = vmatprep.subr.mxu0 %v10413_v26 }
0x160f   : > { %11427 = vmatmul.mubr.msk.f32.vlgmr.msra.gmra.mxu0 %vm1218_vm7, %v4460_v6 }
0x1610   : > { %11444 = vmatpush3.msra.mxu0 %v10413_v26 }
0x167e   : > { %v13014_v8 = vpop.f32.mrf.mxu0 }
0x1680   : > { %v13016_v58 = vpop.f32.mrf.mxu0 }
0x16ac   : > { %v11421_v1 = vpop.f32.mrf.mxu1 }
0x16ad   : > { %v4549_v62 = vmul.f32 0.35355338, %v11421_v1 }
0x16ae   : > { %v4448_v35 = vpop.f32.mrf.mxu1 }
0x16af   : > { %v4548_v54 = vmul.f32 0.35355338, %v4448_v35  ;;  %v4555_v23 = vsel %vm1395_vm8, %v4549_v62, -inf }
0x16b0   : > { %4556 = vmax.xlane.f32.xlu1 %v4555_v23 }
0x16b1   : > { %v4552_v34 = vsel %vm1395_vm8, %v4548_v54, -inf }
0x16b2   : > { %4553 = vmax.xlane.f32.xlu0 %v4552_v34 }
0x16c7   : > { %v13018_v61 = vpop.f32.mrf.mxu0 }
0x16c9   : > { %v13020_v28 = vpop.f32.mrf.mxu0 }
0x16cf   : > { %v11428_v9 = vpop.f32.mrf.mxu0 }
0x16d0   : > { %v4551_v11 = vmul.f32 0.35355338, %v11428_v9 }
0x16d1   : > { %v4539_v57 = vpop.f32.mrf.mxu0 }
0x16d2   : > { %v4550_v3 = vmul.f32 0.35355338, %v4539_v57  ;;  %v4561_v4 = vsel %vm1395_vm8, %v4551_v11, -inf }
0x16d4   : > { %v4558_v39 = vsel %vm1395_vm8, %v4550_v3, -inf }
0x16d5   : > { %4559 = vmax.xlane.f32.xlu0 %v4558_v39 }
0x16d9   : > { %4562 = vmax.xlane.f32.xlu0 %v4561_v4 }
0x1739   : > { %v4557_v7 = vpop.xlane.xlu1 %4556 }
0x173a   : > { %v4565_v13 = vsub.f32 %v4549_v62, %v4557_v7 }
0x173b   : > { %v4554_v31 = vpop.xlane.xlu0 %4553 }
0x173c   : > { %v4570_v16 = vmul.f32 1.442695, %v4565_v13  ;;  %v4564_v5 = vsub.f32 %v4548_v54, %v4554_v31 }
0x173e   : > { %11901 = vpow2.f32 %v4570_v16  ;;  %v4568_v17 = vmul.f32 1.442695, %v4564_v5 }
0x1740   : > { %11903 = vpow2.f32 %v4568_v17 }
0x174b   : > { %v11902_v19 = vpop.eup %11901 }
0x174c   : > { %v4579_v20 = vsel %vm1395_vm8, %v11902_v19, 0.0 }
0x174d   : > { %v11904_v63 = vpop.eup %11903  ;;  %4580 = vadd.xlane.f32.xlu0 %v4579_v20 }
0x174e   : > { %v4576_v60 = vsel %vm1395_vm8, %v11904_v63, 0.0 }
0x174f   : > { %4577 = vadd.xlane.f32.xlu1 %v4576_v60 }
0x175e   : > { %v4560_v45 = vpop.xlane.xlu0 %4559 }
0x175f   : > { %v4566_v30 = vsub.f32 %v4550_v3, %v4560_v45 }
0x1760   : > { %4598 = vrot.lane.b32.xlu1 %v12932_v27, %s12182_s27 }
0x1761   : > { %v4572_v37 = vmul.f32 1.442695, %v4566_v30 }
0x1762   : > { %v4563_v33 = vpop.xlane.xlu0 %4562 }
0x1763   : > { %v4567_v25 = vsub.f32 %v4551_v11, %v4563_v33 }
0x1764   : > { %4685 = vrot.lane.b32.xlu1 %v12942_v48, %s12182_s27 }
0x1765   : > { %v4574_v29 = vmul.f32 1.442695, %v4567_v25 }
0x1767   : > { %11905 = vpow2.f32 %v4574_v29 }
0x1768   : > { %11907 = vpow2.f32 %v4572_v37 }
0x1774   : > { %v11906_v15 = vpop.eup %11905 }
0x1775   : > { %v4585_v41 = vsel %vm1395_vm8, %v11906_v15, 0.0  ;;  %v11908_v36 = vpop.eup %11907 }
0x1776   : > { %4586 = vadd.xlane.f32.xlu0 %v4585_v41  ;;  %v4582_v40 = vsel %vm1395_vm8, %v11908_v36, 0.0 }
0x1788   : > { %4583 = vadd.xlane.f32.xlu1 %v4582_v40 }
0x178c   : > { %4596 = vrot.lane.b32.xlu0 %v12934_v38, %s12182_s27 }
0x1790   : > { %4970 = vrot.lane.b32.xlu0 %v12932_v27, %s14090_s7 }
0x1794   : > { %5061 = vrot.lane.b32.xlu0 %v12942_v48, %s14090_s7 }
0x1798   : > { %4966 = vrot.lane.b32.xlu0 %v12932_v27, %s14088_s11 }
0x1799   : > { %4683 = vrot.lane.b32.xlu1 %v12946_v14, %s12182_s27 }
0x179c   : > { %5055 = vrot.lane.b32.xlu0 %v12946_v14, %s14088_s11 }
0x179d   : > { %4968 = vrot.lane.b32.xlu1 %v12934_v38, %s14090_s7 }
0x17a1   : > { %4964 = vrot.lane.b32.xlu1 %v12934_v38, %s14088_s11 }
0x17a5   : > { %5059 = vrot.lane.b32.xlu1 %v12946_v14, %s14090_s7  ;;  %s14110_s7 = smov 104  }
0x17a9   : > { %5057 = vrot.lane.b32.xlu1 %v12942_v48, %s14088_s11  ;;  %s14109_s11 = smov 72  }
0x17d6   : > { %v4581_v51 = vpop.xlane.xlu0 %4580 }
0x17d8   : > { %v4578_v49 = vpop.xlane.xlu1 %4577 }
0x17d9   : > { %11909 = vrcp.f32 %v4578_v49 }
0x17da   : > { %11911 = vrcp.f32 %v4581_v51 }
0x17dc   : > { %v4599_v53 = vpop.permute.xlu1 %4598 }
0x17dd   : > { %11429 = vmatprep.subr.mxu1 %v4599_v53 }
0x17de   : > { %11430 = vmatpush3.msra.mxu1 %v4599_v53 }
0x17e0   : > { %v4686_v47 = vpop.permute.xlu1 %4685 }
0x17e6   : > { %v11910_v52 = vpop.eup %11909 }
0x17e7   : > { %v4589_v46 = vmul.f32 %v11910_v52, %v11904_v63  ;;  %v11912_v32 = vpop.eup %11911 }
0x17e8   : > { %v4591_v10 = vmul.f32 %v11912_v32, %v11902_v19 }
0x17e9   : > { %11433 = vmatprep.mubr.msk.f32.mxu1 %vm1395_vm8, %v4589_v46 }
0x17ff   : > { %v4587_v0 = vpop.xlane.xlu0 %4586 }
0x1800   : > { %11913 = vrcp.f32 %v4587_v0 }
0x1803   : > { %v4597_v44 = vpop.permute.xlu0 %4596 }
0x1804   : > { %11431 = vmatprep.subr.mxu1 %v4597_v44 }
0x1805   : > { %11432 = vmatpush3.msra.mxu1 %v4597_v44 }
0x1806   : > { %11434 = vmatmul.mubr.msk.f32.vlgmr.msra.gmra.mxu1 %vm1395_vm8, %v4591_v10  ;;  %11436 = vmatprep.subr.mxu1 %v4686_v47 }
0x1807   : > { %11437 = vmatpush3.msra.mxu1 %v4686_v47  ;;  %v4971_v43 = vpop.permute.xlu0 %4970 }
0x1808   : > { %11459 = vmatprep.subr.msk.mxu0 %vm1218_vm7, %v4971_v43 }
0x180b   : > { %v5062_v35 = vpop.permute.xlu0 %5061 }
0x180d   : > { %v11914_v1 = vpop.eup %11913 }
0x180e   : > { %v4595_v23 = vmul.f32 %v11914_v1, %v11906_v15 }
0x180f   : > { %v4967_v9 = vpop.permute.xlu0 %4966 }
0x1811   : > { %v4584_v55 = vpop.xlane.xlu1 %4583 }
0x1812   : > { %11915 = vrcp.f32 %v4584_v55 }
0x1813   : > { %v5056_v3 = vpop.permute.xlu0 %5055 }
0x1815   : > { %v4684_v56 = vpop.permute.xlu1 %4683 }
0x1816   : > { %11438 = vmatprep.subr.mxu1 %v4684_v56 }
0x1817   : > { %11439 = vmatpush3.msra.mxu1 %v4684_v56 }
0x1818   : > { %11451 = vmatprep.subr.mxu1 %v10412_v2 }
0x1819   : > { %v4969_v6 = vpop.permute.xlu1 %4968 }
0x181d   : > { %v4965_v34 = vpop.permute.xlu1 %4964 }
0x181f   : > { %v11916_v62 = vpop.eup %11915 }
0x1820   : > { %v4593_v54 = vmul.f32 %v11916_v62, %v11908_v36 }
0x1821   : > { %v5060_v57 = vpop.permute.xlu1 %5059 }
0x1822   : > { %11440 = vmatprep.mubr.msk.f32.mxu1 %vm1395_vm8, %v4593_v54 }
0x1823   : > { %11441 = vmatmul.mubr.msk.f32.vlgmr.msra.gmra.mxu1 %vm1395_vm8, %v4595_v23 }
0x1824   : > { %11452 = vmatpush3.msra.mxu1 %v10412_v2  ;;  %11453 = vmatprep.mubr.msk.f32.mxu1 %vm1218_vm7, %v13016_v58 }
0x1825   : > { %11466 = vmatprep.subr.msk.mxu1 %vm1218_vm7, %v5062_v35  ;;  %v5058_v58 = vpop.permute.xlu1 %5057 }
0x1827   : > { %11454 = vmatmul.mubr.msk.f32.vlgmr.msra.gmra.mxu1 %vm1218_vm7, %v13014_v8 }
0x1828   : > { %11467 = vmatpush3.xpose.msk.msra.mxu1 %vm1218_vm7, %v5062_v35  ;;  %11456 = vmatprep.mubr.msk.f32.mxu1 %vm1218_vm7, %v13020_v28 }
0x1829   : > { %11468 = vmatprep.subr.msk.mxu1 %vm1218_vm7, %v5060_v57 }
0x182b   : > { %11457 = vmatmul.mubr.msk.f32.gmra.mxu1 %vm1218_vm7, %v13018_v61 }
0x182c   : > { %11469 = vmatpush3.xpose.msk.msra.mxu1 %vm1218_vm7, %v5060_v57  ;;  %11470 = vmatprep.mubr.msk.f32.mxu1 %vm1218_vm7, %v5056_v3  ;;  %v10414_v3 = vld [vmem:[%s12224_s25 + $0x30] sm:$0xff] }
0x182f   : > { %11471 = vmatmul.mubr.msk.f32.vlgmr.msra.gmra.mxu1 %vm1218_vm7, %v5058_v58 }
0x18c6   : > { %v11435_v8 = vpop.f32.mrf.mxu1 }
0x18c8   : > { %v4674_v11 = vpop.f32.mrf.mxu1 }
0x18c9   : > { %11445 = vmatprep.mubr.msk.f32.mxu0 %vm1218_vm7, %v4674_v11 }
0x18ca   : > { %11446 = vmatmul.mubr.msk.f32.vlgmr.msra.gmra.mxu0 %vm1218_vm7, %v11435_v8 }
0x18cb   : > { %11460 = vmatpush3.xpose.msk.msra.mxu0 %vm1218_vm7, %v4971_v43 }
0x18cc   : > { %11461 = vmatprep.subr.msk.mxu0 %vm1218_vm7, %v4969_v6 }
0x18cf   : > { %11462 = vmatpush3.xpose.msk.msra.mxu0 %vm1218_vm7, %v4969_v6 }
0x18e3   : > { %v11442_v61 = vpop.f32.mrf.mxu1 }
0x18e5   : > { %v4761_v28 = vpop.f32.mrf.mxu1 }
0x18e6   : > { %11448 = vmatprep.mubr.msk.f32.mxu0 %vm1218_vm7, %v4761_v28 }
0x18e7   : > { %11449 = vmatmul.mubr.msk.f32.gmra.mxu0 %vm1218_vm7, %v11442_v61  ;;  %v13082_v39 = vpop.f32.mrf.mxu1 }
0x18e8   : > { %11463 = vmatprep.mubr.msk.f32.mxu0 %vm1218_vm7, %v4965_v34 }
0x18e9   : > { %v13084_v4 = vpop.f32.mrf.mxu1 }
0x18eb   : > { %11464 = vmatmul.mubr.msk.f32.vlgmr.msra.gmra.mxu0 %vm1218_vm7, %v4967_v9  ;;  %v13086_v7 = vpop.f32.mrf.mxu1 }
0x18ed   : > { %v13090_v31 = vpop.f32.mrf.mxu1 }
0x18ef   : > { %v11472_v17 = vpop.f32.mrf.mxu1 }
0x18f0   : > { %v5149_v37 = vmul.f32 0.35355338, %v11472_v17 }
0x18f1   : > { %v5137_v60 = vpop.f32.mrf.mxu1 }
0x18f2   : > { %v5148_v29 = vmul.f32 0.35355338, %v5137_v60  ;;  %v5159_v41 = vsel %vm1395_vm8, %v5149_v37, -inf }
0x18f4   : > { %v5156_v15 = vsel %vm1395_vm8, %v5148_v29, -inf }
0x198a   : > { %v13088_v13 = vpop.f32.mrf.mxu0 }
0x198c   : > { %v13092_v16 = vpop.f32.mrf.mxu0 }
0x19a7   : > { %v13094_v5 = vpop.f32.mrf.mxu0 }
0x19a9   : > { %v13096_v19 = vpop.f32.mrf.mxu0 }
0x19ab   : > { %v11465_v20 = vpop.f32.mrf.mxu0 }
0x19ac   : > { %v5147_v63 = vmul.f32 0.35355338, %v11465_v20 }
0x19ad   : > { %v5046_v45 = vpop.f32.mrf.mxu0 }
0x19ae   : > { %v5146_v33 = vmul.f32 0.35355338, %v5046_v45  ;;  %v5153_v25 = vsel %vm1395_vm8, %v5147_v63, -inf }
0x19af   : > { %5154 = vmax.xlane.f32.xlu1 %v5153_v25 }
0x19b0   : > { %v5150_v30 = vsel %vm1395_vm8, %v5146_v33, -inf }
0x19b1   : > { %5151 = vmax.xlane.f32.xlu0 %v5150_v30 }
0x19b5   : > { %5157 = vmax.xlane.f32.xlu0 %v5156_v15 }
0x19b9   : > { %5160 = vmax.xlane.f32.xlu0 %v5159_v41 }
0x1a38   : > { %v5155_v26 = vpop.xlane.xlu1 %5154 }
0x1a39   : > { %v5163_v53 = vsub.f32 %v5147_v63, %v5155_v26 }
0x1a3a   : > { %v5152_v36 = vpop.xlane.xlu0 %5151 }
0x1a3b   : > { %v5168_v0 = vmul.f32 1.442695, %v5163_v53  ;;  %v5162_v2 = vsub.f32 %v5146_v33, %v5152_v36 }
0x1a3d   : > { %v5166_v6 = vmul.f32 1.442695, %v5162_v2 }
0x1a3e   : > { %v5158_v40 = vpop.xlane.xlu0 %5157 }
0x1a3f   : > { %v5164_v49 = vsub.f32 %v5148_v29, %v5158_v40 }
0x1a41   : > { %v5170_v52 = vmul.f32 1.442695, %v5164_v49 }
0x1a42   : > { %v5161_v46 = vpop.xlane.xlu0 %5160 }
0x1a43   : > { %11917 = vpow2.f32 %v5170_v52  ;;  %v5165_v51 = vsub.f32 %v5149_v37, %v5161_v46 }
0x1a45   : > { %v5172_v32 = vmul.f32 1.442695, %v5165_v51 }
0x1a47   : > { %11919 = vpow2.f32 %v5172_v32 }
0x1a48   : > { %11921 = vpow2.f32 %v5168_v0 }
0x1a49   : > { %11923 = vpow2.f32 %v5166_v6 }
0x1a50   : > { %v11918_v44 = vpop.eup %11917 }
0x1a51   : > { %v5180_v10 = vsel %vm1395_vm8, %v11918_v44, 0.0 }
0x1a52   : > { %5181 = vadd.xlane.f32.xlu1 %v5180_v10 }
0x1a54   : > { %v11920_v47 = vpop.eup %11919 }
0x1a55   : > { %v5183_v43 = vsel %vm1395_vm8, %v11920_v47, 0.0  ;;  %v13104_v55 = vpop.eup %11921 }
0x1a56   : > { %5184 = vadd.xlane.f32.xlu0 %v5183_v43  ;;  %v5177_v56 = vsel %vm1395_vm8, %v13104_v55, 0.0  ;;  %v11924_v1 = vpop.eup %11923 }
0x1a57   : > { %v5174_v62 = vsel %vm1395_vm8, %v11924_v1, 0.0 }
0x1a5a   : > { %5178 = vadd.xlane.f32.xlu0 %v5177_v56 }
0x1a63   : > { %5196 = vrot.lane.b32.xlu1 %v12932_v27, %s14092_s16 }
0x1a67   : > { %5283 = vrot.lane.b32.xlu1 %v12942_v48, %s14092_s16 }
0x1a70   : > { %5194 = vrot.lane.b32.xlu0 %v12934_v38, %s14092_s16 }
0x1a74   : > { %5475 = vrot.lane.b32.xlu0 %v12932_v27, %s14109_s11 }
0x1a78   : > { %5469 = vrot.lane.b32.xlu0 %v12934_v38, %s14110_s7 }
0x1a7c   : > { %5566 = vrot.lane.b32.xlu0 %v12942_v48, %s14109_s11 }
0x1a80   : > { %5560 = vrot.lane.b32.xlu0 %v12946_v14, %s14110_s7 }
0x1a8b   : > { %5175 = vadd.xlane.f32.xlu1 %v5174_v62 }
0x1a9c   : > { %5281 = vrot.lane.b32.xlu1 %v12946_v14, %s14092_s16  ;;  %s14111_s16 = smov 40  }
0x1aa0   : > { %5473 = vrot.lane.b32.xlu1 %v12934_v38, %s14109_s11 }
0x1aa4   : > { %5471 = vrot.lane.b32.xlu1 %v12932_v27, %s14110_s7 }
0x1aa8   : > { %5564 = vrot.lane.b32.xlu1 %v12946_v14, %s14109_s11 }
0x1aac   : > { %5562 = vrot.lane.b32.xlu1 %v12942_v48, %s14110_s7 }
0x1adb   : > { %v5182_v35 = vpop.xlane.xlu1 %5181 }
0x1adc   : > { %11925 = vrcp.f32 %v5182_v35  ;;  %v4946_v35 = vadd.f32 %v13084_v4, %v13092_v16 }
0x1adf   : > { %v5197_v54 = vpop.permute.xlu1 %5196  ;;  %v5185_v23 = vpop.xlane.xlu0 %5184 }
0x1ae0   : > { %11473 = vmatprep.subr.mxu0 %v5197_v54  ;;  %11927 = vrcp.f32 %v5185_v23 }
0x1ae1   : > { %11474 = vmatpush3.msra.mxu0 %v5197_v54 }
0x1ae3   : > { %v5284_v34 = vpop.permute.xlu1 %5283  ;;  %v5179_v9 = vpop.xlane.xlu0 %5178 }
0x1ae4   : > { %11480 = vmatprep.subr.mxu1 %v5284_v34  ;;  %11929 = vrcp.f32 %v5179_v9  ;;  %v4961_v9 = vadd.f32 %v13086_v7, %v13094_v5 }
0x1ae5   : > { %11481 = vmatpush3.msra.mxu1 %v5284_v34 }
0x1ae7   : > { %v5195_v57 = vpop.permute.xlu0 %5194 }
0x1ae8   : > { %11475 = vmatprep.subr.mxu0 %v5195_v57 }
0x1ae9   : > { %v11926_v58 = vpop.eup %11925  ;;  %11476 = vmatpush3.msra.mxu0 %v5195_v57 }
0x1aea   : > { %v5191_v8 = vmul.f32 %v11926_v58, %v11918_v44  ;;  %11487 = vmatprep.subr.mxu0 %v10414_v3 }
0x1aeb   : > { %v5476_v61 = vpop.permute.xlu0 %5475 }
0x1aec   : > { %11484 = vmatprep.mubr.msk.f32.mxu1 %vm1395_vm8, %v5191_v8 }
0x1aed   : > { %v11928_v28 = vpop.eup %11927 }
0x1aee   : > { %v5193_v20 = vmul.f32 %v11928_v28, %v11920_v47 }
0x1aef   : > { %v5470_v63 = vpop.permute.xlu0 %5469 }
0x1af1   : > { %v11930_v45 = vpop.eup %11929 }
0x1af2   : > { %v5189_v30 = vmul.f32 %v11930_v45, %v13104_v55 }
0x1af3   : > { %v5567_v37 = vpop.permute.xlu0 %5566 }
0x1af7   : > { %v5561_v32 = vpop.permute.xlu0 %5560 }
0x1b14   : > { %v5176_v11 = vpop.xlane.xlu1 %5175 }
0x1b15   : > { %11931 = vrcp.f32 %v5176_v11 }
0x1b18   : > { %v5282_v17 = vpop.permute.xlu1 %5281 }
0x1b19   : > { %11482 = vmatprep.subr.mxu1 %v5282_v17 }
0x1b1a   : > { %11483 = vmatpush3.msra.mxu1 %v5282_v17 }
0x1b1b   : > { %11485 = vmatmul.mubr.msk.f32.vlgmr.msra.gmra.mxu1 %vm1395_vm8, %v5193_v20  ;;  %11495 = vmatprep.subr.msk.mxu1 %vm1218_vm7, %v5476_v61 }
0x1b1c   : > { %v5474_v60 = vpop.permute.xlu1 %5473  ;;  %11496 = vmatpush3.xpose.msk.msra.mxu1 %vm1218_vm7, %v5476_v61  ;;  %11499 = vmatprep.mubr.msk.f32.mxu1 %vm1218_vm7, %v5470_v63 }
0x1b1d   : > { %11497 = vmatprep.subr.msk.mxu1 %vm1218_vm7, %v5474_v60 }
0x1b20   : > { %11498 = vmatpush3.xpose.msk.msra.mxu1 %vm1218_vm7, %v5474_v60  ;;  %v5472_v25 = vpop.permute.xlu1 %5471 }
0x1b22   : > { %v11932_v33 = vpop.eup %11931 }
0x1b23   : > { %11500 = vmatmul.mubr.msk.f32.vlgmr.msra.gmra.mxu1 %vm1218_vm7, %v5472_v25  ;;  %v5187_v29 = vmul.f32 %v11932_v33, %v11924_v1  ;;  %v4951_v1 = vadd.f32 %v13082_v39, %v13088_v13 }
0x1b24   : > { %v5565_v0 = vpop.permute.xlu1 %5564 }
0x1b25   : > { %11477 = vmatprep.mubr.msk.f32.mxu0 %vm1395_vm8, %v5187_v29 }
0x1b26   : > { %11478 = vmatmul.mubr.msk.f32.vlgmr.msra.gmra.mxu0 %vm1395_vm8, %v5189_v30 }
0x1b27   : > { %11488 = vmatpush3.msra.mxu0 %v10414_v3 }
0x1b28   : > { %11502 = vmatprep.subr.msk.mxu0 %vm1218_vm7, %v5567_v37  ;;  %v5563_v44 = vpop.permute.xlu1 %5562 }
0x1bdb   : > { %v11486_v15 = vpop.f32.mrf.mxu1 }
0x1bdd   : > { %v5359_v41 = vpop.f32.mrf.mxu1 }
0x1be3   : > { %v11501_v36 = vpop.f32.mrf.mxu1 }
0x1be4   : > { %v5652_v26 = vmul.f32 0.35355338, %v11501_v36 }
0x1be5   : > { %v5551_v40 = vpop.f32.mrf.mxu1 }
0x1be6   : > { %v5651_v49 = vmul.f32 0.35355338, %v5551_v40  ;;  %v11479_v53 = vpop.f32.mrf.mxu0  ;;  %v5658_v52 = vsel %vm1395_vm8, %v5652_v26, -inf }
0x1be7   : > { %5659 = vmax.xlane.f32.xlu1 %v5658_v52 }
0x1be8   : > { %v5272_v46 = vpop.f32.mrf.mxu0  ;;  %v5655_v51 = vsel %vm1395_vm8, %v5651_v49, -inf }
0x1be9   : > { %11489 = vmatprep.mubr.msk.f32.mxu0 %vm1218_vm7, %v5272_v46  ;;  %5656 = vmax.xlane.f32.xlu0 %v5655_v51 }
0x1bea   : > { %11490 = vmatmul.mubr.msk.f32.vlgmr.msra.gmra.mxu0 %vm1218_vm7, %v11479_v53 }
0x1beb   : > { %11503 = vmatpush3.xpose.msk.msra.mxu0 %vm1218_vm7, %v5567_v37  ;;  %11492 = vmatprep.mubr.msk.f32.mxu0 %vm1218_vm7, %v5359_v41 }
0x1bec   : > { %11504 = vmatprep.subr.msk.mxu0 %vm1218_vm7, %v5565_v0 }
0x1bee   : > { %11493 = vmatmul.mubr.msk.f32.gmra.mxu0 %vm1218_vm7, %v11486_v15 }
0x1bef   : > { %11505 = vmatpush3.xpose.msk.msra.mxu0 %vm1218_vm7, %v5565_v0  ;;  %11506 = vmatprep.mubr.msk.f32.mxu0 %vm1218_vm7, %v5561_v32  ;;  %v10415_v32 = vld [vmem:[%s12224_s25 + $0x38] sm:$0xff] }
0x1bf2   : > { %11507 = vmatmul.mubr.msk.f32.vlgmr.msra.gmra.mxu0 %vm1218_vm7, %v5563_v44 }
0x1c70   : > { %v5660_v2 = vpop.xlane.xlu1 %5659 }
0x1c71   : > { %v5668_v6 = vsub.f32 %v5652_v26, %v5660_v2 }
0x1c72   : > { %v5657_v10 = vpop.xlane.xlu0 %5656 }
0x1c73   : > { %v5667_v47 = vsub.f32 %v5651_v49, %v5657_v10  ;;  %v5673_v54 = vmul.f32 1.442695, %v5668_v6 }
0x1c75   : > { %v5671_v43 = vmul.f32 1.442695, %v5667_v47 }
0x1c77   : > { %11933 = vpow2.f32 %v5671_v43 }
0x1c78   : > { %11935 = vpow2.f32 %v5673_v54 }
0x1c84   : > { %v11934_v55 = vpop.eup %11933 }
0x1c85   : > { %v5679_v56 = vsel %vm1395_vm8, %v11934_v55, 0.0  ;;  %v11936_v5 = vpop.eup %11935 }
0x1c86   : > { %5680 = vadd.xlane.f32.xlu1 %v5679_v56  ;;  %v5682_v61 = vsel %vm1395_vm8, %v11936_v5, 0.0  ;;  %v10481_v56 = vld [vmem:[%s12229_s29 + $0x1] ss:$0 sm:$0xff] }
0x1c97   : > { %5701 = vrot.lane.b32.xlu1 %v12932_v27, %s14111_s16 }
0x1c9b   : > { %5788 = vrot.lane.b32.xlu1 %v12942_v48, %s14111_s16  ;;  %v4956_v48 = vadd.f32 %v13090_v31, %v13096_v19 }
0x1caa   : > { %v11491_v62 = vpop.f32.mrf.mxu0 }
0x1cab   : > { %v13166_v23 = vadd.f32 %v11491_v62, %v4951_v1 }
0x1cac   : > { %v5446_v34 = vpop.f32.mrf.mxu0 }
0x1cad   : > { %v13170_v27 = vadd.f32 %v5446_v34, %v4946_v35 }
0x1cae   : > { %v11494_v57 = vpop.f32.mrf.mxu0 }
0x1caf   : > { %v13174_v3 = vadd.f32 %v11494_v57, %v4961_v9 }
0x1cb0   : > { %v5456_v39 = vpop.f32.mrf.mxu0 }
0x1cb1   : > { %v13176_v13 = vadd.f32 %v5456_v39, %v4956_v48 }
0x1cb2   : > { %v11508_v4 = vpop.f32.mrf.mxu0 }
0x1cb3   : > { %v5654_v8 = vmul.f32 0.35355338, %v11508_v4 }
0x1cb4   : > { %v5642_v16 = vpop.f32.mrf.mxu0 }
0x1cb5   : > { %v5653_v58 = vmul.f32 0.35355338, %v5642_v16  ;;  %v5664_v7 = vsel %vm1395_vm8, %v5654_v8, -inf }
0x1cb7   : > { %v5661_v11 = vsel %vm1395_vm8, %v5653_v58, -inf }
0x1cb8   : > { %5662 = vmax.xlane.f32.xlu0 %v5661_v11 }
0x1cbc   : > { %5665 = vmax.xlane.f32.xlu0 %v5664_v7 }
0x1cc0   : > { %5683 = vadd.xlane.f32.xlu0 %v5682_v61 }
0x1d0f   : > { %v5681_v31 = vpop.xlane.xlu1 %5680 }
0x1d10   : > { %11937 = vrcp.f32 %v5681_v31 }
0x1d13   : > { %v5702_v19 = vpop.permute.xlu1 %5701 }
0x1d14   : > { %11509 = vmatprep.subr.mxu1 %v5702_v19 }
0x1d15   : > { %11510 = vmatpush3.msra.mxu1 %v5702_v19 }
0x1d17   : > { %v5789_v28 = vpop.permute.xlu1 %5788 }
0x1d18   : > { %11516 = vmatprep.subr.mxu0 %v5789_v28 }
0x1d19   : > { %11517 = vmatpush3.msra.mxu0 %v5789_v28 }
0x1d1d   : > { %v11938_v17 = vpop.eup %11937 }
0x1d1e   : > { %v5692_v20 = vmul.f32 %v11938_v17, %v11934_v55 }
0x1d20   : > { %11513 = vmatprep.mubr.msk.f32.mxu1 %vm1395_vm8, %v5692_v20 }
0x1d41   : > { %v5663_v63 = vpop.xlane.xlu0 %5662 }
0x1d42   : > { %v5669_v60 = vsub.f32 %v5653_v58, %v5663_v63 }
0x1d44   : > { %v5675_v45 = vmul.f32 1.442695, %v5669_v60 }
0x1d45   : > { %v5666_v33 = vpop.xlane.xlu0 %5665 }
0x1d46   : > { %11939 = vpow2.f32 %v5675_v45  ;;  %v5670_v25 = vsub.f32 %v5654_v8, %v5666_v33 }
0x1d48   : > { %v5677_v29 = vmul.f32 1.442695, %v5670_v25 }
0x1d49   : > { %v5684_v36 = vpop.xlane.xlu0 %5683 }
0x1d4a   : > { %11941 = vpow2.f32 %v5677_v29 }
0x1d4b   : > { %11943 = vrcp.f32 %v5684_v36  ;;  %v10490_v36 = vld [vmem:[%s12244_s14 + $0x60] sm:$0xff] }
0x1d53   : > { %v11940_v30 = vpop.eup %11939 }
0x1d54   : > { %v5685_v37 = vsel %vm1395_vm8, %v11940_v30, 0.0 }
0x1d55   : > { %5686 = vadd.xlane.f32.xlu1 %v5685_v37  ;;  %v10493_v37 = vld [vmem:[%s12244_s14 + $0x78] sm:$0xff] }
0x1d57   : > { %v11942_v15 = vpop.eup %11941 }
0x1d58   : > { %v5688_v41 = vsel %vm1395_vm8, %v11942_v15, 0.0  ;;  %v11944_v53 = vpop.eup %11943 }
0x1d59   : > { %5689 = vadd.xlane.f32.xlu0 %v5688_v41  ;;  %v5694_v46 = vmul.f32 %v11944_v53, %v11936_v5  ;;  %v10491_v41 = vld [vmem:[%s12244_s14 + $0x68] sm:$0xff]  ;;  %v10486_v53 = vld [vmem:[%s12244_s14 + $0x40] sm:$0xff] }
0x1d66   : > { %5786 = vrot.lane.b32.xlu1 %v12946_v14, %s14111_s16 }
0x1d6f   : > { %5699 = vrot.lane.b32.xlu0 %v12934_v38, %s14111_s16 }
0x1dde   : > { %v5687_v26 = vpop.xlane.xlu1 %5686 }
0x1ddf   : > { %11945 = vrcp.f32 %v5687_v26  ;;  %v10489_v26 = vld [vmem:[%s12244_s14 + $0x58] sm:$0xff] }
0x1de2   : > { %v5787_v40 = vpop.permute.xlu1 %5786  ;;  %v5690_v49 = vpop.xlane.xlu0 %5689 }
0x1de3   : > { %11947 = vrcp.f32 %v5690_v49  ;;  %11518 = vmatprep.subr.mxu0 %v5787_v40  ;;  %v10487_v49 = vld [vmem:[%s12244_s14 + $0x48] sm:$0xff] }
0x1de4   : > { %11519 = vmatpush3.msra.mxu0 %v5787_v40  ;;  %v10488_v40 = vld [vmem:[%s12244_s14 + $0x50] sm:$0xff] }
0x1de5   : > { %6124 = vmatprep.subr.mxu0 %v10493_v37  ;;  %v10535_v37 = vld [vmem:[%s12254_s24 + $0x1a0] sm:$0xff] }
0x1de6   : > { %v5700_v52 = vpop.permute.xlu0 %5699 }
0x1de7   : > { %11511 = vmatprep.subr.mxu1 %v5700_v52 }
0x1de8   : > { %11512 = vmatpush3.msra.mxu1 %v5700_v52 }
0x1de9   : > { %11514 = vmatmul.mubr.msk.f32.vlgmr.msra.gmra.mxu1 %vm1395_vm8, %v5694_v46  ;;  %11523 = vmatprep.subr.mxu1 %v10415_v32 }
0x1dea   : > { %11524 = vmatpush3.msra.mxu1 %v10415_v32 }
0x1dec   : > { %v11946_v14 = vpop.eup %11945 }
0x1ded   : > { %v5696_v51 = vmul.f32 %v11946_v14, %v11940_v30 }
0x1def   : > { %11520 = vmatprep.mubr.msk.f32.mxu0 %vm1395_vm8, %v5696_v51 }
0x1df0   : > { %v11948_v38 = vpop.eup %11947 }
0x1df1   : > { %v5698_v0 = vmul.f32 %v11948_v38, %v11942_v15  ;;  %v10492_v15 = vld [vmem:[%s12244_s14 + $0x70] sm:$0xff] }
0x1df3   : > { %11521 = vmatmul.mubr.msk.f32.vlgmr.msra.gmra.mxu0 %vm1395_vm8, %v5698_v0 }
0x1df4   : > { %6164 = vmatprep.mubr.f32.mxu0 %v12177_v18  ;;  %6125 = vmatpush1.msra.mxu0 %v10492_v15  ;;  %v10519_v15 = vld [vmem:[%s12254_s24 + $0x120] sm:$0xff] }
0x1df5   : > { %6126 = vmatprep.subr.mxu0 %v10491_v41  ;;  %v10534_v41 = vld [vmem:[%s12254_s24 + $0x198] sm:$0xff] }
0x1df6   : > { %6127 = vmatpush1.msra.mxu0 %v10490_v36  ;;  %v10518_v36 = vld [vmem:[%s12254_s24 + $0x118] sm:$0xff] }
0x1df7   : > { %6128 = vmatprep.subr.mxu0 %v10489_v26  ;;  %v10533_v26 = vld [vmem:[%s12254_s24 + $0x190] sm:$0xff] }
0x1df8   : > { %6129 = vmatpush1.msra.mxu0 %v10488_v40  ;;  %v10517_v40 = vld [vmem:[%s12254_s24 + $0x110] sm:$0xff] }
0x1df9   : > { %6130 = vmatprep.subr.mxu0 %v10487_v49  ;;  %v10532_v49 = vld [vmem:[%s12254_s24 + $0x188] sm:$0xff] }
0x1dfa   : > { %6131 = vmatpush1.msra.mxu0 %v10486_v53  ;;  %v10516_v53 = vld [vmem:[%s12254_s24 + $0x108] sm:$0xff] }
0x1ea9   : > { %v11515_v44 = vpop.f32.mrf.mxu1 }
0x1eab   : > { %v5777_v10 = vpop.f32.mrf.mxu1 }
0x1eac   : > { %11525 = vmatprep.mubr.msk.f32.mxu1 %vm1218_vm7, %v5777_v10 }
0x1ead   : > { %11526 = vmatmul.mubr.msk.f32.vlgmr.msra.gmra.mxu1 %vm1218_vm7, %v11515_v44 }
0x1eb3   : > { %v11522_v47 = vpop.f32.mrf.mxu0 }
0x1eb5   : > { %v5864_v43 = vpop.f32.mrf.mxu0 }
0x1eb6   : > { %11528 = vmatprep.mubr.msk.f32.mxu1 %vm1218_vm7, %v5864_v43 }
0x1eb7   : > { %11529 = vmatmul.mubr.msk.f32.gmra.mxu1 %vm1218_vm7, %v11522_v47 }
0x1f6d   : > { %v11527_v55 = vpop.f32.mrf.mxu1 }
0x1f6e   : > { %v5971_v2 = vadd.f32 %v11527_v55, %v13166_v23 }
0x1f6f   : > { %v5951_v6 = vpop.f32.mrf.mxu1 }
0x1f70   : > { %v5983_v1 = vadd.f32 %v10481_v56, %v5971_v2  ;;  %v5970_v62 = vadd.f32 %v5951_v6, %v13170_v27 }
0x1f72   : > { %v5982_v35 = vadd.f32 %v10481_v56, %v5970_v62  ;;  %v5987_v54 = vadd.f32 %v5983_v1, %v12919_v59  ;;  %v10484_v62 = vld [vmem:[%s12234_s3 + $0x1] ss:$0 sm:$0xff] }
0x1f74   : > { %v5997_v34 = vsel %vm1110_vm6, %v5987_v54, 0.0  ;;  %v5986_v9 = vadd.f32 %v5982_v35, %v12915_v12 }
0x1f75   : > { %5998 = vadd.xlane.f32.xlu1 %v5997_v34 }
0x1f76   : > { %v5994_v57 = vsel %vm1110_vm6, %v5986_v9, 0.0 }
0x1f77   : > { %5995 = vadd.xlane.f32.xlu0 %v5994_v57  ;;  %v11530_v48 = vpop.f32.mrf.mxu1 }
0x1f78   : > { %v5973_v39 = vadd.f32 %v11530_v48, %v13174_v3 }
0x1f79   : > { %v5961_v4 = vpop.f32.mrf.mxu1 }
0x1f7a   : > { %v5972_v23 = vadd.f32 %v5961_v4, %v13176_v13  ;;  %v5985_v16 = vadd.f32 %v10481_v56, %v5973_v39 }
0x1f7c   : > { %v5984_v58 = vadd.f32 %v10481_v56, %v5972_v23  ;;  %v5989_v8 = vadd.f32 %v5985_v16, %v12927_v50 }
0x1f7e   : > { %v5988_v27 = vadd.f32 %v5984_v58, %v12923_v42  ;;  %v6003_v12 = vsel %vm1110_vm6, %v5989_v8, 0.0 }
0x1f80   : > { %v6000_v59 = vsel %vm1110_vm6, %v5988_v27, 0.0 }
0x1f81   : > { %6001 = vadd.xlane.f32.xlu0 %v6000_v59 }
0x1f85   : > { %6004 = vadd.xlane.f32.xlu0 %v6003_v12  ;;  %v10530_v12 = vld [vmem:[%s12254_s24 + $0x178] sm:$0xff] }
0x1ffe   : > { %v5999_v11 = vpop.xlane.xlu1 %5998 }
0x1fff   : > { %v6007_v7 = vmul.f32 0.03125, %v5999_v11  ;;  %v10545_v11 = vld [vmem:[%s12254_s24 + $0x1f0] sm:$0xff] }
0x2000   : > { %v5996_v5 = vpop.xlane.xlu0 %5995 }
0x2001   : > { %v6011_v61 = vsub.f32 %v5987_v54, %v6007_v7  ;;  %v6006_v3 = vmul.f32 0.03125, %v5996_v5  ;;  %v10485_v54 = vld [vmem:[%s12239_s8 + $0x1] ss:$0 sm:$0xff]  ;;  %v10529_v7 = vld [vmem:[%s12254_s24 + $0x170] sm:$0xff]  ;;  %v10544_v5 = vld [vmem:[%s12254_s24 + $0x1e8] sm:$0xff] }
0x2003   : > { %v6010_v31 = vsub.f32 %v5986_v9, %v6006_v3  ;;  %v6015_v19 = vmul.f32 %v6011_v61, %v6011_v61  ;;  %v10543_v3 = vld [vmem:[%s12254_s24 + $0x1e0] sm:$0xff] }
0x2005   : > { %v6021_v13 = vsel %vm1110_vm6, %v6015_v19, 0.0  ;;  %v6014_v28 = vmul.f32 %v6010_v31, %v6010_v31  ;;  %v10542_v19 = vld [vmem:[%s12254_s24 + $0x1d8] sm:$0xff] }
0x2006   : > { %6022 = vadd.xlane.f32.xlu0 %v6021_v13  ;;  %v10526_v13 = vld [vmem:[%s12254_s24 + $0x158] sm:$0xff] }
0x2007   : > { %v6018_v42 = vsel %vm1110_vm6, %v6014_v28, 0.0  ;;  %v10541_v28 = vld [vmem:[%s12254_s24 + $0x1d0] sm:$0xff] }
0x2008   : > { %6019 = vadd.xlane.f32.xlu1 %v6018_v42  ;;  %v10525_v42 = vld [vmem:[%s12254_s24 + $0x150] sm:$0xff] }
0x200a   : > { %v6002_v50 = vpop.xlane.xlu0 %6001 }
0x200b   : > { %v6008_v17 = vmul.f32 0.03125, %v6002_v50  ;;  %v10540_v50 = vld [vmem:[%s12254_s24 + $0x1c8] sm:$0xff] }
0x200d   : > { %v6012_v20 = vsub.f32 %v5988_v27, %v6008_v17  ;;  %v10524_v17 = vld [vmem:[%s12254_s24 + $0x148] sm:$0xff] }
0x200e   : > { %v6005_v63 = vpop.xlane.xlu0 %6004 }
0x200f   : > { %v6009_v60 = vmul.f32 0.03125, %v6005_v63  ;;  %v6016_v45 = vmul.f32 %v6012_v20, %v6012_v20  ;;  %v10523_v63 = vld [vmem:[%s12254_s24 + $0x140] sm:$0xff] }
0x2011   : > { %v6013_v33 = vsub.f32 %v5989_v8, %v6009_v60  ;;  %v6024_v25 = vsel %vm1110_vm6, %v6016_v45, 0.0  ;;  %v10546_v8 = vld [vmem:[%s12254_s24 + $0x1f8] sm:$0xff] }
0x2012   : > { %6025 = vadd.xlane.f32.xlu1 %v6024_v25  ;;  %10964 = vmatprep.subr.mxu1 %v10546_v8  ;;  %v10538_v60 = vld [vmem:[%s12254_s24 + $0x1b8] sm:$0xff]  ;;  %v10521_v25 = vld [vmem:[%s12254_s24 + $0x130] sm:$0xff] }
0x2013   : > { %v6017_v29 = vmul.f32 %v6013_v33, %v6013_v33  ;;  %10965 = vmatpush3.msra.mxu1 %v10530_v12  ;;  %v10522_v45 = vld [vmem:[%s12254_s24 + $0x138] sm:$0xff] }
0x2014   : > { %10966 = vmatprep.subr.mxu1 %v10545_v11 }
0x2015   : > { %v6027_v30 = vsel %vm1110_vm6, %v6017_v29, 0.0  ;;  %10967 = vmatpush3.msra.mxu1 %v10529_v7  ;;  %v10536_v29 = vld [vmem:[%s12254_s24 + $0x1a8] sm:$0xff] }
0x2016   : > { %6028 = vadd.xlane.f32.xlu0 %v6027_v30  ;;  %10968 = vmatprep.subr.mxu1 %v10544_v5  ;;  %v10520_v30 = vld [vmem:[%s12254_s24 + $0x128] sm:$0xff] }
0x208f   : > { %v6023_v52 = vpop.xlane.xlu0 %6022 }
0x2090   : > { %v6031_v46 = vmul.f32 0.03125, %v6023_v52  ;;  %v10531_v52 = vld [vmem:[%s12254_s24 + $0x180] sm:$0xff] }
0x2091   : > { %v6020_v14 = vpop.xlane.xlu1 %6019 }
0x2092   : > { %v6035_v51 = vadd.f32 1e-05, %v6031_v46  ;;  %v6030_v38 = vmul.f32 0.03125, %v6020_v14  ;;  %v10515_v46 = vld [vmem:[%s12254_s24 + $0x100] sm:$0xff] }
0x2093   : > { %v10494_v14 = vld [vmem:[%s12249_s19 + $0x2] sm:$0x3] }
0x2094   : > { %11949 = vrsqrt.f32 %v6035_v51  ;;  %v6034_v0 = vadd.f32 1e-05, %v6030_v38  ;;  %v6081_v51 = vrot.slane %v10494_v14, %v12759_v22  ;;  %v6085_v38 = vrot.slane %v10494_v14, %v12763_v24 }
0x2096   : > { %11951 = vrsqrt.f32 %v6034_v0 }
0x209b   : > { %v6026_v32 = vpop.xlane.xlu1 %6025 }
0x209c   : > { %v6032_v44 = vmul.f32 0.03125, %v6026_v32 }
0x209e   : > { %v6036_v10 = vadd.f32 1e-05, %v6032_v44 }
0x209f   : > { %v6029_v47 = vpop.xlane.xlu0 %6028 }
0x20a0   : > { %11953 = vrsqrt.f32 %v6036_v10  ;;  %v6033_v43 = vmul.f32 0.03125, %v6029_v47 }
0x20a1   : > { %v11950_v55 = vpop.eup %11949 }
0x20a2   : > { %v6037_v56 = vadd.f32 1e-05, %v6033_v43  ;;  %v6043_v1 = vmul.f32 %v11950_v55, %v6011_v61  ;;  %v10528_v61 = vld [vmem:[%s12254_s24 + $0x168] sm:$0xff] }
0x20a3   : > { %v11952_v2 = vpop.eup %11951  ;;  %10969 = vmatpush3.msra.mxu1 %v10528_v61 }
0x20a4   : > { %11955 = vrsqrt.f32 %v6037_v56  ;;  %v6042_v6 = vmul.f32 %v11952_v2, %v6010_v31  ;;  %v6053_v9 = vmul.f32 %v10484_v62, %v6043_v1  ;;  %10970 = vmatprep.subr.mxu1 %v10543_v3  ;;  %v10527_v31 = vld [vmem:[%s12254_s24 + $0x160] sm:$0xff] }
0x20a5   : > { %10971 = vmatpush3.msra.mxu1 %v10527_v31 }
0x20a6   : > { %v6052_v35 = vmul.f32 %v10484_v62, %v6042_v6  ;;  %v13229_v57 = vadd.f32 %v10485_v54, %v6053_v9  ;;  %10972 = vmatprep.subr.mxu1 %v10542_v19 }
0x20a7   : > { %10973 = vmatpush3.msra.mxu1 %v10526_v13 }
0x20a8   : > { %v13224_v34 = vadd.f32 %v10485_v54, %v6052_v35  ;;  %10974 = vmatprep.subr.mxu1 %v10541_v28 }
0x20a9   : > { %10975 = vmatpush3.msra.mxu1 %v10525_v42 }
0x20aa   : > { %10495 = vmatmul.mubr.msk.f32.vlgmr.msra.gmra.mxu0 %vm1110_vm6, %v13224_v34  ;;  %10976 = vmatprep.subr.mxu1 %v10540_v50 }
0x20ab   : > { %6170 = vmatprep.mubr.f32.mxu0 %v12177_v18  ;;  %10977 = vmatpush3.msra.mxu1 %v10524_v17 }
0x20ad   : > { %v11954_v48 = vpop.eup %11953 }
0x20ae   : > { %10496 = vmatmul.mubr.msk.f32.gmra.mxu0 %vm1110_vm6, %v13229_v57  ;;  %v6044_v39 = vmul.f32 %v11954_v48, %v6012_v20  ;;  %v10539_v20 = vld [vmem:[%s12254_s24 + $0x1c0] sm:$0xff] }
0x20af   : > { %6176 = vmatprep.mubr.f32.mxu0 %v12177_v18  ;;  %10978 = vmatprep.subr.mxu1 %v10539_v20 }
0x20b0   : > { %v6054_v4 = vmul.f32 %v10484_v62, %v6044_v39  ;;  %10979 = vmatpush3.msra.mxu1 %v10523_v63 }
0x20b1   : > { %v11956_v23 = vpop.eup %11955  ;;  %10980 = vmatprep.subr.mxu1 %v10538_v60 }
0x20b2   : > { %v13234_v16 = vadd.f32 %v10485_v54, %v6054_v4  ;;  %v6045_v58 = vmul.f32 %v11956_v23, %v6013_v33  ;;  %10981 = vmatpush3.msra.mxu1 %v10522_v45  ;;  %v10537_v33 = vld [vmem:[%s12254_s24 + $0x1b0] sm:$0xff] }
0x20b3   : > { %10982 = vmatprep.subr.mxu1 %v10537_v33 }
0x20b4   : > { %10497 = vmatmul.mubr.msk.f32.gmra.mxu0 %vm1110_vm6, %v13234_v16  ;;  %v6055_v27 = vmul.f32 %v10484_v62, %v6045_v58  ;;  %10983 = vmatpush3.msra.mxu1 %v10521_v25 }
0x20b5   : > { %6182 = vmatprep.mubr.f32.mxu0 %v12177_v18  ;;  %10984 = vmatprep.subr.mxu1 %v10536_v29 }
0x20b6   : > { %v13239_v59 = vadd.f32 %v10485_v54, %v6055_v27  ;;  %10985 = vmatpush3.msra.mxu1 %v10520_v30 }
0x20b7   : > { %10986 = vmatprep.subr.mxu1 %v10535_v37 }
0x20b8   : > { %10498 = vmatmul.mubr.msk.f32.gmra.mxu0 %vm1110_vm6, %v13239_v59  ;;  %10987 = vmatpush3.msra.mxu1 %v10519_v15 }
0x20b9   : > { %10988 = vmatprep.subr.mxu1 %v10534_v41 }
0x20ba   : > { %10989 = vmatpush3.msra.mxu1 %v10518_v36 }
0x20bb   : > { %10990 = vmatprep.subr.mxu1 %v10533_v26 }
0x20bc   : > { %10991 = vmatpush3.msra.mxu1 %v10517_v40 }
0x20bd   : > { %10992 = vmatprep.subr.mxu1 %v10532_v49 }
0x20be   : > { %10993 = vmatpush3.msra.mxu1 %v10516_v53 }
0x20bf   : > { %10994 = vmatprep.subr.mxu1 %v10531_v52 }
0x20c0   : > { %10995 = vmatpush3.msra.mxu1 %v10515_v46 }
0x216a   : > { %v6166_v0 = vpop.f32.mrf.mxu0 }
0x216b   : > { %v13278_v32 = vadd.f32 %v6166_v0, %v6081_v51 }
0x216c   : > { %v6168_v44 = vpop.f32.mrf.mxu0 }
0x216d   : > { %v13281_v10 = vmul.f32 0.70710677, %v13278_v32  ;;  %v13283_v47 = vadd.f32 %v6168_v44, %v6085_v38 }
0x216e   : > { %v6172_v43 = vpop.f32.mrf.mxu0 }
0x216f   : > { %v6205_v55 = vand.u32 2147483647, %v13281_v10  ;;  %v13287_v56 = vmul.f32 0.70710677, %v13283_v47  ;;  %v13289_v2 = vadd.f32 %v6172_v43, %v6081_v51  ;;  %vm6365_vm2 = vcmp.ge.f32.partialorder %v13281_v10, 0.0 }
0x2170   : > { %v6174_v6 = vpop.f32.mrf.mxu0 }
0x2171   : > { %v6213_v1 = vmul.f32 0.3275911, %v6205_v55  ;;  %v6206_v62 = vand.u32 2147483647, %v13287_v56  ;;  %v13293_v35 = vmul.f32 0.70710677, %v13289_v2  ;;  %v13295_v54 = vadd.f32 %v6174_v6, %v6085_v38 }
0x2172   : > { %v6317_v31 = vsub.f32 0.0, %v6205_v55  ;;  %vm6366_vm3 = vcmp.ge.f32.partialorder %v13287_v56, 0.0 }
0x2173   : > { %v6221_v9 = vadd.f32 1.0, %v6213_v1  ;;  %v6214_v48 = vmul.f32 0.3275911, %v6206_v62  ;;  %v6207_v39 = vand.u32 2147483647, %v13293_v35  ;;  %v6318_v45 = vsub.f32 0.0, %v6206_v62 }
0x2174   : > { %v13299_v4 = vmul.f32 0.70710677, %v13295_v54  ;;  %v6178_v23 = vpop.f32.mrf.mxu0  ;;  %v6325_v20 = vmul.f32 %v6317_v31, %v6205_v55  ;;  %vm6367_vm4 = vcmp.ge.f32.partialorder %v13293_v35, 0.0 }
0x2175   : > { %11957 = vrcp.f32 %v6221_v9  ;;  %v6222_v58 = vadd.f32 1.0, %v6214_v48  ;;  %v6215_v27 = vmul.f32 0.3275911, %v6207_v39  ;;  %v13302_v11 = vadd.f32 %v6178_v23, %v6081_v51 }
0x2176   : > { %v6208_v8 = vand.u32 2147483647, %v13299_v4  ;;  %v6180_v12 = vpop.f32.mrf.mxu0  ;;  %v6319_v30 = vsub.f32 0.0, %v6207_v39  ;;  %v6333_v41 = vmul.f32 1.442695, %v6325_v20  ;;  %v6326_v40 = vmul.f32 %v6318_v45, %v6206_v62 }
0x2177   : > { %v13304_v7 = vadd.f32 %v6180_v12, %v6085_v38  ;;  %11959 = vrcp.f32 %v6222_v58  ;;  %v6223_v5 = vadd.f32 1.0, %v6215_v27  ;;  %v13307_v19 = vmul.f32 0.70710677, %v13302_v11 }
0x2178   : > { %v6216_v61 = vmul.f32 0.3275911, %v6208_v8  ;;  %v6184_v3 = vpop.f32.mrf.mxu0  ;;  %v6320_v49 = vsub.f32 0.0, %v6208_v8  ;;  %v6335_v6 = vmul.f32 1.442695, %v6326_v40  ;;  %vm6368_vm5 = vcmp.ge.f32.partialorder %v13299_v4, 0.0 }
0x2179   : > { %11961 = vrcp.f32 %v6223_v5  ;;  %v6209_v42 = vand.u32 2147483647, %v13307_v19  ;;  %v13311_v50 = vmul.f32 0.70710677, %v13304_v7  ;;  %v13313_v17 = vadd.f32 %v6184_v3, %v6081_v51 }
0x217a   : > { %v6224_v13 = vadd.f32 1.0, %v6216_v61  ;;  %v6186_v28 = vpop.f32.mrf.mxu0  ;;  %v6327_v51 = vmul.f32 %v6319_v30, %v6207_v39  ;;  %v6328_v1 = vmul.f32 %v6320_v49, %v6208_v8  ;;  %vm6369_vm9 = vcmp.ge.f32.partialorder %v13307_v19, 0.0 }
0x217b   : > { %v6217_v63 = vmul.f32 0.3275911, %v6209_v42  ;;  %v13315_v60 = vadd.f32 %v6186_v28, %v6085_v38  ;;  %v6210_v33 = vand.u32 2147483647, %v13311_v50  ;;  %v13319_v25 = vmul.f32 0.70710677, %v13313_v17 }
0x217c   : > { %11963 = vrcp.f32 %v6224_v13  ;;  %v6321_v43 = vsub.f32 0.0, %v6209_v42  ;;  %v6337_v39 = vmul.f32 1.442695, %v6327_v51  ;;  %v6339_v8 = vmul.f32 1.442695, %v6328_v1 }
0x217d   : > { %v6225_v29 = vadd.f32 1.0, %v6217_v63  ;;  %v6218_v37 = vmul.f32 0.3275911, %v6210_v33  ;;  %v6211_v15 = vand.u32 2147483647, %v13319_v25  ;;  %v6322_v23 = vsub.f32 0.0, %v6210_v33 }
0x217e   : > { %v13323_v36 = vmul.f32 0.70710677, %v13315_v60  ;;  %v6329_v61 = vmul.f32 %v6321_v43, %v6209_v42  ;;  %vm6370_vm10 = vcmp.ge.f32.partialorder %v13311_v50, 0.0  ;;  %vm6371_vm11 = vcmp.ge.f32.partialorder %v13319_v25, 0.0  ;;  %v10548_v25 = vld [vmem:[%s12259_s30 + $0x1] ss:$0 sm:$0xff] }
0x217f   : > { %11965 = vrcp.f32 %v6225_v29  ;;  %v6226_v53 = vadd.f32 1.0, %v6218_v37  ;;  %v6219_v52 = vmul.f32 0.3275911, %v6211_v15  ;;  %v6330_v20 = vmul.f32 %v6322_v23, %v6210_v33 }
0x2180   : > { %v6212_v14 = vand.u32 2147483647, %v13323_v36  ;;  %v6323_v45 = vsub.f32 0.0, %v6211_v15  ;;  %v6341_v42 = vmul.f32 1.442695, %v6329_v61  ;;  %vm6372_vm12 = vcmp.ge.f32.partialorder %v13323_v36, 0.0 }
0x2181   : > { %11967 = vrcp.f32 %v6226_v53  ;;  %v6227_v38 = vadd.f32 1.0, %v6219_v52  ;;  %v6343_v33 = vmul.f32 1.442695, %v6330_v20 }
0x2182   : > { %v13325_v26 = vpop.eup %11957  ;;  %v6220_v55 = vmul.f32 0.3275911, %v6212_v14  ;;  %11969 = vpow2.f32 %v6333_v41  ;;  %v6324_v49 = vsub.f32 0.0, %v6212_v14  ;;  %v6331_v43 = vmul.f32 %v6323_v45, %v6211_v15 }
0x2183   : > { %v6245_v46 = vmul.f32 1.0614054, %v13325_v26  ;;  %11971 = vrcp.f32 %v6227_v38 }
0x2184   : > { %v13329_v0 = vpop.eup %11959  ;;  %v6228_v58 = vadd.f32 1.0, %v6220_v55 }
0x2185   : > { %v10499_v44 = vadd.f32 -1.4531521, %v6245_v46  ;;  %v6246_v62 = vmul.f32 1.0614054, %v13329_v0 }
0x2186   : > { %v13332_v9 = vpop.eup %11961  ;;  %11973 = vrcp.f32 %v6228_v58  ;;  %v6332_v58 = vmul.f32 %v6324_v49, %v6212_v14 }
0x2187   : > { %v6261_v48 = vmul.f32 %v13325_v26, %v10499_v44  ;;  %v10500_v27 = vadd.f32 -1.4531521, %v6246_v62  ;;  %v6247_v12 = vmul.f32 1.0614054, %v13332_v9  ;;  %11975 = vpow2.f32 %v6335_v6 }
0x2188   : > { %11977 = vpow2.f32 %v6337_v39  ;;  %v13349_v44 = vmul.f32 0.5, %v13283_v47 }
0x2189   : > { %v6269_v5 = vadd.f32 1.4214138, %v6261_v48  ;;  %v13336_v3 = vpop.eup %11963  ;;  %v6262_v31 = vmul.f32 %v13329_v0, %v10500_v27  ;;  %v10501_v13 = vadd.f32 -1.4531521, %v6247_v12  ;;  %11979 = vpow2.f32 %v6339_v8 }
0x218a   : > { %v6248_v63 = vmul.f32 1.0614054, %v13336_v3  ;;  %11981 = vpow2.f32 %v6341_v42 }
0x218b   : > { %v6277_v28 = vmul.f32 %v13325_v26, %v6269_v5  ;;  %v6270_v29 = vadd.f32 1.4214138, %v6262_v31  ;;  %v6263_v30 = vmul.f32 %v13332_v9, %v10501_v13  ;;  %11983 = vpow2.f32 %v6343_v33 }
0x218c   : > { %v10502_v41 = vadd.f32 -1.4531521, %v6248_v63  ;;  %v13342_v40 = vpop.eup %11965  ;;  %v6345_v31 = vmul.f32 1.442695, %v6331_v43 }
0x218d   : > { %v10507_v37 = vadd.f32 -0.28449672, %v6277_v28  ;;  %v6278_v53 = vmul.f32 %v13329_v0, %v6270_v29  ;;  %v6271_v52 = vadd.f32 1.4214138, %v6263_v30  ;;  %v6249_v38 = vmul.f32 1.0614054, %v13342_v40 }
0x218e   : > { %v6264_v51 = vmul.f32 %v13336_v3, %v10502_v41  ;;  %v13352_v1 = vpop.eup %11967  ;;  %v6347_v30 = vmul.f32 1.442695, %v6332_v58  ;;  %11985 = vpow2.f32 %v6345_v31 }
0x218f   : > { %v6293_v46 = vmul.f32 %v13325_v26, %v10507_v37  ;;  %v10508_v55 = vadd.f32 -0.28449672, %v6278_v53  ;;  %v6279_v6 = vmul.f32 %v13332_v9, %v6271_v52  ;;  %v10503_v23 = vadd.f32 -1.4531521, %v6249_v38  ;;  %v11970_v47 = vpop.eup %11969 }
0x2190   : > { %v6272_v48 = vadd.f32 1.4214138, %v6264_v51  ;;  %v6250_v12 = vmul.f32 1.0614054, %v13352_v1  ;;  %v13360_v8 = vpop.eup %11971  ;;  %11987 = vpow2.f32 %v6347_v30 }
0x2191   : > { %v6301_v62 = vadd.f32 0.2548296, %v6293_v46  ;;  %v6294_v39 = vmul.f32 %v13329_v0, %v10508_v55  ;;  %v10509_v27 = vadd.f32 -0.28449672, %v6279_v6  ;;  %v6265_v61 = vmul.f32 %v13342_v40, %v10503_v23 }
0x2192   : > { %v6280_v5 = vmul.f32 %v13336_v3, %v6272_v48  ;;  %v10504_v14 = vadd.f32 -1.4531521, %v6250_v12  ;;  %v6251_v29 = vmul.f32 1.0614054, %v13360_v8 }
0x2193   : > { %v6309_v15 = vmul.f32 %v13325_v26, %v6301_v62  ;;  %v6302_v13 = vadd.f32 0.2548296, %v6294_v39  ;;  %v6295_v28 = vmul.f32 %v13332_v9, %v10509_v27  ;;  %v6273_v45 = vadd.f32 1.4214138, %v6265_v61  ;;  %v13365_v26 = vpop.eup %11973 }
0x2194   : > { %v10510_v63 = vadd.f32 -0.28449672, %v6280_v5  ;;  %v6266_v41 = vmul.f32 %v13352_v1, %v10504_v14  ;;  %v11976_v49 = vpop.eup %11975  ;;  %v6252_v33 = vmul.f32 1.0614054, %v13365_v26  ;;  %v10505_v55 = vadd.f32 -1.4531521, %v6251_v29 }
0x2195   : > { %v6349_v20 = vmul.f32 %v11970_v47, %v6309_v15  ;;  %v6310_v37 = vmul.f32 %v13329_v0, %v6302_v13  ;;  %v6303_v42 = vadd.f32 0.2548296, %v6295_v28  ;;  %v6281_v46 = vmul.f32 %v13342_v40, %v6273_v45  ;;  %v11978_v6 = vpop.eup %11977 }
0x2196   : > { %v6296_v52 = vmul.f32 %v13336_v3, %v10510_v63  ;;  %v6274_v43 = vadd.f32 1.4214138, %v6266_v41  ;;  %v10506_v27 = vadd.f32 -1.4531521, %v6252_v33  ;;  %v11980_v12 = vpop.eup %11979  ;;  %v6267_v5 = vmul.f32 %v13360_v8, %v10505_v55 }
0x2197   : > { %v6357_v53 = vsub.f32 1.0, %v6349_v20  ;;  %v6350_v51 = vmul.f32 %v11976_v49, %v6310_v37  ;;  %v6311_v38 = vmul.f32 %v13332_v9, %v6303_v42  ;;  %v10511_v48 = vadd.f32 -0.28449672, %v6281_v46  ;;  %v11982_v45 = vpop.eup %11981 }
0x2198   : > { %v6304_v62 = vadd.f32 0.2548296, %v6296_v52  ;;  %v6282_v39 = vmul.f32 %v13352_v1, %v6274_v43  ;;  %v6268_v20 = vmul.f32 %v13365_v26, %v10506_v27  ;;  %v6275_v63 = vadd.f32 1.4214138, %v6267_v5 }
0x2199   : > { %v6373_v0 = vsub.f32 0.0, %v6357_v53  ;;  %v6358_v23 = vsub.f32 1.0, %v6350_v51  ;;  %v6351_v58 = vmul.f32 %v11978_v6, %v6311_v38  ;;  %v6297_v9 = vmul.f32 %v13342_v40, %v10511_v48 }
0x219a   : > { %v6312_v15 = vmul.f32 %v13336_v3, %v6304_v62  ;;  %v10512_v13 = vadd.f32 -0.28449672, %v6282_v39  ;;  %v6276_v49 = vadd.f32 1.4214138, %v6268_v20  ;;  %v6189_v52 = vmul.f32 0.5, %v13278_v32 }
0x219b   : > { %v6381_v47 = vsel %vm6365_vm2, %v6357_v53, %v6373_v0  ;;  %v6374_v61 = vsub.f32 0.0, %v6358_v23  ;;  %v6359_v31 = vsub.f32 1.0, %v6351_v58  ;;  %v6305_v14 = vadd.f32 0.2548296, %v6297_v9  ;;  %v11984_v53 = vpop.eup %11983 }
0x219c   : > { %v6352_v28 = vmul.f32 %v11980_v12, %v6312_v15  ;;  %v6389_v29 = vadd.f32 1.0, %v6381_v47  ;;  %v6298_v3 = vmul.f32 %v13352_v1, %v10512_v13  ;;  %v6283_v51 = vmul.f32 %v13360_v8, %v6275_v63  ;;  %v11986_v27 = vpop.eup %11985 }
0x219d   : > { %v6382_v10 = vsel %vm6366_vm3, %v6358_v23, %v6374_v61  ;;  %v6375_v37 = vsub.f32 0.0, %v6359_v31  ;;  %v6313_v30 = vmul.f32 %v13342_v40, %v6305_v14  ;;  %v6284_v40 = vmul.f32 %v13365_v26, %v6276_v49 }
0x219e   : > { %v6390_v42 = vadd.f32 1.0, %v6382_v10  ;;  %v6360_v41 = vsub.f32 1.0, %v6352_v28  ;;  %v6306_v33 = vadd.f32 0.2548296, %v6298_v3  ;;  %v6397_v55 = vmul.f32 %v6389_v29, %v6189_v52  ;;  %v11988_v28 = vpop.eup %11987 }
0x219f   : > { %v6383_v46 = vsel %vm6367_vm4, %v6359_v31, %v6375_v37  ;;  %v6353_v43 = vmul.f32 %v11982_v45, %v6313_v30  ;;  %v10513_v0 = vadd.f32 -0.28449672, %v6283_v51  ;;  %v6192_v32 = vmul.f32 0.5, %v13295_v54 }
0x21a0   : > { %v6398_v56 = vmul.f32 %v6390_v42, %v13349_v44  ;;  %v6376_v38 = vsub.f32 0.0, %v6360_v41  ;;  %v6314_v6 = vmul.f32 %v13352_v1, %v6306_v33  ;;  %v6391_v62 = vadd.f32 1.0, %v6383_v46 }
0x21a1   : > { %v6361_v48 = vsub.f32 1.0, %v6353_v43  ;;  %v10514_v4 = vadd.f32 -0.28449672, %v6284_v40  ;;  %v6299_v44 = vmul.f32 %v13360_v8, %v10513_v0  ;;  %v6191_v39 = vmul.f32 0.5, %v13289_v2 }
0x21a2   : > { %6510 = vmatprep.mubr.f32.mxu1 %v6398_v56  ;;  %v6384_v35 = vsel %vm6368_vm5, %v6360_v41, %v6376_v38  ;;  %v6354_v58 = vmul.f32 %v11984_v53, %v6314_v6  ;;  %v6194_v63 = vmul.f32 0.5, %v13304_v7  ;;  %v6193_v29 = vmul.f32 0.5, %v13302_v11 }
0x21a3   : > { %6511 = vmatmul.mubr.f32.vlgmr.msra.gmra.mxu1 %v6397_v55  ;;  %v6392_v23 = vadd.f32 1.0, %v6384_v35  ;;  %v6377_v1 = vsub.f32 0.0, %v6361_v48  ;;  %v6300_v54 = vmul.f32 %v13365_v26, %v10514_v4  ;;  %v6307_v15 = vadd.f32 0.2548296, %v6299_v44 }
0x21a4   : > { %v6362_v47 = vsub.f32 1.0, %v6354_v58  ;;  %v6399_v9 = vmul.f32 %v6391_v62, %v6191_v39  ;;  %v6196_v49 = vmul.f32 0.5, %v13315_v60  ;;  %v6195_v53 = vmul.f32 0.5, %v13313_v17 }
0x21a5   : > { %v6400_v12 = vmul.f32 %v6392_v23, %v6192_v32  ;;  %v6385_v5 = vsel %vm6369_vm9, %v6361_v48, %v6377_v1  ;;  %v6308_v31 = vadd.f32 0.2548296, %v6300_v54  ;;  %v6315_v13 = vmul.f32 %v13360_v8, %v6307_v15 }
0x21a6   : > { %v6378_v61 = vsub.f32 0.0, %v6362_v47  ;;  %v6393_v19 = vadd.f32 1.0, %v6385_v5 }
0x21a7   : > { %6515 = vmatprep.mubr.f32.mxu1 %v6400_v12  ;;  %v6316_v14 = vmul.f32 %v13365_v26, %v6308_v31  ;;  %v6355_v20 = vmul.f32 %v11986_v27, %v6315_v13 }
0x21a8   : > { %6516 = vmatmul.mubr.f32.gmra.mxu1 %v6399_v9  ;;  %v6386_v2 = vsel %vm6370_vm10, %v6362_v47, %v6378_v61  ;;  %v6401_v42 = vmul.f32 %v6393_v19, %v6193_v29  ;;  %vm12189_vm10 = vmmov 1  }
0x21a9   : > { %v6394_v45 = vadd.f32 1.0, %v6386_v2  ;;  %v6356_v10 = vmul.f32 %v11988_v28, %v6316_v14  ;;  %v6363_v37 = vsub.f32 1.0, %v6355_v20 }
0x21ab   : > { %v6402_v3 = vmul.f32 %v6394_v45, %v6194_v63  ;;  %v6364_v41 = vsub.f32 1.0, %v6356_v10  ;;  %v6379_v8 = vsub.f32 0.0, %v6363_v37  ;;  %v10556_v10 = vld [vmem:[%s12214_s17 + $0x58] sm:$0xff] }
0x21ac   : > { %11531 = vmatprep.subr.mxu0 %v10556_v10 }
0x21ad   : > { %6520 = vmatprep.mubr.f32.mxu1 %v6402_v3  ;;  %v6380_v50 = vsub.f32 0.0, %v6364_v41  ;;  %v6387_v30 = vsel %vm6371_vm11, %v6363_v37, %v6379_v8  ;;  %v10555_v37 = vld [vmem:[%s12214_s17 + $0x50] sm:$0xff]  ;;  %11532 = vmatpush3.msra.mxu0 %v10556_v10  ;;  %v10554_v3 = vld [vmem:[%s12214_s17 + $0x48] sm:$0xff] }
0x21ae   : > { %6521 = vmatmul.mubr.f32.gmra.mxu1 %v6401_v42  ;;  %v6395_v7 = vadd.f32 1.0, %v6387_v30  ;;  %11533 = vmatprep.subr.mxu0 %v10555_v37  ;;  %v10553_v42 = vld [vmem:[%s12214_s17 + $0x40] sm:$0xff] }
0x21af   : > { %v6388_v26 = vsel %vm6372_vm12, %v6364_v41, %v6380_v50  ;;  %11534 = vmatpush3.msra.mxu0 %v10555_v37 }
0x21b0   : > { %v6396_v11 = vadd.f32 1.0, %v6388_v26  ;;  %v6403_v46 = vmul.f32 %v6395_v7, %v6195_v53  ;;  %11535 = vmatprep.subr.mxu0 %v10554_v3 }
0x21b1   : > { %11536 = vmatpush3.msra.mxu0 %v10554_v3 }
0x21b2   : > { %v6404_v52 = vmul.f32 %v6396_v11, %v6196_v49  ;;  %11537 = vmatprep.subr.mxu0 %v10553_v42 }
0x21b3   : > { %11538 = vmatpush3.msra.mxu0 %v10553_v42 }
0x21b4   : > { %6525 = vmatprep.mubr.f32.mxu1 %v6404_v52 }
0x21b5   : > { %6526 = vmatmul.mubr.f32.gmra.mxu1 %v6403_v46  ;;  %v10551_v46 = vld [vmem:[%s14107_s0 + $0x1] ss:$0 sm:$0xff] }
0x2263   : > { %v10996_v33 = vpop.f32.mrf.mxu1 }
0x2265   : > { %v10997_v51 = vpop.f32.mrf.mxu1 }
0x2266   : > { %v10998_v56 = vadd.f32 %v10997_v51, %v10996_v33  ;;  %v10552_v51 = vld [vmem:[%s14108_s18 + $0x1] ss:$0 sm:$0xff] }
0x2268   : > { %v6513_v38 = vadd.f32 %v10998_v56, %v10548_v25  ;;  %v10999_v43 = vpop.f32.mrf.mxu1 }
0x226a   : > { %v11000_v55 = vpop.f32.mrf.mxu1  ;;  %v6531_v36 = vadd.f32 %v6513_v38, %v13224_v34 }
0x226b   : > { %v11001_v6 = vadd.f32 %v11000_v55, %v10999_v43 }
0x226c   : > { %v6539_v40 = vsel %vm1110_vm6, %v6531_v36, 0.0 }
0x226d   : > { %v6518_v60 = vadd.f32 %v11001_v6, %v10548_v25  ;;  %6540 = vadd.xlane.f32.xlu1 %v6539_v40 }
0x226e   : > { %v11002_v0 = vpop.f32.mrf.mxu1 }
0x226f   : > { %v6532_v17 = vadd.f32 %v6518_v60, %v13229_v57 }
0x2270   : > { %v11003_v32 = vpop.f32.mrf.mxu1 }
0x2271   : > { %v6542_v35 = vsel %vm1110_vm6, %v6532_v17, 0.0  ;;  %v11004_v62 = vadd.f32 %v11003_v32, %v11002_v0 }
0x2272   : > { %6543 = vadd.xlane.f32.xlu0 %v6542_v35 }
0x2273   : > { %v6523_v48 = vadd.f32 %v11004_v62, %v10548_v25 }
0x2275   : > { %v6533_v23 = vadd.f32 %v6523_v48, %v13234_v16  ;;  %v11005_v58 = vpop.f32.mrf.mxu1 }
0x2277   : > { %v6545_v4 = vsel %vm1110_vm6, %v6533_v23, 0.0  ;;  %v11006_v34 = vpop.f32.mrf.mxu1 }
0x2278   : > { %6546 = vadd.xlane.f32.xlu1 %v6545_v4  ;;  %v11007_v44 = vadd.f32 %v11006_v34, %v11005_v58  ;;  %v10558_v4 = vld [vmem:[%s12219_s21 + $0x2] ss:$0 sm:$0xff] }
0x227a   : > { %v6528_v39 = vadd.f32 %v11007_v44, %v10548_v25 }
0x227c   : > { %v6534_v1 = vadd.f32 %v6528_v39, %v13239_v59 }
0x227e   : > { %v6548_v27 = vsel %vm1110_vm6, %v6534_v1, 0.0 }
0x227f   : > { %6549 = vadd.xlane.f32.xlu0 %v6548_v27 }
0x22f6   : > { %v6541_v57 = vpop.xlane.xlu1 %6540 }
0x22f7   : > { %v6551_v12 = vmul.f32 0.03125, %v6541_v57 }
0x22f9   : > { %v6555_v47 = vsub.f32 %v6531_v36, %v6551_v12 }
0x22fb   : > { %v6544_v54 = vpop.xlane.xlu0 %6543  ;;  %v6559_v15 = vmul.f32 %v6555_v47, %v6555_v47 }
0x22fc   : > { %v6552_v9 = vmul.f32 0.03125, %v6544_v54 }
0x22fd   : > { %v6563_v16 = vsel %vm1110_vm6, %v6559_v15, 0.0 }
0x22fe   : > { %v6556_v5 = vsub.f32 %v6532_v17, %v6552_v9  ;;  %6564 = vadd.xlane.f32.xlu1 %v6563_v16 }
0x2300   : > { %v6560_v61 = vmul.f32 %v6556_v5, %v6556_v5 }
0x2301   : > { %v6547_v31 = vpop.xlane.xlu1 %6546 }
0x2302   : > { %v6566_v13 = vsel %vm1110_vm6, %v6560_v61, 0.0  ;;  %v6553_v59 = vmul.f32 0.03125, %v6547_v31 }
0x2303   : > { %6567 = vadd.xlane.f32.xlu0 %v6566_v13 }
0x2304   : > { %v6557_v28 = vsub.f32 %v6533_v23, %v6553_v59 }
0x2306   : > { %v6561_v2 = vmul.f32 %v6557_v28, %v6557_v28 }
0x2308   : > { %v6569_v19 = vsel %vm1110_vm6, %v6561_v2, 0.0  ;;  %v6550_v14 = vpop.xlane.xlu0 %6549 }
0x2309   : > { %6570 = vadd.xlane.f32.xlu1 %v6569_v19  ;;  %v6554_v20 = vmul.f32 0.03125, %v6550_v14 }
0x230b   : > { %v6558_v63 = vsub.f32 %v6534_v1, %v6554_v20 }
0x230d   : > { %v6562_v45 = vmul.f32 %v6558_v63, %v6558_v63 }
0x230f   : > { %v6572_v29 = vsel %vm1110_vm6, %v6562_v45, 0.0 }
0x2310   : > { %6573 = vadd.xlane.f32.xlu0 %v6572_v29 }
0x2387   : > { %v6565_v41 = vpop.xlane.xlu1 %6564 }
0x2388   : > { %v6575_v8 = vmul.f32 0.03125, %v6565_v41 }
0x238a   : > { %v6579_v50 = vadd.f32 1e-05, %v6575_v8 }
0x238c   : > { %11989 = vrsqrt.f32 %v6579_v50  ;;  %v6568_v30 = vpop.xlane.xlu0 %6567 }
0x238d   : > { %v6576_v26 = vmul.f32 0.03125, %v6568_v30 }
0x238f   : > { %v6580_v7 = vadd.f32 1e-05, %v6576_v26 }
0x2391   : > { %11991 = vrsqrt.f32 %v6580_v7 }
0x2392   : > { %v6571_v49 = vpop.xlane.xlu1 %6570 }
0x2393   : > { %v6577_v11 = vmul.f32 0.03125, %v6571_v49 }
0x2395   : > { %v6581_v53 = vadd.f32 1e-05, %v6577_v11 }
0x2397   : > { %11993 = vrsqrt.f32 %v6581_v53 }
0x2399   : > { %v11990_v52 = vpop.eup %11989  ;;  %v6574_v25 = vpop.xlane.xlu0 %6573 }
0x239a   : > { %v6587_v33 = vmul.f32 %v11990_v52, %v6555_v47  ;;  %v6578_v56 = vmul.f32 0.03125, %v6574_v25 }
0x239c   : > { %v6597_v38 = vmul.f32 %v10551_v46, %v6587_v33  ;;  %v6582_v55 = vadd.f32 1e-05, %v6578_v56 }
0x239e   : > { %v11992_v43 = vpop.eup %11991  ;;  %v13426_v36 = vadd.f32 %v10552_v51, %v6597_v38  ;;  %11995 = vrsqrt.f32 %v6582_v55 }
0x239f   : > { %v6588_v6 = vmul.f32 %v11992_v43, %v6556_v5 }
0x23a0   : > { %11539 = vmatprep.mubr.msk.f32.mxu0 %vm1110_vm6, %v13426_v36 }
0x23a1   : > { %v6598_v40 = vmul.f32 %v10551_v46, %v6588_v6 }
0x23a3   : > { %v13430_v60 = vadd.f32 %v10552_v51, %v6598_v40 }
0x23a4   : > { %v11994_v0 = vpop.eup %11993 }
0x23a5   : > { %11540 = vmatmul.mubr.msk.f32.vlgmr.msra.gmra.mxu0 %vm1110_vm6, %v13430_v60  ;;  %v6589_v17 = vmul.f32 %v11994_v0, %v6557_v28 }
0x23a7   : > { %v6599_v32 = vmul.f32 %v10551_v46, %v6589_v17 }
0x23a9   : > { %v13434_v35 = vadd.f32 %v10552_v51, %v6599_v32 }
0x23ab   : > { %11542 = vmatprep.mubr.msk.f32.mxu0 %vm1110_vm6, %v13434_v35  ;;  %v11996_v62 = vpop.eup %11995 }
0x23ac   : > { %v6590_v48 = vmul.f32 %v11996_v62, %v6558_v63 }
0x23ae   : > { %v6600_v23 = vmul.f32 %v10551_v46, %v6590_v48 }
0x23b0   : > { %v13438_v58 = vadd.f32 %v10552_v51, %v6600_v23 }
0x23b2   : > { %11543 = vmatmul.mubr.msk.f32.gmra.mxu0 %vm1110_vm6, %v13438_v58 }
0x2465   : > { %v11541_v34 = vpop.f32.mrf.mxu0 }
0x2466   : > { %v13443_v44 = vadd.f32 %v11541_v34, %v10558_v4 }
0x2467   : > { %v6702_v39 = vpop.f32.mrf.mxu0 }
0x2468   : > { %v13445_v1 = vadd.f32 %v10558_v4, %v6702_v39  ;;  %6730 = vrot.lane.b32.xlu1 %v13443_v44, %s12178_s23 }
0x246a   : > { %6728 = vrot.lane.b32.xlu0 %v13445_v1, %s12178_s23  ;;  %11549 = vmatprep.mubr.msk.f32.mxu0 %vm1218_vm7, %v13445_v1 }
0x2472   : > { %v11544_v27 = vpop.f32.mrf.mxu0 }
0x2473   : > { %v13453_v57 = vadd.f32 %v11544_v27, %v10558_v4 }
0x2474   : > { %v6712_v12 = vpop.f32.mrf.mxu0 }
0x2475   : > { %6819 = vrot.lane.b32.xlu1 %v13453_v57, %s12178_s23  ;;  %v13457_v47 = vadd.f32 %v10558_v4, %v6712_v12 }
0x2479   : > { %6817 = vrot.lane.b32.xlu1 %v13457_v47, %s12178_s23  ;;  %s14112_s23 = smov 80  }
0x24da   : > { %v6731_v54 = vpop.permute.xlu1 %6730 }
0x24db   : > { %11545 = vmatprep.subr.msk.mxu0 %vm1218_vm7, %v6731_v54 }
0x24dc   : > { %11546 = vmatpush3.xpose.msk.msra.mxu0 %vm1218_vm7, %v6731_v54  ;;  %v6729_v15 = vpop.permute.xlu0 %6728 }
0x24dd   : > { %11547 = vmatprep.subr.msk.mxu0 %vm1218_vm7, %v6729_v15 }
0x24e0   : > { %11548 = vmatpush3.xpose.msk.msra.mxu0 %vm1218_vm7, %v6729_v15 }
0x24e3   : > { %11550 = vmatmul.mubr.msk.f32.vlgmr.msra.gmra.mxu0 %vm1218_vm7, %v13443_v44 }
0x24e4   : > { %11556 = vmatprep.mubr.msk.f32.mxu0 %vm1218_vm7, %v13457_v47 }
0x24e7   : > { %v6820_v9 = vpop.permute.xlu1 %6819 }
0x24e8   : > { %11552 = vmatprep.subr.msk.mxu0 %vm1218_vm7, %v6820_v9 }
0x24e9   : > { %11553 = vmatpush3.xpose.msk.msra.mxu0 %vm1218_vm7, %v6820_v9 }
0x24eb   : > { %v6818_v16 = vpop.permute.xlu1 %6817 }
0x24ec   : > { %11554 = vmatprep.subr.msk.mxu0 %vm1218_vm7, %v6818_v16 }
0x24ed   : > { %11555 = vmatpush3.xpose.msk.msra.mxu0 %vm1218_vm7, %v6818_v16 }
0x24f0   : > { %11557 = vmatmul.mubr.msk.f32.vlgmr.msra.gmra.mxu0 %vm1218_vm7, %v13453_v57 }
0x25a3   : > { %v11551_v5 = vpop.f32.mrf.mxu0 }
0x25a4   : > { %v6905_v61 = vmul.f32 0.35355338, %v11551_v5 }
0x25a5   : > { %v6806_v31 = vpop.f32.mrf.mxu0 }
0x25a6   : > { %v6904_v13 = vmul.f32 0.35355338, %v6806_v31  ;;  %v6911_v59 = vsel %vm1395_vm8, %v6905_v61, -inf }
0x25a7   : > { %6912 = vmax.xlane.f32.xlu1 %v6911_v59 }
0x25a8   : > { %v6908_v28 = vsel %vm1395_vm8, %v6904_v13, -inf }
0x25a9   : > { %6909 = vmax.xlane.f32.xlu0 %v6908_v28 }
0x25b0   : > { %v11558_v2 = vpop.f32.mrf.mxu0 }
0x25b1   : > { %v6907_v20 = vmul.f32 0.35355338, %v11558_v2 }
0x25b2   : > { %v6895_v19 = vpop.f32.mrf.mxu0 }
0x25b3   : > { %v6906_v14 = vmul.f32 0.35355338, %v6895_v19  ;;  %v6917_v45 = vsel %vm1395_vm8, %v6907_v20, -inf }
0x25b5   : > { %v6914_v63 = vsel %vm1395_vm8, %v6906_v14, -inf }
0x25b6   : > { %6915 = vmax.xlane.f32.xlu0 %v6914_v63 }
0x25ba   : > { %6918 = vmax.xlane.f32.xlu0 %v6917_v45 }
0x2630   : > { %v6913_v29 = vpop.xlane.xlu1 %6912 }
0x2631   : > { %v6921_v10 = vsub.f32 %v6905_v61, %v6913_v29 }
0x2632   : > { %v6910_v37 = vpop.xlane.xlu0 %6909 }
0x2633   : > { %v6926_v3 = vmul.f32 1.442695, %v6921_v10  ;;  %v6920_v42 = vsub.f32 %v6904_v13, %v6910_v37 }
0x2635   : > { %11997 = vpow2.f32 %v6926_v3  ;;  %v6924_v41 = vmul.f32 1.442695, %v6920_v42 }
0x2637   : > { %11999 = vpow2.f32 %v6924_v41 }
0x263f   : > { %v6916_v7 = vpop.xlane.xlu0 %6915 }
0x2640   : > { %v6922_v52 = vsub.f32 %v6906_v14, %v6916_v7 }
0x2642   : > { %v11998_v8 = vpop.eup %11997  ;;  %v6928_v46 = vmul.f32 1.442695, %v6922_v52 }
0x2643   : > { %v6935_v50 = vsel %vm1395_vm8, %v11998_v8, 0.0  ;;  %v6919_v49 = vpop.xlane.xlu0 %6918 }
0x2644   : > { %v12000_v30 = vpop.eup %11999  ;;  %6936 = vadd.xlane.f32.xlu0 %v6935_v50  ;;  %v6923_v11 = vsub.f32 %v6907_v20, %v6919_v49 }
0x2645   : > { %v6932_v26 = vsel %vm1395_vm8, %v12000_v30, 0.0 }
0x2646   : > { %6933 = vadd.xlane.f32.xlu1 %v6932_v26  ;;  %v6930_v53 = vmul.f32 1.442695, %v6923_v11 }
0x2648   : > { %12001 = vpow2.f32 %v6930_v53 }
0x2649   : > { %12003 = vpow2.f32 %v6928_v46 }
0x2655   : > { %v12002_v33 = vpop.eup %12001 }
0x2656   : > { %v6941_v25 = vsel %vm1395_vm8, %v12002_v33, 0.0  ;;  %v12004_v51 = vpop.eup %12003 }
0x2657   : > { %6954 = vrot.lane.b32.xlu1 %v13443_v44, %s12179_s26  ;;  %v6938_v56 = vsel %vm1395_vm8, %v12004_v51, 0.0 }
0x265a   : > { %6952 = vrot.lane.b32.xlu0 %v13445_v1, %s12179_s26 }
0x265b   : > { %7041 = vrot.lane.b32.xlu1 %v13453_v57, %s12179_s26 }
0x265e   : > { %7039 = vrot.lane.b32.xlu0 %v13457_v47, %s12179_s26  ;;  %s14113_s26 = smov 112  }
0x265f   : > { %7132 = vrot.lane.b32.xlu1 %v13443_v44, %s12180_s28 }
0x2662   : > { %7223 = vrot.lane.b32.xlu0 %v13453_v57, %s12180_s28 }
0x2663   : > { %7130 = vrot.lane.b32.xlu1 %v13445_v1, %s12180_s28 }
0x2667   : > { %7126 = vrot.lane.b32.xlu1 %v13445_v1, %s12181_s2 }
0x266b   : > { %7221 = vrot.lane.b32.xlu1 %v13457_v47, %s12180_s28  ;;  %s14114_s28 = smov 48  }
0x2681   : > { %6942 = vadd.xlane.f32.xlu0 %v6941_v25 }
0x268f   : > { %6939 = vadd.xlane.f32.xlu1 %v6938_v56 }
0x2697   : > { %7128 = vrot.lane.b32.xlu0 %v13443_v44, %s12181_s2 }
0x269b   : > { %7217 = vrot.lane.b32.xlu0 %v13457_v47, %s12181_s2 }
0x26a0   : > { %7219 = vrot.lane.b32.xlu1 %v13453_v57, %s12181_s2  ;;  %s14115_s2 = sld [smem:[#allocation5_spill]] }
0x26cd   : > { %v6937_v38 = vpop.xlane.xlu0 %6936 }
0x26ce   : > { %12005 = vrcp.f32 %v6937_v38 }
0x26cf   : > { %v6934_v43 = vpop.xlane.xlu1 %6933 }
0x26d0   : > { %12007 = vrcp.f32 %v6934_v43 }
0x26d1   : > { %v6953_v6 = vpop.permute.xlu0 %6952 }
0x26d3   : > { %v6955_v55 = vpop.permute.xlu1 %6954 }
0x26d4   : > { %11559 = vmatprep.subr.mxu0 %v6955_v55 }
0x26d5   : > { %11560 = vmatpush3.msra.mxu0 %v6955_v55  ;;  %v7040_v62 = vpop.permute.xlu0 %7039 }
0x26d6   : > { %11561 = vmatprep.subr.mxu0 %v6953_v6 }
0x26d7   : > { %v7042_v40 = vpop.permute.xlu1 %7041  ;;  %11562 = vmatpush3.msra.mxu0 %v6953_v6 }
0x26d8   : > { %11566 = vmatprep.subr.mxu0 %v7042_v40 }
0x26d9   : > { %v7224_v39 = vpop.permute.xlu0 %7223 }
0x26db   : > { %v7133_v0 = vpop.permute.xlu1 %7132  ;;  %v12006_v17 = vpop.eup %12005 }
0x26dc   : > { %11573 = vmatprep.subr.msk.mxu1 %vm1218_vm7, %v7133_v0  ;;  %v6947_v4 = vmul.f32 %v12006_v17, %v11998_v8 }
0x26dd   : > { %v12008_v32 = vpop.eup %12007  ;;  %11574 = vmatpush3.xpose.msk.msra.mxu1 %vm1218_vm7, %v7133_v0 }
0x26de   : > { %v6945_v48 = vmul.f32 %v12008_v32, %v12000_v30  ;;  %v10564_v32 = vld [vmem:[%s12224_s25 + $0x48] sm:$0xff] }
0x26df   : > { %v7131_v23 = vpop.permute.xlu1 %7130 }
0x26e0   : > { %11563 = vmatprep.mubr.msk.f32.mxu0 %vm1395_vm8, %v6945_v48  ;;  %11575 = vmatprep.subr.msk.mxu1 %vm1218_vm7, %v7131_v23 }
0x26e1   : > { %11564 = vmatmul.mubr.msk.f32.vlgmr.msra.gmra.mxu0 %vm1395_vm8, %v6947_v4  ;;  %11576 = vmatpush3.xpose.msk.msra.mxu1 %vm1218_vm7, %v7131_v23 }
0x26e2   : > { %11567 = vmatpush3.msra.mxu0 %v7042_v40 }
0x26e3   : > { %11568 = vmatprep.subr.mxu0 %v7040_v62  ;;  %v7127_v34 = vpop.permute.xlu1 %7126 }
0x26e4   : > { %11569 = vmatpush3.msra.mxu0 %v7040_v62  ;;  %11577 = vmatprep.mubr.msk.f32.mxu1 %vm1218_vm7, %v7127_v34 }
0x26e5   : > { %11580 = vmatprep.subr.msk.mxu0 %vm1218_vm7, %v7224_v39 }
0x26e7   : > { %v7222_v54 = vpop.permute.xlu1 %7221 }
0x270a   : > { %v6943_v27 = vpop.xlane.xlu0 %6942 }
0x270b   : > { %12009 = vrcp.f32 %v6943_v27 }
0x270e   : > { %v7129_v12 = vpop.permute.xlu0 %7128 }
0x270f   : > { %11578 = vmatmul.mubr.msk.f32.vlgmr.msra.gmra.mxu1 %vm1218_vm7, %v7129_v12 }
0x2712   : > { %v7218_v31 = vpop.permute.xlu0 %7217 }
0x2718   : > { %v6940_v15 = vpop.xlane.xlu1 %6939  ;;  %v12010_v9 = vpop.eup %12009 }
0x2719   : > { %12011 = vrcp.f32 %v6940_v15  ;;  %v6951_v61 = vmul.f32 %v12010_v9, %v12002_v33 }
0x271c   : > { %v7220_v13 = vpop.permute.xlu1 %7219 }
0x2726   : > { %v12012_v16 = vpop.eup %12011 }
0x2727   : > { %v6949_v5 = vmul.f32 %v12012_v16, %v12004_v51 }
0x2729   : > { %11570 = vmatprep.mubr.msk.f32.mxu0 %vm1395_vm8, %v6949_v5 }
0x272a   : > { %11571 = vmatmul.mubr.msk.f32.vlgmr.msra.gmra.mxu0 %vm1395_vm8, %v6951_v61 }
0x272b   : > { %11581 = vmatpush3.xpose.msk.msra.mxu0 %vm1218_vm7, %v7224_v39  ;;  %11584 = vmatprep.mubr.msk.f32.mxu0 %vm1218_vm7, %v7218_v31  ;;  %v10563_v31 = vld [vmem:[%s12224_s25 + $0x40] sm:$0xff] }
0x272c   : > { %11582 = vmatprep.subr.msk.mxu0 %vm1218_vm7, %v7222_v54 }
0x272f   : > { %11583 = vmatpush3.xpose.msk.msra.mxu0 %vm1218_vm7, %v7222_v54 }
0x2730   : > { %11601 = vmatprep.subr.mxu0 %v10564_v32 }
0x2732   : > { %11585 = vmatmul.mubr.msk.f32.vlgmr.msra.gmra.mxu0 %vm1218_vm7, %v7220_v13 }
0x2733   : > { %11602 = vmatpush3.msra.mxu0 %v10564_v32 }
0x27a1   : > { %v13525_v63 = vpop.f32.mrf.mxu0 }
0x27a3   : > { %v13527_v45 = vpop.f32.mrf.mxu0 }
0x27cf   : > { %v11579_v59 = vpop.f32.mrf.mxu1 }
0x27d0   : > { %v7309_v28 = vmul.f32 0.35355338, %v11579_v59 }
0x27d1   : > { %v7208_v2 = vpop.f32.mrf.mxu1 }
0x27d2   : > { %v7308_v19 = vmul.f32 0.35355338, %v7208_v2  ;;  %v7315_v14 = vsel %vm1395_vm8, %v7309_v28, -inf }
0x27d3   : > { %7316 = vmax.xlane.f32.xlu1 %v7315_v14 }
0x27d4   : > { %v7312_v20 = vsel %vm1395_vm8, %v7308_v19, -inf }
0x27d5   : > { %7313 = vmax.xlane.f32.xlu0 %v7312_v20 }
0x27ea   : > { %v13529_v29 = vpop.f32.mrf.mxu0 }
0x27ec   : > { %v13531_v10 = vpop.f32.mrf.mxu0 }
0x27f2   : > { %v11586_v37 = vpop.f32.mrf.mxu0 }
0x27f3   : > { %v7311_v41 = vmul.f32 0.35355338, %v11586_v37 }
0x27f4   : > { %v7299_v3 = vpop.f32.mrf.mxu0 }
0x27f5   : > { %v7310_v42 = vmul.f32 0.35355338, %v7299_v3  ;;  %v7321_v50 = vsel %vm1395_vm8, %v7311_v41, -inf }
0x27f7   : > { %v7318_v8 = vsel %vm1395_vm8, %v7310_v42, -inf }
0x27f8   : > { %7319 = vmax.xlane.f32.xlu0 %v7318_v8 }
0x27fc   : > { %7322 = vmax.xlane.f32.xlu0 %v7321_v50 }
0x285c   : > { %v7317_v30 = vpop.xlane.xlu1 %7316 }
0x285d   : > { %v7325_v26 = vsub.f32 %v7309_v28, %v7317_v30 }
0x285e   : > { %v7314_v7 = vpop.xlane.xlu0 %7313 }
0x285f   : > { %v7330_v49 = vmul.f32 1.442695, %v7325_v26  ;;  %v7324_v11 = vsub.f32 %v7308_v19, %v7314_v7 }
0x2861   : > { %12013 = vpow2.f32 %v7330_v49  ;;  %v7328_v53 = vmul.f32 1.442695, %v7324_v11 }
0x2863   : > { %12015 = vpow2.f32 %v7328_v53 }
0x286e   : > { %v12014_v52 = vpop.eup %12013 }
0x286f   : > { %v7339_v46 = vsel %vm1395_vm8, %v12014_v52, 0.0 }
0x2870   : > { %v12016_v33 = vpop.eup %12015  ;;  %7340 = vadd.xlane.f32.xlu0 %v7339_v46 }
0x2871   : > { %v7336_v25 = vsel %vm1395_vm8, %v12016_v33, 0.0 }
0x2872   : > { %7337 = vadd.xlane.f32.xlu1 %v7336_v25 }
0x2881   : > { %v7320_v51 = vpop.xlane.xlu0 %7319 }
0x2882   : > { %v7326_v55 = vsub.f32 %v7310_v42, %v7320_v51 }
0x2883   : > { %7358 = vrot.lane.b32.xlu1 %v13443_v44, %s12182_s27 }
0x2884   : > { %v7332_v6 = vmul.f32 1.442695, %v7326_v55 }
0x2885   : > { %v7323_v56 = vpop.xlane.xlu0 %7322 }
0x2886   : > { %v7327_v38 = vsub.f32 %v7311_v41, %v7323_v56 }
0x2887   : > { %7445 = vrot.lane.b32.xlu1 %v13453_v57, %s12182_s27 }
0x2888   : > { %v7334_v43 = vmul.f32 1.442695, %v7327_v38 }
0x288a   : > { %12017 = vpow2.f32 %v7334_v43 }
0x288b   : > { %12019 = vpow2.f32 %v7332_v6 }
0x2897   : > { %v12018_v40 = vpop.eup %12017 }
0x2898   : > { %v7345_v0 = vsel %vm1395_vm8, %v12018_v40, 0.0  ;;  %v12020_v17 = vpop.eup %12019 }
0x2899   : > { %7346 = vadd.xlane.f32.xlu0 %v7345_v0  ;;  %v7342_v62 = vsel %vm1395_vm8, %v12020_v17, 0.0 }
0x28ab   : > { %7343 = vadd.xlane.f32.xlu1 %v7342_v62 }
0x28af   : > { %7356 = vrot.lane.b32.xlu0 %v13445_v1, %s12182_s27 }
0x28b3   : > { %7730 = vrot.lane.b32.xlu0 %v13443_v44, %s14112_s23 }
0x28b7   : > { %7821 = vrot.lane.b32.xlu0 %v13453_v57, %s14112_s23 }
0x28bb   : > { %7726 = vrot.lane.b32.xlu0 %v13443_v44, %s14113_s26 }
0x28bc   : > { %7443 = vrot.lane.b32.xlu1 %v13457_v47, %s12182_s27  ;;  %s14116_s27 = sld [smem:[#allocation7_spill]] }
0x28bf   : > { %7815 = vrot.lane.b32.xlu0 %v13457_v47, %s14113_s26 }
0x28c0   : > { %7728 = vrot.lane.b32.xlu1 %v13445_v1, %s14112_s23 }
0x28c4   : > { %7724 = vrot.lane.b32.xlu1 %v13445_v1, %s14113_s26 }
0x28c8   : > { %7819 = vrot.lane.b32.xlu1 %v13457_v47, %s14112_s23  ;;  %s14121_s23 = sld [smem:[#allocation11_spill]] }
0x28cc   : > { %7817 = vrot.lane.b32.xlu1 %v13453_v57, %s14113_s26  ;;  %s14122_s26 = sld [smem:[#allocation12_spill]] }
0x28f9   : > { %v7341_v39 = vpop.xlane.xlu0 %7340 }
0x28fb   : > { %v7338_v48 = vpop.xlane.xlu1 %7337 }
0x28fc   : > { %12021 = vrcp.f32 %v7338_v48 }
0x28fd   : > { %12023 = vrcp.f32 %v7341_v39 }
0x28ff   : > { %v7359_v23 = vpop.permute.xlu1 %7358 }
0x2900   : > { %11587 = vmatprep.subr.mxu1 %v7359_v23 }
0x2901   : > { %11588 = vmatpush3.msra.mxu1 %v7359_v23 }
0x2903   : > { %v7446_v9 = vpop.permute.xlu1 %7445 }
0x2909   : > { %v12022_v4 = vpop.eup %12021 }
0x290a   : > { %v7349_v34 = vmul.f32 %v12022_v4, %v12016_v33  ;;  %v12024_v12 = vpop.eup %12023 }
0x290b   : > { %v7351_v15 = vmul.f32 %v12024_v12, %v12014_v52 }
0x290c   : > { %11591 = vmatprep.mubr.msk.f32.mxu1 %vm1395_vm8, %v7349_v34 }
0x2922   : > { %v7347_v27 = vpop.xlane.xlu0 %7346 }
0x2923   : > { %12025 = vrcp.f32 %v7347_v27 }
0x2926   : > { %v7357_v54 = vpop.permute.xlu0 %7356 }
0x2927   : > { %11589 = vmatprep.subr.mxu1 %v7357_v54 }
0x2928   : > { %11590 = vmatpush3.msra.mxu1 %v7357_v54 }
0x2929   : > { %11592 = vmatmul.mubr.msk.f32.vlgmr.msra.gmra.mxu1 %vm1395_vm8, %v7351_v15  ;;  %11594 = vmatprep.subr.mxu1 %v7446_v9 }
0x292a   : > { %11595 = vmatpush3.msra.mxu1 %v7446_v9  ;;  %v7731_v16 = vpop.permute.xlu0 %7730 }
0x292b   : > { %11617 = vmatprep.subr.msk.mxu0 %vm1218_vm7, %v7731_v16 }
0x292e   : > { %v7822_v2 = vpop.permute.xlu0 %7821 }
0x2930   : > { %v12026_v59 = vpop.eup %12025 }
0x2931   : > { %v7355_v14 = vmul.f32 %v12026_v59, %v12018_v40 }
0x2932   : > { %v7727_v37 = vpop.permute.xlu0 %7726 }
0x2934   : > { %v7344_v5 = vpop.xlane.xlu1 %7343 }
0x2935   : > { %12027 = vrcp.f32 %v7344_v5 }
0x2936   : > { %v7816_v42 = vpop.permute.xlu0 %7815 }
0x2938   : > { %v7444_v61 = vpop.permute.xlu1 %7443 }
0x2939   : > { %11596 = vmatprep.subr.mxu1 %v7444_v61 }
0x293a   : > { %11597 = vmatpush3.msra.mxu1 %v7444_v61 }
0x293b   : > { %11609 = vmatprep.subr.mxu1 %v10563_v31 }
0x293c   : > { %v7729_v13 = vpop.permute.xlu1 %7728 }
0x2940   : > { %v7725_v20 = vpop.permute.xlu1 %7724 }
0x2942   : > { %v12028_v28 = vpop.eup %12027 }
0x2943   : > { %v7353_v19 = vmul.f32 %v12028_v28, %v12020_v17 }
0x2944   : > { %v7820_v3 = vpop.permute.xlu1 %7819 }
0x2945   : > { %11598 = vmatprep.mubr.msk.f32.mxu1 %vm1395_vm8, %v7353_v19 }
0x2946   : > { %11599 = vmatmul.mubr.msk.f32.vlgmr.msra.gmra.mxu1 %vm1395_vm8, %v7355_v14 }
0x2947   : > { %11610 = vmatpush3.msra.mxu1 %v10563_v31  ;;  %11611 = vmatprep.mubr.msk.f32.mxu1 %vm1218_vm7, %v13527_v45 }
0x2948   : > { %11624 = vmatprep.subr.msk.mxu1 %vm1218_vm7, %v7822_v2  ;;  %v7818_v45 = vpop.permute.xlu1 %7817 }
0x294a   : > { %11612 = vmatmul.mubr.msk.f32.vlgmr.msra.gmra.mxu1 %vm1218_vm7, %v13525_v63 }
0x294b   : > { %11625 = vmatpush3.xpose.msk.msra.mxu1 %vm1218_vm7, %v7822_v2  ;;  %11614 = vmatprep.mubr.msk.f32.mxu1 %vm1218_vm7, %v13531_v10 }
0x294c   : > { %11626 = vmatprep.subr.msk.mxu1 %vm1218_vm7, %v7820_v3 }
0x294e   : > { %11615 = vmatmul.mubr.msk.f32.gmra.mxu1 %vm1218_vm7, %v13529_v29 }
0x294f   : > { %11627 = vmatpush3.xpose.msk.msra.mxu1 %vm1218_vm7, %v7820_v3  ;;  %11628 = vmatprep.mubr.msk.f32.mxu1 %vm1218_vm7, %v7816_v42  ;;  %v10565_v42 = vld [vmem:[%s12224_s25 + $0x50] sm:$0xff] }
0x2952   : > { %11629 = vmatmul.mubr.msk.f32.vlgmr.msra.gmra.mxu1 %vm1218_vm7, %v7818_v45 }
0x29e9   : > { %v11593_v63 = vpop.f32.mrf.mxu1 }
0x29eb   : > { %v7434_v41 = vpop.f32.mrf.mxu1 }
0x29ec   : > { %11603 = vmatprep.mubr.msk.f32.mxu0 %vm1218_vm7, %v7434_v41 }
0x29ed   : > { %11604 = vmatmul.mubr.msk.f32.vlgmr.msra.gmra.mxu0 %vm1218_vm7, %v11593_v63 }
0x29ee   : > { %11618 = vmatpush3.xpose.msk.msra.mxu0 %vm1218_vm7, %v7731_v16 }
0x29ef   : > { %11619 = vmatprep.subr.msk.mxu0 %vm1218_vm7, %v7729_v13 }
0x29f2   : > { %11620 = vmatpush3.xpose.msk.msra.mxu0 %vm1218_vm7, %v7729_v13 }
0x2a06   : > { %v11600_v29 = vpop.f32.mrf.mxu1 }
0x2a08   : > { %v7521_v10 = vpop.f32.mrf.mxu1 }
0x2a09   : > { %11606 = vmatprep.mubr.msk.f32.mxu0 %vm1218_vm7, %v7521_v10 }
0x2a0a   : > { %11607 = vmatmul.mubr.msk.f32.gmra.mxu0 %vm1218_vm7, %v11600_v29  ;;  %v13593_v8 = vpop.f32.mrf.mxu1 }
0x2a0b   : > { %11621 = vmatprep.mubr.msk.f32.mxu0 %vm1218_vm7, %v7725_v20 }
0x2a0c   : > { %v13595_v50 = vpop.f32.mrf.mxu1 }
0x2a0e   : > { %11622 = vmatmul.mubr.msk.f32.vlgmr.msra.gmra.mxu0 %vm1218_vm7, %v7727_v37  ;;  %v13597_v30 = vpop.f32.mrf.mxu1 }
0x2a10   : > { %v13601_v7 = vpop.f32.mrf.mxu1 }
0x2a12   : > { %v11630_v53 = vpop.f32.mrf.mxu1 }
0x2a13   : > { %v7909_v6 = vmul.f32 0.35355338, %v11630_v53 }
0x2a14   : > { %v7897_v25 = vpop.f32.mrf.mxu1 }
0x2a15   : > { %v7908_v43 = vmul.f32 0.35355338, %v7897_v25  ;;  %v7919_v0 = vsel %vm1395_vm8, %v7909_v6, -inf }
0x2a17   : > { %v7916_v40 = vsel %vm1395_vm8, %v7908_v43, -inf }
0x2aad   : > { %v13599_v26 = vpop.f32.mrf.mxu0 }
0x2aaf   : > { %v13603_v49 = vpop.f32.mrf.mxu0 }
0x2aca   : > { %v13605_v11 = vpop.f32.mrf.mxu0 }
0x2acc   : > { %v13607_v52 = vpop.f32.mrf.mxu0 }
0x2ace   : > { %v11623_v46 = vpop.f32.mrf.mxu0 }
0x2acf   : > { %v7907_v33 = vmul.f32 0.35355338, %v11623_v46 }
0x2ad0   : > { %v7806_v51 = vpop.f32.mrf.mxu0 }
0x2ad1   : > { %v7906_v56 = vmul.f32 0.35355338, %v7806_v51  ;;  %v7913_v38 = vsel %vm1395_vm8, %v7907_v33, -inf }
0x2ad2   : > { %7914 = vmax.xlane.f32.xlu1 %v7913_v38 }
0x2ad3   : > { %v7910_v55 = vsel %vm1395_vm8, %v7906_v56, -inf }
0x2ad4   : > { %7911 = vmax.xlane.f32.xlu0 %v7910_v55 }
0x2ad8   : > { %7917 = vmax.xlane.f32.xlu0 %v7916_v40 }
0x2adc   : > { %7920 = vmax.xlane.f32.xlu0 %v7919_v0 }
0x2b5b   : > { %v7915_v32 = vpop.xlane.xlu1 %7914 }
0x2b5c   : > { %v7923_v23 = vsub.f32 %v7907_v33, %v7915_v32 }
0x2b5d   : > { %v7912_v17 = vpop.xlane.xlu0 %7911 }
0x2b5e   : > { %v7928_v27 = vmul.f32 1.442695, %v7923_v23  ;;  %v7922_v31 = vsub.f32 %v7906_v56, %v7912_v17 }
0x2b60   : > { %v7926_v13 = vmul.f32 1.442695, %v7922_v31 }
0x2b61   : > { %v7918_v62 = vpop.xlane.xlu0 %7917 }
0x2b62   : > { %v7924_v48 = vsub.f32 %v7908_v43, %v7918_v62 }
0x2b64   : > { %v7930_v4 = vmul.f32 1.442695, %v7924_v48 }
0x2b65   : > { %v7921_v34 = vpop.xlane.xlu0 %7920 }
0x2b66   : > { %12029 = vpow2.f32 %v7930_v4  ;;  %v7925_v39 = vsub.f32 %v7909_v6, %v7921_v34 }
0x2b68   : > { %v7932_v12 = vmul.f32 1.442695, %v7925_v39 }
0x2b6a   : > { %12031 = vpow2.f32 %v7932_v12 }
0x2b6b   : > { %12033 = vpow2.f32 %v7928_v27 }
0x2b6c   : > { %12035 = vpow2.f32 %v7926_v13 }
0x2b73   : > { %v12030_v54 = vpop.eup %12029 }
0x2b74   : > { %v7940_v15 = vsel %vm1395_vm8, %v12030_v54, 0.0 }
0x2b75   : > { %7941 = vadd.xlane.f32.xlu1 %v7940_v15 }
0x2b77   : > { %v12032_v9 = vpop.eup %12031 }
0x2b78   : > { %v7943_v16 = vsel %vm1395_vm8, %v12032_v9, 0.0  ;;  %v13615_v5 = vpop.eup %12033 }
0x2b79   : > { %7944 = vadd.xlane.f32.xlu0 %v7943_v16  ;;  %v7937_v61 = vsel %vm1395_vm8, %v13615_v5, 0.0  ;;  %v12036_v59 = vpop.eup %12035 }
0x2b7a   : > { %v7934_v28 = vsel %vm1395_vm8, %v12036_v59, 0.0 }
0x2b7d   : > { %7938 = vadd.xlane.f32.xlu0 %v7937_v61 }
0x2b86   : > { %7956 = vrot.lane.b32.xlu1 %v13443_v44, %s14114_s28 }
0x2b8a   : > { %8043 = vrot.lane.b32.xlu1 %v13453_v57, %s14114_s28 }
0x2b93   : > { %7954 = vrot.lane.b32.xlu0 %v13445_v1, %s14114_s28 }
0x2b97   : > { %8235 = vrot.lane.b32.xlu0 %v13443_v44, %s14109_s11 }
0x2b9b   : > { %8229 = vrot.lane.b32.xlu0 %v13445_v1, %s14110_s7 }
0x2b9f   : > { %8326 = vrot.lane.b32.xlu0 %v13453_v57, %s14109_s11 }
0x2ba3   : > { %8320 = vrot.lane.b32.xlu0 %v13457_v47, %s14110_s7 }
0x2bae   : > { %7935 = vadd.xlane.f32.xlu1 %v7934_v28 }
0x2bbf   : > { %8041 = vrot.lane.b32.xlu1 %v13457_v47, %s14114_s28  ;;  %s12190_s28 = smov 32  }
0x2bc3   : > { %8233 = vrot.lane.b32.xlu1 %v13445_v1, %s14109_s11 }
0x2bc7   : > { %8231 = vrot.lane.b32.xlu1 %v13443_v44, %s14110_s7 }
0x2bcb   : > { %8324 = vrot.lane.b32.xlu1 %v13457_v47, %s14109_s11  ;;  %s14118_s11 = sld [smem:[#allocation9_spill]] }
0x2bcf   : > { %8322 = vrot.lane.b32.xlu1 %v13453_v57, %s14110_s7  ;;  %s14117_s7 = sld [smem:[#allocation6_spill]] }
0x2bfe   : > { %v7942_v2 = vpop.xlane.xlu1 %7941 }
0x2bff   : > { %12037 = vrcp.f32 %v7942_v2  ;;  %v7706_v2 = vadd.f32 %v13595_v50, %v13603_v49 }
0x2c02   : > { %v7957_v19 = vpop.permute.xlu1 %7956  ;;  %v7945_v14 = vpop.xlane.xlu0 %7944 }
0x2c03   : > { %11631 = vmatprep.subr.mxu0 %v7957_v19  ;;  %12039 = vrcp.f32 %v7945_v14 }
0x2c04   : > { %11632 = vmatpush3.msra.mxu0 %v7957_v19 }
0x2c06   : > { %v8044_v20 = vpop.permute.xlu1 %8043  ;;  %v7939_v37 = vpop.xlane.xlu0 %7938 }
0x2c07   : > { %11638 = vmatprep.subr.mxu1 %v8044_v20  ;;  %12041 = vrcp.f32 %v7939_v37  ;;  %v7721_v37 = vadd.f32 %v13597_v30, %v13605_v11 }
0x2c08   : > { %11639 = vmatpush3.msra.mxu1 %v8044_v20 }
0x2c0a   : > { %v7955_v3 = vpop.permute.xlu0 %7954 }
0x2c0b   : > { %11633 = vmatprep.subr.mxu0 %v7955_v3 }
0x2c0c   : > { %v12038_v45 = vpop.eup %12037  ;;  %11634 = vmatpush3.msra.mxu0 %v7955_v3 }
0x2c0d   : > { %v7951_v63 = vmul.f32 %v12038_v45, %v12030_v54  ;;  %11645 = vmatprep.subr.mxu0 %v10565_v42 }
0x2c0e   : > { %v8236_v29 = vpop.permute.xlu0 %8235 }
0x2c0f   : > { %11642 = vmatprep.mubr.msk.f32.mxu1 %vm1395_vm8, %v7951_v63 }
0x2c10   : > { %v12040_v10 = vpop.eup %12039 }
0x2c11   : > { %v7953_v46 = vmul.f32 %v12040_v10, %v12032_v9 }
0x2c12   : > { %v8230_v33 = vpop.permute.xlu0 %8229 }
0x2c14   : > { %v12042_v51 = vpop.eup %12041 }
0x2c15   : > { %v7949_v55 = vmul.f32 %v12042_v51, %v13615_v5 }
0x2c16   : > { %v8327_v6 = vpop.permute.xlu0 %8326 }
0x2c1a   : > { %v8321_v12 = vpop.permute.xlu0 %8320 }
0x2c37   : > { %v7936_v41 = vpop.xlane.xlu1 %7935 }
0x2c38   : > { %12043 = vrcp.f32 %v7936_v41 }
0x2c3b   : > { %v8042_v53 = vpop.permute.xlu1 %8041 }
0x2c3c   : > { %11640 = vmatprep.subr.mxu1 %v8042_v53 }
0x2c3d   : > { %11641 = vmatpush3.msra.mxu1 %v8042_v53 }
0x2c3e   : > { %11643 = vmatmul.mubr.msk.f32.vlgmr.msra.gmra.mxu1 %vm1395_vm8, %v7953_v46  ;;  %11653 = vmatprep.subr.msk.mxu1 %vm1218_vm7, %v8236_v29 }
0x2c3f   : > { %v8234_v25 = vpop.permute.xlu1 %8233  ;;  %11654 = vmatpush3.xpose.msk.msra.mxu1 %vm1218_vm7, %v8236_v29  ;;  %11657 = vmatprep.mubr.msk.f32.mxu1 %vm1218_vm7, %v8230_v33 }
0x2c40   : > { %11655 = vmatprep.subr.msk.mxu1 %vm1218_vm7, %v8234_v25 }
0x2c43   : > { %11656 = vmatpush3.xpose.msk.msra.mxu1 %vm1218_vm7, %v8234_v25  ;;  %v8232_v38 = vpop.permute.xlu1 %8231 }
0x2c45   : > { %v12044_v56 = vpop.eup %12043 }
0x2c46   : > { %11658 = vmatmul.mubr.msk.f32.vlgmr.msra.gmra.mxu1 %vm1218_vm7, %v8232_v38  ;;  %v7947_v43 = vmul.f32 %v12044_v56, %v12036_v59  ;;  %v7711_v59 = vadd.f32 %v13593_v8, %v13599_v26 }
0x2c47   : > { %v8325_v27 = vpop.permute.xlu1 %8324 }
0x2c48   : > { %11635 = vmatprep.mubr.msk.f32.mxu0 %vm1395_vm8, %v7947_v43 }
0x2c49   : > { %11636 = vmatmul.mubr.msk.f32.vlgmr.msra.gmra.mxu0 %vm1395_vm8, %v7949_v55 }
0x2c4a   : > { %11646 = vmatpush3.msra.mxu0 %v10565_v42 }
0x2c4b   : > { %11660 = vmatprep.subr.msk.mxu0 %vm1218_vm7, %v8327_v6  ;;  %v8323_v54 = vpop.permute.xlu1 %8322 }
0x2cfe   : > { %v11644_v40 = vpop.f32.mrf.mxu1 }
0x2d00   : > { %v8119_v0 = vpop.f32.mrf.mxu1 }
0x2d06   : > { %v11659_v17 = vpop.f32.mrf.mxu1 }
0x2d07   : > { %v8412_v32 = vmul.f32 0.35355338, %v11659_v17 }
0x2d08   : > { %v8311_v62 = vpop.f32.mrf.mxu1 }
0x2d09   : > { %v8411_v48 = vmul.f32 0.35355338, %v8311_v62  ;;  %v11637_v23 = vpop.f32.mrf.mxu0  ;;  %v8418_v4 = vsel %vm1395_vm8, %v8412_v32, -inf }
0x2d0a   : > { %8419 = vmax.xlane.f32.xlu1 %v8418_v4 }
0x2d0b   : > { %v8032_v34 = vpop.f32.mrf.mxu0  ;;  %v8415_v39 = vsel %vm1395_vm8, %v8411_v48, -inf }
0x2d0c   : > { %11647 = vmatprep.mubr.msk.f32.mxu0 %vm1218_vm7, %v8032_v34  ;;  %8416 = vmax.xlane.f32.xlu0 %v8415_v39 }
0x2d0d   : > { %11648 = vmatmul.mubr.msk.f32.vlgmr.msra.gmra.mxu0 %vm1218_vm7, %v11637_v23 }
0x2d0e   : > { %11661 = vmatpush3.xpose.msk.msra.mxu0 %vm1218_vm7, %v8327_v6  ;;  %11650 = vmatprep.mubr.msk.f32.mxu0 %vm1218_vm7, %v8119_v0 }
0x2d0f   : > { %11662 = vmatprep.subr.msk.mxu0 %vm1218_vm7, %v8325_v27 }
0x2d11   : > { %11651 = vmatmul.mubr.msk.f32.gmra.mxu0 %vm1218_vm7, %v11644_v40 }
0x2d12   : > { %11663 = vmatpush3.xpose.msk.msra.mxu0 %vm1218_vm7, %v8325_v27  ;;  %11664 = vmatprep.mubr.msk.f32.mxu0 %vm1218_vm7, %v8321_v12  ;;  %v10566_v12 = vld [vmem:[%s12224_s25 + $0x58] sm:$0xff] }
0x2d15   : > { %11665 = vmatmul.mubr.msk.f32.vlgmr.msra.gmra.mxu0 %vm1218_vm7, %v8323_v54 }
0x2d93   : > { %v8420_v31 = vpop.xlane.xlu1 %8419 }
0x2d94   : > { %v8428_v13 = vsub.f32 %v8412_v32, %v8420_v31 }
0x2d95   : > { %v8417_v15 = vpop.xlane.xlu0 %8416 }
0x2d96   : > { %v8427_v9 = vsub.f32 %v8411_v48, %v8417_v15  ;;  %v8433_v19 = vmul.f32 1.442695, %v8428_v13 }
0x2d98   : > { %v8431_v16 = vmul.f32 1.442695, %v8427_v9 }
0x2d9a   : > { %12045 = vpow2.f32 %v8431_v16 }
0x2d9b   : > { %12047 = vpow2.f32 %v8433_v19 }
0x2da7   : > { %v12046_v5 = vpop.eup %12045 }
0x2da8   : > { %v8439_v61 = vsel %vm1395_vm8, %v12046_v5, 0.0  ;;  %v12048_v11 = vpop.eup %12047 }
0x2da9   : > { %8440 = vadd.xlane.f32.xlu1 %v8439_v61  ;;  %v8442_v29 = vsel %vm1395_vm8, %v12048_v11, 0.0  ;;  %v10632_v61 = vld [vmem:[%s12229_s29 + $0x2] ss:$0 sm:$0xff] }
0x2dba   : > { %8461 = vrot.lane.b32.xlu1 %v13443_v44, %s14111_s16 }
0x2dbe   : > { %8548 = vrot.lane.b32.xlu1 %v13453_v57, %s14111_s16  ;;  %v7716_v57 = vadd.f32 %v13601_v7, %v13607_v52 }
0x2dcd   : > { %v11649_v28 = vpop.f32.mrf.mxu0 }
0x2dce   : > { %v13677_v14 = vadd.f32 %v11649_v28, %v7711_v59 }
0x2dcf   : > { %v8206_v20 = vpop.f32.mrf.mxu0 }
0x2dd0   : > { %v13681_v44 = vadd.f32 %v8206_v20, %v7706_v2 }
0x2dd1   : > { %v11652_v3 = vpop.f32.mrf.mxu0 }
0x2dd2   : > { %v13685_v42 = vadd.f32 %v11652_v3, %v7721_v37 }
0x2dd3   : > { %v8216_v8 = vpop.f32.mrf.mxu0 }
0x2dd4   : > { %v13687_v26 = vadd.f32 %v8216_v8, %v7716_v57 }
0x2dd5   : > { %v11666_v50 = vpop.f32.mrf.mxu0 }
0x2dd6   : > { %v8414_v63 = vmul.f32 0.35355338, %v11666_v50 }
0x2dd7   : > { %v8402_v49 = vpop.f32.mrf.mxu0 }
0x2dd8   : > { %v8413_v45 = vmul.f32 0.35355338, %v8402_v49  ;;  %v8424_v30 = vsel %vm1395_vm8, %v8414_v63, -inf }
0x2dda   : > { %v8421_v41 = vsel %vm1395_vm8, %v8413_v45, -inf }
0x2ddb   : > { %8422 = vmax.xlane.f32.xlu0 %v8421_v41 }
0x2ddf   : > { %8425 = vmax.xlane.f32.xlu0 %v8424_v30 }
0x2de3   : > { %8443 = vadd.xlane.f32.xlu0 %v8442_v29 }
0x2e32   : > { %v8441_v7 = vpop.xlane.xlu1 %8440 }
0x2e33   : > { %12049 = vrcp.f32 %v8441_v7 }
0x2e36   : > { %v8462_v52 = vpop.permute.xlu1 %8461 }
0x2e37   : > { %11667 = vmatprep.subr.mxu1 %v8462_v52 }
0x2e38   : > { %11668 = vmatpush3.msra.mxu1 %v8462_v52 }
0x2e3a   : > { %v8549_v10 = vpop.permute.xlu1 %8548 }
0x2e3b   : > { %11674 = vmatprep.subr.mxu0 %v8549_v10 }
0x2e3c   : > { %11675 = vmatpush3.msra.mxu0 %v8549_v10 }
0x2e40   : > { %v12050_v53 = vpop.eup %12049 }
0x2e41   : > { %v8452_v46 = vmul.f32 %v12050_v53, %v12046_v5 }
0x2e43   : > { %11671 = vmatprep.mubr.msk.f32.mxu1 %vm1395_vm8, %v8452_v46 }
0x2e64   : > { %v8423_v33 = vpop.xlane.xlu0 %8422 }
0x2e65   : > { %v8429_v25 = vsub.f32 %v8413_v45, %v8423_v33 }
0x2e67   : > { %v8435_v51 = vmul.f32 1.442695, %v8429_v25 }
0x2e68   : > { %v8426_v56 = vpop.xlane.xlu0 %8425 }
0x2e69   : > { %12051 = vpow2.f32 %v8435_v51  ;;  %v8430_v38 = vsub.f32 %v8414_v63, %v8426_v56 }
0x2e6b   : > { %v8437_v43 = vmul.f32 1.442695, %v8430_v38 }
0x2e6c   : > { %v8444_v17 = vpop.xlane.xlu0 %8443 }
0x2e6d   : > { %12053 = vpow2.f32 %v8437_v43 }
0x2e6e   : > { %12055 = vrcp.f32 %v8444_v17  ;;  %v10641_v17 = vld [vmem:[%s12244_s14 + $0xa0] sm:$0xff] }
0x2e76   : > { %v12052_v55 = vpop.eup %12051 }
0x2e77   : > { %v8445_v6 = vsel %vm1395_vm8, %v12052_v55, 0.0 }
0x2e78   : > { %8446 = vadd.xlane.f32.xlu1 %v8445_v6  ;;  %v10644_v6 = vld [vmem:[%s12244_s14 + $0xb8] sm:$0xff] }
0x2e7a   : > { %v12054_v40 = vpop.eup %12053 }
0x2e7b   : > { %v8448_v0 = vsel %vm1395_vm8, %v12054_v40, 0.0  ;;  %v12056_v23 = vpop.eup %12055 }
0x2e7c   : > { %8449 = vadd.xlane.f32.xlu0 %v8448_v0  ;;  %v8454_v34 = vmul.f32 %v12056_v23, %v12048_v11  ;;  %v10642_v0 = vld [vmem:[%s12244_s14 + $0xa8] sm:$0xff]  ;;  %v10637_v23 = vld [vmem:[%s12244_s14 + $0x80] sm:$0xff] }
0x2e89   : > { %8546 = vrot.lane.b32.xlu1 %v13457_v47, %s14111_s16 }
0x2e92   : > { %8459 = vrot.lane.b32.xlu0 %v13445_v1, %s14111_s16  ;;  %s14120_s16 = sld [smem:[#allocation10_spill]] }
0x2f01   : > { %v8447_v32 = vpop.xlane.xlu1 %8446 }
0x2f02   : > { %12057 = vrcp.f32 %v8447_v32  ;;  %v10640_v32 = vld [vmem:[%s12244_s14 + $0x98] sm:$0xff] }
0x2f05   : > { %v8547_v62 = vpop.permute.xlu1 %8546  ;;  %v8450_v48 = vpop.xlane.xlu0 %8449 }
0x2f06   : > { %12059 = vrcp.f32 %v8450_v48  ;;  %11676 = vmatprep.subr.mxu0 %v8547_v62  ;;  %v10638_v48 = vld [vmem:[%s12244_s14 + $0x88] sm:$0xff] }
0x2f07   : > { %11677 = vmatpush3.msra.mxu0 %v8547_v62  ;;  %v10639_v62 = vld [vmem:[%s12244_s14 + $0x90] sm:$0xff] }
0x2f08   : > { %8884 = vmatprep.subr.mxu0 %v10644_v6  ;;  %v10686_v6 = vld [vmem:[%s12254_s24 + $0x2a0] sm:$0xff] }
0x2f09   : > { %v8460_v4 = vpop.permute.xlu0 %8459 }
0x2f0a   : > { %11669 = vmatprep.subr.mxu1 %v8460_v4 }
0x2f0b   : > { %11670 = vmatpush3.msra.mxu1 %v8460_v4 }
0x2f0c   : > { %11672 = vmatmul.mubr.msk.f32.vlgmr.msra.gmra.mxu1 %vm1395_vm8, %v8454_v34  ;;  %11681 = vmatprep.subr.mxu1 %v10566_v12 }
0x2f0d   : > { %11682 = vmatpush3.msra.mxu1 %v10566_v12 }
0x2f0f   : > { %v12058_v47 = vpop.eup %12057 }
0x2f10   : > { %v8456_v39 = vmul.f32 %v12058_v47, %v12052_v55 }
0x2f12   : > { %11678 = vmatprep.mubr.msk.f32.mxu0 %vm1395_vm8, %v8456_v39 }
0x2f13   : > { %v12060_v1 = vpop.eup %12059 }
0x2f14   : > { %v8458_v27 = vmul.f32 %v12060_v1, %v12054_v40  ;;  %v10643_v40 = vld [vmem:[%s12244_s14 + $0xb0] sm:$0xff] }
0x2f16   : > { %11679 = vmatmul.mubr.msk.f32.vlgmr.msra.gmra.mxu0 %vm1395_vm8, %v8458_v27 }
0x2f17   : > { %8924 = vmatprep.mubr.f32.mxu0 %v12177_v18  ;;  %8885 = vmatpush1.msra.mxu0 %v10643_v40  ;;  %v10670_v40 = vld [vmem:[%s12254_s24 + $0x220] sm:$0xff] }
0x2f18   : > { %8886 = vmatprep.subr.mxu0 %v10642_v0  ;;  %v10685_v0 = vld [vmem:[%s12254_s24 + $0x298] sm:$0xff] }
0x2f19   : > { %8887 = vmatpush1.msra.mxu0 %v10641_v17  ;;  %v10669_v17 = vld [vmem:[%s12254_s24 + $0x218] sm:$0xff] }
0x2f1a   : > { %8888 = vmatprep.subr.mxu0 %v10640_v32  ;;  %v10684_v32 = vld [vmem:[%s12254_s24 + $0x290] sm:$0xff] }
0x2f1b   : > { %8889 = vmatpush1.msra.mxu0 %v10639_v62  ;;  %v10668_v62 = vld [vmem:[%s12254_s24 + $0x210] sm:$0xff] }
0x2f1c   : > { %8890 = vmatprep.subr.mxu0 %v10638_v48  ;;  %v10683_v48 = vld [vmem:[%s12254_s24 + $0x288] sm:$0xff] }
0x2f1d   : > { %8891 = vmatpush1.msra.mxu0 %v10637_v23  ;;  %v10667_v23 = vld [vmem:[%s12254_s24 + $0x208] sm:$0xff] }
0x2fcc   : > { %v11673_v54 = vpop.f32.mrf.mxu1 }
0x2fce   : > { %v8537_v15 = vpop.f32.mrf.mxu1 }
0x2fcf   : > { %11683 = vmatprep.mubr.msk.f32.mxu1 %vm1218_vm7, %v8537_v15 }
0x2fd0   : > { %11684 = vmatmul.mubr.msk.f32.vlgmr.msra.gmra.mxu1 %vm1218_vm7, %v11673_v54 }
0x2fd6   : > { %v11680_v9 = vpop.f32.mrf.mxu0 }
0x2fd8   : > { %v8624_v16 = vpop.f32.mrf.mxu0 }
0x2fd9   : > { %11686 = vmatprep.mubr.msk.f32.mxu1 %vm1218_vm7, %v8624_v16 }
0x2fda   : > { %11687 = vmatmul.mubr.msk.f32.gmra.mxu1 %vm1218_vm7, %v11680_v9 }
0x3090   : > { %v11685_v5 = vpop.f32.mrf.mxu1 }
0x3091   : > { %v8731_v31 = vadd.f32 %v11685_v5, %v13677_v14 }
0x3092   : > { %v8711_v13 = vpop.f32.mrf.mxu1 }
0x3093   : > { %v8743_v59 = vadd.f32 %v10632_v61, %v8731_v31  ;;  %v8730_v28 = vadd.f32 %v8711_v13, %v13681_v44 }
0x3095   : > { %v8742_v2 = vadd.f32 %v10632_v61, %v8730_v28  ;;  %v8747_v19 = vadd.f32 %v8743_v59, %v13430_v60  ;;  %v10635_v28 = vld [vmem:[%s12234_s3 + $0x2] ss:$0 sm:$0xff] }
0x3097   : > { %v8757_v20 = vsel %vm1110_vm6, %v8747_v19, 0.0  ;;  %v8746_v37 = vadd.f32 %v8742_v2, %v13426_v36 }
0x3098   : > { %8758 = vadd.xlane.f32.xlu1 %v8757_v20 }
0x3099   : > { %v8754_v3 = vsel %vm1110_vm6, %v8746_v37, 0.0 }
0x309a   : > { %8755 = vadd.xlane.f32.xlu0 %v8754_v3  ;;  %v11688_v57 = vpop.f32.mrf.mxu1 }
0x309b   : > { %v8733_v8 = vadd.f32 %v11688_v57, %v13685_v42 }
0x309c   : > { %v8721_v50 = vpop.f32.mrf.mxu1 }
0x309d   : > { %v8732_v14 = vadd.f32 %v8721_v50, %v13687_v26  ;;  %v8745_v49 = vadd.f32 %v10632_v61, %v8733_v8 }
0x309f   : > { %v8744_v45 = vadd.f32 %v10632_v61, %v8732_v14  ;;  %v8749_v63 = vadd.f32 %v8745_v49, %v13438_v58 }
0x30a1   : > { %v8748_v44 = vadd.f32 %v8744_v45, %v13434_v35  ;;  %v8763_v36 = vsel %vm1110_vm6, %v8749_v63, 0.0 }
0x30a3   : > { %v8760_v60 = vsel %vm1110_vm6, %v8748_v44, 0.0 }
0x30a4   : > { %8761 = vadd.xlane.f32.xlu0 %v8760_v60 }
0x30a8   : > { %8764 = vadd.xlane.f32.xlu0 %v8763_v36  ;;  %v10681_v36 = vld [vmem:[%s12254_s24 + $0x278] sm:$0xff] }
0x3121   : > { %v8759_v41 = vpop.xlane.xlu1 %8758 }
0x3122   : > { %v8767_v30 = vmul.f32 0.03125, %v8759_v41  ;;  %v10696_v41 = vld [vmem:[%s12254_s24 + $0x2f0] sm:$0xff] }
0x3123   : > { %v8756_v11 = vpop.xlane.xlu0 %8755 }
0x3124   : > { %v8771_v29 = vsub.f32 %v8747_v19, %v8767_v30  ;;  %v8766_v42 = vmul.f32 0.03125, %v8756_v11  ;;  %v10636_v19 = vld [vmem:[%s12239_s8 + $0x2] ss:$0 sm:$0xff]  ;;  %v10680_v30 = vld [vmem:[%s12254_s24 + $0x270] sm:$0xff]  ;;  %v10695_v11 = vld [vmem:[%s12254_s24 + $0x2e8] sm:$0xff] }
0x3126   : > { %v8770_v7 = vsub.f32 %v8746_v37, %v8766_v42  ;;  %v8775_v52 = vmul.f32 %v8771_v29, %v8771_v29  ;;  %v10694_v42 = vld [vmem:[%s12254_s24 + $0x2e0] sm:$0xff] }
0x3128   : > { %v8781_v26 = vsel %vm1110_vm6, %v8775_v52, 0.0  ;;  %v8774_v10 = vmul.f32 %v8770_v7, %v8770_v7  ;;  %v10693_v52 = vld [vmem:[%s12254_s24 + $0x2d8] sm:$0xff] }
0x3129   : > { %8782 = vadd.xlane.f32.xlu0 %v8781_v26  ;;  %v10677_v26 = vld [vmem:[%s12254_s24 + $0x258] sm:$0xff] }
0x312a   : > { %v8778_v35 = vsel %vm1110_vm6, %v8774_v10, 0.0  ;;  %v10692_v10 = vld [vmem:[%s12254_s24 + $0x2d0] sm:$0xff] }
0x312b   : > { %8779 = vadd.xlane.f32.xlu1 %v8778_v35  ;;  %v10676_v35 = vld [vmem:[%s12254_s24 + $0x250] sm:$0xff] }
0x312d   : > { %v8762_v58 = vpop.xlane.xlu0 %8761 }
0x312e   : > { %v8768_v53 = vmul.f32 0.03125, %v8762_v58  ;;  %v10691_v58 = vld [vmem:[%s12254_s24 + $0x2c8] sm:$0xff] }
0x3130   : > { %v8772_v46 = vsub.f32 %v8748_v44, %v8768_v53  ;;  %v10675_v53 = vld [vmem:[%s12254_s24 + $0x248] sm:$0xff] }
0x3131   : > { %v8765_v33 = vpop.xlane.xlu0 %8764 }
0x3132   : > { %v8769_v25 = vmul.f32 0.03125, %v8765_v33  ;;  %v8776_v51 = vmul.f32 %v8772_v46, %v8772_v46  ;;  %v10674_v33 = vld [vmem:[%s12254_s24 + $0x240] sm:$0xff] }
0x3134   : > { %v8773_v56 = vsub.f32 %v8749_v63, %v8769_v25  ;;  %v8784_v38 = vsel %vm1110_vm6, %v8776_v51, 0.0  ;;  %v10697_v63 = vld [vmem:[%s12254_s24 + $0x2f8] sm:$0xff] }
0x3135   : > { %8785 = vadd.xlane.f32.xlu1 %v8784_v38  ;;  %11100 = vmatprep.subr.mxu1 %v10697_v63  ;;  %v10689_v25 = vld [vmem:[%s12254_s24 + $0x2b8] sm:$0xff]  ;;  %v10672_v38 = vld [vmem:[%s12254_s24 + $0x230] sm:$0xff] }
0x3136   : > { %v8777_v43 = vmul.f32 %v8773_v56, %v8773_v56  ;;  %11101 = vmatpush3.msra.mxu1 %v10681_v36  ;;  %v10673_v51 = vld [vmem:[%s12254_s24 + $0x238] sm:$0xff] }
0x3137   : > { %11102 = vmatprep.subr.mxu1 %v10696_v41 }
0x3138   : > { %v8787_v55 = vsel %vm1110_vm6, %v8777_v43, 0.0  ;;  %11103 = vmatpush3.msra.mxu1 %v10680_v30  ;;  %v10687_v43 = vld [vmem:[%s12254_s24 + $0x2a8] sm:$0xff] }
0x3139   : > { %8788 = vadd.xlane.f32.xlu0 %v8787_v55  ;;  %11104 = vmatprep.subr.mxu1 %v10695_v11  ;;  %v10671_v55 = vld [vmem:[%s12254_s24 + $0x228] sm:$0xff] }
0x31b2   : > { %v8783_v4 = vpop.xlane.xlu0 %8782 }
0x31b3   : > { %v8791_v34 = vmul.f32 0.03125, %v8783_v4  ;;  %v10682_v4 = vld [vmem:[%s12254_s24 + $0x280] sm:$0xff] }
0x31b4   : > { %v8780_v47 = vpop.xlane.xlu1 %8779 }
0x31b5   : > { %v8795_v39 = vadd.f32 1e-05, %v8791_v34  ;;  %v8790_v1 = vmul.f32 0.03125, %v8780_v47  ;;  %v10666_v34 = vld [vmem:[%s12254_s24 + $0x200] sm:$0xff] }
0x31b6   : > { %v10645_v47 = vld [vmem:[%s12249_s19 + $0x4] sm:$0x3] }
0x31b7   : > { %12061 = vrsqrt.f32 %v8795_v39  ;;  %v8794_v27 = vadd.f32 1e-05, %v8790_v1  ;;  %v8841_v39 = vrot.slane %v10645_v47, %v12759_v22  ;;  %v8845_v1 = vrot.slane %v10645_v47, %v12763_v24 }
0x31b9   : > { %12063 = vrsqrt.f32 %v8794_v27 }
0x31be   : > { %v8786_v12 = vpop.xlane.xlu1 %8785 }
0x31bf   : > { %v8792_v54 = vmul.f32 0.03125, %v8786_v12 }
0x31c1   : > { %v8796_v15 = vadd.f32 1e-05, %v8792_v54 }
0x31c2   : > { %v8789_v9 = vpop.xlane.xlu0 %8788 }
0x31c3   : > { %12065 = vrsqrt.f32 %v8796_v15  ;;  %v8793_v16 = vmul.f32 0.03125, %v8789_v9 }
0x31c4   : > { %v12062_v5 = vpop.eup %12061 }
0x31c5   : > { %v8797_v61 = vadd.f32 1e-05, %v8793_v16  ;;  %v8803_v59 = vmul.f32 %v12062_v5, %v8771_v29  ;;  %v10679_v29 = vld [vmem:[%s12254_s24 + $0x268] sm:$0xff] }
0x31c6   : > { %v12064_v31 = vpop.eup %12063  ;;  %11105 = vmatpush3.msra.mxu1 %v10679_v29 }
0x31c7   : > { %v8802_v13 = vmul.f32 %v12064_v31, %v8770_v7  ;;  %12067 = vrsqrt.f32 %v8797_v61  ;;  %v8813_v37 = vmul.f32 %v10635_v28, %v8803_v59  ;;  %11106 = vmatprep.subr.mxu1 %v10694_v42  ;;  %v10678_v7 = vld [vmem:[%s12254_s24 + $0x260] sm:$0xff] }
0x31c8   : > { %11107 = vmatpush3.msra.mxu1 %v10678_v7 }
0x31c9   : > { %v8812_v2 = vmul.f32 %v10635_v28, %v8802_v13  ;;  %v13740_v3 = vadd.f32 %v10636_v19, %v8813_v37  ;;  %11108 = vmatprep.subr.mxu1 %v10693_v52 }
0x31ca   : > { %11109 = vmatpush3.msra.mxu1 %v10677_v26 }
0x31cb   : > { %v13735_v20 = vadd.f32 %v10636_v19, %v8812_v2  ;;  %11110 = vmatprep.subr.mxu1 %v10692_v10 }
0x31cc   : > { %11111 = vmatpush3.msra.mxu1 %v10676_v35 }
0x31cd   : > { %10646 = vmatmul.mubr.msk.f32.vlgmr.msra.gmra.mxu0 %vm1110_vm6, %v13735_v20  ;;  %11112 = vmatprep.subr.mxu1 %v10691_v58 }
0x31ce   : > { %8930 = vmatprep.mubr.f32.mxu0 %v12177_v18  ;;  %11113 = vmatpush3.msra.mxu1 %v10675_v53 }
0x31d0   : > { %v12066_v57 = vpop.eup %12065 }
0x31d1   : > { %10647 = vmatmul.mubr.msk.f32.gmra.mxu0 %vm1110_vm6, %v13740_v3  ;;  %v8804_v8 = vmul.f32 %v12066_v57, %v8772_v46  ;;  %v10690_v46 = vld [vmem:[%s12254_s24 + $0x2c0] sm:$0xff] }
0x31d2   : > { %8936 = vmatprep.mubr.f32.mxu0 %v12177_v18  ;;  %11114 = vmatprep.subr.mxu1 %v10690_v46 }
0x31d3   : > { %v8814_v50 = vmul.f32 %v10635_v28, %v8804_v8  ;;  %11115 = vmatpush3.msra.mxu1 %v10674_v33 }
0x31d4   : > { %v12068_v14 = vpop.eup %12067  ;;  %11116 = vmatprep.subr.mxu1 %v10689_v25 }
0x31d5   : > { %v8805_v49 = vmul.f32 %v12068_v14, %v8773_v56  ;;  %v13745_v45 = vadd.f32 %v10636_v19, %v8814_v50  ;;  %11117 = vmatpush3.msra.mxu1 %v10673_v51  ;;  %v10688_v56 = vld [vmem:[%s12254_s24 + $0x2b0] sm:$0xff] }
0x31d6   : > { %11118 = vmatprep.subr.mxu1 %v10688_v56 }
0x31d7   : > { %10648 = vmatmul.mubr.msk.f32.gmra.mxu0 %vm1110_vm6, %v13745_v45  ;;  %v8815_v44 = vmul.f32 %v10635_v28, %v8805_v49  ;;  %11119 = vmatpush3.msra.mxu1 %v10672_v38 }
0x31d8   : > { %8942 = vmatprep.mubr.f32.mxu0 %v12177_v18  ;;  %11120 = vmatprep.subr.mxu1 %v10687_v43 }
0x31d9   : > { %v13750_v60 = vadd.f32 %v10636_v19, %v8815_v44  ;;  %11121 = vmatpush3.msra.mxu1 %v10671_v55 }
0x31da   : > { %11122 = vmatprep.subr.mxu1 %v10686_v6 }
0x31db   : > { %10649 = vmatmul.mubr.msk.f32.gmra.mxu0 %vm1110_vm6, %v13750_v60  ;;  %11123 = vmatpush3.msra.mxu1 %v10670_v40 }
0x31dc   : > { %11124 = vmatprep.subr.mxu1 %v10685_v0 }
0x31dd   : > { %11125 = vmatpush3.msra.mxu1 %v10669_v17 }
0x31de   : > { %11126 = vmatprep.subr.mxu1 %v10684_v32 }
0x31df   : > { %11127 = vmatpush3.msra.mxu1 %v10668_v62 }
0x31e0   : > { %11128 = vmatprep.subr.mxu1 %v10683_v48 }
0x31e1   : > { %11129 = vmatpush3.msra.mxu1 %v10667_v23 }
0x31e2   : > { %11130 = vmatprep.subr.mxu1 %v10682_v4 }
0x31e3   : > { %11131 = vmatpush3.msra.mxu1 %v10666_v34 }
0x328d   : > { %v8926_v27 = vpop.f32.mrf.mxu0 }
0x328e   : > { %v13789_v12 = vadd.f32 %v8926_v27, %v8841_v39 }
0x328f   : > { %v8928_v54 = vpop.f32.mrf.mxu0 }
0x3290   : > { %v13792_v15 = vmul.f32 0.70710677, %v13789_v12  ;;  %v13794_v9 = vadd.f32 %v8928_v54, %v8845_v1 }
0x3291   : > { %v8932_v16 = vpop.f32.mrf.mxu0 }
0x3292   : > { %v8965_v5 = vand.u32 2147483647, %v13792_v15  ;;  %v13798_v61 = vmul.f32 0.70710677, %v13794_v9  ;;  %v13800_v31 = vadd.f32 %v8932_v16, %v8841_v39  ;;  %vm9125_vm7 = vcmp.ge.f32.partialorder %v13792_v15, 0.0 }
0x3293   : > { %v8934_v13 = vpop.f32.mrf.mxu0 }
0x3294   : > { %v8973_v59 = vmul.f32 0.3275911, %v8965_v5  ;;  %v8966_v28 = vand.u32 2147483647, %v13798_v61  ;;  %v13804_v2 = vmul.f32 0.70710677, %v13800_v31  ;;  %v13806_v19 = vadd.f32 %v8934_v13, %v8845_v1 }
0x3295   : > { %v9077_v7 = vsub.f32 0.0, %v8965_v5  ;;  %vm9126_vm13 = vcmp.ge.f32.partialorder %v13798_v61, 0.0 }
0x3296   : > { %v8981_v37 = vadd.f32 1.0, %v8973_v59  ;;  %v8974_v57 = vmul.f32 0.3275911, %v8966_v28  ;;  %v8967_v8 = vand.u32 2147483647, %v13804_v2  ;;  %v9078_v51 = vsub.f32 0.0, %v8966_v28 }
0x3297   : > { %v13810_v50 = vmul.f32 0.70710677, %v13806_v19  ;;  %v8938_v14 = vpop.f32.mrf.mxu0  ;;  %v9085_v46 = vmul.f32 %v9077_v7, %v8965_v5  ;;  %vm9127_vm14 = vcmp.ge.f32.partialorder %v13804_v2, 0.0 }
0x3298   : > { %12069 = vrcp.f32 %v8981_v37  ;;  %v8982_v49 = vadd.f32 1.0, %v8974_v57  ;;  %v8975_v44 = vmul.f32 0.3275911, %v8967_v8  ;;  %v13813_v41 = vadd.f32 %v8938_v14, %v8841_v39 }
0x3299   : > { %v8968_v63 = vand.u32 2147483647, %v13810_v50  ;;  %v8940_v36 = vpop.f32.mrf.mxu0  ;;  %v9079_v55 = vsub.f32 0.0, %v8967_v8  ;;  %v9093_v0 = vmul.f32 1.442695, %v9085_v46  ;;  %v9086_v62 = vmul.f32 %v9078_v51, %v8966_v28 }
0x329a   : > { %v13815_v30 = vadd.f32 %v8940_v36, %v8845_v1  ;;  %12071 = vrcp.f32 %v8982_v49  ;;  %v8983_v11 = vadd.f32 1.0, %v8975_v44  ;;  %v13818_v52 = vmul.f32 0.70710677, %v13813_v41 }
0x329b   : > { %v8976_v29 = vmul.f32 0.3275911, %v8968_v63  ;;  %v8944_v42 = vpop.f32.mrf.mxu0  ;;  %v9080_v48 = vsub.f32 0.0, %v8968_v63  ;;  %v9095_v13 = vmul.f32 1.442695, %v9086_v62  ;;  %vm9128_vm15 = vcmp.ge.f32.partialorder %v13810_v50, 0.0 }
0x329c   : > { %12073 = vrcp.f32 %v8983_v11  ;;  %v8969_v35 = vand.u32 2147483647, %v13818_v52  ;;  %v13822_v58 = vmul.f32 0.70710677, %v13815_v30  ;;  %v13824_v53 = vadd.f32 %v8944_v42, %v8841_v39 }
0x329d   : > { %v8984_v26 = vadd.f32 1.0, %v8976_v29  ;;  %v8946_v10 = vpop.f32.mrf.mxu0  ;;  %v9087_v39 = vmul.f32 %v9079_v55, %v8967_v8  ;;  %v9088_v59 = vmul.f32 %v9080_v48, %v8968_v63  ;;  %vm9129_vm1 = vcmp.ge.f32.partialorder %v13818_v52, 0.0 }
0x329e   : > { %v8977_v33 = vmul.f32 0.3275911, %v8969_v35  ;;  %v13826_v25 = vadd.f32 %v8946_v10, %v8845_v1  ;;  %v8970_v56 = vand.u32 2147483647, %v13822_v58  ;;  %v13830_v38 = vmul.f32 0.70710677, %v13824_v53 }
0x329f   : > { %12075 = vrcp.f32 %v8984_v26  ;;  %v9081_v16 = vsub.f32 0.0, %v8969_v35  ;;  %v9097_v8 = vmul.f32 1.442695, %v9087_v39  ;;  %v9099_v63 = vmul.f32 1.442695, %v9088_v59 }
0x32a0   : > { %v8985_v43 = vadd.f32 1.0, %v8977_v33  ;;  %v8978_v6 = vmul.f32 0.3275911, %v8970_v56  ;;  %v8971_v40 = vand.u32 2147483647, %v13830_v38  ;;  %v9082_v14 = vsub.f32 0.0, %v8970_v56 }
0x32a1   : > { %v13834_v17 = vmul.f32 0.70710677, %v13826_v25  ;;  %v9089_v29 = vmul.f32 %v9081_v16, %v8969_v35  ;;  %vm9130_vm2 = vcmp.ge.f32.partialorder %v13822_v58, 0.0  ;;  %vm9131_vm3 = vcmp.ge.f32.partialorder %v13830_v38, 0.0  ;;  %v10699_v38 = vld [vmem:[%s12259_s30 + $0x2] ss:$0 sm:$0xff] }
0x32a2   : > { %12077 = vrcp.f32 %v8985_v43  ;;  %v8986_v23 = vadd.f32 1.0, %v8978_v6  ;;  %v8979_v4 = vmul.f32 0.3275911, %v8971_v40  ;;  %v9090_v46 = vmul.f32 %v9082_v14, %v8970_v56 }
0x32a3   : > { %v8972_v47 = vand.u32 2147483647, %v13834_v17  ;;  %v9083_v51 = vsub.f32 0.0, %v8971_v40  ;;  %v9101_v35 = vmul.f32 1.442695, %v9089_v29  ;;  %vm9132_vm4 = vcmp.ge.f32.partialorder %v13834_v17, 0.0 }
0x32a4   : > { %12079 = vrcp.f32 %v8986_v23  ;;  %v8987_v1 = vadd.f32 1.0, %v8979_v4  ;;  %v9103_v56 = vmul.f32 1.442695, %v9090_v46 }
0x32a5   : > { %v13836_v32 = vpop.eup %12069  ;;  %v8980_v5 = vmul.f32 0.3275911, %v8972_v47  ;;  %12081 = vpow2.f32 %v9093_v0  ;;  %v9084_v48 = vsub.f32 0.0, %v8972_v47  ;;  %v9091_v16 = vmul.f32 %v9083_v51, %v8971_v40 }
0x32a6   : > { %v9005_v34 = vmul.f32 1.0614054, %v13836_v32  ;;  %12083 = vrcp.f32 %v8987_v1 }
0x32a7   : > { %v13840_v27 = vpop.eup %12071  ;;  %v8988_v49 = vadd.f32 1.0, %v8980_v5 }
0x32a8   : > { %v10650_v54 = vadd.f32 -1.4531521, %v9005_v34  ;;  %v9006_v28 = vmul.f32 1.0614054, %v13840_v27 }
0x32a9   : > { %v13843_v37 = vpop.eup %12073  ;;  %12085 = vrcp.f32 %v8988_v49  ;;  %v9092_v49 = vmul.f32 %v9084_v48, %v8972_v47 }
0x32aa   : > { %v9021_v57 = vmul.f32 %v13836_v32, %v10650_v54  ;;  %v10651_v44 = vadd.f32 -1.4531521, %v9006_v28  ;;  %v9007_v36 = vmul.f32 1.0614054, %v13843_v37  ;;  %12087 = vpow2.f32 %v9095_v13 }
0x32ab   : > { %12089 = vpow2.f32 %v9097_v8  ;;  %v13860_v54 = vmul.f32 0.5, %v13794_v9 }
0x32ac   : > { %v9029_v11 = vadd.f32 1.4214138, %v9021_v57  ;;  %v13847_v42 = vpop.eup %12075  ;;  %v9022_v7 = vmul.f32 %v13840_v27, %v10651_v44  ;;  %v10652_v26 = vadd.f32 -1.4531521, %v9007_v36  ;;  %12091 = vpow2.f32 %v9099_v63 }
0x32ad   : > { %v9008_v33 = vmul.f32 1.0614054, %v13847_v42  ;;  %12093 = vpow2.f32 %v9101_v35 }
0x32ae   : > { %v9037_v10 = vmul.f32 %v13836_v32, %v9029_v11  ;;  %v9030_v43 = vadd.f32 1.4214138, %v9022_v7  ;;  %v9023_v55 = vmul.f32 %v13843_v37, %v10652_v26  ;;  %12095 = vpow2.f32 %v9103_v56 }
0x32af   : > { %v10653_v0 = vadd.f32 -1.4531521, %v9008_v33  ;;  %v13853_v62 = vpop.eup %12077  ;;  %v9105_v7 = vmul.f32 1.442695, %v9091_v16 }
0x32b0   : > { %v10658_v6 = vadd.f32 -0.28449672, %v9037_v10  ;;  %v9038_v23 = vmul.f32 %v13840_v27, %v9030_v43  ;;  %v9031_v4 = vadd.f32 1.4214138, %v9023_v55  ;;  %v9009_v1 = vmul.f32 1.0614054, %v13853_v62 }
0x32b1   : > { %v9024_v39 = vmul.f32 %v13847_v42, %v10653_v0  ;;  %v13863_v59 = vpop.eup %12079  ;;  %v9107_v55 = vmul.f32 1.442695, %v9092_v49  ;;  %12097 = vpow2.f32 %v9105_v7 }
0x32b2   : > { %v9053_v34 = vmul.f32 %v13836_v32, %v10658_v6  ;;  %v10659_v5 = vadd.f32 -0.28449672, %v9038_v23  ;;  %v9039_v13 = vmul.f32 %v13843_v37, %v9031_v4  ;;  %v10654_v14 = vadd.f32 -1.4531521, %v9009_v1  ;;  %v12082_v9 = vpop.eup %12081 }
0x32b3   : > { %v9032_v57 = vadd.f32 1.4214138, %v9024_v39  ;;  %v9010_v36 = vmul.f32 1.0614054, %v13863_v59  ;;  %v13871_v63 = vpop.eup %12083  ;;  %12099 = vpow2.f32 %v9107_v55 }
0x32b4   : > { %v9061_v28 = vadd.f32 0.2548296, %v9053_v34  ;;  %v9054_v8 = vmul.f32 %v13840_v27, %v10659_v5  ;;  %v10660_v44 = vadd.f32 -0.28449672, %v9039_v13  ;;  %v9025_v29 = vmul.f32 %v13853_v62, %v10654_v14 }
0x32b5   : > { %v9040_v11 = vmul.f32 %v13847_v42, %v9032_v57  ;;  %v10655_v47 = vadd.f32 -1.4531521, %v9010_v36  ;;  %v9011_v43 = vmul.f32 1.0614054, %v13871_v63 }
0x32b6   : > { %v9069_v40 = vmul.f32 %v13836_v32, %v9061_v28  ;;  %v9062_v26 = vadd.f32 0.2548296, %v9054_v8  ;;  %v9055_v10 = vmul.f32 %v13843_v37, %v10660_v44  ;;  %v9033_v51 = vadd.f32 1.4214138, %v9025_v29  ;;  %v13876_v32 = vpop.eup %12085 }
0x32b7   : > { %v10661_v33 = vadd.f32 -0.28449672, %v9040_v11  ;;  %v9026_v0 = vmul.f32 %v13863_v59, %v10655_v47  ;;  %v12088_v48 = vpop.eup %12087  ;;  %v9012_v56 = vmul.f32 1.0614054, %v13876_v32  ;;  %v10656_v5 = vadd.f32 -1.4531521, %v9011_v43 }
0x32b8   : > { %v9109_v46 = vmul.f32 %v12082_v9, %v9069_v40  ;;  %v9070_v6 = vmul.f32 %v13840_v27, %v9062_v26  ;;  %v9063_v35 = vadd.f32 0.2548296, %v9055_v10  ;;  %v9041_v34 = vmul.f32 %v13853_v62, %v9033_v51  ;;  %v12090_v13 = vpop.eup %12089 }
0x32b9   : > { %v9056_v4 = vmul.f32 %v13847_v42, %v10661_v33  ;;  %v9034_v16 = vadd.f32 1.4214138, %v9026_v0  ;;  %v10657_v44 = vadd.f32 -1.4531521, %v9012_v56  ;;  %v12092_v36 = vpop.eup %12091  ;;  %v9027_v11 = vmul.f32 %v13871_v63, %v10656_v5 }
0x32ba   : > { %v9117_v23 = vsub.f32 1.0, %v9109_v46  ;;  %v9110_v39 = vmul.f32 %v12088_v48, %v9070_v6  ;;  %v9071_v1 = vmul.f32 %v13843_v37, %v9063_v35  ;;  %v10662_v57 = vadd.f32 -0.28449672, %v9041_v34  ;;  %v12094_v51 = vpop.eup %12093 }
0x32bb   : > { %v9064_v28 = vadd.f32 0.2548296, %v9056_v4  ;;  %v9042_v8 = vmul.f32 %v13863_v59, %v9034_v16  ;;  %v9028_v46 = vmul.f32 %v13876_v32, %v10657_v44  ;;  %v9035_v33 = vadd.f32 1.4214138, %v9027_v11 }
0x32bc   : > { %v9133_v27 = vsub.f32 0.0, %v9117_v23  ;;  %v9118_v14 = vsub.f32 1.0, %v9110_v39  ;;  %v9111_v49 = vmul.f32 %v12090_v13, %v9071_v1  ;;  %v9057_v37 = vmul.f32 %v13853_v62, %v10662_v57 }
0x32bd   : > { %v9072_v40 = vmul.f32 %v13847_v42, %v9064_v28  ;;  %v10663_v26 = vadd.f32 -0.28449672, %v9042_v8  ;;  %v9036_v48 = vadd.f32 1.4214138, %v9028_v46  ;;  %v8949_v4 = vmul.f32 0.5, %v13789_v12 }
0x32be   : > { %v9141_v9 = vsel %vm9125_vm7, %v9117_v23, %v9133_v27  ;;  %v9134_v29 = vsub.f32 0.0, %v9118_v14  ;;  %v9119_v7 = vsub.f32 1.0, %v9111_v49  ;;  %v9065_v47 = vadd.f32 0.2548296, %v9057_v37  ;;  %v12096_v23 = vpop.eup %12095 }
0x32bf   : > { %v9112_v10 = vmul.f32 %v12092_v36, %v9072_v40  ;;  %v9149_v43 = vadd.f32 1.0, %v9141_v9  ;;  %v9058_v42 = vmul.f32 %v13863_v59, %v10663_v26  ;;  %v9043_v39 = vmul.f32 %v13871_v63, %v9035_v33  ;;  %v12098_v44 = vpop.eup %12097 }
0x32c0   : > { %v9142_v15 = vsel %vm9126_vm13, %v9118_v14, %v9134_v29  ;;  %v9135_v6 = vsub.f32 0.0, %v9119_v7  ;;  %v9073_v55 = vmul.f32 %v13853_v62, %v9065_v47  ;;  %v9044_v62 = vmul.f32 %v13876_v32, %v9036_v48 }
0x32c1   : > { %v9150_v35 = vadd.f32 1.0, %v9142_v15  ;;  %v9120_v0 = vsub.f32 1.0, %v9112_v10  ;;  %v9066_v56 = vadd.f32 0.2548296, %v9058_v42  ;;  %v9157_v5 = vmul.f32 %v9149_v43, %v8949_v4  ;;  %v12100_v10 = vpop.eup %12099 }
0x32c2   : > { %v9143_v34 = vsel %vm9127_vm14, %v9119_v7, %v9135_v6  ;;  %v9113_v16 = vmul.f32 %v12094_v51, %v9073_v55  ;;  %v10664_v27 = vadd.f32 -0.28449672, %v9043_v39  ;;  %v8952_v12 = vmul.f32 0.5, %v13806_v19 }
0x32c3   : > { %v9158_v61 = vmul.f32 %v9150_v35, %v13860_v54  ;;  %v9136_v1 = vsub.f32 0.0, %v9120_v0  ;;  %v9074_v13 = vmul.f32 %v13863_v59, %v9066_v56  ;;  %v9151_v28 = vadd.f32 1.0, %v9143_v34 }
0x32c4   : > { %v9121_v57 = vsub.f32 1.0, %v9113_v16  ;;  %v10665_v50 = vadd.f32 -0.28449672, %v9044_v62  ;;  %v9059_v54 = vmul.f32 %v13871_v63, %v10664_v27  ;;  %v8951_v8 = vmul.f32 0.5, %v13800_v31 }
0x32c5   : > { %9270 = vmatprep.mubr.f32.mxu1 %v9158_v61  ;;  %v9144_v2 = vsel %vm9128_vm15, %v9120_v0, %v9136_v1  ;;  %v9114_v49 = vmul.f32 %v12096_v23, %v9074_v13  ;;  %v8954_v33 = vmul.f32 0.5, %v13815_v30  ;;  %v8953_v43 = vmul.f32 0.5, %v13813_v41 }
0x32c6   : > { %9271 = vmatmul.mubr.f32.vlgmr.msra.gmra.mxu1 %v9157_v5  ;;  %v9152_v14 = vadd.f32 1.0, %v9144_v2  ;;  %v9137_v59 = vsub.f32 0.0, %v9121_v57  ;;  %v9060_v19 = vmul.f32 %v13876_v32, %v10665_v50  ;;  %v9067_v40 = vadd.f32 0.2548296, %v9059_v54 }
0x32c7   : > { %v9122_v9 = vsub.f32 1.0, %v9114_v49  ;;  %v9159_v37 = vmul.f32 %v9151_v28, %v8951_v8  ;;  %v8956_v48 = vmul.f32 0.5, %v13826_v25  ;;  %v8955_v23 = vmul.f32 0.5, %v13824_v53 }
0x32c8   : > { %v9160_v36 = vmul.f32 %v9152_v14, %v8952_v12  ;;  %v9145_v11 = vsel %vm9129_vm1, %v9121_v57, %v9137_v59  ;;  %v9068_v7 = vadd.f32 0.2548296, %v9060_v19  ;;  %v9075_v26 = vmul.f32 %v13871_v63, %v9067_v40 }
0x32c9   : > { %v9138_v29 = vsub.f32 0.0, %v9122_v9  ;;  %v9153_v52 = vadd.f32 1.0, %v9145_v11  ;;  %vm9682_vm7 = vcmask 7168  }
0x32ca   : > { %9275 = vmatprep.mubr.f32.mxu1 %v9160_v36  ;;  %v9076_v47 = vmul.f32 %v13876_v32, %v9068_v7  ;;  %v9115_v46 = vmul.f32 %v12098_v44, %v9075_v26 }
0x32cb   : > { %9276 = vmatmul.mubr.f32.gmra.mxu1 %v9159_v37  ;;  %v9146_v31 = vsel %vm9130_vm2, %v9122_v9, %v9138_v29  ;;  %v9161_v35 = vmul.f32 %v9153_v52, %v8953_v43 }
0x32cc   : > { %v9154_v51 = vadd.f32 1.0, %v9146_v31  ;;  %v9116_v15 = vmul.f32 %v12100_v10, %v9076_v47  ;;  %v9123_v6 = vsub.f32 1.0, %v9115_v46 }
0x32ce   : > { %v9162_v42 = vmul.f32 %v9154_v51, %v8954_v33  ;;  %v9124_v0 = vsub.f32 1.0, %v9116_v15  ;;  %v9139_v63 = vsub.f32 0.0, %v9123_v6  ;;  %v9374_v15 = vld [vmem:[%s14115_s2 + $0x18] sm:$0xff] }
0x32cf   : > { %11689 = vmatprep.subr.mxu0 %v9374_v15 }
0x32d0   : > { %9280 = vmatprep.mubr.f32.mxu1 %v9162_v42  ;;  %v9140_v58 = vsub.f32 0.0, %v9124_v0  ;;  %v9147_v55 = vsel %vm9131_vm3, %v9123_v6, %v9139_v63  ;;  %11690 = vmatpush3.msra.mxu0 %v9374_v15  ;;  %v9373_v6 = vld [vmem:[%s14115_s2 + $0x10] sm:$0xff]  ;;  %v9372_v42 = vld [vmem:[%s14115_s2 + $0x8] sm:$0xff]  ;;  %vm9751_vm3 = vcmask 1041409  }
0x32d1   : > { %9281 = vmatmul.mubr.f32.gmra.mxu1 %v9161_v35  ;;  %v9155_v30 = vadd.f32 1.0, %v9147_v55  ;;  %11691 = vmatprep.subr.mxu0 %v9373_v6  ;;  %v9371_v35 = vld [vmem:[%s14115_s2] sm:$0xff] }
0x32d2   : > { %v9148_v32 = vsel %vm9132_vm4, %v9124_v0, %v9140_v58  ;;  %11692 = vmatpush3.msra.mxu0 %v9373_v6  ;;  %v9482_v0 = vld [vmem:[%s14116_s27 + $0x18] sm:$0xff]  ;;  %v9613_v6 = vadd.s32 24, %v12756_v21  ;;  %vm9754_vm4 = vcmask 254976  }
0x32d3   : > { %v9156_v41 = vadd.f32 1.0, %v9148_v32  ;;  %v9163_v34 = vmul.f32 %v9155_v30, %v8955_v23  ;;  %11693 = vmatprep.subr.mxu0 %v9372_v42 }
0x32d4   : > { %11694 = vmatpush3.msra.mxu0 %v9372_v42 }
0x32d5   : > { %v9164_v4 = vmul.f32 %v9156_v41, %v8956_v48  ;;  %11695 = vmatprep.subr.mxu0 %v9371_v35 }
0x32d6   : > { %11696 = vmatpush3.msra.mxu0 %v9371_v35  ;;  %v12134_v35 = vld [vmem:[%s12371_s12] sm:$0xff] }
0x32d7   : > { %9285 = vmatprep.mubr.f32.mxu1 %v9164_v4  ;;  %11703 = vmatprep.subr.mxu0 %v9482_v0 }
0x32d8   : > { %9286 = vmatmul.mubr.f32.gmra.mxu1 %v9163_v34 }
0x3386   : > { %v11132_v56 = vpop.f32.mrf.mxu1 }
0x3388   : > { %v11133_v39 = vpop.f32.mrf.mxu1 }
0x3389   : > { %v11134_v61 = vadd.f32 %v11133_v39, %v11132_v56  ;;  %v10702_v56 = vld [vmem:[%s14107_s0 + $0x2] ss:$0 sm:$0xff] }
0x338b   : > { %v9273_v1 = vadd.f32 %v11134_v61, %v10699_v38  ;;  %v11135_v16 = vpop.f32.mrf.mxu1  ;;  %v10703_v61 = vld [vmem:[%s14108_s18 + $0x2] ss:$0 sm:$0xff] }
0x338d   : > { %v11136_v5 = vpop.f32.mrf.mxu1  ;;  %v9291_v17 = vadd.f32 %v9273_v1, %v13735_v20 }
0x338e   : > { %v11137_v13 = vadd.f32 %v11136_v5, %v11135_v16 }
0x338f   : > { %v9299_v62 = vsel %vm1110_vm6, %v9291_v17, 0.0 }
0x3390   : > { %v9278_v25 = vadd.f32 %v11137_v13, %v10699_v38  ;;  %9300 = vadd.xlane.f32.xlu1 %v9299_v62 }
0x3391   : > { %v11138_v27 = vpop.f32.mrf.mxu1 }
0x3392   : > { %v9292_v53 = vadd.f32 %v9278_v25, %v13740_v3 }
0x3393   : > { %v11139_v12 = vpop.f32.mrf.mxu1 }
0x3394   : > { %v9302_v2 = vsel %vm1110_vm6, %v9292_v53, 0.0  ;;  %v11140_v28 = vadd.f32 %v11139_v12, %v11138_v27 }
0x3395   : > { %9303 = vadd.xlane.f32.xlu0 %v9302_v2 }
0x3396   : > { %v9283_v57 = vadd.f32 %v11140_v28, %v10699_v38  ;;  %v9480_v28 = vld [vmem:[%s14116_s27 + $0x8] sm:$0xff] }
0x3398   : > { %v9293_v14 = vadd.f32 %v9283_v57, %v13745_v45  ;;  %v11141_v49 = vpop.f32.mrf.mxu1 }
0x339a   : > { %v9305_v50 = vsel %vm1110_vm6, %v9293_v14, 0.0  ;;  %v11142_v20 = vpop.f32.mrf.mxu1 }
0x339b   : > { %9306 = vadd.xlane.f32.xlu1 %v9305_v50  ;;  %v11143_v54 = vadd.f32 %v11142_v20, %v11141_v49 }
0x339d   : > { %v9288_v8 = vadd.f32 %v11143_v54, %v10699_v38 }
0x339f   : > { %v9294_v59 = vadd.f32 %v9288_v8, %v13750_v60 }
0x33a1   : > { %v9308_v44 = vsel %vm1110_vm6, %v9294_v59, 0.0 }
0x33a2   : > { %9309 = vadd.xlane.f32.xlu0 %v9308_v44 }
0x3419   : > { %v9301_v3 = vpop.xlane.xlu1 %9300 }
0x341a   : > { %v9311_v36 = vmul.f32 0.03125, %v9301_v3  ;;  %v10714_v3 = vld [vmem:[%s14118_s11] ss:$0 sm:$0xff]  ;;  %s14124_s11 = sld [smem:[#allocation13_spill]] }
0x341c   : > { %v9315_v9 = vsub.f32 %v9291_v17, %v9311_v36 }
0x341e   : > { %v9304_v19 = vpop.xlane.xlu0 %9303  ;;  %v9319_v40 = vmul.f32 %v9315_v9, %v9315_v9 }
0x341f   : > { %v9312_v37 = vmul.f32 0.03125, %v9304_v19 }
0x3420   : > { %v9323_v45 = vsel %vm1110_vm6, %v9319_v40, 0.0 }
0x3421   : > { %v9316_v11 = vsub.f32 %v9292_v53, %v9312_v37  ;;  %9324 = vadd.xlane.f32.xlu1 %v9323_v45  ;;  %v9481_v53 = vld [vmem:[%s14116_s27 + $0x10] sm:$0xff] }
0x3423   : > { %v9320_v29 = vmul.f32 %v9316_v11, %v9316_v11 }
0x3424   : > { %v9307_v7 = vpop.xlane.xlu1 %9306 }
0x3425   : > { %v9326_v26 = vsel %vm1110_vm6, %v9320_v29, 0.0  ;;  %v9313_v60 = vmul.f32 0.03125, %v9307_v7 }
0x3426   : > { %9327 = vadd.xlane.f32.xlu0 %v9326_v26 }
0x3427   : > { %v9317_v10 = vsub.f32 %v9293_v14, %v9313_v60  ;;  %v9479_v14 = vld [vmem:[%s14116_s27] sm:$0xff] }
0x3429   : > { %v9321_v31 = vmul.f32 %v9317_v10, %v9317_v10 }
0x342b   : > { %v9329_v52 = vsel %vm1110_vm6, %v9321_v31, 0.0  ;;  %v9310_v47 = vpop.xlane.xlu0 %9309 }
0x342c   : > { %9330 = vadd.xlane.f32.xlu1 %v9329_v52  ;;  %v9314_v46 = vmul.f32 0.03125, %v9310_v47  ;;  %v9611_v47 = vadd.s32 8, %v12756_v21 }
0x342e   : > { %v9318_v33 = vsub.f32 %v9294_v59, %v9314_v46  ;;  %v10704_v59 = vld [vmem:[%s14117_s7] ss:$0 sm:$0xff]  ;;  %v9629_v46 = vand.u32 15, %v9611_v47  ;;  %s14123_s7 = sld [smem:[#allocation15_spill]] }
0x3430   : > { %v9322_v51 = vmul.f32 %v9318_v33, %v9318_v33  ;;  %vm9667_vm5 = vcmp.eq.s32.totalorder %v9629_v46, 8 }
0x3431   : > { %vm9671_vm11 = vmxor %vm9667_vm5, %vm12189_vm10  ;;  %vm9942_vm5 = vcmask 523264  }
0x3432   : > { %v9332_v43 = vsel %vm1110_vm6, %v9322_v51, 0.0  ;;  %v10715_v51 = vld [vmem:[#allocation2] ss:$0 sm:$0xff] }
0x3433   : > { %9333 = vadd.xlane.f32.xlu0 %v9332_v43 }
0x34aa   : > { %v9325_v63 = vpop.xlane.xlu1 %9324 }
0x34ab   : > { %v9335_v58 = vmul.f32 0.03125, %v9325_v63 }
0x34ad   : > { %v9339_v55 = vadd.f32 1e-05, %v9335_v58 }
0x34af   : > { %12101 = vrsqrt.f32 %v9339_v55  ;;  %v9328_v32 = vpop.xlane.xlu0 %9327 }
0x34b0   : > { %v9336_v30 = vmul.f32 0.03125, %v9328_v32  ;;  %v9643_v32 = vand.u32 15, %v9613_v6 }
0x34b2   : > { %v9340_v48 = vadd.f32 1e-05, %v9336_v30  ;;  %vm9669_vm13 = vcmp.eq.s32.totalorder %v9643_v32, 8 }
0x34b3   : > { %vm9673_vm15 = vmxor %vm9669_vm13, %vm12189_vm10 }
0x34b4   : > { %12103 = vrsqrt.f32 %v9340_v48 }
0x34b5   : > { %v9331_v41 = vpop.xlane.xlu1 %9330 }
0x34b6   : > { %v9337_v23 = vmul.f32 0.03125, %v9331_v41 }
0x34b8   : > { %v9341_v4 = vadd.f32 1e-05, %v9337_v23 }
0x34ba   : > { %12105 = vrsqrt.f32 %v9341_v4 }
0x34bc   : > { %v12102_v34 = vpop.eup %12101  ;;  %v9334_v39 = vpop.xlane.xlu0 %9333 }
0x34bd   : > { %v9347_v38 = vmul.f32 %v12102_v34, %v9315_v9  ;;  %v9338_v1 = vmul.f32 0.03125, %v9334_v39 }
0x34bf   : > { %v9357_v16 = vmul.f32 %v10702_v56, %v9347_v38  ;;  %v9342_v17 = vadd.f32 1e-05, %v9338_v1 }
0x34c1   : > { %v12104_v5 = vpop.eup %12103  ;;  %v9367_v13 = vadd.f32 %v10703_v61, %v9357_v16  ;;  %12107 = vrsqrt.f32 %v9342_v17 }
0x34c2   : > { %v9348_v62 = vmul.f32 %v12104_v5, %v9316_v11 }
0x34c3   : > { %11697 = vmatprep.mubr.msk.f32.mxu0 %vm1110_vm6, %v9367_v13 }
0x34c4   : > { %v9358_v25 = vmul.f32 %v10702_v56, %v9348_v62 }
0x34c6   : > { %v9368_v27 = vadd.f32 %v10703_v61, %v9358_v25  ;;  %v12136_v25 = vld [vmem:[%s12371_s12 + $0x10] sm:$0xff] }
0x34c7   : > { %v12106_v12 = vpop.eup %12105  ;;  %vm9616_vm2 = vcmp.eq.s32.totalorder %v12136_v25, 0 }
0x34c8   : > { %11698 = vmatmul.mubr.msk.f32.vlgmr.msra.gmra.mxu0 %vm1110_vm6, %v9368_v27  ;;  %v9349_v2 = vmul.f32 %v12106_v12, %v9317_v10 }
0x34c9   : > { %11704 = vmatpush3.msra.mxu0 %v9482_v0 }
0x34ca   : > { %11705 = vmatprep.subr.mxu0 %v9481_v53  ;;  %v9359_v57 = vmul.f32 %v10702_v56, %v9349_v2 }
0x34cb   : > { %11706 = vmatpush3.msra.mxu0 %v9481_v53 }
0x34cc   : > { %11707 = vmatprep.subr.mxu0 %v9480_v28  ;;  %v9369_v49 = vadd.f32 %v10703_v61, %v9359_v57 }
0x34cd   : > { %11708 = vmatpush3.msra.mxu0 %v9480_v28 }
0x34ce   : > { %11709 = vmatprep.subr.mxu0 %v9479_v14  ;;  %11700 = vmatprep.mubr.msk.f32.mxu0 %vm1110_vm6, %v9369_v49  ;;  %v12108_v50 = vpop.eup %12107 }
0x34cf   : > { %11710 = vmatpush3.msra.mxu0 %v9479_v14  ;;  %v9350_v20 = vmul.f32 %v12108_v50, %v9318_v33  ;;  %v12133_v33 = vld [vmem:[%s12371_s12 + $0x8] sm:$0xff] }
0x34d0   : > { %vm9615_vm9 = vcmp.eq.s32.totalorder %v12133_v33, 0 }
0x34d1   : > { %v9360_v54 = vmul.f32 %v10702_v56, %v9350_v20  ;;  %vm9675_vm12 = vmand %vm9615_vm9, %vm9671_vm11  ;;  %v12135_v56 = vld [vmem:[%s12371_s12 + $0x18] sm:$0xff]  ;;  %s14119_s12 = sld [smem:[#allocation8_spill]] }
0x34d2   : > { %vm9617_vm14 = vcmp.eq.s32.totalorder %v12135_v56, 0 }
0x34d3   : > { %v9370_v8 = vadd.f32 %v10703_v61, %v9360_v54  ;;  %vm9677_vm1 = vmand %vm9617_vm14, %vm9673_vm15 }
0x34d5   : > { %11701 = vmatmul.mubr.msk.f32.gmra.mxu0 %vm1110_vm6, %v9370_v8 }
0x34d6   : > { %11711 = vmatprep.mubr.msk.f32.mxu0 %vm1110_vm6, %v9367_v13 }
0x34d9   : > { %11712 = vmatmul.mubr.msk.f32.vlgmr.msra.gmra.mxu0 %vm1110_vm6, %v9368_v27 }
0x34da   : > { %11714 = vmatprep.mubr.msk.f32.mxu0 %vm1110_vm6, %v9369_v49 }
0x34dd   : > { %11715 = vmatmul.mubr.msk.f32.gmra.mxu0 %vm1110_vm6, %v9370_v8 }
0x34de   : > { %10010 = vmatprep.mubr.f32.mxu0 %v12177_v18 }
0x3588   : > { %v11699_v44 = vpop.f32.mrf.mxu0 }
0x3589   : > { %v9466_v36 = vadd.f32 %v11699_v44, %v10704_v59 }
0x358a   : > { %v9460_v9 = vpop.f32.mrf.mxu0 }
0x358b   : > { %v9583_v19 = vmul.f32 %v10714_v3, %v9466_v36  ;;  %v9461_v40 = vadd.f32 %v10704_v59, %v9460_v9 }
0x358d   : > { %v9582_v37 = vmul.f32 %v10714_v3, %v9461_v40  ;;  %v9589_v45 = vsel %vm1395_vm8, %v9583_v19, 0.0 }
0x358e   : > { %9590 = vadd.xlane.f32.xlu1 %v9589_v45 }
0x358f   : > { %v9586_v11 = vsel %vm1395_vm8, %v9582_v37, 0.0 }
0x3592   : > { %9587 = vadd.xlane.f32.xlu1 %v9586_v11 }
0x3595   : > { %v11702_v29 = vpop.f32.mrf.mxu0 }
0x3596   : > { %v9476_v7 = vadd.f32 %v11702_v29, %v10704_v59 }
0x3597   : > { %v9470_v26 = vpop.f32.mrf.mxu0 }
0x3598   : > { %v9585_v60 = vmul.f32 %v10714_v3, %v9476_v7  ;;  %v9471_v18 = vadd.f32 %v10704_v59, %v9470_v26 }
0x359a   : > { %v9584_v10 = vmul.f32 %v10714_v3, %v9471_v18  ;;  %v9595_v31 = vsel %vm1395_vm8, %v9585_v60, 0.0 }
0x359b   : > { %9596 = vadd.xlane.f32.xlu0 %v9595_v31 }
0x359c   : > { %v9592_v52 = vsel %vm1395_vm8, %v9584_v10, 0.0  ;;  %vm9614_vm8 = vcmp.eq.s32.totalorder %v12134_v35, 0 }
0x359f   : > { %9593 = vadd.xlane.f32.xlu0 %v9592_v52 }
0x3617   : > { %v9591_v43 = vpop.xlane.xlu1 %9590 }
0x3618   : > { %v9606_v15 = vadd.f32 %v10715_v51, %v9591_v43 }
0x361a   : > { %v9679_v42 = vsel %vm9675_vm12, -inf, %v9606_v15 }
0x361b   : > { %v9800_v0 = vsel %vm9682_vm7, %v9679_v42, -inf  ;;  %v9588_v63 = vpop.xlane.xlu1 %9587 }
0x361c   : > { %v9801_v58 = vrot.slane %v9800_v0, 4  ;;  %v9605_v55 = vadd.f32 %v10715_v51, %v9588_v63 }
0x361e   : > { %v9802_v30 = vmax.f32 %v9800_v0, %v9801_v58  ;;  %v9678_v48 = vsel %vm9614_vm8, -inf, %v9605_v55 }
0x361f   : > { %v9683_v41 = vsel %vm9682_vm7, %v9678_v48, -inf }
0x3620   : > { %v9803_v23 = vrot.slane %v9802_v30, 2  ;;  %v9684_v4 = vrot.slane %v9683_v41, 4 }
0x3622   : > { %v9804_v34 = vmax.f32 %v9802_v30, %v9803_v23  ;;  %v9685_v21 = vmax.f32 %v9683_v41, %v9684_v4 }
0x3624   : > { %v9805_v38 = vrot.slane %v9804_v34, 1  ;;  %v9686_v39 = vrot.slane %v9685_v21, 2  ;;  %v9597_v16 = vpop.xlane.xlu0 %9596 }
0x3625   : > { %v9608_v5 = vadd.f32 %v10715_v51, %v9597_v16 }
0x3626   : > { %v9806_v61 = vmax.f32 %v9804_v34, %v9805_v38  ;;  %v9687_v1 = vmax.f32 %v9685_v21, %v9686_v39 }
0x3627   : > { %v9681_v62 = vsel %vm9677_vm1, -inf, %v9608_v5 }
0x3628   : > { %v9814_v17 = vsub.f32 %v9679_v42, %v9806_v61  ;;  %v9688_v13 = vrot.slane %v9687_v1, 1  ;;  %v9807_v12 = vsel %vm9682_vm7, %v9681_v62, -inf  ;;  %v9594_v2 = vpop.xlane.xlu0 %9593 }
0x3629   : > { %v9808_v28 = vrot.slane %v9807_v12, 4  ;;  %v9607_v57 = vadd.f32 %v10715_v51, %v9594_v2  ;;  %v11713_v2 = vpop.f32.mrf.mxu0 }
0x362a   : > { %v9816_v27 = vmul.f32 1.442695, %v9814_v17  ;;  %v9689_v53 = vmax.f32 %v9687_v1, %v9688_v13 }
0x362b   : > { %v9809_v49 = vmax.f32 %v9807_v12, %v9808_v28  ;;  %v9680_v50 = vsel %vm9616_vm2, -inf, %v9607_v57  ;;  %v10709_v28 = vld [vmem:[%s14119_s12] ss:$0 sm:$0xff]  ;;  %s14125_s12 = sld [smem:[#allocation14_spill]] }
0x362c   : > { %12109 = vpow2.f32 %v9816_v27  ;;  %v9697_v14 = vsub.f32 %v9678_v48, %v9689_v53  ;;  %v9690_v54 = vsel %vm9682_vm7, %v9680_v50, -inf  ;;  %v9562_v57 = vadd.f32 %v11713_v2, %v10709_v28 }
0x362d   : > { %v9810_v8 = vrot.slane %v9809_v49, 2  ;;  %v9691_v59 = vrot.slane %v9690_v54, 4 }
0x362e   : > { %v9699_v20 = vmul.f32 1.442695, %v9697_v14 }
0x362f   : > { %v9811_v44 = vmax.f32 %v9809_v49, %v9810_v8  ;;  %v9692_v3 = vmax.f32 %v9690_v54, %v9691_v59  ;;  %v9556_v49 = vpop.f32.mrf.mxu0 }
0x3630   : > { %12111 = vpow2.f32 %v9699_v20  ;;  %v9557_v20 = vadd.f32 %v10709_v28, %v9556_v49 }
0x3631   : > { %v9812_v36 = vrot.slane %v9811_v44, 1  ;;  %v9693_v9 = vrot.slane %v9692_v3, 2 }
0x3633   : > { %v9813_v19 = vmax.f32 %v9811_v44, %v9812_v36  ;;  %v9694_v40 = vmax.f32 %v9692_v3, %v9693_v9  ;;  %v11716_v36 = vpop.f32.mrf.mxu0 }
0x3635   : > { %v9815_v37 = vsub.f32 %v9681_v62, %v9813_v19  ;;  %v9695_v45 = vrot.slane %v9694_v40, 1 }
0x3637   : > { %v9818_v29 = vmul.f32 1.442695, %v9815_v37  ;;  %v9696_v7 = vmax.f32 %v9694_v40, %v9695_v45  ;;  %v9572_v40 = vadd.f32 %v11716_v36, %v10709_v28  ;;  %v9566_v37 = vpop.f32.mrf.mxu0  ;;  %v9924_v36 = vld [vmem:[%s12312_s20 + $0x50] sm:$0xff] }
0x3639   : > { %v12110_v11 = vpop.eup %12109  ;;  %12113 = vpow2.f32 %v9818_v29  ;;  %v9698_v18 = vsub.f32 %v9680_v50, %v9696_v7 }
0x363a   : > { %v9820_v26 = vsel %vm9682_vm7, %v12110_v11, 0.0 }
0x363b   : > { %v9821_v60 = vrot.slane %v9820_v26, 4  ;;  %v9701_v52 = vmul.f32 1.442695, %v9698_v18 }
0x363d   : > { %v12112_v10 = vpop.eup %12111  ;;  %v9822_v31 = vadd.f32 %v9821_v60, %v9820_v26  ;;  %12115 = vpow2.f32 %v9701_v52  ;;  %v9567_v26 = vadd.f32 %v10709_v28, %v9566_v37  ;;  %v9920_v37 = vld [vmem:[%s12312_s20 + $0x30] sm:$0xff] }
0x363e   : > { %v9703_v47 = vsel %vm9682_vm7, %v12112_v10, 0.0 }
0x363f   : > { %v9823_v46 = vrot.slane %v9822_v31, 2  ;;  %v9704_v33 = vrot.slane %v9703_v47, 4 }
0x3641   : > { %v9824_v51 = vadd.f32 %v9823_v46, %v9822_v31  ;;  %v9705_v43 = vadd.f32 %v9704_v33, %v9703_v47 }
0x3643   : > { %v9825_v15 = vrot.slane %v9824_v51, 1  ;;  %v9706_v6 = vrot.slane %v9705_v43, 2 }
0x3645   : > { %v9707_v42 = vadd.f32 %v9706_v6, %v9705_v43  ;;  %v9826_v35 = vadd.f32 %v9825_v15, %v9824_v51 }
0x3646   : > { %v12114_v63 = vpop.eup %12113 }
0x3647   : > { %v9708_v0 = vrot.slane %v9707_v42, 1  ;;  %12117 = vrcp.f32 %v9826_v35  ;;  %v9827_v58 = vsel %vm9682_vm7, %v12114_v63, 0.0 }
0x3648   : > { %v9828_v32 = vrot.slane %v9827_v58, 4 }
0x3649   : > { %v9709_v55 = vadd.f32 %v9708_v0, %v9707_v42 }
0x364a   : > { %v12116_v30 = vpop.eup %12115  ;;  %v9829_v48 = vadd.f32 %v9828_v32, %v9827_v58 }
0x364b   : > { %12119 = vrcp.f32 %v9709_v55  ;;  %v9710_v41 = vsel %vm9682_vm7, %v12116_v30, 0.0 }
0x364c   : > { %v9830_v23 = vrot.slane %v9829_v48, 2  ;;  %v9711_v4 = vrot.slane %v9710_v41, 4 }
0x364e   : > { %v9831_v34 = vadd.f32 %v9830_v23, %v9829_v48  ;;  %v9712_v21 = vadd.f32 %v9711_v4, %v9710_v41 }
0x3650   : > { %v9832_v56 = vrot.slane %v9831_v34, 1  ;;  %v9713_v38 = vrot.slane %v9712_v21, 2 }
0x3652   : > { %v9714_v61 = vadd.f32 %v9713_v38, %v9712_v21  ;;  %v9833_v1 = vadd.f32 %v9832_v56, %v9831_v34 }
0x3654   : > { %v12118_v39 = vpop.eup %12117  ;;  %v9715_v5 = vrot.slane %v9714_v61, 1  ;;  %12121 = vrcp.f32 %v9833_v1 }
0x3655   : > { %v9835_v16 = vmul.f32 %v12118_v39, %v12110_v11 }
0x3656   : > { %v9716_v13 = vadd.f32 %v9715_v5, %v9714_v61 }
0x3657   : > { %9840 = vperm.xlu1 %11772, %v9835_v16  }
0x3658   : > { %v12120_v17 = vpop.eup %12119  ;;  %12123 = vrcp.f32 %v9716_v13 }
0x3659   : > { %v9718_v62 = vmul.f32 %v12120_v17, %v12112_v10 }
0x365b   : > { %9723 = vperm.xlu1 %11772, %v9718_v62  }
0x3661   : > { %v12122_v25 = vpop.eup %12121 }
0x3662   : > { %v9837_v27 = vmul.f32 %v12122_v25, %v12114_v63 }
0x3664   : > { %9845 = vperm.xlu0 %11771, %v9837_v27  }
0x3665   : > { %v12124_v53 = vpop.eup %12123 }
0x3666   : > { %v9720_v12 = vmul.f32 %v12124_v53, %v12116_v30 }
0x3668   : > { %9728 = vperm.xlu1 %11772, %v9720_v12  }
0x36d2   : > { %v9841_v14 = vpop.permute.xlu1 %9840 }
0x36d3   : > { %v9848_v50 = vmul.f32 %v9841_v14, %v9562_v57 }
0x36d5   : > { %v9850_v8 = vsel %vm1110_vm6, %v9848_v50, 0.0 }
0x36d6   : > { %v9724_v54 = vpop.permute.xlu1 %9723  ;;  %v9851_v44 = vrot.slane %v9850_v8, 4 }
0x36d7   : > { %v9731_v59 = vmul.f32 %v9724_v54, %v9557_v20  ;;  %v9929_v54 = vld [vmem:[%s12312_s20 + $0x78] sm:$0xff] }
0x36d8   : > { %v9852_v9 = vadd.f32 %v9851_v44, %v9850_v8  ;;  %v9928_v8 = vld [vmem:[%s12312_s20 + $0x70] sm:$0xff]  ;;  %9962 = vmatprep.subr.mxu0 %v9929_v54  ;;  %v9926_v44 = vld [vmem:[%s12312_s20 + $0x60] sm:$0xff]  ;;  %v10097_v54 = vld [vmem:[%s14123_s7 + $0xe8] sm:$0xff] }
0x36d9   : > { %v9733_v3 = vsel %vm1110_vm6, %v9731_v59, 0.0  ;;  %v9927_v59 = vld [vmem:[%s12312_s20 + $0x68] sm:$0xff]  ;;  %9963 = vmatpush1.msra.mxu0 %v9928_v8 }
0x36da   : > { %v9734_v19 = vrot.slane %v9733_v3, 4  ;;  %v9853_v29 = vrot.slane %v9852_v9, 2  ;;  %9964 = vmatprep.subr.mxu0 %v9927_v59  ;;  %v10081_v8 = vld [vmem:[%s14123_s7 + $0x68] sm:$0xff]  ;;  %v10096_v59 = vld [vmem:[%s14123_s7 + $0xe0] sm:$0xff] }
0x36db   : > { %9965 = vmatpush1.msra.mxu0 %v9926_v44 }
0x36dc   : > { %v9735_v7 = vadd.f32 %v9734_v19, %v9733_v3  ;;  %v9854_v52 = vadd.f32 %v9853_v29, %v9852_v9  ;;  %v9925_v3 = vld [vmem:[%s12312_s20 + $0x58] sm:$0xff]  ;;  %v9923_v9 = vld [vmem:[%s12312_s20 + $0x48] sm:$0xff]  ;;  %v9922_v19 = vld [vmem:[%s12312_s20 + $0x40] sm:$0xff] }
0x36dd   : > { %9966 = vmatprep.subr.mxu0 %v9925_v3  ;;  %v9917_v29 = vld [vmem:[%s12312_s20 + $0x18] sm:$0xff] }
0x36de   : > { %v9736_v47 = vrot.slane %v9735_v7, 2  ;;  %v9855_v15 = vrot.slane %v9854_v52, 1  ;;  %9967 = vmatpush1.msra.mxu0 %v9924_v36 }
0x36df   : > { %v9846_v45 = vpop.permute.xlu0 %9845  ;;  %9968 = vmatprep.subr.mxu0 %v9923_v9 }
0x36e0   : > { %v9849_v11 = vmul.f32 %v9846_v45, %v9572_v40  ;;  %v9737_v6 = vadd.f32 %v9736_v47, %v9735_v7  ;;  %v9856_v32 = vadd.f32 %v9855_v15, %v9854_v52  ;;  %v9921_v40 = vld [vmem:[%s12312_s20 + $0x38] sm:$0xff]  ;;  %9969 = vmatpush1.msra.mxu0 %v9922_v19  ;;  %v9919_v45 = vld [vmem:[%s12312_s20 + $0x28] sm:$0xff]  ;;  %v9916_v7 = vld [vmem:[%s12312_s20 + $0x10] sm:$0xff] }
0x36e1   : > { %9970 = vmatprep.subr.mxu0 %v9921_v40  ;;  %v10716_v15 = vld [vmem:[%s14120_s16] ss:$0 sm:$0xff]  ;;  %s10301_s16 = sshll.u32 %s14127_s4, 1 }
0x36e2   : > { %v9857_v60 = vsel %vm1110_vm6, %v9849_v11, 0.0  ;;  %v9738_v58 = vrot.slane %v9737_v6, 1  ;;  %v9918_v11 = vld [vmem:[%s12312_s20 + $0x20] sm:$0xff]  ;;  %9971 = vmatpush1.msra.mxu0 %v9920_v37 }
0x36e3   : > { %v9858_v18 = vrot.slane %v9857_v60, 4  ;;  %v9729_v10 = vpop.permute.xlu1 %9728  ;;  %9972 = vmatprep.subr.mxu0 %v9919_v45 }
0x36e4   : > { %v9732_v31 = vmul.f32 %v9729_v10, %v9567_v26  ;;  %v9739_v4 = vadd.f32 %v9738_v58, %v9737_v6  ;;  %9973 = vmatpush1.msra.mxu0 %v9918_v11  ;;  %v9915_v26 = vld [vmem:[%s12312_s20 + $0x8] sm:$0xff] }
0x36e5   : > { %v9859_v46 = vadd.f32 %v9858_v18, %v9857_v60  ;;  %9974 = vmatprep.subr.mxu0 %v9917_v29  ;;  %v10080_v29 = vld [vmem:[%s14123_s7 + $0x60] sm:$0xff] }
0x36e6   : > { %v9740_v33 = vsel %vm1110_vm6, %v9732_v31, 0.0  ;;  %9975 = vmatpush1.msra.mxu0 %v9916_v7  ;;  %v10095_v7 = vld [vmem:[%s14123_s7 + $0xd8] sm:$0xff] }
0x36e7   : > { %v9860_v51 = vrot.slane %v9859_v46, 2  ;;  %v9741_v43 = vrot.slane %v9740_v33, 4  ;;  %9976 = vmatprep.subr.mxu0 %v9915_v26  ;;  %v10079_v26 = vld [vmem:[%s14123_s7 + $0x58] sm:$0xff] }
0x36e9   : > { %v9861_v42 = vadd.f32 %v9860_v51, %v9859_v46  ;;  %v9742_v35 = vadd.f32 %v9741_v43, %v9740_v33  ;;  %v9914_v46 = vld [vmem:[%s12312_s20] sm:$0xff] }
0x36ea   : > { %9977 = vmatpush1.msra.mxu0 %v9914_v46  ;;  %v10091_v46 = vld [vmem:[%s14123_s7 + $0xb8] sm:$0xff] }
0x36eb   : > { %v9862_v0 = vrot.slane %v9861_v42, 1  ;;  %v9743_v63 = vrot.slane %v9742_v35, 2 }
0x36ed   : > { %v9744_v55 = vadd.f32 %v9743_v63, %v9742_v35  ;;  %v9863_v30 = vadd.f32 %v9862_v0, %v9861_v42 }
0x36ef   : > { %v9745_v48 = vrot.slane %v9744_v55, 1  ;;  %v9866_v41 = vsel %vm9751_vm3, %v9863_v30, %v9856_v32 }
0x36f0   : > { %v9868_v23 = vsel %vm9754_vm4, %v9866_v41, 0.0 }
0x36f1   : > { %9869 = vadd.xlane.f32.xlu0 %v9868_v23  ;;  %v9746_v34 = vadd.f32 %v9745_v48, %v9744_v55  ;;  %v10717_v55 = vld [vmem:[%s14121_s23] ss:$0 sm:$0xff]  ;;  %s958_s23 = scalar_lea.vmem %s12352_s22, %s10301_s16 }
0x36f3   : > { %v9752_v21 = vsel %vm9751_vm3, %v9746_v34, %v9739_v4 }
0x36f4   : > { %v9755_v56 = vsel %vm9754_vm4, %v9752_v21, 0.0 }
0x36f5   : > { %9756 = vadd.xlane.f32.xlu1 %v9755_v56 }
0x377a   : > { %v9870_v38 = vpop.xlane.xlu0 %9869 }
0x377b   : > { %v9871_v39 = vmul.f32 0.03125, %v9870_v38 }
0x377d   : > { %v9873_v61 = vrot.slane %v9871_v39, 1  ;;  %v9876_v16 = vsub.f32 %v9856_v32, %v9871_v39 }
0x377e   : > { %v9757_v1 = vpop.xlane.xlu1 %9756 }
0x377f   : > { %v9877_v5 = vsub.f32 %v9863_v30, %v9873_v61  ;;  %v9758_v17 = vmul.f32 0.03125, %v9757_v1  ;;  %v9878_v25 = vmul.f32 %v9876_v16, %v9876_v16 }
0x3781   : > { %v9879_v13 = vmul.f32 %v9877_v5, %v9877_v5  ;;  %v9760_v62 = vrot.slane %v9758_v17, 1  ;;  %v9763_v53 = vsub.f32 %v9739_v4, %v9758_v17 }
0x3783   : > { %v9882_v27 = vrot.slane %v9879_v13, 7  ;;  %v9764_v12 = vsub.f32 %v9746_v34, %v9760_v62  ;;  %v9765_v14 = vmul.f32 %v9763_v53, %v9763_v53 }
0x3785   : > { %v9766_v2 = vmul.f32 %v9764_v12, %v9764_v12  ;;  %v9883_v28 = vsel %vm9751_vm3, %v9882_v27, %v9878_v25 }
0x3786   : > { %v9885_v57 = vsel %vm9754_vm4, %v9883_v28, 0.0 }
0x3787   : > { %v9769_v49 = vrot.slane %v9766_v2, 7  ;;  %9886 = vadd.xlane.f32.xlu0 %v9885_v57 }
0x3789   : > { %v9770_v50 = vsel %vm9751_vm3, %v9769_v49, %v9765_v14  ;;  %v10099_v14 = vld [vmem:[%s14123_s7 + $0xf8] sm:$0xff] }
0x378a   : > { %v9772_v20 = vsel %vm9754_vm4, %v9770_v50, 0.0  ;;  %v10083_v49 = vld [vmem:[%s14123_s7 + $0x78] sm:$0xff]  ;;  %v10098_v50 = vld [vmem:[%s14123_s7 + $0xf0] sm:$0xff]  ;;  %11160 = vmatprep.subr.mxu1 %v10099_v14 }
0x378b   : > { %9773 = vadd.xlane.f32.xlu0 %v9772_v20  ;;  %v10082_v20 = vld [vmem:[%s14123_s7 + $0x70] sm:$0xff]  ;;  %11161 = vmatpush3.msra.mxu1 %v10083_v49 }
0x378c   : > { %11162 = vmatprep.subr.mxu1 %v10098_v50 }
0x378d   : > { %11163 = vmatpush3.msra.mxu1 %v10082_v20 }
0x378e   : > { %11164 = vmatprep.subr.mxu1 %v10097_v54 }
0x378f   : > { %11165 = vmatpush3.msra.mxu1 %v10081_v8 }
0x3790   : > { %11166 = vmatprep.subr.mxu1 %v10096_v59 }
0x3791   : > { %11167 = vmatpush3.msra.mxu1 %v10080_v29 }
0x3792   : > { %11168 = vmatprep.subr.mxu1 %v10095_v7 }
0x3793   : > { %11169 = vmatpush3.msra.mxu1 %v10079_v26 }
0x3810   : > { %v9887_v60 = vpop.xlane.xlu0 %9886 }
0x3811   : > { %v9888_v18 = vmul.f32 0.03125, %v9887_v60  ;;  %v10094_v60 = vld [vmem:[%s14123_s7 + $0xd0] sm:$0xff] }
0x3812   : > { %11170 = vmatprep.subr.mxu1 %v10094_v60 }
0x3813   : > { %v9889_v10 = vadd.f32 1e-05, %v9888_v18  ;;  %v10078_v18 = vld [vmem:[%s14123_s7 + $0x50] sm:$0xff] }
0x3814   : > { %v9774_v31 = vpop.xlane.xlu0 %9773  ;;  %11171 = vmatpush3.msra.mxu1 %v10078_v18 }
0x3815   : > { %12125 = vrsqrt.f32 %v9889_v10  ;;  %v9775_v52 = vmul.f32 0.03125, %v9774_v31  ;;  %v10093_v10 = vld [vmem:[%s14123_s7 + $0xc8] sm:$0xff] }
0x3816   : > { %v10077_v31 = vld [vmem:[%s14123_s7 + $0x48] sm:$0xff]  ;;  %11172 = vmatprep.subr.mxu1 %v10093_v10 }
0x3817   : > { %v9776_v47 = vadd.f32 1e-05, %v9775_v52  ;;  %v10092_v52 = vld [vmem:[%s14123_s7 + $0xc0] sm:$0xff]  ;;  %11173 = vmatpush3.msra.mxu1 %v10077_v31 }
0x3818   : > { %11174 = vmatprep.subr.mxu1 %v10092_v52 }
0x3819   : > { %12127 = vrsqrt.f32 %v9776_v47  ;;  %v10076_v47 = vld [vmem:[%s14123_s7 + $0x40] sm:$0xff] }
0x381a   : > { %11175 = vmatpush3.msra.mxu1 %v10076_v47 }
0x381b   : > { %11176 = vmatprep.subr.mxu1 %v10091_v46 }
0x3822   : > { %v12126_v33 = vpop.eup %12125 }
0x3823   : > { %v9892_v51 = vrot.slane %v12126_v33, 1  ;;  %v9895_v43 = vmul.f32 %v12126_v33, %v9876_v16  ;;  %v9930_v16 = vld [vmem:[%s14122_s26] sm:$0x3]  ;;  %v10075_v33 = vld [vmem:[%s14123_s7 + $0x38] sm:$0xff] }
0x3824   : > { %v9939_v17 = vrot.slane %v9930_v16, %v12763_v24  ;;  %11177 = vmatpush3.msra.mxu1 %v10075_v33 }
0x3825   : > { %v9896_v6 = vmul.f32 %v9892_v51, %v9877_v5  ;;  %v9897_v35 = vmul.f32 %v10716_v15, %v9895_v43  ;;  %v9935_v5 = vrot.slane %v9930_v16, %v12759_v22  ;;  %v10090_v51 = vld [vmem:[%s14123_s7 + $0xb0] sm:$0xff] }
0x3826   : > { %v12128_v42 = vpop.eup %12127  ;;  %v10074_v43 = vld [vmem:[%s14123_s7 + $0x30] sm:$0xff]  ;;  %11178 = vmatprep.subr.mxu1 %v10090_v51 }
0x3827   : > { %v9898_v0 = vmul.f32 %v10716_v15, %v9896_v6  ;;  %v9779_v63 = vrot.slane %v12128_v42, 1  ;;  %v9782_v58 = vmul.f32 %v12128_v42, %v9763_v53  ;;  %v9899_v41 = vadd.f32 %v10717_v55, %v9897_v35  ;;  %v10073_v6 = vld [vmem:[%s14123_s7 + $0x28] sm:$0xff]  ;;  %11179 = vmatpush3.msra.mxu1 %v10074_v43  ;;  %v10088_v42 = vld [vmem:[%s14123_s7 + $0xa0] sm:$0xff] }
0x3828   : > { %v10072_v35 = vld [vmem:[%s14123_s7 + $0x20] sm:$0xff] }
0x3829   : > { %v9900_v32 = vadd.f32 %v10717_v55, %v9898_v0  ;;  %v9783_v30 = vmul.f32 %v9779_v63, %v9764_v12  ;;  %v9790_v48 = vmul.f32 %v10716_v15, %v9782_v58  ;;  %v10087_v0 = vld [vmem:[%s14123_s7 + $0x98] sm:$0xff]  ;;  %v10086_v58 = vld [vmem:[%s14123_s7 + $0x90] sm:$0xff] }
0x382a   : > { %v10071_v63 = vld [vmem:[%s14123_s7 + $0x18] sm:$0xff] }
0x382b   : > { %v9908_v23 = vrot.slane %v9900_v32, 7  ;;  %v9791_v4 = vmul.f32 %v10716_v15, %v9783_v30  ;;  %v9798_v34 = vadd.f32 %v10717_v55, %v9790_v48  ;;  %v10089_v15 = vld [vmem:[%s14123_s7 + $0xa8] sm:$0xff]  ;;  %v10084_v48 = vld [vmem:[%s14123_s7 + $0x80] sm:$0xff] }
0x382c   : > { %11180 = vmatprep.subr.mxu1 %v10089_v15  ;;  %v10085_v32 = vld [vmem:[%s14123_s7 + $0x88] sm:$0xff] }
0x382d   : > { %v9909_v21 = vsel %vm9751_vm3, %v9908_v23, %v9899_v41  ;;  %v9799_v56 = vadd.f32 %v10717_v55, %v9791_v4  ;;  %11181 = vmatpush3.msra.mxu1 %v10073_v6  ;;  %v10070_v55 = vld [vmem:[%s14123_s7 + $0x10] sm:$0xff]  ;;  %v10069_v30 = vld [vmem:[%s14123_s7 + $0x8] sm:$0xff]  ;;  %v10068_v41 = vld [vmem:[%s14123_s7] sm:$0xff] }
0x382e   : > { %9910 = vrot.lane.b32.xlu1 %v9909_v21, %s12190_s28  ;;  %11182 = vmatprep.subr.mxu1 %v10088_v42  ;;  %v10019_v21 = vld [vmem:[%s14124_s11] sm:$0x3] }
0x382f   : > { %v9903_v38 = vrot.slane %v9799_v56, 7  ;;  %11183 = vmatpush3.msra.mxu1 %v10072_v35  ;;  %v10020_v56 = vld [vmem:[%s14125_s12] sm:$0x3] }
0x3830   : > { %11184 = vmatprep.subr.mxu1 %v10087_v0 }
0x3831   : > { %v9904_v39 = vsel %vm9751_vm3, %v9903_v38, %v9798_v34  ;;  %11185 = vmatpush3.msra.mxu1 %v10071_v63  ;;  %v10046_v38 = vrot.slane %v10019_v21, %v12759_v22 }
0x3832   : > { %11186 = vmatprep.subr.mxu1 %v10086_v58 }
0x3833   : > { %11187 = vmatpush3.msra.mxu1 %v10070_v55 }
0x3834   : > { %11188 = vmatprep.subr.mxu1 %v10085_v32 }
0x3835   : > { %11189 = vmatpush3.msra.mxu1 %v10069_v30 }
0x3836   : > { %11190 = vmatprep.subr.mxu1 %v10084_v48 }
0x3837   : > { %11191 = vmatpush3.msra.mxu1 %v10068_v41 }
0x38a0   : > { %v9911_v61 = vpop.permute.xlu1 %9910 }
0x38a1   : > { %v14006_v1 = vsel %vm1110_vm6, %v9904_v39, %v9911_v61  ;;  %v10050_v39 = vrot.slane %v10019_v21, %v12763_v24 }
0x38a2   : > { %10718 = vmatmul.mubr.msk.f32.vlgmr.msra.gmra.mxu0 %vm9942_vm5, %v14006_v1 }
0x3962   : > { %v10012_v13 = vpop.f32.mrf.mxu0 }
0x3963   : > { %v10013_v62 = vadd.f32 %v10012_v13, %v9935_v5  ;;  %v10063_v13 = vrot.slane %v10020_v56, %v12763_v24 }
0x3964   : > { %v10014_v25 = vpop.f32.mrf.mxu0 }
0x3965   : > { %v10017_v27 = vmax.f32 %v10013_v62, 0.0  ;;  %v10015_v53 = vadd.f32 %v10014_v25, %v9939_v17  ;;  %v10059_v17 = vrot.slane %v10020_v56, %v12759_v22 }
0x3967   : > { %v10018_v12 = vmax.f32 %v10015_v53, 0.0  ;;  %v10021_v2 = vsel %vm1005_vm0, %v10017_v27, 0.0 }
0x3969   : > { %v10022_v28 = vsel %vm1005_vm0, %v10018_v12, 0.0 }
0x396a   : > { %v10023_v57 = vadd.f32 %v10022_v28, %v10021_v2  ;;  %v10719_v2 = vld [vmem:[%s12337_s1] ss:$0 sm:$0xff] }
0x396c   : > { %10024 = vadd.xlane.f32.xlu0 %v10023_v57 }
0x39f5   : > { %v10025_v44 = vpop.xlane.xlu0 %10024 }
0x39f6   : > { %v10027_v3 = vmul.f32 0.00390625, %v10025_v44 }
0x39f8   : > { %v14021_v36 = vsub.f32 %v10017_v27, %v10027_v3  ;;  %v14023_v9 = vsub.f32 %v10018_v12, %v10027_v3 }
0x39fa   : > { %v10030_v19 = vmul.f32 %v14021_v36, %v14021_v36  ;;  %v10031_v40 = vmul.f32 %v14023_v9, %v14023_v9 }
0x39fc   : > { %v10032_v37 = vsel %vm1005_vm0, %v10030_v19, 0.0  ;;  %v10033_v45 = vsel %vm1005_vm0, %v10031_v40, 0.0  ;;  %vm10180_vm0 = vcmask 517120   ;;  %v10721_v19 = vld [vmem:[%s12347_s15] ss:$0 sm:$0xff] }
0x39fd   : > { %v10034_v11 = vadd.f32 %v10033_v45, %v10032_v37 }
0x39ff   : > { %10035 = vadd.xlane.f32.xlu0 %v10034_v11 }
0x3a88   : > { %v10036_v23 = vpop.xlane.xlu0 %10035 }
0x3a89   : > { %v10037_v4 = vmul.f32 0.00390625, %v10036_v23 }
0x3a8b   : > { %v10038_v34 = vadd.f32 1e-05, %v10037_v4 }
0x3a8d   : > { %12129 = vrsqrt.f32 %v10038_v34 }
0x3a9a   : > { %v12130_v61 = vpop.eup %12129 }
0x3a9b   : > { %v10040_v16 = vmul.f32 %v12130_v61, %v14021_v36  ;;  %v10041_v5 = vmul.f32 %v12130_v61, %v14023_v9  ;;  %v10720_v9 = vld [vmem:[%s12342_s10] ss:$0 sm:$0xff] }
0x3a9d   : > { %v10053_v62 = vmul.f32 %v10046_v38, %v10040_v16  ;;  %v10054_v25 = vmul.f32 %v10050_v39, %v10041_v5 }
0x3a9f   : > { %v10066_v27 = vadd.f32 %v10059_v17, %v10053_v62  ;;  %v10067_v53 = vadd.f32 %v10063_v13, %v10054_v25 }
0x3aa1   : > { %10171 = vmatprep.mubr.f32.mxu1 %v10067_v53 }
0x3aa2   : > { %10172 = vmatmul.mubr.f32.vlgmr.msra.gmra.mxu1 %v10066_v27 }
0x3b62   : > { %v11192_v12 = vpop.f32.mrf.mxu1 }
0x3b64   : > { %v11193_v28 = vpop.f32.mrf.mxu1 }
0x3b65   : > { %v11194_v57 = vadd.f32 %v11193_v28, %v11192_v12 }
0x3b67   : > { %v10174_v14 = vadd.f32 %v11194_v57, %v10719_v2 }
0x3b69   : > { %v10177_v49 = vadd.f32 %v10174_v14, %v14006_v1 }
0x3b6b   : > { %v10181_v22 = vsel %vm10180_vm0, %v10177_v49, 0.0 }
0x3b6c   : > { %10182 = vadd.xlane.f32.xlu0 %v10181_v22 }
0x3bf5   : > { %v10183_v24 = vpop.xlane.xlu0 %10182 }
0x3bf6   : > { %v10185_v50 = vmul.f32 0.015625, %v10183_v24 }
0x3bf8   : > { %v10186_v20 = vsub.f32 %v10177_v49, %v10185_v50 }
0x3bfa   : > { %v10187_v54 = vmul.f32 %v10186_v20, %v10186_v20 }
0x3bfc   : > { %v10188_v8 = vsel %vm10180_vm0, %v10187_v54, 0.0 }
0x3bfd   : > { %10189 = vadd.xlane.f32.xlu0 %v10188_v8 }
0x3c86   : > { %v10190_v59 = vpop.xlane.xlu0 %10189 }
0x3c87   : > { %v10191_v44 = vmul.f32 0.015625, %v10190_v59 }
0x3c89   : > { %v10192_v3 = vadd.f32 1e-05, %v10191_v44 }
0x3c8b   : > { %12131 = vrsqrt.f32 %v10192_v3 }
0x3c98   : > { %v12132_v36 = vpop.eup %12131 }
0x3c99   : > { %v10194_v1 = vmul.f32 %v12132_v36, %v10186_v20 }
0x3c9b   : > { %v10201_v40 = vmul.f32 %v10720_v9, %v10194_v1 }
0x3c9d   : > { %v10208_v37 = vadd.f32 %v10721_v19, %v10201_v40 }
0x3c9f   : > { %10209 = vst.msk [vmem:[%s958_s23] sm:$0x3] %vm10180_vm0, %v10208_v37 }
0x3ca0 PF: > { %s75_s6 = sadd.s32 1, %s12143_s6  }
0x3ca1   : > { %p72_p4 = scmp.ge.s32.totalorder %s75_s6, 5  }
0x3ca3   :  { %74 = sbr.rel (!%p72_p4) target bundleno = 48 (0x30), region = 229 }

</bundles_post_ra>
